<compile_context>
chip_gen: v7x
topology: tpu7x:2x2x1
jax: 0.10.0
libtpu: 0.0.40
codegen_flags: <defaults>
</compile_context>

<pallas_src>
import jax
import jax.numpy as jnp
import numpy as np
from jax.experimental import pallas as pl
from jax.experimental.pallas import tpu as pltpu

NODES = ['A1', 'A2', 'A3', 'A4', 'B1', 'B2', 'B3', 'B4', 'C1', 'C2', 'C3', 'C4',
         'D1', 'D2', 'D3', 'D4', 'E1', 'E2', 'E3', 'E4']

LANES = 128
SUBLANES = 8                         # (8, 128) = one packed f32 vreg per quantity
GROUP = SUBLANES * LANES             # 1024 batch elements per inner-loop group
MAX_GROUPS_PER_TILE = 8              # 64 sublanes -> ~10.7 MiB double-buffered (fits v5e)

# Fused-input feature offsets.
F_ROOT, F_OTHER, F_BONE, F_SCALE, F_RXYZ, F_K = 0, 3, 26, 46, 47, 50
N_IN_FEATS = 59                      # 3 + 23 + 20 + 1 + 3 + 9
N_OUT_FEATS = 105                    # 63 xyz + 42 uv


def fk_kernel(in_ref, out_ref):
    """in_ref: (59, G*8, 128), out_ref: (105, G*8, 128); inner loop over 8-sublane groups."""
    n_groups = in_ref.shape[1] // SUBLANES

    @pl.loop(0, n_groups)
    def _(g):
        off = pl.multiple_of(g * SUBLANES, SUBLANES)

        def I(f):                                    # one packed (8,128) input tile
            return in_ref[f, pl.ds(off, SUBLANES), :]

        def O(f, v):                                 # one packed (8,128) output store
            out_ref[f, pl.ds(off, SUBLANES), :] = v

        def sincos(v):
            return jnp.sin(v), jnp.cos(v)

        # ---- loaded once per group ----
        scale = I(F_SCALE)
        root_xyz = (I(F_RXYZ + 0), I(F_RXYZ + 1), I(F_RXYZ + 2))
        k = [I(F_K + j) for j in range(9)]           # row-major 3x3 intrinsics

        def A(j):                                    # joint angle j
            return I(F_OTHER + j)

        def Ls(j):                                   # bone length with scale folded in
            return I(F_BONE + j) * scale

        # ---- streaming emit: store absolute xyz + pinhole uv at permuted index ----
        def project_store(dst, p):
            x, y, z = p
            O(3 * dst + 0, x)
            O(3 * dst + 1, y)
            O(3 * dst + 2, z)
            uh = k[0] * x + k[1] * y + k[2] * z
            vh = k[3] * x + k[4] * y + k[5] * z
            wh = k[6] * x + k[7] * y + k[8] * z
            inv = pl.reciprocal(wh, approx=True)     # EUP slot
            inv = inv * (2.0 - wh * inv)             # one Newton step -> ~f32 accurate
            O(63 + 2 * dst + 0, uh * inv)
            O(63 + 2 * dst + 1, vh * inv)

        def step(prev, col2, bone):                  # child = parent + Ls * (R col2)
            return tuple(prev[r] + bone * col2[r] for r in range(3))

        def matvec(P, v):                            # P column-major 3x3, v 3-vector
            p0, p1, p2 = P
            return tuple(p0[r] * v[0] + p1[r] * v[1] + p2[r] * v[2] for r in range(3))

        def rot3_cols(x, y, z):
            """Columns of Rx(x) @ Ry(y) @ Rz(z), closed form."""
            sx, cx = sincos(x)
            sy, cy = sincos(y)
            sz, cz = sincos(z)
            c0 = (cy * cz, sx * sy * cz + cx * sz, -cx * sy * cz + sx * sz)
            c1 = (-cy * sz, -sx * sy * sz + cx * cz, cx * sy * sz + sx * cz)
            c2 = (sy, -sx * cy, cx * cy)
            return c0, c1, c2

        # Joint 0 (wrist): relative position == 0 -> absolute == root offset.
        project_store(0, root_xyz)

        R_root = rot3_cols(I(F_ROOT + 0), I(F_ROOT + 1), I(F_ROOT + 2))

        # Output indices: reference reverses each finger's 4 joints
        # (config.joint_order_switched assumed False), so chain position n (1..4)
        # of finger f is stored at joint index 4*f + 5 - n.

        # --- thumb (finger 0): A1 & A2 full xyz rotation, A3 y-only, A4 identity ---
        L1c = rot3_cols(A(0), A(1), A(2))
        R1 = tuple(matvec(R_root, c) for c in L1c)            # full 3 columns needed
        p1 = step(root_xyz, R1[2], Ls(0))
        project_store(4, p1)

        # A2 is dense, but only result columns 0 and 2 are ever consumed.
        sx2, cx2 = sincos(A(3))
        sy2, cy2 = sincos(A(4))
        sz2, cz2 = sincos(A(5))
        l2_c0 = (cy2 * cz2, sx2 * sy2 * cz2 + cx2 * sz2, -cx2 * sy2 * cz2 + sx2 * sz2)
        l2_c2 = (sy2, -sx2 * cy2, cx2 * cy2)
        R2_c0 = matvec(R1, l2_c0)
        R2_c2 = matvec(R1, l2_c2)
        p2 = step(p1, R2_c2, Ls(1))
        project_store(3, p2)

        # A3 (y-only): only column 2 of R2 @ Ry is needed downstream.
        s3, c3 = sincos(A(6))
        col2 = tuple(R2_c0[r] * s3 + R2_c2[r] * c3 for r in range(3))
        p3 = step(p2, col2, Ls(2))
        project_store(2, p3)
        p4 = step(p3, col2, Ls(3))                             # A4: identity rotation
        project_store(1, p4)

        # --- fingers B..E: *1 has (x, y) angles, *2/*3 x only, *4 identity ---
        r0c0, r0c1, r0c2 = R_root
        for f in range(1, 5):
            a = 7 + 4 * (f - 1)          # angle base in other_angles
            b = 4 * f                    # bone base
            d = 4 * f                    # output-joint base
            # *1 : R_root @ (Rx(x) @ Ry(y)); only result columns 1 and 2 needed.
            sx1, cx1 = sincos(A(a))
            sy1, cy1 = sincos(A(a + 1))
            R1c1 = tuple(r0c1[r] * cx1 + r0c2[r] * sx1 for r in range(3))
            a12, a22 = -sx1 * cy1, cx1 * cy1
            R1c2 = tuple(r0c0[r] * sy1 + r0c1[r] * a12 + r0c2[r] * a22 for r in range(3))
            p1 = step(root_xyz, R1c2, Ls(b))
            project_store(d + 4, p1)
            # *2 : Rx only; need result columns 1 and 2.
            s2f, c2f = sincos(A(a + 2))
            R2c1 = tuple(R1c1[r] * c2f + R1c2[r] * s2f for r in range(3))
            R2c2 = tuple(R1c2[r] * c2f - R1c1[r] * s2f for r in range(3))
            p2 = step(p1, R2c2, Ls(b + 1))
            project_store(d + 3, p2)
            # *3 : Rx only; only column 2 ever needed.
            s3f, c3f = sincos(A(a + 3))
            c3col = tuple(R2c2[r] * c3f - R2c1[r] * s3f for r in range(3))
            p3 = step(p2, c3col, Ls(b + 2))
            project_store(d + 2, p3)
            p4 = step(p3, c3col, Ls(b + 3))                    # *4: identity rotation
            project_store(d + 1, p4)


def _choose_tiling(B):
    """Pick (groups_per_tile, n_tiles) from B: >=2 grid steps when possible (v7x),
    <= 64 sublanes per step (fits v5e's 16 MiB scoped VMEM with double buffering)."""
    n_groups_total = max(1, -(-B // GROUP))
    n_tiles = -(-n_groups_total // MAX_GROUPS_PER_TILE)
    if n_groups_total >= 2:
        n_tiles = max(2, n_tiles)
    groups_per_tile = -(-n_groups_total // n_tiles)
    return groups_per_tile, n_tiles


def forward_kinematics(root_angles, other_angles, bone_lengths,
                       camera_intrinsic_matrix, index_root_bone_length,
                       kp_coord_xyz_root):
    """Mirrors ForwardKinematics.forward. Returns [xyz21 (B,21,3), uv21 (B,21,2), None]."""
    f32 = jnp.float32
    B = root_angles.shape[0]

    feats = jnp.concatenate([
        jnp.asarray(root_angles, f32).reshape(B, 3),
        jnp.asarray(other_angles, f32).reshape(B, 23),
        jnp.asarray(bone_lengths, f32).reshape(B, 20),
        jnp.asarray(index_root_bone_length, f32).reshape(B, 1),
        jnp.asarray(kp_coord_xyz_root, f32).reshape(B, 3),
        jnp.asarray(camera_intrinsic_matrix, f32).reshape(B, 9),
    ], axis=1)                                        # (B, 59)

    groups_per_tile, n_tiles = _choose_tiling(B)
    sub_tile = groups_per_tile * SUBLANES
    Bp = n_tiles * groups_per_tile * GROUP
    n_sub = Bp // LANES

    # Batch-last, lane-dense layout; padded lanes replicate the last real sample
    # so the discarded region never produces inf/NaN.
    x = feats.T                                        # (59, B)
    x = jnp.pad(x, ((0, 0), (0, Bp - B)), mode='edge')
    x = x.reshape(N_IN_FEATS, n_sub, LANES)

    out_p = pl.pallas_call(
        fk_kernel,
        out_shape=jax.ShapeDtypeStruct((N_OUT_FEATS, n_sub, LANES), f32),
        grid=(n_tiles,),
        in_specs=[pl.BlockSpec((N_IN_FEATS, sub_tile, LANES), lambda i: (0, i, 0))],
        out_specs=pl.BlockSpec((N_OUT_FEATS, sub_tile, LANES), lambda i: (0, i, 0)),
        compiler_params=pltpu.CompilerParams(
            dimension_semantics=("parallel",)),        # megacore sharding on v7x
    )(x)

    flat = out_p.reshape(N_OUT_FEATS, Bp)[:, :B]
    kp_coord_xyz21_absolute = flat[:63].T.reshape(B, 21, 3)
    kp_coord_uv21 = flat[63:].T.reshape(B, 21, 2)
    return [kp_coord_xyz21_absolute, kp_coord_uv21, None]


def _reference_fk(root_angles, other_angles, bone_lengths, K, scale, root_xyz):
    """Pure-jnp port of the PyTorch module, used only for the self-test."""
    hi = jax.lax.Precision.HIGHEST

    def rotmat(a):
        x, y, z = a[:, 0], a[:, 1], a[:, 2]
        sx, cx, sy, cy, sz, cz = (jnp.sin(x), jnp.cos(x), jnp.sin(y),
                                  jnp.cos(y), jnp.sin(z), jnp.cos(z))
        zero, one = jnp.zeros_like(x), jnp.ones_like(x)
        Rx = jnp.stack([one, zero, zero, zero, cx, -sx, zero, sx, cx], -1).reshape(-1, 3, 3)
        Ry = jnp.stack([cy, zero, sy, zero, one, zero, -sy, zero, cy], -1).reshape(-1, 3, 3)
        Rz = jnp.stack([cz, -sz, zero, sz, cz, zero, zero, zero, one], -1).reshape(-1, 3, 3)
        return jnp.einsum('bij,bjk,bkl->bil', Rx, Ry, Rz, precision=hi)

    B = root_angles.shape[0]
    zero = jnp.zeros((B,), jnp.float32)
    rots = [rotmat(root_angles)]
    poss = [jnp.zeros((B, 3), jnp.float32)]
    ai = 0
    for i, node in enumerate(NODES):
        pR = rots[0] if i % 4 == 0 else rots[i]
        pP = poss[0] if i % 4 == 0 else poss[i]
        if node.startswith('A') and (node.endswith('1') or node.endswith('2')):
            Rl = rotmat(other_angles[:, ai:ai + 3]); ai += 3
        elif node == 'A3':
            Rl = rotmat(jnp.stack([zero, other_angles[:, ai], zero], -1)); ai += 1
        elif node.endswith('1'):
            Rl = rotmat(jnp.stack([other_angles[:, ai], other_angles[:, ai + 1], zero], -1)); ai += 2
        elif not node.endswith('4'):
            Rl = rotmat(jnp.stack([other_angles[:, ai], zero, zero], -1)); ai += 1
        else:
            Rl = None
        Rg = pR if Rl is None else jnp.einsum('bij,bjk->bik', pR, Rl, precision=hi)
        pos = pP + Rg[:, :, 2] * bone_lengths[:, i][:, None]
        rots.append(Rg)
        poss.append(pos)

    xyz = jnp.stack(poss, axis=1) * scale.reshape(B, 1, 1) + root_xyz[:, None, :]
    perm = [0]
    for base in range(1, 21, 4):
        perm += [base + 3, base + 2, base + 1, base]
    xyz = xyz[:, jnp.array(perm)]
    uvw = jnp.einsum('bij,bkj->bki', K, xyz, precision=hi)
    uv = uvw[..., :2] / uvw[..., 2:3]
    return xyz, uv


def _make_inputs(key, B):
    k1, k2, k3, k4, k5 = jax.random.split(key, 5)
    root_angles = jax.random.uniform(k1, (B, 3), jnp.float32, -0.3, 0.3)
    other_angles = jax.random.uniform(k2, (B, 23), jnp.float32, -0.3, 0.3)
    bone_lengths = jax.random.uniform(k3, (B, 20), jnp.float32, 0.02, 0.10)
    index_root_bone_length = jax.random.uniform(k4, (B, 1), jnp.float32, 0.08, 0.12)
    kp_coord_xyz_root = jnp.concatenate(
        [jax.random.uniform(k5, (B, 2), jnp.float32, -0.05, 0.05),
         jnp.full((B, 1), 0.6, jnp.float32)], axis=1)                 # z > 0
    camera_intrinsic_matrix = jnp.broadcast_to(
        jnp.array([[120.0, 0.0, 64.0],
                   [0.0, 120.0, 64.0],
                   [0.0, 0.0, 1.0]], jnp.float32), (B, 3, 3))
    return (root_angles, other_angles, bone_lengths, camera_intrinsic_matrix,
            index_root_bone_length, kp_coord_xyz_root)


def _check(B, key):
    (root_angles, other_angles, bone_lengths, camera_intrinsic_matrix,
     index_root_bone_length, kp_coord_xyz_root) = _make_inputs(key, B)

    xyz21, uv21, _ = forward_kinematics(
        root_angles, other_angles, bone_lengths, camera_intrinsic_matrix,
        index_root_bone_length, kp_coord_xyz_root)
    jax.block_until_ready(xyz21)
    jax.block_until_ready(uv21)
    assert xyz21.shape == (B, 21, 3) and uv21.shape == (B, 21, 2)

    xyz_ref, uv_ref = _reference_fk(
        root_angles, other_angles, bone_lengths, camera_intrinsic_matrix,
        index_root_bone_length, kp_coord_xyz_root)
    np.testing.assert_allclose(np.asarray(xyz21), np.asarray(xyz_ref),
                               rtol=1e-3, atol=1e-4)
    np.testing.assert_allclose(np.asarray(uv21), np.asarray(uv_ref),
                               rtol=1e-3, atol=5e-2)


if __name__ == "__main__":
    key = jax.random.PRNGKey(0)
    k_small, k_multi = jax.random.split(key)
    _check(2, k_small)        # tiny batch: single tile, single inner group
    _check(2500, k_multi)     # exercises multi-group inner loop + 2-step grid + padding
    print("KERNEL_OK")
</pallas_src>

<mosaic_0001>
module attributes {stable_mosaic.version = 11 : i64} {
  func.func @fk_kernel(%arg0: i32, %arg1: memref<59x8x128xf32, #tpu.memory_space<vmem>>, %arg2: memref<105x8x128xf32, #tpu.memory_space<vmem>>) attributes {dimension_semantics = [#tpu.dimension_semantics<parallel>], iteration_bounds = array<i64: 1>, scalar_prefetch = 0 : i64, scratch_operands = 0 : i64, tpu.core_type = #tpu.core_type<tc>, window_params = [{transform_indices = @transform_0, window_bounds = array<i64: 59, 8, 128>}, {transform_indices = @transform_1, window_bounds = array<i64: 105, 8, 128>}]} {
    %c0_i32 = arith.constant 0 : i32
    %c1_i32 = arith.constant 1 : i32
    %0 = arith.muli %c0_i32, %c1_i32 : i32
    %c0_i32_0 = arith.constant 0 : i32
    %1 = arith.addi %c0_i32_0, %0 : i32
    %c8_i32 = arith.constant 8 : i32
    %2 = arith.muli %1, %c8_i32 : i32
    %3 = tpu.assume_multiple %2, 8 : i32
    %c46 = arith.constant 46 : index
    %4 = arith.index_cast %3 : i32 to index
    %c0 = arith.constant 0 : index
    %5 = vector.load %arg1[%c46, %4, %c0] : memref<59x8x128xf32, #tpu.memory_space<vmem>>, vector<1x8x128xf32>
    %6 = vector.shape_cast %5 : vector<1x8x128xf32> to vector<8x128xf32>
    %c47 = arith.constant 47 : index
    %7 = arith.index_cast %3 : i32 to index
    %c0_1 = arith.constant 0 : index
    %8 = vector.load %arg1[%c47, %7, %c0_1] : memref<59x8x128xf32, #tpu.memory_space<vmem>>, vector<1x8x128xf32>
    %9 = vector.shape_cast %8 : vector<1x8x128xf32> to vector<8x128xf32>
    %c48 = arith.constant 48 : index
    %10 = arith.index_cast %3 : i32 to index
    %c0_2 = arith.constant 0 : index
    %11 = vector.load %arg1[%c48, %10, %c0_2] : memref<59x8x128xf32, #tpu.memory_space<vmem>>, vector<1x8x128xf32>
    %12 = vector.shape_cast %11 : vector<1x8x128xf32> to vector<8x128xf32>
    %c49 = arith.constant 49 : index
    %13 = arith.index_cast %3 : i32 to index
    %c0_3 = arith.constant 0 : index
    %14 = vector.load %arg1[%c49, %13, %c0_3] : memref<59x8x128xf32, #tpu.memory_space<vmem>>, vector<1x8x128xf32>
    %15 = vector.shape_cast %14 : vector<1x8x128xf32> to vector<8x128xf32>
    %c50 = arith.constant 50 : index
    %16 = arith.index_cast %3 : i32 to index
    %c0_4 = arith.constant 0 : index
    %17 = vector.load %arg1[%c50, %16, %c0_4] : memref<59x8x128xf32, #tpu.memory_space<vmem>>, vector<1x8x128xf32>
    %18 = vector.shape_cast %17 : vector<1x8x128xf32> to vector<8x128xf32>
    %c51 = arith.constant 51 : index
    %19 = arith.index_cast %3 : i32 to index
    %c0_5 = arith.constant 0 : index
    %20 = vector.load %arg1[%c51, %19, %c0_5] : memref<59x8x128xf32, #tpu.memory_space<vmem>>, vector<1x8x128xf32>
    %21 = vector.shape_cast %20 : vector<1x8x128xf32> to vector<8x128xf32>
    %c52 = arith.constant 52 : index
    %22 = arith.index_cast %3 : i32 to index
    %c0_6 = arith.constant 0 : index
    %23 = vector.load %arg1[%c52, %22, %c0_6] : memref<59x8x128xf32, #tpu.memory_space<vmem>>, vector<1x8x128xf32>
    %24 = vector.shape_cast %23 : vector<1x8x128xf32> to vector<8x128xf32>
    %c53 = arith.constant 53 : index
    %25 = arith.index_cast %3 : i32 to index
    %c0_7 = arith.constant 0 : index
    %26 = vector.load %arg1[%c53, %25, %c0_7] : memref<59x8x128xf32, #tpu.memory_space<vmem>>, vector<1x8x128xf32>
    %27 = vector.shape_cast %26 : vector<1x8x128xf32> to vector<8x128xf32>
    %c54 = arith.constant 54 : index
    %28 = arith.index_cast %3 : i32 to index
    %c0_8 = arith.constant 0 : index
    %29 = vector.load %arg1[%c54, %28, %c0_8] : memref<59x8x128xf32, #tpu.memory_space<vmem>>, vector<1x8x128xf32>
    %30 = vector.shape_cast %29 : vector<1x8x128xf32> to vector<8x128xf32>
    %c55 = arith.constant 55 : index
    %31 = arith.index_cast %3 : i32 to index
    %c0_9 = arith.constant 0 : index
    %32 = vector.load %arg1[%c55, %31, %c0_9] : memref<59x8x128xf32, #tpu.memory_space<vmem>>, vector<1x8x128xf32>
    %33 = vector.shape_cast %32 : vector<1x8x128xf32> to vector<8x128xf32>
    %c56 = arith.constant 56 : index
    %34 = arith.index_cast %3 : i32 to index
    %c0_10 = arith.constant 0 : index
    %35 = vector.load %arg1[%c56, %34, %c0_10] : memref<59x8x128xf32, #tpu.memory_space<vmem>>, vector<1x8x128xf32>
    %36 = vector.shape_cast %35 : vector<1x8x128xf32> to vector<8x128xf32>
    %c57 = arith.constant 57 : index
    %37 = arith.index_cast %3 : i32 to index
    %c0_11 = arith.constant 0 : index
    %38 = vector.load %arg1[%c57, %37, %c0_11] : memref<59x8x128xf32, #tpu.memory_space<vmem>>, vector<1x8x128xf32>
    %39 = vector.shape_cast %38 : vector<1x8x128xf32> to vector<8x128xf32>
    %c58 = arith.constant 58 : index
    %40 = arith.index_cast %3 : i32 to index
    %c0_12 = arith.constant 0 : index
    %41 = vector.load %arg1[%c58, %40, %c0_12] : memref<59x8x128xf32, #tpu.memory_space<vmem>>, vector<1x8x128xf32>
    %42 = vector.shape_cast %41 : vector<1x8x128xf32> to vector<8x128xf32>
    %c0_13 = arith.constant 0 : index
    %43 = arith.index_cast %3 : i32 to index
    %c0_14 = arith.constant 0 : index
    %44 = vector.load %arg2[%c0_13, %43, %c0_14] : memref<105x8x128xf32, #tpu.memory_space<vmem>>, vector<1x8x128xf32>
    %45 = vector.shape_cast %44 : vector<1x8x128xf32> to vector<8x128xf32>
    %46 = vector.shape_cast %9 : vector<8x128xf32> to vector<1x8x128xf32>
    tpu.vector_store %arg2[%c0_13, %43, %c0_14], %46 {strides = array<i32>} : memref<105x8x128xf32, #tpu.memory_space<vmem>>, vector<1x8x128xf32>,
    %c1 = arith.constant 1 : index
    %47 = arith.index_cast %3 : i32 to index
    %c0_15 = arith.constant 0 : index
    %48 = vector.load %arg2[%c1, %47, %c0_15] : memref<105x8x128xf32, #tpu.memory_space<vmem>>, vector<1x8x128xf32>
    %49 = vector.shape_cast %48 : vector<1x8x128xf32> to vector<8x128xf32>
    %50 = vector.shape_cast %12 : vector<8x128xf32> to vector<1x8x128xf32>
    tpu.vector_store %arg2[%c1, %47, %c0_15], %50 {strides = array<i32>} : memref<105x8x128xf32, #tpu.memory_space<vmem>>, vector<1x8x128xf32>,
    %c2 = arith.constant 2 : index
    %51 = arith.index_cast %3 : i32 to index
    %c0_16 = arith.constant 0 : index
    %52 = vector.load %arg2[%c2, %51, %c0_16] : memref<105x8x128xf32, #tpu.memory_space<vmem>>, vector<1x8x128xf32>
    %53 = vector.shape_cast %52 : vector<1x8x128xf32> to vector<8x128xf32>
    %54 = vector.shape_cast %15 : vector<8x128xf32> to vector<1x8x128xf32>
    tpu.vector_store %arg2[%c2, %51, %c0_16], %54 {strides = array<i32>} : memref<105x8x128xf32, #tpu.memory_space<vmem>>, vector<1x8x128xf32>,
    %55 = arith.mulf %18, %9 : vector<8x128xf32>
    %56 = arith.mulf %21, %12 : vector<8x128xf32>
    %57 = arith.addf %55, %56 : vector<8x128xf32>
    %58 = arith.mulf %24, %15 : vector<8x128xf32>
    %59 = arith.addf %57, %58 : vector<8x128xf32>
    %60 = arith.mulf %27, %9 : vector<8x128xf32>
    %61 = arith.mulf %30, %12 : vector<8x128xf32>
    %62 = arith.addf %60, %61 : vector<8x128xf32>
    %63 = arith.mulf %33, %15 : vector<8x128xf32>
    %64 = arith.addf %62, %63 : vector<8x128xf32>
    %65 = arith.mulf %36, %9 : vector<8x128xf32>
    %66 = arith.mulf %39, %12 : vector<8x128xf32>
    %67 = arith.addf %65, %66 : vector<8x128xf32>
    %68 = arith.mulf %42, %15 : vector<8x128xf32>
    %69 = arith.addf %67, %68 : vector<8x128xf32>
    %70 = tpu.reciprocal %69 {approx = true} : vector<8x128xf32> -> vector<8x128xf32>
    %71 = arith.mulf %69, %70 : vector<8x128xf32>
    %cst = arith.constant 2.000000e+00 : f32
    %72 = vector.broadcast %cst : f32 to vector<8x128xf32>
    %73 = arith.subf %72, %71 : vector<8x128xf32>
    %74 = arith.mulf %70, %73 : vector<8x128xf32>
    %75 = arith.mulf %59, %74 : vector<8x128xf32>
    %c63 = arith.constant 63 : index
    %76 = arith.index_cast %3 : i32 to index
    %c0_17 = arith.constant 0 : index
    %77 = vector.load %arg2[%c63, %76, %c0_17] : memref<105x8x128xf32, #tpu.memory_space<vmem>>, vector<1x8x128xf32>
    %78 = vector.shape_cast %77 : vector<1x8x128xf32> to vector<8x128xf32>
    %79 = vector.shape_cast %75 : vector<8x128xf32> to vector<1x8x128xf32>
    tpu.vector_store %arg2[%c63, %76, %c0_17], %79 {strides = array<i32>} : memref<105x8x128xf32, #tpu.memory_space<vmem>>, vector<1x8x128xf32>,
    %80 = arith.mulf %64, %74 : vector<8x128xf32>
    %c64 = arith.constant 64 : index
    %81 = arith.index_cast %3 : i32 to index
    %c0_18 = arith.constant 0 : index
    %82 = vector.load %arg2[%c64, %81, %c0_18] : memref<105x8x128xf32, #tpu.memory_space<vmem>>, vector<1x8x128xf32>
    %83 = vector.shape_cast %82 : vector<1x8x128xf32> to vector<8x128xf32>
    %84 = vector.shape_cast %80 : vector<8x128xf32> to vector<1x8x128xf32>
    tpu.vector_store %arg2[%c64, %81, %c0_18], %84 {strides = array<i32>} : memref<105x8x128xf32, #tpu.memory_space<vmem>>, vector<1x8x128xf32>,
    %c0_19 = arith.constant 0 : index
    %85 = arith.index_cast %3 : i32 to index
    %c0_20 = arith.constant 0 : index
    %86 = vector.load %arg1[%c0_19, %85, %c0_20] : memref<59x8x128xf32, #tpu.memory_space<vmem>>, vector<1x8x128xf32>
    %87 = vector.shape_cast %86 : vector<1x8x128xf32> to vector<8x128xf32>
    %c1_21 = arith.constant 1 : index
    %88 = arith.index_cast %3 : i32 to index
    %c0_22 = arith.constant 0 : index
    %89 = vector.load %arg1[%c1_21, %88, %c0_22] : memref<59x8x128xf32, #tpu.memory_space<vmem>>, vector<1x8x128xf32>
    %90 = vector.shape_cast %89 : vector<1x8x128xf32> to vector<8x128xf32>
    %c2_23 = arith.constant 2 : index
    %91 = arith.index_cast %3 : i32 to index
    %c0_24 = arith.constant 0 : index
    %92 = vector.load %arg1[%c2_23, %91, %c0_24] : memref<59x8x128xf32, #tpu.memory_space<vmem>>, vector<1x8x128xf32>
    %93 = vector.shape_cast %92 : vector<1x8x128xf32> to vector<8x128xf32>
    %94 = math.sin %87 : vector<8x128xf32>
    %95 = math.cos %87 : vector<8x128xf32>
    %96 = math.sin %90 : vector<8x128xf32>
    %97 = math.cos %90 : vector<8x128xf32>
    %98 = math.sin %93 : vector<8x128xf32>
    %99 = math.cos %93 : vector<8x128xf32>
    %100 = arith.mulf %97, %99 : vector<8x128xf32>
    %101 = arith.mulf %94, %96 : vector<8x128xf32>
    %102 = arith.mulf %101, %99 : vector<8x128xf32>
    %103 = arith.mulf %95, %98 : vector<8x128xf32>
    %104 = arith.addf %102, %103 : vector<8x128xf32>
    %cst_25 = arith.constant 0.000000e+00 : f32
    %105 = vector.broadcast %cst_25 : f32 to vector<8x128xf32>
    %106 = arith.subf %105, %95 : vector<8x128xf32>
    %107 = arith.mulf %106, %96 : vector<8x128xf32>
    %108 = arith.mulf %107, %99 : vector<8x128xf32>
    %109 = arith.mulf %94, %98 : vector<8x128xf32>
    %110 = arith.addf %108, %109 : vector<8x128xf32>
    %cst_26 = arith.constant 0.000000e+00 : f32
    %111 = vector.broadcast %cst_26 : f32 to vector<8x128xf32>
    %112 = arith.subf %111, %97 : vector<8x128xf32>
    %113 = arith.mulf %112, %98 : vector<8x128xf32>
    %cst_27 = arith.constant 0.000000e+00 : f32
    %114 = vector.broadcast %cst_27 : f32 to vector<8x128xf32>
    %115 = arith.subf %114, %94 : vector<8x128xf32>
    %116 = arith.mulf %115, %96 : vector<8x128xf32>
    %117 = arith.mulf %116, %98 : vector<8x128xf32>
    %118 = arith.mulf %95, %99 : vector<8x128xf32>
    %119 = arith.addf %117, %118 : vector<8x128xf32>
    %120 = arith.mulf %95, %96 : vector<8x128xf32>
    %121 = arith.mulf %120, %98 : vector<8x128xf32>
    %122 = arith.mulf %94, %99 : vector<8x128xf32>
    %123 = arith.addf %121, %122 : vector<8x128xf32>
    %cst_28 = arith.constant 0.000000e+00 : f32
    %124 = vector.broadcast %cst_28 : f32 to vector<8x128xf32>
    %125 = arith.subf %124, %94 : vector<8x128xf32>
    %126 = arith.mulf %125, %97 : vector<8x128xf32>
    %127 = arith.mulf %95, %97 : vector<8x128xf32>
    %c3 = arith.constant 3 : index
    %128 = arith.index_cast %3 : i32 to index
    %c0_29 = arith.constant 0 : index
    %129 = vector.load %arg1[%c3, %128, %c0_29] : memref<59x8x128xf32, #tpu.memory_space<vmem>>, vector<1x8x128xf32>
    %130 = vector.shape_cast %129 : vector<1x8x128xf32> to vector<8x128xf32>
    %c4 = arith.constant 4 : index
    %131 = arith.index_cast %3 : i32 to index
    %c0_30 = arith.constant 0 : index
    %132 = vector.load %arg1[%c4, %131, %c0_30] : memref<59x8x128xf32, #tpu.memory_space<vmem>>, vector<1x8x128xf32>
    %133 = vector.shape_cast %132 : vector<1x8x128xf32> to vector<8x128xf32>
    %c5 = arith.constant 5 : index
    %134 = arith.index_cast %3 : i32 to index
    %c0_31 = arith.constant 0 : index
    %135 = vector.load %arg1[%c5, %134, %c0_31] : memref<59x8x128xf32, #tpu.memory_space<vmem>>, vector<1x8x128xf32>
    %136 = vector.shape_cast %135 : vector<1x8x128xf32> to vector<8x128xf32>
    %137 = math.sin %130 : vector<8x128xf32>
    %138 = math.cos %130 : vector<8x128xf32>
    %139 = math.sin %133 : vector<8x128xf32>
    %140 = math.cos %133 : vector<8x128xf32>
    %141 = math.sin %136 : vector<8x128xf32>
    %142 = math.cos %136 : vector<8x128xf32>
    %143 = arith.mulf %140, %142 : vector<8x128xf32>
    %144 = arith.mulf %137, %139 : vector<8x128xf32>
    %145 = arith.mulf %144, %142 : vector<8x128xf32>
    %146 = arith.mulf %138, %141 : vector<8x128xf32>
    %147 = arith.addf %145, %146 : vector<8x128xf32>
    %cst_32 = arith.constant 0.000000e+00 : f32
    %148 = vector.broadcast %cst_32 : f32 to vector<8x128xf32>
    %149 = arith.subf %148, %138 : vector<8x128xf32>
    %150 = arith.mulf %149, %139 : vector<8x128xf32>
    %151 = arith.mulf %150, %142 : vector<8x128xf32>
    %152 = arith.mulf %137, %141 : vector<8x128xf32>
    %153 = arith.addf %151, %152 : vector<8x128xf32>
    %cst_33 = arith.constant 0.000000e+00 : f32
    %154 = vector.broadcast %cst_33 : f32 to vector<8x128xf32>
    %155 = arith.subf %154, %140 : vector<8x128xf32>
    %156 = arith.mulf %155, %141 : vector<8x128xf32>
    %cst_34 = arith.constant 0.000000e+00 : f32
    %157 = vector.broadcast %cst_34 : f32 to vector<8x128xf32>
    %158 = arith.subf %157, %137 : vector<8x128xf32>
    %159 = arith.mulf %158, %139 : vector<8x128xf32>
    %160 = arith.mulf %159, %141 : vector<8x128xf32>
    %161 = arith.mulf %138, %142 : vector<8x128xf32>
    %162 = arith.addf %160, %161 : vector<8x128xf32>
    %163 = arith.mulf %138, %139 : vector<8x128xf32>
    %164 = arith.mulf %163, %141 : vector<8x128xf32>
    %165 = arith.mulf %137, %142 : vector<8x128xf32>
    %166 = arith.addf %164, %165 : vector<8x128xf32>
    %cst_35 = arith.constant 0.000000e+00 : f32
    %167 = vector.broadcast %cst_35 : f32 to vector<8x128xf32>
    %168 = arith.subf %167, %137 : vector<8x128xf32>
    %169 = arith.mulf %168, %140 : vector<8x128xf32>
    %170 = arith.mulf %138, %140 : vector<8x128xf32>
    %171 = arith.mulf %100, %143 : vector<8x128xf32>
    %172 = arith.mulf %113, %147 : vector<8x128xf32>
    %173 = arith.addf %171, %172 : vector<8x128xf32>
    %174 = arith.mulf %96, %153 : vector<8x128xf32>
    %175 = arith.addf %173, %174 : vector<8x128xf32>
    %176 = arith.mulf %104, %143 : vector<8x128xf32>
    %177 = arith.mulf %119, %147 : vector<8x128xf32>
    %178 = arith.addf %176, %177 : vector<8x128xf32>
    %179 = arith.mulf %126, %153 : vector<8x128xf32>
    %180 = arith.addf %178, %179 : vector<8x128xf32>
    %181 = arith.mulf %110, %143 : vector<8x128xf32>
    %182 = arith.mulf %123, %147 : vector<8x128xf32>
    %183 = arith.addf %181, %182 : vector<8x128xf32>
    %184 = arith.mulf %127, %153 : vector<8x128xf32>
    %185 = arith.addf %183, %184 : vector<8x128xf32>
    %186 = arith.mulf %100, %156 : vector<8x128xf32>
    %187 = arith.mulf %113, %162 : vector<8x128xf32>
    %188 = arith.addf %186, %187 : vector<8x128xf32>
    %189 = arith.mulf %96, %166 : vector<8x128xf32>
    %190 = arith.addf %188, %189 : vector<8x128xf32>
    %191 = arith.mulf %104, %156 : vector<8x128xf32>
    %192 = arith.mulf %119, %162 : vector<8x128xf32>
    %193 = arith.addf %191, %192 : vector<8x128xf32>
    %194 = arith.mulf %126, %166 : vector<8x128xf32>
    %195 = arith.addf %193, %194 : vector<8x128xf32>
    %196 = arith.mulf %110, %156 : vector<8x128xf32>
    %197 = arith.mulf %123, %162 : vector<8x128xf32>
    %198 = arith.addf %196, %197 : vector<8x128xf32>
    %199 = arith.mulf %127, %166 : vector<8x128xf32>
    %200 = arith.addf %198, %199 : vector<8x128xf32>
    %201 = arith.mulf %100, %139 : vector<8x128xf32>
    %202 = arith.mulf %113, %169 : vector<8x128xf32>
    %203 = arith.addf %201, %202 : vector<8x128xf32>
    %204 = arith.mulf %96, %170 : vector<8x128xf32>
    %205 = arith.addf %203, %204 : vector<8x128xf32>
    %206 = arith.mulf %104, %139 : vector<8x128xf32>
    %207 = arith.mulf %119, %169 : vector<8x128xf32>
    %208 = arith.addf %206, %207 : vector<8x128xf32>
    %209 = arith.mulf %126, %170 : vector<8x128xf32>
    %210 = arith.addf %208, %209 : vector<8x128xf32>
    %211 = arith.mulf %110, %139 : vector<8x128xf32>
    %212 = arith.mulf %123, %169 : vector<8x128xf32>
    %213 = arith.addf %211, %212 : vector<8x128xf32>
    %214 = arith.mulf %127, %170 : vector<8x128xf32>
    %215 = arith.addf %213, %214 : vector<8x128xf32>
    %c26 = arith.constant 26 : index
    %216 = arith.index_cast %3 : i32 to index
    %c0_36 = arith.constant 0 : index
    %217 = vector.load %arg1[%c26, %216, %c0_36] : memref<59x8x128xf32, #tpu.memory_space<vmem>>, vector<1x8x128xf32>
    %218 = vector.shape_cast %217 : vector<1x8x128xf32> to vector<8x128xf32>
    %219 = arith.mulf %218, %6 : vector<8x128xf32>
    %220 = arith.mulf %219, %205 : vector<8x128xf32>
    %221 = arith.addf %9, %220 : vector<8x128xf32>
    %222 = arith.mulf %219, %210 : vector<8x128xf32>
    %223 = arith.addf %12, %222 : vector<8x128xf32>
    %224 = arith.mulf %219, %215 : vector<8x128xf32>
    %225 = arith.addf %15, %224 : vector<8x128xf32>
    %c12 = arith.constant 12 : index
    %226 = arith.index_cast %3 : i32 to index
    %c0_37 = arith.constant 0 : index
    %227 = vector.load %arg2[%c12, %226, %c0_37] : memref<105x8x128xf32, #tpu.memory_space<vmem>>, vector<1x8x128xf32>
    %228 = vector.shape_cast %227 : vector<1x8x128xf32> to vector<8x128xf32>
    %229 = vector.shape_cast %221 : vector<8x128xf32> to vector<1x8x128xf32>
    tpu.vector_store %arg2[%c12, %226, %c0_37], %229 {strides = array<i32>} : memref<105x8x128xf32, #tpu.memory_space<vmem>>, vector<1x8x128xf32>,
    %c13 = arith.constant 13 : index
    %230 = arith.index_cast %3 : i32 to index
    %c0_38 = arith.constant 0 : index
    %231 = vector.load %arg2[%c13, %230, %c0_38] : memref<105x8x128xf32, #tpu.memory_space<vmem>>, vector<1x8x128xf32>
    %232 = vector.shape_cast %231 : vector<1x8x128xf32> to vector<8x128xf32>
    %233 = vector.shape_cast %223 : vector<8x128xf32> to vector<1x8x128xf32>
    tpu.vector_store %arg2[%c13, %230, %c0_38], %233 {strides = array<i32>} : memref<105x8x128xf32, #tpu.memory_space<vmem>>, vector<1x8x128xf32>,
    %c14 = arith.constant 14 : index
    %234 = arith.index_cast %3 : i32 to index
    %c0_39 = arith.constant 0 : index
    %235 = vector.load %arg2[%c14, %234, %c0_39] : memref<105x8x128xf32, #tpu.memory_space<vmem>>, vector<1x8x128xf32>
    %236 = vector.shape_cast %235 : vector<1x8x128xf32> to vector<8x128xf32>
    %237 = vector.shape_cast %225 : vector<8x128xf32> to vector<1x8x128xf32>
    tpu.vector_store %arg2[%c14, %234, %c0_39], %237 {strides = array<i32>} : memref<105x8x128xf32, #tpu.memory_space<vmem>>, vector<1x8x128xf32>,
    %238 = arith.mulf %18, %221 : vector<8x128xf32>
    %239 = arith.mulf %21, %223 : vector<8x128xf32>
    %240 = arith.addf %238, %239 : vector<8x128xf32>
    %241 = arith.mulf %24, %225 : vector<8x128xf32>
    %242 = arith.addf %240, %241 : vector<8x128xf32>
    %243 = arith.mulf %27, %221 : vector<8x128xf32>
    %244 = arith.mulf %30, %223 : vector<8x128xf32>
    %245 = arith.addf %243, %244 : vector<8x128xf32>
    %246 = arith.mulf %33, %225 : vector<8x128xf32>
    %247 = arith.addf %245, %246 : vector<8x128xf32>
    %248 = arith.mulf %36, %221 : vector<8x128xf32>
    %249 = arith.mulf %39, %223 : vector<8x128xf32>
    %250 = arith.addf %248, %249 : vector<8x128xf32>
    %251 = arith.mulf %42, %225 : vector<8x128xf32>
    %252 = arith.addf %250, %251 : vector<8x128xf32>
    %253 = tpu.reciprocal %252 {approx = true} : vector<8x128xf32> -> vector<8x128xf32>
    %254 = arith.mulf %252, %253 : vector<8x128xf32>
    %cst_40 = arith.constant 2.000000e+00 : f32
    %255 = vector.broadcast %cst_40 : f32 to vector<8x128xf32>
    %256 = arith.subf %255, %254 : vector<8x128xf32>
    %257 = arith.mulf %253, %256 : vector<8x128xf32>
    %258 = arith.mulf %242, %257 : vector<8x128xf32>
    %c71 = arith.constant 71 : index
    %259 = arith.index_cast %3 : i32 to index
    %c0_41 = arith.constant 0 : index
    %260 = vector.load %arg2[%c71, %259, %c0_41] : memref<105x8x128xf32, #tpu.memory_space<vmem>>, vector<1x8x128xf32>
    %261 = vector.shape_cast %260 : vector<1x8x128xf32> to vector<8x128xf32>
    %262 = vector.shape_cast %258 : vector<8x128xf32> to vector<1x8x128xf32>
    tpu.vector_store %arg2[%c71, %259, %c0_41], %262 {strides = array<i32>} : memref<105x8x128xf32, #tpu.memory_space<vmem>>, vector<1x8x128xf32>,
    %263 = arith.mulf %247, %257 : vector<8x128xf32>
    %c72 = arith.constant 72 : index
    %264 = arith.index_cast %3 : i32 to index
    %c0_42 = arith.constant 0 : index
    %265 = vector.load %arg2[%c72, %264, %c0_42] : memref<105x8x128xf32, #tpu.memory_space<vmem>>, vector<1x8x128xf32>
    %266 = vector.shape_cast %265 : vector<1x8x128xf32> to vector<8x128xf32>
    %267 = vector.shape_cast %263 : vector<8x128xf32> to vector<1x8x128xf32>
    tpu.vector_store %arg2[%c72, %264, %c0_42], %267 {strides = array<i32>} : memref<105x8x128xf32, #tpu.memory_space<vmem>>, vector<1x8x128xf32>,
    %c6 = arith.constant 6 : index
    %268 = arith.index_cast %3 : i32 to index
    %c0_43 = arith.constant 0 : index
    %269 = vector.load %arg1[%c6, %268, %c0_43] : memref<59x8x128xf32, #tpu.memory_space<vmem>>, vector<1x8x128xf32>
    %270 = vector.shape_cast %269 : vector<1x8x128xf32> to vector<8x128xf32>
    %271 = math.sin %270 : vector<8x128xf32>
    %272 = math.cos %270 : vector<8x128xf32>
    %c7 = arith.constant 7 : index
    %273 = arith.index_cast %3 : i32 to index
    %c0_44 = arith.constant 0 : index
    %274 = vector.load %arg1[%c7, %273, %c0_44] : memref<59x8x128xf32, #tpu.memory_space<vmem>>, vector<1x8x128xf32>
    %275 = vector.shape_cast %274 : vector<1x8x128xf32> to vector<8x128xf32>
    %276 = math.sin %275 : vector<8x128xf32>
    %277 = math.cos %275 : vector<8x128xf32>
    %c8 = arith.constant 8 : index
    %278 = arith.index_cast %3 : i32 to index
    %c0_45 = arith.constant 0 : index
    %279 = vector.load %arg1[%c8, %278, %c0_45] : memref<59x8x128xf32, #tpu.memory_space<vmem>>, vector<1x8x128xf32>
    %280 = vector.shape_cast %279 : vector<1x8x128xf32> to vector<8x128xf32>
    %281 = math.sin %280 : vector<8x128xf32>
    %282 = math.cos %280 : vector<8x128xf32>
    %283 = arith.mulf %277, %282 : vector<8x128xf32>
    %284 = arith.mulf %271, %276 : vector<8x128xf32>
    %285 = arith.mulf %284, %282 : vector<8x128xf32>
    %286 = arith.mulf %272, %281 : vector<8x128xf32>
    %287 = arith.addf %285, %286 : vector<8x128xf32>
    %cst_46 = arith.constant 0.000000e+00 : f32
    %288 = vector.broadcast %cst_46 : f32 to vector<8x128xf32>
    %289 = arith.subf %288, %272 : vector<8x128xf32>
    %290 = arith.mulf %289, %276 : vector<8x128xf32>
    %291 = arith.mulf %290, %282 : vector<8x128xf32>
    %292 = arith.mulf %271, %281 : vector<8x128xf32>
    %293 = arith.addf %291, %292 : vector<8x128xf32>
    %cst_47 = arith.constant 0.000000e+00 : f32
    %294 = vector.broadcast %cst_47 : f32 to vector<8x128xf32>
    %295 = arith.subf %294, %271 : vector<8x128xf32>
    %296 = arith.mulf %295, %277 : vector<8x128xf32>
    %297 = arith.mulf %272, %277 : vector<8x128xf32>
    %298 = arith.mulf %175, %283 : vector<8x128xf32>
    %299 = arith.mulf %190, %287 : vector<8x128xf32>
    %300 = arith.addf %298, %299 : vector<8x128xf32>
    %301 = arith.mulf %205, %293 : vector<8x128xf32>
    %302 = arith.addf %300, %301 : vector<8x128xf32>
    %303 = arith.mulf %180, %283 : vector<8x128xf32>
    %304 = arith.mulf %195, %287 : vector<8x128xf32>
    %305 = arith.addf %303, %304 : vector<8x128xf32>
    %306 = arith.mulf %210, %293 : vector<8x128xf32>
    %307 = arith.addf %305, %306 : vector<8x128xf32>
    %308 = arith.mulf %185, %283 : vector<8x128xf32>
    %309 = arith.mulf %200, %287 : vector<8x128xf32>
    %310 = arith.addf %308, %309 : vector<8x128xf32>
    %311 = arith.mulf %215, %293 : vector<8x128xf32>
    %312 = arith.addf %310, %311 : vector<8x128xf32>
    %313 = arith.mulf %175, %276 : vector<8x128xf32>
    %314 = arith.mulf %190, %296 : vector<8x128xf32>
    %315 = arith.addf %313, %314 : vector<8x128xf32>
    %316 = arith.mulf %205, %297 : vector<8x128xf32>
    %317 = arith.addf %315, %316 : vector<8x128xf32>
    %318 = arith.mulf %180, %276 : vector<8x128xf32>
    %319 = arith.mulf %195, %296 : vector<8x128xf32>
    %320 = arith.addf %318, %319 : vector<8x128xf32>
    %321 = arith.mulf %210, %297 : vector<8x128xf32>
    %322 = arith.addf %320, %321 : vector<8x128xf32>
    %323 = arith.mulf %185, %276 : vector<8x128xf32>
    %324 = arith.mulf %200, %296 : vector<8x128xf32>
    %325 = arith.addf %323, %324 : vector<8x128xf32>
    %326 = arith.mulf %215, %297 : vector<8x128xf32>
    %327 = arith.addf %325, %326 : vector<8x128xf32>
    %c27 = arith.constant 27 : index
    %328 = arith.index_cast %3 : i32 to index
    %c0_48 = arith.constant 0 : index
    %329 = vector.load %arg1[%c27, %328, %c0_48] : memref<59x8x128xf32, #tpu.memory_space<vmem>>, vector<1x8x128xf32>
    %330 = vector.shape_cast %329 : vector<1x8x128xf32> to vector<8x128xf32>
    %331 = arith.mulf %330, %6 : vector<8x128xf32>
    %332 = arith.mulf %331, %317 : vector<8x128xf32>
    %333 = arith.addf %221, %332 : vector<8x128xf32>
    %334 = arith.mulf %331, %322 : vector<8x128xf32>
    %335 = arith.addf %223, %334 : vector<8x128xf32>
    %336 = arith.mulf %331, %327 : vector<8x128xf32>
    %337 = arith.addf %225, %336 : vector<8x128xf32>
    %c9 = arith.constant 9 : index
    %338 = arith.index_cast %3 : i32 to index
    %c0_49 = arith.constant 0 : index
    %339 = vector.load %arg2[%c9, %338, %c0_49] : memref<105x8x128xf32, #tpu.memory_space<vmem>>, vector<1x8x128xf32>
    %340 = vector.shape_cast %339 : vector<1x8x128xf32> to vector<8x128xf32>
    %341 = vector.shape_cast %333 : vector<8x128xf32> to vector<1x8x128xf32>
    tpu.vector_store %arg2[%c9, %338, %c0_49], %341 {strides = array<i32>} : memref<105x8x128xf32, #tpu.memory_space<vmem>>, vector<1x8x128xf32>,
    %c10 = arith.constant 10 : index
    %342 = arith.index_cast %3 : i32 to index
    %c0_50 = arith.constant 0 : index
    %343 = vector.load %arg2[%c10, %342, %c0_50] : memref<105x8x128xf32, #tpu.memory_space<vmem>>, vector<1x8x128xf32>
    %344 = vector.shape_cast %343 : vector<1x8x128xf32> to vector<8x128xf32>
    %345 = vector.shape_cast %335 : vector<8x128xf32> to vector<1x8x128xf32>
    tpu.vector_store %arg2[%c10, %342, %c0_50], %345 {strides = array<i32>} : memref<105x8x128xf32, #tpu.memory_space<vmem>>, vector<1x8x128xf32>,
    %c11 = arith.constant 11 : index
    %346 = arith.index_cast %3 : i32 to index
    %c0_51 = arith.constant 0 : index
    %347 = vector.load %arg2[%c11, %346, %c0_51] : memref<105x8x128xf32, #tpu.memory_space<vmem>>, vector<1x8x128xf32>
    %348 = vector.shape_cast %347 : vector<1x8x128xf32> to vector<8x128xf32>
    %349 = vector.shape_cast %337 : vector<8x128xf32> to vector<1x8x128xf32>
    tpu.vector_store %arg2[%c11, %346, %c0_51], %349 {strides = array<i32>} : memref<105x8x128xf32, #tpu.memory_space<vmem>>, vector<1x8x128xf32>,
    %350 = arith.mulf %18, %333 : vector<8x128xf32>
    %351 = arith.mulf %21, %335 : vector<8x128xf32>
    %352 = arith.addf %350, %351 : vector<8x128xf32>
    %353 = arith.mulf %24, %337 : vector<8x128xf32>
    %354 = arith.addf %352, %353 : vector<8x128xf32>
    %355 = arith.mulf %27, %333 : vector<8x128xf32>
    %356 = arith.mulf %30, %335 : vector<8x128xf32>
    %357 = arith.addf %355, %356 : vector<8x128xf32>
    %358 = arith.mulf %33, %337 : vector<8x128xf32>
    %359 = arith.addf %357, %358 : vector<8x128xf32>
    %360 = arith.mulf %36, %333 : vector<8x128xf32>
    %361 = arith.mulf %39, %335 : vector<8x128xf32>
    %362 = arith.addf %360, %361 : vector<8x128xf32>
    %363 = arith.mulf %42, %337 : vector<8x128xf32>
    %364 = arith.addf %362, %363 : vector<8x128xf32>
    %365 = tpu.reciprocal %364 {approx = true} : vector<8x128xf32> -> vector<8x128xf32>
    %366 = arith.mulf %364, %365 : vector<8x128xf32>
    %cst_52 = arith.constant 2.000000e+00 : f32
    %367 = vector.broadcast %cst_52 : f32 to vector<8x128xf32>
    %368 = arith.subf %367, %366 : vector<8x128xf32>
    %369 = arith.mulf %365, %368 : vector<8x128xf32>
    %370 = arith.mulf %354, %369 : vector<8x128xf32>
    %c69 = arith.constant 69 : index
    %371 = arith.index_cast %3 : i32 to index
    %c0_53 = arith.constant 0 : index
    %372 = vector.load %arg2[%c69, %371, %c0_53] : memref<105x8x128xf32, #tpu.memory_space<vmem>>, vector<1x8x128xf32>
    %373 = vector.shape_cast %372 : vector<1x8x128xf32> to vector<8x128xf32>
    %374 = vector.shape_cast %370 : vector<8x128xf32> to vector<1x8x128xf32>
    tpu.vector_store %arg2[%c69, %371, %c0_53], %374 {strides = array<i32>} : memref<105x8x128xf32, #tpu.memory_space<vmem>>, vector<1x8x128xf32>,
    %375 = arith.mulf %359, %369 : vector<8x128xf32>
    %c70 = arith.constant 70 : index
    %376 = arith.index_cast %3 : i32 to index
    %c0_54 = arith.constant 0 : index
    %377 = vector.load %arg2[%c70, %376, %c0_54] : memref<105x8x128xf32, #tpu.memory_space<vmem>>, vector<1x8x128xf32>
    %378 = vector.shape_cast %377 : vector<1x8x128xf32> to vector<8x128xf32>
    %379 = vector.shape_cast %375 : vector<8x128xf32> to vector<1x8x128xf32>
    tpu.vector_store %arg2[%c70, %376, %c0_54], %379 {strides = array<i32>} : memref<105x8x128xf32, #tpu.memory_space<vmem>>, vector<1x8x128xf32>,
    %c9_55 = arith.constant 9 : index
    %380 = arith.index_cast %3 : i32 to index
    %c0_56 = arith.constant 0 : index
    %381 = vector.load %arg1[%c9_55, %380, %c0_56] : memref<59x8x128xf32, #tpu.memory_space<vmem>>, vector<1x8x128xf32>
    %382 = vector.shape_cast %381 : vector<1x8x128xf32> to vector<8x128xf32>
    %383 = math.sin %382 : vector<8x128xf32>
    %384 = math.cos %382 : vector<8x128xf32>
    %385 = arith.mulf %302, %383 : vector<8x128xf32>
    %386 = arith.mulf %317, %384 : vector<8x128xf32>
    %387 = arith.addf %385, %386 : vector<8x128xf32>
    %388 = arith.mulf %307, %383 : vector<8x128xf32>
    %389 = arith.mulf %322, %384 : vector<8x128xf32>
    %390 = arith.addf %388, %389 : vector<8x128xf32>
    %391 = arith.mulf %312, %383 : vector<8x128xf32>
    %392 = arith.mulf %327, %384 : vector<8x128xf32>
    %393 = arith.addf %391, %392 : vector<8x128xf32>
    %c28 = arith.constant 28 : index
    %394 = arith.index_cast %3 : i32 to index
    %c0_57 = arith.constant 0 : index
    %395 = vector.load %arg1[%c28, %394, %c0_57] : memref<59x8x128xf32, #tpu.memory_space<vmem>>, vector<1x8x128xf32>
    %396 = vector.shape_cast %395 : vector<1x8x128xf32> to vector<8x128xf32>
    %397 = arith.mulf %396, %6 : vector<8x128xf32>
    %398 = arith.mulf %397, %387 : vector<8x128xf32>
    %399 = arith.addf %333, %398 : vector<8x128xf32>
    %400 = arith.mulf %397, %390 : vector<8x128xf32>
    %401 = arith.addf %335, %400 : vector<8x128xf32>
    %402 = arith.mulf %397, %393 : vector<8x128xf32>
    %403 = arith.addf %337, %402 : vector<8x128xf32>
    %c6_58 = arith.constant 6 : index
    %404 = arith.index_cast %3 : i32 to index
    %c0_59 = arith.constant 0 : index
    %405 = vector.load %arg2[%c6_58, %404, %c0_59] : memref<105x8x128xf32, #tpu.memory_space<vmem>>, vector<1x8x128xf32>
    %406 = vector.shape_cast %405 : vector<1x8x128xf32> to vector<8x128xf32>
    %407 = vector.shape_cast %399 : vector<8x128xf32> to vector<1x8x128xf32>
    tpu.vector_store %arg2[%c6_58, %404, %c0_59], %407 {strides = array<i32>} : memref<105x8x128xf32, #tpu.memory_space<vmem>>, vector<1x8x128xf32>,
    %c7_60 = arith.constant 7 : index
    %408 = arith.index_cast %3 : i32 to index
    %c0_61 = arith.constant 0 : index
    %409 = vector.load %arg2[%c7_60, %408, %c0_61] : memref<105x8x128xf32, #tpu.memory_space<vmem>>, vector<1x8x128xf32>
    %410 = vector.shape_cast %409 : vector<1x8x128xf32> to vector<8x128xf32>
    %411 = vector.shape_cast %401 : vector<8x128xf32> to vector<1x8x128xf32>
    tpu.vector_store %arg2[%c7_60, %408, %c0_61], %411 {strides = array<i32>} : memref<105x8x128xf32, #tpu.memory_space<vmem>>, vector<1x8x128xf32>,
    %c8_62 = arith.constant 8 : index
    %412 = arith.index_cast %3 : i32 to index
    %c0_63 = arith.constant 0 : index
    %413 = vector.load %arg2[%c8_62, %412, %c0_63] : memref<105x8x128xf32, #tpu.memory_space<vmem>>, vector<1x8x128xf32>
    %414 = vector.shape_cast %413 : vector<1x8x128xf32> to vector<8x128xf32>
    %415 = vector.shape_cast %403 : vector<8x128xf32> to vector<1x8x128xf32>
    tpu.vector_store %arg2[%c8_62, %412, %c0_63], %415 {strides = array<i32>} : memref<105x8x128xf32, #tpu.memory_space<vmem>>, vector<1x8x128xf32>,
    %416 = arith.mulf %18, %399 : vector<8x128xf32>
    %417 = arith.mulf %21, %401 : vector<8x128xf32>
    %418 = arith.addf %416, %417 : vector<8x128xf32>
    %419 = arith.mulf %24, %403 : vector<8x128xf32>
    %420 = arith.addf %418, %419 : vector<8x128xf32>
    %421 = arith.mulf %27, %399 : vector<8x128xf32>
    %422 = arith.mulf %30, %401 : vector<8x128xf32>
    %423 = arith.addf %421, %422 : vector<8x128xf32>
    %424 = arith.mulf %33, %403 : vector<8x128xf32>
    %425 = arith.addf %423, %424 : vector<8x128xf32>
    %426 = arith.mulf %36, %399 : vector<8x128xf32>
    %427 = arith.mulf %39, %401 : vector<8x128xf32>
    %428 = arith.addf %426, %427 : vector<8x128xf32>
    %429 = arith.mulf %42, %403 : vector<8x128xf32>
    %430 = arith.addf %428, %429 : vector<8x128xf32>
    %431 = tpu.reciprocal %430 {approx = true} : vector<8x128xf32> -> vector<8x128xf32>
    %432 = arith.mulf %430, %431 : vector<8x128xf32>
    %cst_64 = arith.constant 2.000000e+00 : f32
    %433 = vector.broadcast %cst_64 : f32 to vector<8x128xf32>
    %434 = arith.subf %433, %432 : vector<8x128xf32>
    %435 = arith.mulf %431, %434 : vector<8x128xf32>
    %436 = arith.mulf %420, %435 : vector<8x128xf32>
    %c67 = arith.constant 67 : index
    %437 = arith.index_cast %3 : i32 to index
    %c0_65 = arith.constant 0 : index
    %438 = vector.load %arg2[%c67, %437, %c0_65] : memref<105x8x128xf32, #tpu.memory_space<vmem>>, vector<1x8x128xf32>
    %439 = vector.shape_cast %438 : vector<1x8x128xf32> to vector<8x128xf32>
    %440 = vector.shape_cast %436 : vector<8x128xf32> to vector<1x8x128xf32>
    tpu.vector_store %arg2[%c67, %437, %c0_65], %440 {strides = array<i32>} : memref<105x8x128xf32, #tpu.memory_space<vmem>>, vector<1x8x128xf32>,
    %441 = arith.mulf %425, %435 : vector<8x128xf32>
    %c68 = arith.constant 68 : index
    %442 = arith.index_cast %3 : i32 to index
    %c0_66 = arith.constant 0 : index
    %443 = vector.load %arg2[%c68, %442, %c0_66] : memref<105x8x128xf32, #tpu.memory_space<vmem>>, vector<1x8x128xf32>
    %444 = vector.shape_cast %443 : vector<1x8x128xf32> to vector<8x128xf32>
    %445 = vector.shape_cast %441 : vector<8x128xf32> to vector<1x8x128xf32>
    tpu.vector_store %arg2[%c68, %442, %c0_66], %445 {strides = array<i32>} : memref<105x8x128xf32, #tpu.memory_space<vmem>>, vector<1x8x128xf32>,
    %c29 = arith.constant 29 : index
    %446 = arith.index_cast %3 : i32 to index
    %c0_67 = arith.constant 0 : index
    %447 = vector.load %arg1[%c29, %446, %c0_67] : memref<59x8x128xf32, #tpu.memory_space<vmem>>, vector<1x8x128xf32>
    %448 = vector.shape_cast %447 : vector<1x8x128xf32> to vector<8x128xf32>
    %449 = arith.mulf %448, %6 : vector<8x128xf32>
    %450 = arith.mulf %449, %387 : vector<8x128xf32>
    %451 = arith.addf %399, %450 : vector<8x128xf32>
    %452 = arith.mulf %449, %390 : vector<8x128xf32>
    %453 = arith.addf %401, %452 : vector<8x128xf32>
    %454 = arith.mulf %449, %393 : vector<8x128xf32>
    %455 = arith.addf %403, %454 : vector<8x128xf32>
    %c3_68 = arith.constant 3 : index
    %456 = arith.index_cast %3 : i32 to index
    %c0_69 = arith.constant 0 : index
    %457 = vector.load %arg2[%c3_68, %456, %c0_69] : memref<105x8x128xf32, #tpu.memory_space<vmem>>, vector<1x8x128xf32>
    %458 = vector.shape_cast %457 : vector<1x8x128xf32> to vector<8x128xf32>
    %459 = vector.shape_cast %451 : vector<8x128xf32> to vector<1x8x128xf32>
    tpu.vector_store %arg2[%c3_68, %456, %c0_69], %459 {strides = array<i32>} : memref<105x8x128xf32, #tpu.memory_space<vmem>>, vector<1x8x128xf32>,
    %c4_70 = arith.constant 4 : index
    %460 = arith.index_cast %3 : i32 to index
    %c0_71 = arith.constant 0 : index
    %461 = vector.load %arg2[%c4_70, %460, %c0_71] : memref<105x8x128xf32, #tpu.memory_space<vmem>>, vector<1x8x128xf32>
    %462 = vector.shape_cast %461 : vector<1x8x128xf32> to vector<8x128xf32>
    %463 = vector.shape_cast %453 : vector<8x128xf32> to vector<1x8x128xf32>
    tpu.vector_store %arg2[%c4_70, %460, %c0_71], %463 {strides = array<i32>} : memref<105x8x128xf32, #tpu.memory_space<vmem>>, vector<1x8x128xf32>,
    %c5_72 = arith.constant 5 : index
    %464 = arith.index_cast %3 : i32 to index
    %c0_73 = arith.constant 0 : index
    %465 = vector.load %arg2[%c5_72, %464, %c0_73] : memref<105x8x128xf32, #tpu.memory_space<vmem>>, vector<1x8x128xf32>
    %466 = vector.shape_cast %465 : vector<1x8x128xf32> to vector<8x128xf32>
    %467 = vector.shape_cast %455 : vector<8x128xf32> to vector<1x8x128xf32>
    tpu.vector_store %arg2[%c5_72, %464, %c0_73], %467 {strides = array<i32>} : memref<105x8x128xf32, #tpu.memory_space<vmem>>, vector<1x8x128xf32>,
    %468 = arith.mulf %18, %451 : vector<8x128xf32>
    %469 = arith.mulf %21, %453 : vector<8x128xf32>
    %470 = arith.addf %468, %469 : vector<8x128xf32>
    %471 = arith.mulf %24, %455 : vector<8x128xf32>
    %472 = arith.addf %470, %471 : vector<8x128xf32>
    %473 = arith.mulf %27, %451 : vector<8x128xf32>
    %474 = arith.mulf %30, %453 : vector<8x128xf32>
    %475 = arith.addf %473, %474 : vector<8x128xf32>
    %476 = arith.mulf %33, %455 : vector<8x128xf32>
    %477 = arith.addf %475, %476 : vector<8x128xf32>
    %478 = arith.mulf %36, %451 : vector<8x128xf32>
    %479 = arith.mulf %39, %453 : vector<8x128xf32>
    %480 = arith.addf %478, %479 : vector<8x128xf32>
    %481 = arith.mulf %42, %455 : vector<8x128xf32>
    %482 = arith.addf %480, %481 : vector<8x128xf32>
    %483 = tpu.reciprocal %482 {approx = true} : vector<8x128xf32> -> vector<8x128xf32>
    %484 = arith.mulf %482, %483 : vector<8x128xf32>
    %cst_74 = arith.constant 2.000000e+00 : f32
    %485 = vector.broadcast %cst_74 : f32 to vector<8x128xf32>
    %486 = arith.subf %485, %484 : vector<8x128xf32>
    %487 = arith.mulf %483, %486 : vector<8x128xf32>
    %488 = arith.mulf %472, %487 : vector<8x128xf32>
    %c65 = arith.constant 65 : index
    %489 = arith.index_cast %3 : i32 to index
    %c0_75 = arith.constant 0 : index
    %490 = vector.load %arg2[%c65, %489, %c0_75] : memref<105x8x128xf32, #tpu.memory_space<vmem>>, vector<1x8x128xf32>
    %491 = vector.shape_cast %490 : vector<1x8x128xf32> to vector<8x128xf32>
    %492 = vector.shape_cast %488 : vector<8x128xf32> to vector<1x8x128xf32>
    tpu.vector_store %arg2[%c65, %489, %c0_75], %492 {strides = array<i32>} : memref<105x8x128xf32, #tpu.memory_space<vmem>>, vector<1x8x128xf32>,
    %493 = arith.mulf %477, %487 : vector<8x128xf32>
    %c66 = arith.constant 66 : index
    %494 = arith.index_cast %3 : i32 to index
    %c0_76 = arith.constant 0 : index
    %495 = vector.load %arg2[%c66, %494, %c0_76] : memref<105x8x128xf32, #tpu.memory_space<vmem>>, vector<1x8x128xf32>
    %496 = vector.shape_cast %495 : vector<1x8x128xf32> to vector<8x128xf32>
    %497 = vector.shape_cast %493 : vector<8x128xf32> to vector<1x8x128xf32>
    tpu.vector_store %arg2[%c66, %494, %c0_76], %497 {strides = array<i32>} : memref<105x8x128xf32, #tpu.memory_space<vmem>>, vector<1x8x128xf32>,
    %c10_77 = arith.constant 10 : index
    %498 = arith.index_cast %3 : i32 to index
    %c0_78 = arith.constant 0 : index
    %499 = vector.load %arg1[%c10_77, %498, %c0_78] : memref<59x8x128xf32, #tpu.memory_space<vmem>>, vector<1x8x128xf32>
    %500 = vector.shape_cast %499 : vector<1x8x128xf32> to vector<8x128xf32>
    %501 = math.sin %500 : vector<8x128xf32>
    %502 = math.cos %500 : vector<8x128xf32>
    %c11_79 = arith.constant 11 : index
    %503 = arith.index_cast %3 : i32 to index
    %c0_80 = arith.constant 0 : index
    %504 = vector.load %arg1[%c11_79, %503, %c0_80] : memref<59x8x128xf32, #tpu.memory_space<vmem>>, vector<1x8x128xf32>
    %505 = vector.shape_cast %504 : vector<1x8x128xf32> to vector<8x128xf32>
    %506 = math.sin %505 : vector<8x128xf32>
    %507 = math.cos %505 : vector<8x128xf32>
    %508 = arith.mulf %113, %502 : vector<8x128xf32>
    %509 = arith.mulf %96, %501 : vector<8x128xf32>
    %510 = arith.addf %508, %509 : vector<8x128xf32>
    %511 = arith.mulf %119, %502 : vector<8x128xf32>
    %512 = arith.mulf %126, %501 : vector<8x128xf32>
    %513 = arith.addf %511, %512 : vector<8x128xf32>
    %514 = arith.mulf %123, %502 : vector<8x128xf32>
    %515 = arith.mulf %127, %501 : vector<8x128xf32>
    %516 = arith.addf %514, %515 : vector<8x128xf32>
    %cst_81 = arith.constant 0.000000e+00 : f32
    %517 = vector.broadcast %cst_81 : f32 to vector<8x128xf32>
    %518 = arith.subf %517, %501 : vector<8x128xf32>
    %519 = arith.mulf %518, %507 : vector<8x128xf32>
    %520 = arith.mulf %502, %507 : vector<8x128xf32>
    %521 = arith.mulf %100, %506 : vector<8x128xf32>
    %522 = arith.mulf %113, %519 : vector<8x128xf32>
    %523 = arith.addf %521, %522 : vector<8x128xf32>
    %524 = arith.mulf %96, %520 : vector<8x128xf32>
    %525 = arith.addf %523, %524 : vector<8x128xf32>
    %526 = arith.mulf %104, %506 : vector<8x128xf32>
    %527 = arith.mulf %119, %519 : vector<8x128xf32>
    %528 = arith.addf %526, %527 : vector<8x128xf32>
    %529 = arith.mulf %126, %520 : vector<8x128xf32>
    %530 = arith.addf %528, %529 : vector<8x128xf32>
    %531 = arith.mulf %110, %506 : vector<8x128xf32>
    %532 = arith.mulf %123, %519 : vector<8x128xf32>
    %533 = arith.addf %531, %532 : vector<8x128xf32>
    %534 = arith.mulf %127, %520 : vector<8x128xf32>
    %535 = arith.addf %533, %534 : vector<8x128xf32>
    %c30 = arith.constant 30 : index
    %536 = arith.index_cast %3 : i32 to index
    %c0_82 = arith.constant 0 : index
    %537 = vector.load %arg1[%c30, %536, %c0_82] : memref<59x8x128xf32, #tpu.memory_space<vmem>>, vector<1x8x128xf32>
    %538 = vector.shape_cast %537 : vector<1x8x128xf32> to vector<8x128xf32>
    %539 = arith.mulf %538, %6 : vector<8x128xf32>
    %540 = arith.mulf %539, %525 : vector<8x128xf32>
    %541 = arith.addf %9, %540 : vector<8x128xf32>
    %542 = arith.mulf %539, %530 : vector<8x128xf32>
    %543 = arith.addf %12, %542 : vector<8x128xf32>
    %544 = arith.mulf %539, %535 : vector<8x128xf32>
    %545 = arith.addf %15, %544 : vector<8x128xf32>
    %c24 = arith.constant 24 : index
    %546 = arith.index_cast %3 : i32 to index
    %c0_83 = arith.constant 0 : index
    %547 = vector.load %arg2[%c24, %546, %c0_83] : memref<105x8x128xf32, #tpu.memory_space<vmem>>, vector<1x8x128xf32>
    %548 = vector.shape_cast %547 : vector<1x8x128xf32> to vector<8x128xf32>
    %549 = vector.shape_cast %541 : vector<8x128xf32> to vector<1x8x128xf32>
    tpu.vector_store %arg2[%c24, %546, %c0_83], %549 {strides = array<i32>} : memref<105x8x128xf32, #tpu.memory_space<vmem>>, vector<1x8x128xf32>,
    %c25 = arith.constant 25 : index
    %550 = arith.index_cast %3 : i32 to index
    %c0_84 = arith.constant 0 : index
    %551 = vector.load %arg2[%c25, %550, %c0_84] : memref<105x8x128xf32, #tpu.memory_space<vmem>>, vector<1x8x128xf32>
    %552 = vector.shape_cast %551 : vector<1x8x128xf32> to vector<8x128xf32>
    %553 = vector.shape_cast %543 : vector<8x128xf32> to vector<1x8x128xf32>
    tpu.vector_store %arg2[%c25, %550, %c0_84], %553 {strides = array<i32>} : memref<105x8x128xf32, #tpu.memory_space<vmem>>, vector<1x8x128xf32>,
    %c26_85 = arith.constant 26 : index
    %554 = arith.index_cast %3 : i32 to index
    %c0_86 = arith.constant 0 : index
    %555 = vector.load %arg2[%c26_85, %554, %c0_86] : memref<105x8x128xf32, #tpu.memory_space<vmem>>, vector<1x8x128xf32>
    %556 = vector.shape_cast %555 : vector<1x8x128xf32> to vector<8x128xf32>
    %557 = vector.shape_cast %545 : vector<8x128xf32> to vector<1x8x128xf32>
    tpu.vector_store %arg2[%c26_85, %554, %c0_86], %557 {strides = array<i32>} : memref<105x8x128xf32, #tpu.memory_space<vmem>>, vector<1x8x128xf32>,
    %558 = arith.mulf %18, %541 : vector<8x128xf32>
    %559 = arith.mulf %21, %543 : vector<8x128xf32>
    %560 = arith.addf %558, %559 : vector<8x128xf32>
    %561 = arith.mulf %24, %545 : vector<8x128xf32>
    %562 = arith.addf %560, %561 : vector<8x128xf32>
    %563 = arith.mulf %27, %541 : vector<8x128xf32>
    %564 = arith.mulf %30, %543 : vector<8x128xf32>
    %565 = arith.addf %563, %564 : vector<8x128xf32>
    %566 = arith.mulf %33, %545 : vector<8x128xf32>
    %567 = arith.addf %565, %566 : vector<8x128xf32>
    %568 = arith.mulf %36, %541 : vector<8x128xf32>
    %569 = arith.mulf %39, %543 : vector<8x128xf32>
    %570 = arith.addf %568, %569 : vector<8x128xf32>
    %571 = arith.mulf %42, %545 : vector<8x128xf32>
    %572 = arith.addf %570, %571 : vector<8x128xf32>
    %573 = tpu.reciprocal %572 {approx = true} : vector<8x128xf32> -> vector<8x128xf32>
    %574 = arith.mulf %572, %573 : vector<8x128xf32>
    %cst_87 = arith.constant 2.000000e+00 : f32
    %575 = vector.broadcast %cst_87 : f32 to vector<8x128xf32>
    %576 = arith.subf %575, %574 : vector<8x128xf32>
    %577 = arith.mulf %573, %576 : vector<8x128xf32>
    %578 = arith.mulf %562, %577 : vector<8x128xf32>
    %c79 = arith.constant 79 : index
    %579 = arith.index_cast %3 : i32 to index
    %c0_88 = arith.constant 0 : index
    %580 = vector.load %arg2[%c79, %579, %c0_88] : memref<105x8x128xf32, #tpu.memory_space<vmem>>, vector<1x8x128xf32>
    %581 = vector.shape_cast %580 : vector<1x8x128xf32> to vector<8x128xf32>
    %582 = vector.shape_cast %578 : vector<8x128xf32> to vector<1x8x128xf32>
    tpu.vector_store %arg2[%c79, %579, %c0_88], %582 {strides = array<i32>} : memref<105x8x128xf32, #tpu.memory_space<vmem>>, vector<1x8x128xf32>,
    %583 = arith.mulf %567, %577 : vector<8x128xf32>
    %c80 = arith.constant 80 : index
    %584 = arith.index_cast %3 : i32 to index
    %c0_89 = arith.constant 0 : index
    %585 = vector.load %arg2[%c80, %584, %c0_89] : memref<105x8x128xf32, #tpu.memory_space<vmem>>, vector<1x8x128xf32>
    %586 = vector.shape_cast %585 : vector<1x8x128xf32> to vector<8x128xf32>
    %587 = vector.shape_cast %583 : vector<8x128xf32> to vector<1x8x128xf32>
    tpu.vector_store %arg2[%c80, %584, %c0_89], %587 {strides = array<i32>} : memref<105x8x128xf32, #tpu.memory_space<vmem>>, vector<1x8x128xf32>,
    %c12_90 = arith.constant 12 : index
    %588 = arith.index_cast %3 : i32 to index
    %c0_91 = arith.constant 0 : index
    %589 = vector.load %arg1[%c12_90, %588, %c0_91] : memref<59x8x128xf32, #tpu.memory_space<vmem>>, vector<1x8x128xf32>
    %590 = vector.shape_cast %589 : vector<1x8x128xf32> to vector<8x128xf32>
    %591 = math.sin %590 : vector<8x128xf32>
    %592 = math.cos %590 : vector<8x128xf32>
    %593 = arith.mulf %510, %592 : vector<8x128xf32>
    %594 = arith.mulf %525, %591 : vector<8x128xf32>
    %595 = arith.addf %593, %594 : vector<8x128xf32>
    %596 = arith.mulf %513, %592 : vector<8x128xf32>
    %597 = arith.mulf %530, %591 : vector<8x128xf32>
    %598 = arith.addf %596, %597 : vector<8x128xf32>
    %599 = arith.mulf %516, %592 : vector<8x128xf32>
    %600 = arith.mulf %535, %591 : vector<8x128xf32>
    %601 = arith.addf %599, %600 : vector<8x128xf32>
    %602 = arith.mulf %525, %592 : vector<8x128xf32>
    %603 = arith.mulf %510, %591 : vector<8x128xf32>
    %604 = arith.subf %602, %603 : vector<8x128xf32>
    %605 = arith.mulf %530, %592 : vector<8x128xf32>
    %606 = arith.mulf %513, %591 : vector<8x128xf32>
    %607 = arith.subf %605, %606 : vector<8x128xf32>
    %608 = arith.mulf %535, %592 : vector<8x128xf32>
    %609 = arith.mulf %516, %591 : vector<8x128xf32>
    %610 = arith.subf %608, %609 : vector<8x128xf32>
    %c31 = arith.constant 31 : index
    %611 = arith.index_cast %3 : i32 to index
    %c0_92 = arith.constant 0 : index
    %612 = vector.load %arg1[%c31, %611, %c0_92] : memref<59x8x128xf32, #tpu.memory_space<vmem>>, vector<1x8x128xf32>
    %613 = vector.shape_cast %612 : vector<1x8x128xf32> to vector<8x128xf32>
    %614 = arith.mulf %613, %6 : vector<8x128xf32>
    %615 = arith.mulf %614, %604 : vector<8x128xf32>
    %616 = arith.addf %541, %615 : vector<8x128xf32>
    %617 = arith.mulf %614, %607 : vector<8x128xf32>
    %618 = arith.addf %543, %617 : vector<8x128xf32>
    %619 = arith.mulf %614, %610 : vector<8x128xf32>
    %620 = arith.addf %545, %619 : vector<8x128xf32>
    %c21 = arith.constant 21 : index
    %621 = arith.index_cast %3 : i32 to index
    %c0_93 = arith.constant 0 : index
    %622 = vector.load %arg2[%c21, %621, %c0_93] : memref<105x8x128xf32, #tpu.memory_space<vmem>>, vector<1x8x128xf32>
    %623 = vector.shape_cast %622 : vector<1x8x128xf32> to vector<8x128xf32>
    %624 = vector.shape_cast %616 : vector<8x128xf32> to vector<1x8x128xf32>
    tpu.vector_store %arg2[%c21, %621, %c0_93], %624 {strides = array<i32>} : memref<105x8x128xf32, #tpu.memory_space<vmem>>, vector<1x8x128xf32>,
    %c22 = arith.constant 22 : index
    %625 = arith.index_cast %3 : i32 to index
    %c0_94 = arith.constant 0 : index
    %626 = vector.load %arg2[%c22, %625, %c0_94] : memref<105x8x128xf32, #tpu.memory_space<vmem>>, vector<1x8x128xf32>
    %627 = vector.shape_cast %626 : vector<1x8x128xf32> to vector<8x128xf32>
    %628 = vector.shape_cast %618 : vector<8x128xf32> to vector<1x8x128xf32>
    tpu.vector_store %arg2[%c22, %625, %c0_94], %628 {strides = array<i32>} : memref<105x8x128xf32, #tpu.memory_space<vmem>>, vector<1x8x128xf32>,
    %c23 = arith.constant 23 : index
    %629 = arith.index_cast %3 : i32 to index
    %c0_95 = arith.constant 0 : index
    %630 = vector.load %arg2[%c23, %629, %c0_95] : memref<105x8x128xf32, #tpu.memory_space<vmem>>, vector<1x8x128xf32>
    %631 = vector.shape_cast %630 : vector<1x8x128xf32> to vector<8x128xf32>
    %632 = vector.shape_cast %620 : vector<8x128xf32> to vector<1x8x128xf32>
    tpu.vector_store %arg2[%c23, %629, %c0_95], %632 {strides = array<i32>} : memref<105x8x128xf32, #tpu.memory_space<vmem>>, vector<1x8x128xf32>,
    %633 = arith.mulf %18, %616 : vector<8x128xf32>
    %634 = arith.mulf %21, %618 : vector<8x128xf32>
    %635 = arith.addf %633, %634 : vector<8x128xf32>
    %636 = arith.mulf %24, %620 : vector<8x128xf32>
    %637 = arith.addf %635, %636 : vector<8x128xf32>
    %638 = arith.mulf %27, %616 : vector<8x128xf32>
    %639 = arith.mulf %30, %618 : vector<8x128xf32>
    %640 = arith.addf %638, %639 : vector<8x128xf32>
    %641 = arith.mulf %33, %620 : vector<8x128xf32>
    %642 = arith.addf %640, %641 : vector<8x128xf32>
    %643 = arith.mulf %36, %616 : vector<8x128xf32>
    %644 = arith.mulf %39, %618 : vector<8x128xf32>
    %645 = arith.addf %643, %644 : vector<8x128xf32>
    %646 = arith.mulf %42, %620 : vector<8x128xf32>
    %647 = arith.addf %645, %646 : vector<8x128xf32>
    %648 = tpu.reciprocal %647 {approx = true} : vector<8x128xf32> -> vector<8x128xf32>
    %649 = arith.mulf %647, %648 : vector<8x128xf32>
    %cst_96 = arith.constant 2.000000e+00 : f32
    %650 = vector.broadcast %cst_96 : f32 to vector<8x128xf32>
    %651 = arith.subf %650, %649 : vector<8x128xf32>
    %652 = arith.mulf %648, %651 : vector<8x128xf32>
    %653 = arith.mulf %637, %652 : vector<8x128xf32>
    %c77 = arith.constant 77 : index
    %654 = arith.index_cast %3 : i32 to index
    %c0_97 = arith.constant 0 : index
    %655 = vector.load %arg2[%c77, %654, %c0_97] : memref<105x8x128xf32, #tpu.memory_space<vmem>>, vector<1x8x128xf32>
    %656 = vector.shape_cast %655 : vector<1x8x128xf32> to vector<8x128xf32>
    %657 = vector.shape_cast %653 : vector<8x128xf32> to vector<1x8x128xf32>
    tpu.vector_store %arg2[%c77, %654, %c0_97], %657 {strides = array<i32>} : memref<105x8x128xf32, #tpu.memory_space<vmem>>, vector<1x8x128xf32>,
    %658 = arith.mulf %642, %652 : vector<8x128xf32>
    %c78 = arith.constant 78 : index
    %659 = arith.index_cast %3 : i32 to index
    %c0_98 = arith.constant 0 : index
    %660 = vector.load %arg2[%c78, %659, %c0_98] : memref<105x8x128xf32, #tpu.memory_space<vmem>>, vector<1x8x128xf32>
    %661 = vector.shape_cast %660 : vector<1x8x128xf32> to vector<8x128xf32>
    %662 = vector.shape_cast %658 : vector<8x128xf32> to vector<1x8x128xf32>
    tpu.vector_store %arg2[%c78, %659, %c0_98], %662 {strides = array<i32>} : memref<105x8x128xf32, #tpu.memory_space<vmem>>, vector<1x8x128xf32>,
    %c13_99 = arith.constant 13 : index
    %663 = arith.index_cast %3 : i32 to index
    %c0_100 = arith.constant 0 : index
    %664 = vector.load %arg1[%c13_99, %663, %c0_100] : memref<59x8x128xf32, #tpu.memory_space<vmem>>, vector<1x8x128xf32>
    %665 = vector.shape_cast %664 : vector<1x8x128xf32> to vector<8x128xf32>
    %666 = math.sin %665 : vector<8x128xf32>
    %667 = math.cos %665 : vector<8x128xf32>
    %668 = arith.mulf %604, %667 : vector<8x128xf32>
    %669 = arith.mulf %595, %666 : vector<8x128xf32>
    %670 = arith.subf %668, %669 : vector<8x128xf32>
    %671 = arith.mulf %607, %667 : vector<8x128xf32>
    %672 = arith.mulf %598, %666 : vector<8x128xf32>
    %673 = arith.subf %671, %672 : vector<8x128xf32>
    %674 = arith.mulf %610, %667 : vector<8x128xf32>
    %675 = arith.mulf %601, %666 : vector<8x128xf32>
    %676 = arith.subf %674, %675 : vector<8x128xf32>
    %c32 = arith.constant 32 : index
    %677 = arith.index_cast %3 : i32 to index
    %c0_101 = arith.constant 0 : index
    %678 = vector.load %arg1[%c32, %677, %c0_101] : memref<59x8x128xf32, #tpu.memory_space<vmem>>, vector<1x8x128xf32>
    %679 = vector.shape_cast %678 : vector<1x8x128xf32> to vector<8x128xf32>
    %680 = arith.mulf %679, %6 : vector<8x128xf32>
    %681 = arith.mulf %680, %670 : vector<8x128xf32>
    %682 = arith.addf %616, %681 : vector<8x128xf32>
    %683 = arith.mulf %680, %673 : vector<8x128xf32>
    %684 = arith.addf %618, %683 : vector<8x128xf32>
    %685 = arith.mulf %680, %676 : vector<8x128xf32>
    %686 = arith.addf %620, %685 : vector<8x128xf32>
    %c18 = arith.constant 18 : index
    %687 = arith.index_cast %3 : i32 to index
    %c0_102 = arith.constant 0 : index
    %688 = vector.load %arg2[%c18, %687, %c0_102] : memref<105x8x128xf32, #tpu.memory_space<vmem>>, vector<1x8x128xf32>
    %689 = vector.shape_cast %688 : vector<1x8x128xf32> to vector<8x128xf32>
    %690 = vector.shape_cast %682 : vector<8x128xf32> to vector<1x8x128xf32>
    tpu.vector_store %arg2[%c18, %687, %c0_102], %690 {strides = array<i32>} : memref<105x8x128xf32, #tpu.memory_space<vmem>>, vector<1x8x128xf32>,
    %c19 = arith.constant 19 : index
    %691 = arith.index_cast %3 : i32 to index
    %c0_103 = arith.constant 0 : index
    %692 = vector.load %arg2[%c19, %691, %c0_103] : memref<105x8x128xf32, #tpu.memory_space<vmem>>, vector<1x8x128xf32>
    %693 = vector.shape_cast %692 : vector<1x8x128xf32> to vector<8x128xf32>
    %694 = vector.shape_cast %684 : vector<8x128xf32> to vector<1x8x128xf32>
    tpu.vector_store %arg2[%c19, %691, %c0_103], %694 {strides = array<i32>} : memref<105x8x128xf32, #tpu.memory_space<vmem>>, vector<1x8x128xf32>,
    %c20 = arith.constant 20 : index
    %695 = arith.index_cast %3 : i32 to index
    %c0_104 = arith.constant 0 : index
    %696 = vector.load %arg2[%c20, %695, %c0_104] : memref<105x8x128xf32, #tpu.memory_space<vmem>>, vector<1x8x128xf32>
    %697 = vector.shape_cast %696 : vector<1x8x128xf32> to vector<8x128xf32>
    %698 = vector.shape_cast %686 : vector<8x128xf32> to vector<1x8x128xf32>
    tpu.vector_store %arg2[%c20, %695, %c0_104], %698 {strides = array<i32>} : memref<105x8x128xf32, #tpu.memory_space<vmem>>, vector<1x8x128xf32>,
    %699 = arith.mulf %18, %682 : vector<8x128xf32>
    %700 = arith.mulf %21, %684 : vector<8x128xf32>
    %701 = arith.addf %699, %700 : vector<8x128xf32>
    %702 = arith.mulf %24, %686 : vector<8x128xf32>
    %703 = arith.addf %701, %702 : vector<8x128xf32>
    %704 = arith.mulf %27, %682 : vector<8x128xf32>
    %705 = arith.mulf %30, %684 : vector<8x128xf32>
    %706 = arith.addf %704, %705 : vector<8x128xf32>
    %707 = arith.mulf %33, %686 : vector<8x128xf32>
    %708 = arith.addf %706, %707 : vector<8x128xf32>
    %709 = arith.mulf %36, %682 : vector<8x128xf32>
    %710 = arith.mulf %39, %684 : vector<8x128xf32>
    %711 = arith.addf %709, %710 : vector<8x128xf32>
    %712 = arith.mulf %42, %686 : vector<8x128xf32>
    %713 = arith.addf %711, %712 : vector<8x128xf32>
    %714 = tpu.reciprocal %713 {approx = true} : vector<8x128xf32> -> vector<8x128xf32>
    %715 = arith.mulf %713, %714 : vector<8x128xf32>
    %cst_105 = arith.constant 2.000000e+00 : f32
    %716 = vector.broadcast %cst_105 : f32 to vector<8x128xf32>
    %717 = arith.subf %716, %715 : vector<8x128xf32>
    %718 = arith.mulf %714, %717 : vector<8x128xf32>
    %719 = arith.mulf %703, %718 : vector<8x128xf32>
    %c75 = arith.constant 75 : index
    %720 = arith.index_cast %3 : i32 to index
    %c0_106 = arith.constant 0 : index
    %721 = vector.load %arg2[%c75, %720, %c0_106] : memref<105x8x128xf32, #tpu.memory_space<vmem>>, vector<1x8x128xf32>
    %722 = vector.shape_cast %721 : vector<1x8x128xf32> to vector<8x128xf32>
    %723 = vector.shape_cast %719 : vector<8x128xf32> to vector<1x8x128xf32>
    tpu.vector_store %arg2[%c75, %720, %c0_106], %723 {strides = array<i32>} : memref<105x8x128xf32, #tpu.memory_space<vmem>>, vector<1x8x128xf32>,
    %724 = arith.mulf %708, %718 : vector<8x128xf32>
    %c76 = arith.constant 76 : index
    %725 = arith.index_cast %3 : i32 to index
    %c0_107 = arith.constant 0 : index
    %726 = vector.load %arg2[%c76, %725, %c0_107] : memref<105x8x128xf32, #tpu.memory_space<vmem>>, vector<1x8x128xf32>
    %727 = vector.shape_cast %726 : vector<1x8x128xf32> to vector<8x128xf32>
    %728 = vector.shape_cast %724 : vector<8x128xf32> to vector<1x8x128xf32>
    tpu.vector_store %arg2[%c76, %725, %c0_107], %728 {strides = array<i32>} : memref<105x8x128xf32, #tpu.memory_space<vmem>>, vector<1x8x128xf32>,
    %c33 = arith.constant 33 : index
    %729 = arith.index_cast %3 : i32 to index
    %c0_108 = arith.constant 0 : index
    %730 = vector.load %arg1[%c33, %729, %c0_108] : memref<59x8x128xf32, #tpu.memory_space<vmem>>, vector<1x8x128xf32>
    %731 = vector.shape_cast %730 : vector<1x8x128xf32> to vector<8x128xf32>
    %732 = arith.mulf %731, %6 : vector<8x128xf32>
    %733 = arith.mulf %732, %670 : vector<8x128xf32>
    %734 = arith.addf %682, %733 : vector<8x128xf32>
    %735 = arith.mulf %732, %673 : vector<8x128xf32>
    %736 = arith.addf %684, %735 : vector<8x128xf32>
    %737 = arith.mulf %732, %676 : vector<8x128xf32>
    %738 = arith.addf %686, %737 : vector<8x128xf32>
    %c15 = arith.constant 15 : index
    %739 = arith.index_cast %3 : i32 to index
    %c0_109 = arith.constant 0 : index
    %740 = vector.load %arg2[%c15, %739, %c0_109] : memref<105x8x128xf32, #tpu.memory_space<vmem>>, vector<1x8x128xf32>
    %741 = vector.shape_cast %740 : vector<1x8x128xf32> to vector<8x128xf32>
    %742 = vector.shape_cast %734 : vector<8x128xf32> to vector<1x8x128xf32>
    tpu.vector_store %arg2[%c15, %739, %c0_109], %742 {strides = array<i32>} : memref<105x8x128xf32, #tpu.memory_space<vmem>>, vector<1x8x128xf32>,
    %c16 = arith.constant 16 : index
    %743 = arith.index_cast %3 : i32 to index
    %c0_110 = arith.constant 0 : index
    %744 = vector.load %arg2[%c16, %743, %c0_110] : memref<105x8x128xf32, #tpu.memory_space<vmem>>, vector<1x8x128xf32>
    %745 = vector.shape_cast %744 : vector<1x8x128xf32> to vector<8x128xf32>
    %746 = vector.shape_cast %736 : vector<8x128xf32> to vector<1x8x128xf32>
    tpu.vector_store %arg2[%c16, %743, %c0_110], %746 {strides = array<i32>} : memref<105x8x128xf32, #tpu.memory_space<vmem>>, vector<1x8x128xf32>,
    %c17 = arith.constant 17 : index
    %747 = arith.index_cast %3 : i32 to index
    %c0_111 = arith.constant 0 : index
    %748 = vector.load %arg2[%c17, %747, %c0_111] : memref<105x8x128xf32, #tpu.memory_space<vmem>>, vector<1x8x128xf32>
    %749 = vector.shape_cast %748 : vector<1x8x128xf32> to vector<8x128xf32>
    %750 = vector.shape_cast %738 : vector<8x128xf32> to vector<1x8x128xf32>
    tpu.vector_store %arg2[%c17, %747, %c0_111], %750 {strides = array<i32>} : memref<105x8x128xf32, #tpu.memory_space<vmem>>, vector<1x8x128xf32>,
    %751 = arith.mulf %18, %734 : vector<8x128xf32>
    %752 = arith.mulf %21, %736 : vector<8x128xf32>
    %753 = arith.addf %751, %752 : vector<8x128xf32>
    %754 = arith.mulf %24, %738 : vector<8x128xf32>
    %755 = arith.addf %753, %754 : vector<8x128xf32>
    %756 = arith.mulf %27, %734 : vector<8x128xf32>
    %757 = arith.mulf %30, %736 : vector<8x128xf32>
    %758 = arith.addf %756, %757 : vector<8x128xf32>
    %759 = arith.mulf %33, %738 : vector<8x128xf32>
    %760 = arith.addf %758, %759 : vector<8x128xf32>
    %761 = arith.mulf %36, %734 : vector<8x128xf32>
    %762 = arith.mulf %39, %736 : vector<8x128xf32>
    %763 = arith.addf %761, %762 : vector<8x128xf32>
    %764 = arith.mulf %42, %738 : vector<8x128xf32>
    %765 = arith.addf %763, %764 : vector<8x128xf32>
    %766 = tpu.reciprocal %765 {approx = true} : vector<8x128xf32> -> vector<8x128xf32>
    %767 = arith.mulf %765, %766 : vector<8x128xf32>
    %cst_112 = arith.constant 2.000000e+00 : f32
    %768 = vector.broadcast %cst_112 : f32 to vector<8x128xf32>
    %769 = arith.subf %768, %767 : vector<8x128xf32>
    %770 = arith.mulf %766, %769 : vector<8x128xf32>
    %771 = arith.mulf %755, %770 : vector<8x128xf32>
    %c73 = arith.constant 73 : index
    %772 = arith.index_cast %3 : i32 to index
    %c0_113 = arith.constant 0 : index
    %773 = vector.load %arg2[%c73, %772, %c0_113] : memref<105x8x128xf32, #tpu.memory_space<vmem>>, vector<1x8x128xf32>
    %774 = vector.shape_cast %773 : vector<1x8x128xf32> to vector<8x128xf32>
    %775 = vector.shape_cast %771 : vector<8x128xf32> to vector<1x8x128xf32>
    tpu.vector_store %arg2[%c73, %772, %c0_113], %775 {strides = array<i32>} : memref<105x8x128xf32, #tpu.memory_space<vmem>>, vector<1x8x128xf32>,
    %776 = arith.mulf %760, %770 : vector<8x128xf32>
    %c74 = arith.constant 74 : index
    %777 = arith.index_cast %3 : i32 to index
    %c0_114 = arith.constant 0 : index
    %778 = vector.load %arg2[%c74, %777, %c0_114] : memref<105x8x128xf32, #tpu.memory_space<vmem>>, vector<1x8x128xf32>
    %779 = vector.shape_cast %778 : vector<1x8x128xf32> to vector<8x128xf32>
    %780 = vector.shape_cast %776 : vector<8x128xf32> to vector<1x8x128xf32>
    tpu.vector_store %arg2[%c74, %777, %c0_114], %780 {strides = array<i32>} : memref<105x8x128xf32, #tpu.memory_space<vmem>>, vector<1x8x128xf32>,
    %c14_115 = arith.constant 14 : index
    %781 = arith.index_cast %3 : i32 to index
    %c0_116 = arith.constant 0 : index
    %782 = vector.load %arg1[%c14_115, %781, %c0_116] : memref<59x8x128xf32, #tpu.memory_space<vmem>>, vector<1x8x128xf32>
    %783 = vector.shape_cast %782 : vector<1x8x128xf32> to vector<8x128xf32>
    %784 = math.sin %783 : vector<8x128xf32>
    %785 = math.cos %783 : vector<8x128xf32>
    %c15_117 = arith.constant 15 : index
    %786 = arith.index_cast %3 : i32 to index
    %c0_118 = arith.constant 0 : index
    %787 = vector.load %arg1[%c15_117, %786, %c0_118] : memref<59x8x128xf32, #tpu.memory_space<vmem>>, vector<1x8x128xf32>
    %788 = vector.shape_cast %787 : vector<1x8x128xf32> to vector<8x128xf32>
    %789 = math.sin %788 : vector<8x128xf32>
    %790 = math.cos %788 : vector<8x128xf32>
    %791 = arith.mulf %113, %785 : vector<8x128xf32>
    %792 = arith.mulf %96, %784 : vector<8x128xf32>
    %793 = arith.addf %791, %792 : vector<8x128xf32>
    %794 = arith.mulf %119, %785 : vector<8x128xf32>
    %795 = arith.mulf %126, %784 : vector<8x128xf32>
    %796 = arith.addf %794, %795 : vector<8x128xf32>
    %797 = arith.mulf %123, %785 : vector<8x128xf32>
    %798 = arith.mulf %127, %784 : vector<8x128xf32>
    %799 = arith.addf %797, %798 : vector<8x128xf32>
    %cst_119 = arith.constant 0.000000e+00 : f32
    %800 = vector.broadcast %cst_119 : f32 to vector<8x128xf32>
    %801 = arith.subf %800, %784 : vector<8x128xf32>
    %802 = arith.mulf %801, %790 : vector<8x128xf32>
    %803 = arith.mulf %785, %790 : vector<8x128xf32>
    %804 = arith.mulf %100, %789 : vector<8x128xf32>
    %805 = arith.mulf %113, %802 : vector<8x128xf32>
    %806 = arith.addf %804, %805 : vector<8x128xf32>
    %807 = arith.mulf %96, %803 : vector<8x128xf32>
    %808 = arith.addf %806, %807 : vector<8x128xf32>
    %809 = arith.mulf %104, %789 : vector<8x128xf32>
    %810 = arith.mulf %119, %802 : vector<8x128xf32>
    %811 = arith.addf %809, %810 : vector<8x128xf32>
    %812 = arith.mulf %126, %803 : vector<8x128xf32>
    %813 = arith.addf %811, %812 : vector<8x128xf32>
    %814 = arith.mulf %110, %789 : vector<8x128xf32>
    %815 = arith.mulf %123, %802 : vector<8x128xf32>
    %816 = arith.addf %814, %815 : vector<8x128xf32>
    %817 = arith.mulf %127, %803 : vector<8x128xf32>
    %818 = arith.addf %816, %817 : vector<8x128xf32>
    %c34 = arith.constant 34 : index
    %819 = arith.index_cast %3 : i32 to index
    %c0_120 = arith.constant 0 : index
    %820 = vector.load %arg1[%c34, %819, %c0_120] : memref<59x8x128xf32, #tpu.memory_space<vmem>>, vector<1x8x128xf32>
    %821 = vector.shape_cast %820 : vector<1x8x128xf32> to vector<8x128xf32>
    %822 = arith.mulf %821, %6 : vector<8x128xf32>
    %823 = arith.mulf %822, %808 : vector<8x128xf32>
    %824 = arith.addf %9, %823 : vector<8x128xf32>
    %825 = arith.mulf %822, %813 : vector<8x128xf32>
    %826 = arith.addf %12, %825 : vector<8x128xf32>
    %827 = arith.mulf %822, %818 : vector<8x128xf32>
    %828 = arith.addf %15, %827 : vector<8x128xf32>
    %c36 = arith.constant 36 : index
    %829 = arith.index_cast %3 : i32 to index
    %c0_121 = arith.constant 0 : index
    %830 = vector.load %arg2[%c36, %829, %c0_121] : memref<105x8x128xf32, #tpu.memory_space<vmem>>, vector<1x8x128xf32>
    %831 = vector.shape_cast %830 : vector<1x8x128xf32> to vector<8x128xf32>
    %832 = vector.shape_cast %824 : vector<8x128xf32> to vector<1x8x128xf32>
    tpu.vector_store %arg2[%c36, %829, %c0_121], %832 {strides = array<i32>} : memref<105x8x128xf32, #tpu.memory_space<vmem>>, vector<1x8x128xf32>,
    %c37 = arith.constant 37 : index
    %833 = arith.index_cast %3 : i32 to index
    %c0_122 = arith.constant 0 : index
    %834 = vector.load %arg2[%c37, %833, %c0_122] : memref<105x8x128xf32, #tpu.memory_space<vmem>>, vector<1x8x128xf32>
    %835 = vector.shape_cast %834 : vector<1x8x128xf32> to vector<8x128xf32>
    %836 = vector.shape_cast %826 : vector<8x128xf32> to vector<1x8x128xf32>
    tpu.vector_store %arg2[%c37, %833, %c0_122], %836 {strides = array<i32>} : memref<105x8x128xf32, #tpu.memory_space<vmem>>, vector<1x8x128xf32>,
    %c38 = arith.constant 38 : index
    %837 = arith.index_cast %3 : i32 to index
    %c0_123 = arith.constant 0 : index
    %838 = vector.load %arg2[%c38, %837, %c0_123] : memref<105x8x128xf32, #tpu.memory_space<vmem>>, vector<1x8x128xf32>
    %839 = vector.shape_cast %838 : vector<1x8x128xf32> to vector<8x128xf32>
    %840 = vector.shape_cast %828 : vector<8x128xf32> to vector<1x8x128xf32>
    tpu.vector_store %arg2[%c38, %837, %c0_123], %840 {strides = array<i32>} : memref<105x8x128xf32, #tpu.memory_space<vmem>>, vector<1x8x128xf32>,
    %841 = arith.mulf %18, %824 : vector<8x128xf32>
    %842 = arith.mulf %21, %826 : vector<8x128xf32>
    %843 = arith.addf %841, %842 : vector<8x128xf32>
    %844 = arith.mulf %24, %828 : vector<8x128xf32>
    %845 = arith.addf %843, %844 : vector<8x128xf32>
    %846 = arith.mulf %27, %824 : vector<8x128xf32>
    %847 = arith.mulf %30, %826 : vector<8x128xf32>
    %848 = arith.addf %846, %847 : vector<8x128xf32>
    %849 = arith.mulf %33, %828 : vector<8x128xf32>
    %850 = arith.addf %848, %849 : vector<8x128xf32>
    %851 = arith.mulf %36, %824 : vector<8x128xf32>
    %852 = arith.mulf %39, %826 : vector<8x128xf32>
    %853 = arith.addf %851, %852 : vector<8x128xf32>
    %854 = arith.mulf %42, %828 : vector<8x128xf32>
    %855 = arith.addf %853, %854 : vector<8x128xf32>
    %856 = tpu.reciprocal %855 {approx = true} : vector<8x128xf32> -> vector<8x128xf32>
    %857 = arith.mulf %855, %856 : vector<8x128xf32>
    %cst_124 = arith.constant 2.000000e+00 : f32
    %858 = vector.broadcast %cst_124 : f32 to vector<8x128xf32>
    %859 = arith.subf %858, %857 : vector<8x128xf32>
    %860 = arith.mulf %856, %859 : vector<8x128xf32>
    %861 = arith.mulf %845, %860 : vector<8x128xf32>
    %c87 = arith.constant 87 : index
    %862 = arith.index_cast %3 : i32 to index
    %c0_125 = arith.constant 0 : index
    %863 = vector.load %arg2[%c87, %862, %c0_125] : memref<105x8x128xf32, #tpu.memory_space<vmem>>, vector<1x8x128xf32>
    %864 = vector.shape_cast %863 : vector<1x8x128xf32> to vector<8x128xf32>
    %865 = vector.shape_cast %861 : vector<8x128xf32> to vector<1x8x128xf32>
    tpu.vector_store %arg2[%c87, %862, %c0_125], %865 {strides = array<i32>} : memref<105x8x128xf32, #tpu.memory_space<vmem>>, vector<1x8x128xf32>,
    %866 = arith.mulf %850, %860 : vector<8x128xf32>
    %c88 = arith.constant 88 : index
    %867 = arith.index_cast %3 : i32 to index
    %c0_126 = arith.constant 0 : index
    %868 = vector.load %arg2[%c88, %867, %c0_126] : memref<105x8x128xf32, #tpu.memory_space<vmem>>, vector<1x8x128xf32>
    %869 = vector.shape_cast %868 : vector<1x8x128xf32> to vector<8x128xf32>
    %870 = vector.shape_cast %866 : vector<8x128xf32> to vector<1x8x128xf32>
    tpu.vector_store %arg2[%c88, %867, %c0_126], %870 {strides = array<i32>} : memref<105x8x128xf32, #tpu.memory_space<vmem>>, vector<1x8x128xf32>,
    %c16_127 = arith.constant 16 : index
    %871 = arith.index_cast %3 : i32 to index
    %c0_128 = arith.constant 0 : index
    %872 = vector.load %arg1[%c16_127, %871, %c0_128] : memref<59x8x128xf32, #tpu.memory_space<vmem>>, vector<1x8x128xf32>
    %873 = vector.shape_cast %872 : vector<1x8x128xf32> to vector<8x128xf32>
    %874 = math.sin %873 : vector<8x128xf32>
    %875 = math.cos %873 : vector<8x128xf32>
    %876 = arith.mulf %793, %875 : vector<8x128xf32>
    %877 = arith.mulf %808, %874 : vector<8x128xf32>
    %878 = arith.addf %876, %877 : vector<8x128xf32>
    %879 = arith.mulf %796, %875 : vector<8x128xf32>
    %880 = arith.mulf %813, %874 : vector<8x128xf32>
    %881 = arith.addf %879, %880 : vector<8x128xf32>
    %882 = arith.mulf %799, %875 : vector<8x128xf32>
    %883 = arith.mulf %818, %874 : vector<8x128xf32>
    %884 = arith.addf %882, %883 : vector<8x128xf32>
    %885 = arith.mulf %808, %875 : vector<8x128xf32>
    %886 = arith.mulf %793, %874 : vector<8x128xf32>
    %887 = arith.subf %885, %886 : vector<8x128xf32>
    %888 = arith.mulf %813, %875 : vector<8x128xf32>
    %889 = arith.mulf %796, %874 : vector<8x128xf32>
    %890 = arith.subf %888, %889 : vector<8x128xf32>
    %891 = arith.mulf %818, %875 : vector<8x128xf32>
    %892 = arith.mulf %799, %874 : vector<8x128xf32>
    %893 = arith.subf %891, %892 : vector<8x128xf32>
    %c35 = arith.constant 35 : index
    %894 = arith.index_cast %3 : i32 to index
    %c0_129 = arith.constant 0 : index
    %895 = vector.load %arg1[%c35, %894, %c0_129] : memref<59x8x128xf32, #tpu.memory_space<vmem>>, vector<1x8x128xf32>
    %896 = vector.shape_cast %895 : vector<1x8x128xf32> to vector<8x128xf32>
    %897 = arith.mulf %896, %6 : vector<8x128xf32>
    %898 = arith.mulf %897, %887 : vector<8x128xf32>
    %899 = arith.addf %824, %898 : vector<8x128xf32>
    %900 = arith.mulf %897, %890 : vector<8x128xf32>
    %901 = arith.addf %826, %900 : vector<8x128xf32>
    %902 = arith.mulf %897, %893 : vector<8x128xf32>
    %903 = arith.addf %828, %902 : vector<8x128xf32>
    %c33_130 = arith.constant 33 : index
    %904 = arith.index_cast %3 : i32 to index
    %c0_131 = arith.constant 0 : index
    %905 = vector.load %arg2[%c33_130, %904, %c0_131] : memref<105x8x128xf32, #tpu.memory_space<vmem>>, vector<1x8x128xf32>
    %906 = vector.shape_cast %905 : vector<1x8x128xf32> to vector<8x128xf32>
    %907 = vector.shape_cast %899 : vector<8x128xf32> to vector<1x8x128xf32>
    tpu.vector_store %arg2[%c33_130, %904, %c0_131], %907 {strides = array<i32>} : memref<105x8x128xf32, #tpu.memory_space<vmem>>, vector<1x8x128xf32>,
    %c34_132 = arith.constant 34 : index
    %908 = arith.index_cast %3 : i32 to index
    %c0_133 = arith.constant 0 : index
    %909 = vector.load %arg2[%c34_132, %908, %c0_133] : memref<105x8x128xf32, #tpu.memory_space<vmem>>, vector<1x8x128xf32>
    %910 = vector.shape_cast %909 : vector<1x8x128xf32> to vector<8x128xf32>
    %911 = vector.shape_cast %901 : vector<8x128xf32> to vector<1x8x128xf32>
    tpu.vector_store %arg2[%c34_132, %908, %c0_133], %911 {strides = array<i32>} : memref<105x8x128xf32, #tpu.memory_space<vmem>>, vector<1x8x128xf32>,
    %c35_134 = arith.constant 35 : index
    %912 = arith.index_cast %3 : i32 to index
    %c0_135 = arith.constant 0 : index
    %913 = vector.load %arg2[%c35_134, %912, %c0_135] : memref<105x8x128xf32, #tpu.memory_space<vmem>>, vector<1x8x128xf32>
    %914 = vector.shape_cast %913 : vector<1x8x128xf32> to vector<8x128xf32>
    %915 = vector.shape_cast %903 : vector<8x128xf32> to vector<1x8x128xf32>
    tpu.vector_store %arg2[%c35_134, %912, %c0_135], %915 {strides = array<i32>} : memref<105x8x128xf32, #tpu.memory_space<vmem>>, vector<1x8x128xf32>,
    %916 = arith.mulf %18, %899 : vector<8x128xf32>
    %917 = arith.mulf %21, %901 : vector<8x128xf32>
    %918 = arith.addf %916, %917 : vector<8x128xf32>
    %919 = arith.mulf %24, %903 : vector<8x128xf32>
    %920 = arith.addf %918, %919 : vector<8x128xf32>
    %921 = arith.mulf %27, %899 : vector<8x128xf32>
    %922 = arith.mulf %30, %901 : vector<8x128xf32>
    %923 = arith.addf %921, %922 : vector<8x128xf32>
    %924 = arith.mulf %33, %903 : vector<8x128xf32>
    %925 = arith.addf %923, %924 : vector<8x128xf32>
    %926 = arith.mulf %36, %899 : vector<8x128xf32>
    %927 = arith.mulf %39, %901 : vector<8x128xf32>
    %928 = arith.addf %926, %927 : vector<8x128xf32>
    %929 = arith.mulf %42, %903 : vector<8x128xf32>
    %930 = arith.addf %928, %929 : vector<8x128xf32>
    %931 = tpu.reciprocal %930 {approx = true} : vector<8x128xf32> -> vector<8x128xf32>
    %932 = arith.mulf %930, %931 : vector<8x128xf32>
    %cst_136 = arith.constant 2.000000e+00 : f32
    %933 = vector.broadcast %cst_136 : f32 to vector<8x128xf32>
    %934 = arith.subf %933, %932 : vector<8x128xf32>
    %935 = arith.mulf %931, %934 : vector<8x128xf32>
    %936 = arith.mulf %920, %935 : vector<8x128xf32>
    %c85 = arith.constant 85 : index
    %937 = arith.index_cast %3 : i32 to index
    %c0_137 = arith.constant 0 : index
    %938 = vector.load %arg2[%c85, %937, %c0_137] : memref<105x8x128xf32, #tpu.memory_space<vmem>>, vector<1x8x128xf32>
    %939 = vector.shape_cast %938 : vector<1x8x128xf32> to vector<8x128xf32>
    %940 = vector.shape_cast %936 : vector<8x128xf32> to vector<1x8x128xf32>
    tpu.vector_store %arg2[%c85, %937, %c0_137], %940 {strides = array<i32>} : memref<105x8x128xf32, #tpu.memory_space<vmem>>, vector<1x8x128xf32>,
    %941 = arith.mulf %925, %935 : vector<8x128xf32>
    %c86 = arith.constant 86 : index
    %942 = arith.index_cast %3 : i32 to index
    %c0_138 = arith.constant 0 : index
    %943 = vector.load %arg2[%c86, %942, %c0_138] : memref<105x8x128xf32, #tpu.memory_space<vmem>>, vector<1x8x128xf32>
    %944 = vector.shape_cast %943 : vector<1x8x128xf32> to vector<8x128xf32>
    %945 = vector.shape_cast %941 : vector<8x128xf32> to vector<1x8x128xf32>
    tpu.vector_store %arg2[%c86, %942, %c0_138], %945 {strides = array<i32>} : memref<105x8x128xf32, #tpu.memory_space<vmem>>, vector<1x8x128xf32>,
    %c17_139 = arith.constant 17 : index
    %946 = arith.index_cast %3 : i32 to index
    %c0_140 = arith.constant 0 : index
    %947 = vector.load %arg1[%c17_139, %946, %c0_140] : memref<59x8x128xf32, #tpu.memory_space<vmem>>, vector<1x8x128xf32>
    %948 = vector.shape_cast %947 : vector<1x8x128xf32> to vector<8x128xf32>
    %949 = math.sin %948 : vector<8x128xf32>
    %950 = math.cos %948 : vector<8x128xf32>
    %951 = arith.mulf %887, %950 : vector<8x128xf32>
    %952 = arith.mulf %878, %949 : vector<8x128xf32>
    %953 = arith.subf %951, %952 : vector<8x128xf32>
    %954 = arith.mulf %890, %950 : vector<8x128xf32>
    %955 = arith.mulf %881, %949 : vector<8x128xf32>
    %956 = arith.subf %954, %955 : vector<8x128xf32>
    %957 = arith.mulf %893, %950 : vector<8x128xf32>
    %958 = arith.mulf %884, %949 : vector<8x128xf32>
    %959 = arith.subf %957, %958 : vector<8x128xf32>
    %c36_141 = arith.constant 36 : index
    %960 = arith.index_cast %3 : i32 to index
    %c0_142 = arith.constant 0 : index
    %961 = vector.load %arg1[%c36_141, %960, %c0_142] : memref<59x8x128xf32, #tpu.memory_space<vmem>>, vector<1x8x128xf32>
    %962 = vector.shape_cast %961 : vector<1x8x128xf32> to vector<8x128xf32>
    %963 = arith.mulf %962, %6 : vector<8x128xf32>
    %964 = arith.mulf %963, %953 : vector<8x128xf32>
    %965 = arith.addf %899, %964 : vector<8x128xf32>
    %966 = arith.mulf %963, %956 : vector<8x128xf32>
    %967 = arith.addf %901, %966 : vector<8x128xf32>
    %968 = arith.mulf %963, %959 : vector<8x128xf32>
    %969 = arith.addf %903, %968 : vector<8x128xf32>
    %c30_143 = arith.constant 30 : index
    %970 = arith.index_cast %3 : i32 to index
    %c0_144 = arith.constant 0 : index
    %971 = vector.load %arg2[%c30_143, %970, %c0_144] : memref<105x8x128xf32, #tpu.memory_space<vmem>>, vector<1x8x128xf32>
    %972 = vector.shape_cast %971 : vector<1x8x128xf32> to vector<8x128xf32>
    %973 = vector.shape_cast %965 : vector<8x128xf32> to vector<1x8x128xf32>
    tpu.vector_store %arg2[%c30_143, %970, %c0_144], %973 {strides = array<i32>} : memref<105x8x128xf32, #tpu.memory_space<vmem>>, vector<1x8x128xf32>,
    %c31_145 = arith.constant 31 : index
    %974 = arith.index_cast %3 : i32 to index
    %c0_146 = arith.constant 0 : index
    %975 = vector.load %arg2[%c31_145, %974, %c0_146] : memref<105x8x128xf32, #tpu.memory_space<vmem>>, vector<1x8x128xf32>
    %976 = vector.shape_cast %975 : vector<1x8x128xf32> to vector<8x128xf32>
    %977 = vector.shape_cast %967 : vector<8x128xf32> to vector<1x8x128xf32>
    tpu.vector_store %arg2[%c31_145, %974, %c0_146], %977 {strides = array<i32>} : memref<105x8x128xf32, #tpu.memory_space<vmem>>, vector<1x8x128xf32>,
    %c32_147 = arith.constant 32 : index
    %978 = arith.index_cast %3 : i32 to index
    %c0_148 = arith.constant 0 : index
    %979 = vector.load %arg2[%c32_147, %978, %c0_148] : memref<105x8x128xf32, #tpu.memory_space<vmem>>, vector<1x8x128xf32>
    %980 = vector.shape_cast %979 : vector<1x8x128xf32> to vector<8x128xf32>
    %981 = vector.shape_cast %969 : vector<8x128xf32> to vector<1x8x128xf32>
    tpu.vector_store %arg2[%c32_147, %978, %c0_148], %981 {strides = array<i32>} : memref<105x8x128xf32, #tpu.memory_space<vmem>>, vector<1x8x128xf32>,
    %982 = arith.mulf %18, %965 : vector<8x128xf32>
    %983 = arith.mulf %21, %967 : vector<8x128xf32>
    %984 = arith.addf %982, %983 : vector<8x128xf32>
    %985 = arith.mulf %24, %969 : vector<8x128xf32>
    %986 = arith.addf %984, %985 : vector<8x128xf32>
    %987 = arith.mulf %27, %965 : vector<8x128xf32>
    %988 = arith.mulf %30, %967 : vector<8x128xf32>
    %989 = arith.addf %987, %988 : vector<8x128xf32>
    %990 = arith.mulf %33, %969 : vector<8x128xf32>
    %991 = arith.addf %989, %990 : vector<8x128xf32>
    %992 = arith.mulf %36, %965 : vector<8x128xf32>
    %993 = arith.mulf %39, %967 : vector<8x128xf32>
    %994 = arith.addf %992, %993 : vector<8x128xf32>
    %995 = arith.mulf %42, %969 : vector<8x128xf32>
    %996 = arith.addf %994, %995 : vector<8x128xf32>
    %997 = tpu.reciprocal %996 {approx = true} : vector<8x128xf32> -> vector<8x128xf32>
    %998 = arith.mulf %996, %997 : vector<8x128xf32>
    %cst_149 = arith.constant 2.000000e+00 : f32
    %999 = vector.broadcast %cst_149 : f32 to vector<8x128xf32>
    %1000 = arith.subf %999, %998 : vector<8x128xf32>
    %1001 = arith.mulf %997, %1000 : vector<8x128xf32>
    %1002 = arith.mulf %986, %1001 : vector<8x128xf32>
    %c83 = arith.constant 83 : index
    %1003 = arith.index_cast %3 : i32 to index
    %c0_150 = arith.constant 0 : index
    %1004 = vector.load %arg2[%c83, %1003, %c0_150] : memref<105x8x128xf32, #tpu.memory_space<vmem>>, vector<1x8x128xf32>
    %1005 = vector.shape_cast %1004 : vector<1x8x128xf32> to vector<8x128xf32>
    %1006 = vector.shape_cast %1002 : vector<8x128xf32> to vector<1x8x128xf32>
    tpu.vector_store %arg2[%c83, %1003, %c0_150], %1006 {strides = array<i32>} : memref<105x8x128xf32, #tpu.memory_space<vmem>>, vector<1x8x128xf32>,
    %1007 = arith.mulf %991, %1001 : vector<8x128xf32>
    %c84 = arith.constant 84 : index
    %1008 = arith.index_cast %3 : i32 to index
    %c0_151 = arith.constant 0 : index
    %1009 = vector.load %arg2[%c84, %1008, %c0_151] : memref<105x8x128xf32, #tpu.memory_space<vmem>>, vector<1x8x128xf32>
    %1010 = vector.shape_cast %1009 : vector<1x8x128xf32> to vector<8x128xf32>
    %1011 = vector.shape_cast %1007 : vector<8x128xf32> to vector<1x8x128xf32>
    tpu.vector_store %arg2[%c84, %1008, %c0_151], %1011 {strides = array<i32>} : memref<105x8x128xf32, #tpu.memory_space<vmem>>, vector<1x8x128xf32>,
    %c37_152 = arith.constant 37 : index
    %1012 = arith.index_cast %3 : i32 to index
    %c0_153 = arith.constant 0 : index
    %1013 = vector.load %arg1[%c37_152, %1012, %c0_153] : memref<59x8x128xf32, #tpu.memory_space<vmem>>, vector<1x8x128xf32>
    %1014 = vector.shape_cast %1013 : vector<1x8x128xf32> to vector<8x128xf32>
    %1015 = arith.mulf %1014, %6 : vector<8x128xf32>
    %1016 = arith.mulf %1015, %953 : vector<8x128xf32>
    %1017 = arith.addf %965, %1016 : vector<8x128xf32>
    %1018 = arith.mulf %1015, %956 : vector<8x128xf32>
    %1019 = arith.addf %967, %1018 : vector<8x128xf32>
    %1020 = arith.mulf %1015, %959 : vector<8x128xf32>
    %1021 = arith.addf %969, %1020 : vector<8x128xf32>
    %c27_154 = arith.constant 27 : index
    %1022 = arith.index_cast %3 : i32 to index
    %c0_155 = arith.constant 0 : index
    %1023 = vector.load %arg2[%c27_154, %1022, %c0_155] : memref<105x8x128xf32, #tpu.memory_space<vmem>>, vector<1x8x128xf32>
    %1024 = vector.shape_cast %1023 : vector<1x8x128xf32> to vector<8x128xf32>
    %1025 = vector.shape_cast %1017 : vector<8x128xf32> to vector<1x8x128xf32>
    tpu.vector_store %arg2[%c27_154, %1022, %c0_155], %1025 {strides = array<i32>} : memref<105x8x128xf32, #tpu.memory_space<vmem>>, vector<1x8x128xf32>,
    %c28_156 = arith.constant 28 : index
    %1026 = arith.index_cast %3 : i32 to index
    %c0_157 = arith.constant 0 : index
    %1027 = vector.load %arg2[%c28_156, %1026, %c0_157] : memref<105x8x128xf32, #tpu.memory_space<vmem>>, vector<1x8x128xf32>
    %1028 = vector.shape_cast %1027 : vector<1x8x128xf32> to vector<8x128xf32>
    %1029 = vector.shape_cast %1019 : vector<8x128xf32> to vector<1x8x128xf32>
    tpu.vector_store %arg2[%c28_156, %1026, %c0_157], %1029 {strides = array<i32>} : memref<105x8x128xf32, #tpu.memory_space<vmem>>, vector<1x8x128xf32>,
    %c29_158 = arith.constant 29 : index
    %1030 = arith.index_cast %3 : i32 to index
    %c0_159 = arith.constant 0 : index
    %1031 = vector.load %arg2[%c29_158, %1030, %c0_159] : memref<105x8x128xf32, #tpu.memory_space<vmem>>, vector<1x8x128xf32>
    %1032 = vector.shape_cast %1031 : vector<1x8x128xf32> to vector<8x128xf32>
    %1033 = vector.shape_cast %1021 : vector<8x128xf32> to vector<1x8x128xf32>
    tpu.vector_store %arg2[%c29_158, %1030, %c0_159], %1033 {strides = array<i32>} : memref<105x8x128xf32, #tpu.memory_space<vmem>>, vector<1x8x128xf32>,
    %1034 = arith.mulf %18, %1017 : vector<8x128xf32>
    %1035 = arith.mulf %21, %1019 : vector<8x128xf32>
    %1036 = arith.addf %1034, %1035 : vector<8x128xf32>
    %1037 = arith.mulf %24, %1021 : vector<8x128xf32>
    %1038 = arith.addf %1036, %1037 : vector<8x128xf32>
    %1039 = arith.mulf %27, %1017 : vector<8x128xf32>
    %1040 = arith.mulf %30, %1019 : vector<8x128xf32>
    %1041 = arith.addf %1039, %1040 : vector<8x128xf32>
    %1042 = arith.mulf %33, %1021 : vector<8x128xf32>
    %1043 = arith.addf %1041, %1042 : vector<8x128xf32>
    %1044 = arith.mulf %36, %1017 : vector<8x128xf32>
    %1045 = arith.mulf %39, %1019 : vector<8x128xf32>
    %1046 = arith.addf %1044, %1045 : vector<8x128xf32>
    %1047 = arith.mulf %42, %1021 : vector<8x128xf32>
    %1048 = arith.addf %1046, %1047 : vector<8x128xf32>
    %1049 = tpu.reciprocal %1048 {approx = true} : vector<8x128xf32> -> vector<8x128xf32>
    %1050 = arith.mulf %1048, %1049 : vector<8x128xf32>
    %cst_160 = arith.constant 2.000000e+00 : f32
    %1051 = vector.broadcast %cst_160 : f32 to vector<8x128xf32>
    %1052 = arith.subf %1051, %1050 : vector<8x128xf32>
    %1053 = arith.mulf %1049, %1052 : vector<8x128xf32>
    %1054 = arith.mulf %1038, %1053 : vector<8x128xf32>
    %c81 = arith.constant 81 : index
    %1055 = arith.index_cast %3 : i32 to index
    %c0_161 = arith.constant 0 : index
    %1056 = vector.load %arg2[%c81, %1055, %c0_161] : memref<105x8x128xf32, #tpu.memory_space<vmem>>, vector<1x8x128xf32>
    %1057 = vector.shape_cast %1056 : vector<1x8x128xf32> to vector<8x128xf32>
    %1058 = vector.shape_cast %1054 : vector<8x128xf32> to vector<1x8x128xf32>
    tpu.vector_store %arg2[%c81, %1055, %c0_161], %1058 {strides = array<i32>} : memref<105x8x128xf32, #tpu.memory_space<vmem>>, vector<1x8x128xf32>,
    %1059 = arith.mulf %1043, %1053 : vector<8x128xf32>
    %c82 = arith.constant 82 : index
    %1060 = arith.index_cast %3 : i32 to index
    %c0_162 = arith.constant 0 : index
    %1061 = vector.load %arg2[%c82, %1060, %c0_162] : memref<105x8x128xf32, #tpu.memory_space<vmem>>, vector<1x8x128xf32>
    %1062 = vector.shape_cast %1061 : vector<1x8x128xf32> to vector<8x128xf32>
    %1063 = vector.shape_cast %1059 : vector<8x128xf32> to vector<1x8x128xf32>
    tpu.vector_store %arg2[%c82, %1060, %c0_162], %1063 {strides = array<i32>} : memref<105x8x128xf32, #tpu.memory_space<vmem>>, vector<1x8x128xf32>,
    %c18_163 = arith.constant 18 : index
    %1064 = arith.index_cast %3 : i32 to index
    %c0_164 = arith.constant 0 : index
    %1065 = vector.load %arg1[%c18_163, %1064, %c0_164] : memref<59x8x128xf32, #tpu.memory_space<vmem>>, vector<1x8x128xf32>
    %1066 = vector.shape_cast %1065 : vector<1x8x128xf32> to vector<8x128xf32>
    %1067 = math.sin %1066 : vector<8x128xf32>
    %1068 = math.cos %1066 : vector<8x128xf32>
    %c19_165 = arith.constant 19 : index
    %1069 = arith.index_cast %3 : i32 to index
    %c0_166 = arith.constant 0 : index
    %1070 = vector.load %arg1[%c19_165, %1069, %c0_166] : memref<59x8x128xf32, #tpu.memory_space<vmem>>, vector<1x8x128xf32>
    %1071 = vector.shape_cast %1070 : vector<1x8x128xf32> to vector<8x128xf32>
    %1072 = math.sin %1071 : vector<8x128xf32>
    %1073 = math.cos %1071 : vector<8x128xf32>
    %1074 = arith.mulf %113, %1068 : vector<8x128xf32>
    %1075 = arith.mulf %96, %1067 : vector<8x128xf32>
    %1076 = arith.addf %1074, %1075 : vector<8x128xf32>
    %1077 = arith.mulf %119, %1068 : vector<8x128xf32>
    %1078 = arith.mulf %126, %1067 : vector<8x128xf32>
    %1079 = arith.addf %1077, %1078 : vector<8x128xf32>
    %1080 = arith.mulf %123, %1068 : vector<8x128xf32>
    %1081 = arith.mulf %127, %1067 : vector<8x128xf32>
    %1082 = arith.addf %1080, %1081 : vector<8x128xf32>
    %cst_167 = arith.constant 0.000000e+00 : f32
    %1083 = vector.broadcast %cst_167 : f32 to vector<8x128xf32>
    %1084 = arith.subf %1083, %1067 : vector<8x128xf32>
    %1085 = arith.mulf %1084, %1073 : vector<8x128xf32>
    %1086 = arith.mulf %1068, %1073 : vector<8x128xf32>
    %1087 = arith.mulf %100, %1072 : vector<8x128xf32>
    %1088 = arith.mulf %113, %1085 : vector<8x128xf32>
    %1089 = arith.addf %1087, %1088 : vector<8x128xf32>
    %1090 = arith.mulf %96, %1086 : vector<8x128xf32>
    %1091 = arith.addf %1089, %1090 : vector<8x128xf32>
    %1092 = arith.mulf %104, %1072 : vector<8x128xf32>
    %1093 = arith.mulf %119, %1085 : vector<8x128xf32>
    %1094 = arith.addf %1092, %1093 : vector<8x128xf32>
    %1095 = arith.mulf %126, %1086 : vector<8x128xf32>
    %1096 = arith.addf %1094, %1095 : vector<8x128xf32>
    %1097 = arith.mulf %110, %1072 : vector<8x128xf32>
    %1098 = arith.mulf %123, %1085 : vector<8x128xf32>
    %1099 = arith.addf %1097, %1098 : vector<8x128xf32>
    %1100 = arith.mulf %127, %1086 : vector<8x128xf32>
    %1101 = arith.addf %1099, %1100 : vector<8x128xf32>
    %c38_168 = arith.constant 38 : index
    %1102 = arith.index_cast %3 : i32 to index
    %c0_169 = arith.constant 0 : index
    %1103 = vector.load %arg1[%c38_168, %1102, %c0_169] : memref<59x8x128xf32, #tpu.memory_space<vmem>>, vector<1x8x128xf32>
    %1104 = vector.shape_cast %1103 : vector<1x8x128xf32> to vector<8x128xf32>
    %1105 = arith.mulf %1104, %6 : vector<8x128xf32>
    %1106 = arith.mulf %1105, %1091 : vector<8x128xf32>
    %1107 = arith.addf %9, %1106 : vector<8x128xf32>
    %1108 = arith.mulf %1105, %1096 : vector<8x128xf32>
    %1109 = arith.addf %12, %1108 : vector<8x128xf32>
    %1110 = arith.mulf %1105, %1101 : vector<8x128xf32>
    %1111 = arith.addf %15, %1110 : vector<8x128xf32>
    %c48_170 = arith.constant 48 : index
    %1112 = arith.index_cast %3 : i32 to index
    %c0_171 = arith.constant 0 : index
    %1113 = vector.load %arg2[%c48_170, %1112, %c0_171] : memref<105x8x128xf32, #tpu.memory_space<vmem>>, vector<1x8x128xf32>
    %1114 = vector.shape_cast %1113 : vector<1x8x128xf32> to vector<8x128xf32>
    %1115 = vector.shape_cast %1107 : vector<8x128xf32> to vector<1x8x128xf32>
    tpu.vector_store %arg2[%c48_170, %1112, %c0_171], %1115 {strides = array<i32>} : memref<105x8x128xf32, #tpu.memory_space<vmem>>, vector<1x8x128xf32>,
    %c49_172 = arith.constant 49 : index
    %1116 = arith.index_cast %3 : i32 to index
    %c0_173 = arith.constant 0 : index
    %1117 = vector.load %arg2[%c49_172, %1116, %c0_173] : memref<105x8x128xf32, #tpu.memory_space<vmem>>, vector<1x8x128xf32>
    %1118 = vector.shape_cast %1117 : vector<1x8x128xf32> to vector<8x128xf32>
    %1119 = vector.shape_cast %1109 : vector<8x128xf32> to vector<1x8x128xf32>
    tpu.vector_store %arg2[%c49_172, %1116, %c0_173], %1119 {strides = array<i32>} : memref<105x8x128xf32, #tpu.memory_space<vmem>>, vector<1x8x128xf32>,
    %c50_174 = arith.constant 50 : index
    %1120 = arith.index_cast %3 : i32 to index
    %c0_175 = arith.constant 0 : index
    %1121 = vector.load %arg2[%c50_174, %1120, %c0_175] : memref<105x8x128xf32, #tpu.memory_space<vmem>>, vector<1x8x128xf32>
    %1122 = vector.shape_cast %1121 : vector<1x8x128xf32> to vector<8x128xf32>
    %1123 = vector.shape_cast %1111 : vector<8x128xf32> to vector<1x8x128xf32>
    tpu.vector_store %arg2[%c50_174, %1120, %c0_175], %1123 {strides = array<i32>} : memref<105x8x128xf32, #tpu.memory_space<vmem>>, vector<1x8x128xf32>,
    %1124 = arith.mulf %18, %1107 : vector<8x128xf32>
    %1125 = arith.mulf %21, %1109 : vector<8x128xf32>
    %1126 = arith.addf %1124, %1125 : vector<8x128xf32>
    %1127 = arith.mulf %24, %1111 : vector<8x128xf32>
    %1128 = arith.addf %1126, %1127 : vector<8x128xf32>
    %1129 = arith.mulf %27, %1107 : vector<8x128xf32>
    %1130 = arith.mulf %30, %1109 : vector<8x128xf32>
    %1131 = arith.addf %1129, %1130 : vector<8x128xf32>
    %1132 = arith.mulf %33, %1111 : vector<8x128xf32>
    %1133 = arith.addf %1131, %1132 : vector<8x128xf32>
    %1134 = arith.mulf %36, %1107 : vector<8x128xf32>
    %1135 = arith.mulf %39, %1109 : vector<8x128xf32>
    %1136 = arith.addf %1134, %1135 : vector<8x128xf32>
    %1137 = arith.mulf %42, %1111 : vector<8x128xf32>
    %1138 = arith.addf %1136, %1137 : vector<8x128xf32>
    %1139 = tpu.reciprocal %1138 {approx = true} : vector<8x128xf32> -> vector<8x128xf32>
    %1140 = arith.mulf %1138, %1139 : vector<8x128xf32>
    %cst_176 = arith.constant 2.000000e+00 : f32
    %1141 = vector.broadcast %cst_176 : f32 to vector<8x128xf32>
    %1142 = arith.subf %1141, %1140 : vector<8x128xf32>
    %1143 = arith.mulf %1139, %1142 : vector<8x128xf32>
    %1144 = arith.mulf %1128, %1143 : vector<8x128xf32>
    %c95 = arith.constant 95 : index
    %1145 = arith.index_cast %3 : i32 to index
    %c0_177 = arith.constant 0 : index
    %1146 = vector.load %arg2[%c95, %1145, %c0_177] : memref<105x8x128xf32, #tpu.memory_space<vmem>>, vector<1x8x128xf32>
    %1147 = vector.shape_cast %1146 : vector<1x8x128xf32> to vector<8x128xf32>
    %1148 = vector.shape_cast %1144 : vector<8x128xf32> to vector<1x8x128xf32>
    tpu.vector_store %arg2[%c95, %1145, %c0_177], %1148 {strides = array<i32>} : memref<105x8x128xf32, #tpu.memory_space<vmem>>, vector<1x8x128xf32>,
    %1149 = arith.mulf %1133, %1143 : vector<8x128xf32>
    %c96 = arith.constant 96 : index
    %1150 = arith.index_cast %3 : i32 to index
    %c0_178 = arith.constant 0 : index
    %1151 = vector.load %arg2[%c96, %1150, %c0_178] : memref<105x8x128xf32, #tpu.memory_space<vmem>>, vector<1x8x128xf32>
    %1152 = vector.shape_cast %1151 : vector<1x8x128xf32> to vector<8x128xf32>
    %1153 = vector.shape_cast %1149 : vector<8x128xf32> to vector<1x8x128xf32>
    tpu.vector_store %arg2[%c96, %1150, %c0_178], %1153 {strides = array<i32>} : memref<105x8x128xf32, #tpu.memory_space<vmem>>, vector<1x8x128xf32>,
    %c20_179 = arith.constant 20 : index
    %1154 = arith.index_cast %3 : i32 to index
    %c0_180 = arith.constant 0 : index
    %1155 = vector.load %arg1[%c20_179, %1154, %c0_180] : memref<59x8x128xf32, #tpu.memory_space<vmem>>, vector<1x8x128xf32>
    %1156 = vector.shape_cast %1155 : vector<1x8x128xf32> to vector<8x128xf32>
    %1157 = math.sin %1156 : vector<8x128xf32>
    %1158 = math.cos %1156 : vector<8x128xf32>
    %1159 = arith.mulf %1076, %1158 : vector<8x128xf32>
    %1160 = arith.mulf %1091, %1157 : vector<8x128xf32>
    %1161 = arith.addf %1159, %1160 : vector<8x128xf32>
    %1162 = arith.mulf %1079, %1158 : vector<8x128xf32>
    %1163 = arith.mulf %1096, %1157 : vector<8x128xf32>
    %1164 = arith.addf %1162, %1163 : vector<8x128xf32>
    %1165 = arith.mulf %1082, %1158 : vector<8x128xf32>
    %1166 = arith.mulf %1101, %1157 : vector<8x128xf32>
    %1167 = arith.addf %1165, %1166 : vector<8x128xf32>
    %1168 = arith.mulf %1091, %1158 : vector<8x128xf32>
    %1169 = arith.mulf %1076, %1157 : vector<8x128xf32>
    %1170 = arith.subf %1168, %1169 : vector<8x128xf32>
    %1171 = arith.mulf %1096, %1158 : vector<8x128xf32>
    %1172 = arith.mulf %1079, %1157 : vector<8x128xf32>
    %1173 = arith.subf %1171, %1172 : vector<8x128xf32>
    %1174 = arith.mulf %1101, %1158 : vector<8x128xf32>
    %1175 = arith.mulf %1082, %1157 : vector<8x128xf32>
    %1176 = arith.subf %1174, %1175 : vector<8x128xf32>
    %c39 = arith.constant 39 : index
    %1177 = arith.index_cast %3 : i32 to index
    %c0_181 = arith.constant 0 : index
    %1178 = vector.load %arg1[%c39, %1177, %c0_181] : memref<59x8x128xf32, #tpu.memory_space<vmem>>, vector<1x8x128xf32>
    %1179 = vector.shape_cast %1178 : vector<1x8x128xf32> to vector<8x128xf32>
    %1180 = arith.mulf %1179, %6 : vector<8x128xf32>
    %1181 = arith.mulf %1180, %1170 : vector<8x128xf32>
    %1182 = arith.addf %1107, %1181 : vector<8x128xf32>
    %1183 = arith.mulf %1180, %1173 : vector<8x128xf32>
    %1184 = arith.addf %1109, %1183 : vector<8x128xf32>
    %1185 = arith.mulf %1180, %1176 : vector<8x128xf32>
    %1186 = arith.addf %1111, %1185 : vector<8x128xf32>
    %c45 = arith.constant 45 : index
    %1187 = arith.index_cast %3 : i32 to index
    %c0_182 = arith.constant 0 : index
    %1188 = vector.load %arg2[%c45, %1187, %c0_182] : memref<105x8x128xf32, #tpu.memory_space<vmem>>, vector<1x8x128xf32>
    %1189 = vector.shape_cast %1188 : vector<1x8x128xf32> to vector<8x128xf32>
    %1190 = vector.shape_cast %1182 : vector<8x128xf32> to vector<1x8x128xf32>
    tpu.vector_store %arg2[%c45, %1187, %c0_182], %1190 {strides = array<i32>} : memref<105x8x128xf32, #tpu.memory_space<vmem>>, vector<1x8x128xf32>,
    %c46_183 = arith.constant 46 : index
    %1191 = arith.index_cast %3 : i32 to index
    %c0_184 = arith.constant 0 : index
    %1192 = vector.load %arg2[%c46_183, %1191, %c0_184] : memref<105x8x128xf32, #tpu.memory_space<vmem>>, vector<1x8x128xf32>
    %1193 = vector.shape_cast %1192 : vector<1x8x128xf32> to vector<8x128xf32>
    %1194 = vector.shape_cast %1184 : vector<8x128xf32> to vector<1x8x128xf32>
    tpu.vector_store %arg2[%c46_183, %1191, %c0_184], %1194 {strides = array<i32>} : memref<105x8x128xf32, #tpu.memory_space<vmem>>, vector<1x8x128xf32>,
    %c47_185 = arith.constant 47 : index
    %1195 = arith.index_cast %3 : i32 to index
    %c0_186 = arith.constant 0 : index
    %1196 = vector.load %arg2[%c47_185, %1195, %c0_186] : memref<105x8x128xf32, #tpu.memory_space<vmem>>, vector<1x8x128xf32>
    %1197 = vector.shape_cast %1196 : vector<1x8x128xf32> to vector<8x128xf32>
    %1198 = vector.shape_cast %1186 : vector<8x128xf32> to vector<1x8x128xf32>
    tpu.vector_store %arg2[%c47_185, %1195, %c0_186], %1198 {strides = array<i32>} : memref<105x8x128xf32, #tpu.memory_space<vmem>>, vector<1x8x128xf32>,
    %1199 = arith.mulf %18, %1182 : vector<8x128xf32>
    %1200 = arith.mulf %21, %1184 : vector<8x128xf32>
    %1201 = arith.addf %1199, %1200 : vector<8x128xf32>
    %1202 = arith.mulf %24, %1186 : vector<8x128xf32>
    %1203 = arith.addf %1201, %1202 : vector<8x128xf32>
    %1204 = arith.mulf %27, %1182 : vector<8x128xf32>
    %1205 = arith.mulf %30, %1184 : vector<8x128xf32>
    %1206 = arith.addf %1204, %1205 : vector<8x128xf32>
    %1207 = arith.mulf %33, %1186 : vector<8x128xf32>
    %1208 = arith.addf %1206, %1207 : vector<8x128xf32>
    %1209 = arith.mulf %36, %1182 : vector<8x128xf32>
    %1210 = arith.mulf %39, %1184 : vector<8x128xf32>
    %1211 = arith.addf %1209, %1210 : vector<8x128xf32>
    %1212 = arith.mulf %42, %1186 : vector<8x128xf32>
    %1213 = arith.addf %1211, %1212 : vector<8x128xf32>
    %1214 = tpu.reciprocal %1213 {approx = true} : vector<8x128xf32> -> vector<8x128xf32>
    %1215 = arith.mulf %1213, %1214 : vector<8x128xf32>
    %cst_187 = arith.constant 2.000000e+00 : f32
    %1216 = vector.broadcast %cst_187 : f32 to vector<8x128xf32>
    %1217 = arith.subf %1216, %1215 : vector<8x128xf32>
    %1218 = arith.mulf %1214, %1217 : vector<8x128xf32>
    %1219 = arith.mulf %1203, %1218 : vector<8x128xf32>
    %c93 = arith.constant 93 : index
    %1220 = arith.index_cast %3 : i32 to index
    %c0_188 = arith.constant 0 : index
    %1221 = vector.load %arg2[%c93, %1220, %c0_188] : memref<105x8x128xf32, #tpu.memory_space<vmem>>, vector<1x8x128xf32>
    %1222 = vector.shape_cast %1221 : vector<1x8x128xf32> to vector<8x128xf32>
    %1223 = vector.shape_cast %1219 : vector<8x128xf32> to vector<1x8x128xf32>
    tpu.vector_store %arg2[%c93, %1220, %c0_188], %1223 {strides = array<i32>} : memref<105x8x128xf32, #tpu.memory_space<vmem>>, vector<1x8x128xf32>,
    %1224 = arith.mulf %1208, %1218 : vector<8x128xf32>
    %c94 = arith.constant 94 : index
    %1225 = arith.index_cast %3 : i32 to index
    %c0_189 = arith.constant 0 : index
    %1226 = vector.load %arg2[%c94, %1225, %c0_189] : memref<105x8x128xf32, #tpu.memory_space<vmem>>, vector<1x8x128xf32>
    %1227 = vector.shape_cast %1226 : vector<1x8x128xf32> to vector<8x128xf32>
    %1228 = vector.shape_cast %1224 : vector<8x128xf32> to vector<1x8x128xf32>
    tpu.vector_store %arg2[%c94, %1225, %c0_189], %1228 {strides = array<i32>} : memref<105x8x128xf32, #tpu.memory_space<vmem>>, vector<1x8x128xf32>,
    %c21_190 = arith.constant 21 : index
    %1229 = arith.index_cast %3 : i32 to index
    %c0_191 = arith.constant 0 : index
    %1230 = vector.load %arg1[%c21_190, %1229, %c0_191] : memref<59x8x128xf32, #tpu.memory_space<vmem>>, vector<1x8x128xf32>
    %1231 = vector.shape_cast %1230 : vector<1x8x128xf32> to vector<8x128xf32>
    %1232 = math.sin %1231 : vector<8x128xf32>
    %1233 = math.cos %1231 : vector<8x128xf32>
    %1234 = arith.mulf %1170, %1233 : vector<8x128xf32>
    %1235 = arith.mulf %1161, %1232 : vector<8x128xf32>
    %1236 = arith.subf %1234, %1235 : vector<8x128xf32>
    %1237 = arith.mulf %1173, %1233 : vector<8x128xf32>
    %1238 = arith.mulf %1164, %1232 : vector<8x128xf32>
    %1239 = arith.subf %1237, %1238 : vector<8x128xf32>
    %1240 = arith.mulf %1176, %1233 : vector<8x128xf32>
    %1241 = arith.mulf %1167, %1232 : vector<8x128xf32>
    %1242 = arith.subf %1240, %1241 : vector<8x128xf32>
    %c40 = arith.constant 40 : index
    %1243 = arith.index_cast %3 : i32 to index
    %c0_192 = arith.constant 0 : index
    %1244 = vector.load %arg1[%c40, %1243, %c0_192] : memref<59x8x128xf32, #tpu.memory_space<vmem>>, vector<1x8x128xf32>
    %1245 = vector.shape_cast %1244 : vector<1x8x128xf32> to vector<8x128xf32>
    %1246 = arith.mulf %1245, %6 : vector<8x128xf32>
    %1247 = arith.mulf %1246, %1236 : vector<8x128xf32>
    %1248 = arith.addf %1182, %1247 : vector<8x128xf32>
    %1249 = arith.mulf %1246, %1239 : vector<8x128xf32>
    %1250 = arith.addf %1184, %1249 : vector<8x128xf32>
    %1251 = arith.mulf %1246, %1242 : vector<8x128xf32>
    %1252 = arith.addf %1186, %1251 : vector<8x128xf32>
    %c42 = arith.constant 42 : index
    %1253 = arith.index_cast %3 : i32 to index
    %c0_193 = arith.constant 0 : index
    %1254 = vector.load %arg2[%c42, %1253, %c0_193] : memref<105x8x128xf32, #tpu.memory_space<vmem>>, vector<1x8x128xf32>
    %1255 = vector.shape_cast %1254 : vector<1x8x128xf32> to vector<8x128xf32>
    %1256 = vector.shape_cast %1248 : vector<8x128xf32> to vector<1x8x128xf32>
    tpu.vector_store %arg2[%c42, %1253, %c0_193], %1256 {strides = array<i32>} : memref<105x8x128xf32, #tpu.memory_space<vmem>>, vector<1x8x128xf32>,
    %c43 = arith.constant 43 : index
    %1257 = arith.index_cast %3 : i32 to index
    %c0_194 = arith.constant 0 : index
    %1258 = vector.load %arg2[%c43, %1257, %c0_194] : memref<105x8x128xf32, #tpu.memory_space<vmem>>, vector<1x8x128xf32>
    %1259 = vector.shape_cast %1258 : vector<1x8x128xf32> to vector<8x128xf32>
    %1260 = vector.shape_cast %1250 : vector<8x128xf32> to vector<1x8x128xf32>
    tpu.vector_store %arg2[%c43, %1257, %c0_194], %1260 {strides = array<i32>} : memref<105x8x128xf32, #tpu.memory_space<vmem>>, vector<1x8x128xf32>,
    %c44 = arith.constant 44 : index
    %1261 = arith.index_cast %3 : i32 to index
    %c0_195 = arith.constant 0 : index
    %1262 = vector.load %arg2[%c44, %1261, %c0_195] : memref<105x8x128xf32, #tpu.memory_space<vmem>>, vector<1x8x128xf32>
    %1263 = vector.shape_cast %1262 : vector<1x8x128xf32> to vector<8x128xf32>
    %1264 = vector.shape_cast %1252 : vector<8x128xf32> to vector<1x8x128xf32>
    tpu.vector_store %arg2[%c44, %1261, %c0_195], %1264 {strides = array<i32>} : memref<105x8x128xf32, #tpu.memory_space<vmem>>, vector<1x8x128xf32>,
    %1265 = arith.mulf %18, %1248 : vector<8x128xf32>
    %1266 = arith.mulf %21, %1250 : vector<8x128xf32>
    %1267 = arith.addf %1265, %1266 : vector<8x128xf32>
    %1268 = arith.mulf %24, %1252 : vector<8x128xf32>
    %1269 = arith.addf %1267, %1268 : vector<8x128xf32>
    %1270 = arith.mulf %27, %1248 : vector<8x128xf32>
    %1271 = arith.mulf %30, %1250 : vector<8x128xf32>
    %1272 = arith.addf %1270, %1271 : vector<8x128xf32>
    %1273 = arith.mulf %33, %1252 : vector<8x128xf32>
    %1274 = arith.addf %1272, %1273 : vector<8x128xf32>
    %1275 = arith.mulf %36, %1248 : vector<8x128xf32>
    %1276 = arith.mulf %39, %1250 : vector<8x128xf32>
    %1277 = arith.addf %1275, %1276 : vector<8x128xf32>
    %1278 = arith.mulf %42, %1252 : vector<8x128xf32>
    %1279 = arith.addf %1277, %1278 : vector<8x128xf32>
    %1280 = tpu.reciprocal %1279 {approx = true} : vector<8x128xf32> -> vector<8x128xf32>
    %1281 = arith.mulf %1279, %1280 : vector<8x128xf32>
    %cst_196 = arith.constant 2.000000e+00 : f32
    %1282 = vector.broadcast %cst_196 : f32 to vector<8x128xf32>
    %1283 = arith.subf %1282, %1281 : vector<8x128xf32>
    %1284 = arith.mulf %1280, %1283 : vector<8x128xf32>
    %1285 = arith.mulf %1269, %1284 : vector<8x128xf32>
    %c91 = arith.constant 91 : index
    %1286 = arith.index_cast %3 : i32 to index
    %c0_197 = arith.constant 0 : index
    %1287 = vector.load %arg2[%c91, %1286, %c0_197] : memref<105x8x128xf32, #tpu.memory_space<vmem>>, vector<1x8x128xf32>
    %1288 = vector.shape_cast %1287 : vector<1x8x128xf32> to vector<8x128xf32>
    %1289 = vector.shape_cast %1285 : vector<8x128xf32> to vector<1x8x128xf32>
    tpu.vector_store %arg2[%c91, %1286, %c0_197], %1289 {strides = array<i32>} : memref<105x8x128xf32, #tpu.memory_space<vmem>>, vector<1x8x128xf32>,
    %1290 = arith.mulf %1274, %1284 : vector<8x128xf32>
    %c92 = arith.constant 92 : index
    %1291 = arith.index_cast %3 : i32 to index
    %c0_198 = arith.constant 0 : index
    %1292 = vector.load %arg2[%c92, %1291, %c0_198] : memref<105x8x128xf32, #tpu.memory_space<vmem>>, vector<1x8x128xf32>
    %1293 = vector.shape_cast %1292 : vector<1x8x128xf32> to vector<8x128xf32>
    %1294 = vector.shape_cast %1290 : vector<8x128xf32> to vector<1x8x128xf32>
    tpu.vector_store %arg2[%c92, %1291, %c0_198], %1294 {strides = array<i32>} : memref<105x8x128xf32, #tpu.memory_space<vmem>>, vector<1x8x128xf32>,
    %c41 = arith.constant 41 : index
    %1295 = arith.index_cast %3 : i32 to index
    %c0_199 = arith.constant 0 : index
    %1296 = vector.load %arg1[%c41, %1295, %c0_199] : memref<59x8x128xf32, #tpu.memory_space<vmem>>, vector<1x8x128xf32>
    %1297 = vector.shape_cast %1296 : vector<1x8x128xf32> to vector<8x128xf32>
    %1298 = arith.mulf %1297, %6 : vector<8x128xf32>
    %1299 = arith.mulf %1298, %1236 : vector<8x128xf32>
    %1300 = arith.addf %1248, %1299 : vector<8x128xf32>
    %1301 = arith.mulf %1298, %1239 : vector<8x128xf32>
    %1302 = arith.addf %1250, %1301 : vector<8x128xf32>
    %1303 = arith.mulf %1298, %1242 : vector<8x128xf32>
    %1304 = arith.addf %1252, %1303 : vector<8x128xf32>
    %c39_200 = arith.constant 39 : index
    %1305 = arith.index_cast %3 : i32 to index
    %c0_201 = arith.constant 0 : index
    %1306 = vector.load %arg2[%c39_200, %1305, %c0_201] : memref<105x8x128xf32, #tpu.memory_space<vmem>>, vector<1x8x128xf32>
    %1307 = vector.shape_cast %1306 : vector<1x8x128xf32> to vector<8x128xf32>
    %1308 = vector.shape_cast %1300 : vector<8x128xf32> to vector<1x8x128xf32>
    tpu.vector_store %arg2[%c39_200, %1305, %c0_201], %1308 {strides = array<i32>} : memref<105x8x128xf32, #tpu.memory_space<vmem>>, vector<1x8x128xf32>,
    %c40_202 = arith.constant 40 : index
    %1309 = arith.index_cast %3 : i32 to index
    %c0_203 = arith.constant 0 : index
    %1310 = vector.load %arg2[%c40_202, %1309, %c0_203] : memref<105x8x128xf32, #tpu.memory_space<vmem>>, vector<1x8x128xf32>
    %1311 = vector.shape_cast %1310 : vector<1x8x128xf32> to vector<8x128xf32>
    %1312 = vector.shape_cast %1302 : vector<8x128xf32> to vector<1x8x128xf32>
    tpu.vector_store %arg2[%c40_202, %1309, %c0_203], %1312 {strides = array<i32>} : memref<105x8x128xf32, #tpu.memory_space<vmem>>, vector<1x8x128xf32>,
    %c41_204 = arith.constant 41 : index
    %1313 = arith.index_cast %3 : i32 to index
    %c0_205 = arith.constant 0 : index
    %1314 = vector.load %arg2[%c41_204, %1313, %c0_205] : memref<105x8x128xf32, #tpu.memory_space<vmem>>, vector<1x8x128xf32>
    %1315 = vector.shape_cast %1314 : vector<1x8x128xf32> to vector<8x128xf32>
    %1316 = vector.shape_cast %1304 : vector<8x128xf32> to vector<1x8x128xf32>
    tpu.vector_store %arg2[%c41_204, %1313, %c0_205], %1316 {strides = array<i32>} : memref<105x8x128xf32, #tpu.memory_space<vmem>>, vector<1x8x128xf32>,
    %1317 = arith.mulf %18, %1300 : vector<8x128xf32>
    %1318 = arith.mulf %21, %1302 : vector<8x128xf32>
    %1319 = arith.addf %1317, %1318 : vector<8x128xf32>
    %1320 = arith.mulf %24, %1304 : vector<8x128xf32>
    %1321 = arith.addf %1319, %1320 : vector<8x128xf32>
    %1322 = arith.mulf %27, %1300 : vector<8x128xf32>
    %1323 = arith.mulf %30, %1302 : vector<8x128xf32>
    %1324 = arith.addf %1322, %1323 : vector<8x128xf32>
    %1325 = arith.mulf %33, %1304 : vector<8x128xf32>
    %1326 = arith.addf %1324, %1325 : vector<8x128xf32>
    %1327 = arith.mulf %36, %1300 : vector<8x128xf32>
    %1328 = arith.mulf %39, %1302 : vector<8x128xf32>
    %1329 = arith.addf %1327, %1328 : vector<8x128xf32>
    %1330 = arith.mulf %42, %1304 : vector<8x128xf32>
    %1331 = arith.addf %1329, %1330 : vector<8x128xf32>
    %1332 = tpu.reciprocal %1331 {approx = true} : vector<8x128xf32> -> vector<8x128xf32>
    %1333 = arith.mulf %1331, %1332 : vector<8x128xf32>
    %cst_206 = arith.constant 2.000000e+00 : f32
    %1334 = vector.broadcast %cst_206 : f32 to vector<8x128xf32>
    %1335 = arith.subf %1334, %1333 : vector<8x128xf32>
    %1336 = arith.mulf %1332, %1335 : vector<8x128xf32>
    %1337 = arith.mulf %1321, %1336 : vector<8x128xf32>
    %c89 = arith.constant 89 : index
    %1338 = arith.index_cast %3 : i32 to index
    %c0_207 = arith.constant 0 : index
    %1339 = vector.load %arg2[%c89, %1338, %c0_207] : memref<105x8x128xf32, #tpu.memory_space<vmem>>, vector<1x8x128xf32>
    %1340 = vector.shape_cast %1339 : vector<1x8x128xf32> to vector<8x128xf32>
    %1341 = vector.shape_cast %1337 : vector<8x128xf32> to vector<1x8x128xf32>
    tpu.vector_store %arg2[%c89, %1338, %c0_207], %1341 {strides = array<i32>} : memref<105x8x128xf32, #tpu.memory_space<vmem>>, vector<1x8x128xf32>,
    %1342 = arith.mulf %1326, %1336 : vector<8x128xf32>
    %c90 = arith.constant 90 : index
    %1343 = arith.index_cast %3 : i32 to index
    %c0_208 = arith.constant 0 : index
    %1344 = vector.load %arg2[%c90, %1343, %c0_208] : memref<105x8x128xf32, #tpu.memory_space<vmem>>, vector<1x8x128xf32>
    %1345 = vector.shape_cast %1344 : vector<1x8x128xf32> to vector<8x128xf32>
    %1346 = vector.shape_cast %1342 : vector<8x128xf32> to vector<1x8x128xf32>
    tpu.vector_store %arg2[%c90, %1343, %c0_208], %1346 {strides = array<i32>} : memref<105x8x128xf32, #tpu.memory_space<vmem>>, vector<1x8x128xf32>,
    %c22_209 = arith.constant 22 : index
    %1347 = arith.index_cast %3 : i32 to index
    %c0_210 = arith.constant 0 : index
    %1348 = vector.load %arg1[%c22_209, %1347, %c0_210] : memref<59x8x128xf32, #tpu.memory_space<vmem>>, vector<1x8x128xf32>
    %1349 = vector.shape_cast %1348 : vector<1x8x128xf32> to vector<8x128xf32>
    %1350 = math.sin %1349 : vector<8x128xf32>
    %1351 = math.cos %1349 : vector<8x128xf32>
    %c23_211 = arith.constant 23 : index
    %1352 = arith.index_cast %3 : i32 to index
    %c0_212 = arith.constant 0 : index
    %1353 = vector.load %arg1[%c23_211, %1352, %c0_212] : memref<59x8x128xf32, #tpu.memory_space<vmem>>, vector<1x8x128xf32>
    %1354 = vector.shape_cast %1353 : vector<1x8x128xf32> to vector<8x128xf32>
    %1355 = math.sin %1354 : vector<8x128xf32>
    %1356 = math.cos %1354 : vector<8x128xf32>
    %1357 = arith.mulf %113, %1351 : vector<8x128xf32>
    %1358 = arith.mulf %96, %1350 : vector<8x128xf32>
    %1359 = arith.addf %1357, %1358 : vector<8x128xf32>
    %1360 = arith.mulf %119, %1351 : vector<8x128xf32>
    %1361 = arith.mulf %126, %1350 : vector<8x128xf32>
    %1362 = arith.addf %1360, %1361 : vector<8x128xf32>
    %1363 = arith.mulf %123, %1351 : vector<8x128xf32>
    %1364 = arith.mulf %127, %1350 : vector<8x128xf32>
    %1365 = arith.addf %1363, %1364 : vector<8x128xf32>
    %cst_213 = arith.constant 0.000000e+00 : f32
    %1366 = vector.broadcast %cst_213 : f32 to vector<8x128xf32>
    %1367 = arith.subf %1366, %1350 : vector<8x128xf32>
    %1368 = arith.mulf %1367, %1356 : vector<8x128xf32>
    %1369 = arith.mulf %1351, %1356 : vector<8x128xf32>
    %1370 = arith.mulf %100, %1355 : vector<8x128xf32>
    %1371 = arith.mulf %113, %1368 : vector<8x128xf32>
    %1372 = arith.addf %1370, %1371 : vector<8x128xf32>
    %1373 = arith.mulf %96, %1369 : vector<8x128xf32>
    %1374 = arith.addf %1372, %1373 : vector<8x128xf32>
    %1375 = arith.mulf %104, %1355 : vector<8x128xf32>
    %1376 = arith.mulf %119, %1368 : vector<8x128xf32>
    %1377 = arith.addf %1375, %1376 : vector<8x128xf32>
    %1378 = arith.mulf %126, %1369 : vector<8x128xf32>
    %1379 = arith.addf %1377, %1378 : vector<8x128xf32>
    %1380 = arith.mulf %110, %1355 : vector<8x128xf32>
    %1381 = arith.mulf %123, %1368 : vector<8x128xf32>
    %1382 = arith.addf %1380, %1381 : vector<8x128xf32>
    %1383 = arith.mulf %127, %1369 : vector<8x128xf32>
    %1384 = arith.addf %1382, %1383 : vector<8x128xf32>
    %c42_214 = arith.constant 42 : index
    %1385 = arith.index_cast %3 : i32 to index
    %c0_215 = arith.constant 0 : index
    %1386 = vector.load %arg1[%c42_214, %1385, %c0_215] : memref<59x8x128xf32, #tpu.memory_space<vmem>>, vector<1x8x128xf32>
    %1387 = vector.shape_cast %1386 : vector<1x8x128xf32> to vector<8x128xf32>
    %1388 = arith.mulf %1387, %6 : vector<8x128xf32>
    %1389 = arith.mulf %1388, %1374 : vector<8x128xf32>
    %1390 = arith.addf %9, %1389 : vector<8x128xf32>
    %1391 = arith.mulf %1388, %1379 : vector<8x128xf32>
    %1392 = arith.addf %12, %1391 : vector<8x128xf32>
    %1393 = arith.mulf %1388, %1384 : vector<8x128xf32>
    %1394 = arith.addf %15, %1393 : vector<8x128xf32>
    %c60 = arith.constant 60 : index
    %1395 = arith.index_cast %3 : i32 to index
    %c0_216 = arith.constant 0 : index
    %1396 = vector.load %arg2[%c60, %1395, %c0_216] : memref<105x8x128xf32, #tpu.memory_space<vmem>>, vector<1x8x128xf32>
    %1397 = vector.shape_cast %1396 : vector<1x8x128xf32> to vector<8x128xf32>
    %1398 = vector.shape_cast %1390 : vector<8x128xf32> to vector<1x8x128xf32>
    tpu.vector_store %arg2[%c60, %1395, %c0_216], %1398 {strides = array<i32>} : memref<105x8x128xf32, #tpu.memory_space<vmem>>, vector<1x8x128xf32>,
    %c61 = arith.constant 61 : index
    %1399 = arith.index_cast %3 : i32 to index
    %c0_217 = arith.constant 0 : index
    %1400 = vector.load %arg2[%c61, %1399, %c0_217] : memref<105x8x128xf32, #tpu.memory_space<vmem>>, vector<1x8x128xf32>
    %1401 = vector.shape_cast %1400 : vector<1x8x128xf32> to vector<8x128xf32>
    %1402 = vector.shape_cast %1392 : vector<8x128xf32> to vector<1x8x128xf32>
    tpu.vector_store %arg2[%c61, %1399, %c0_217], %1402 {strides = array<i32>} : memref<105x8x128xf32, #tpu.memory_space<vmem>>, vector<1x8x128xf32>,
    %c62 = arith.constant 62 : index
    %1403 = arith.index_cast %3 : i32 to index
    %c0_218 = arith.constant 0 : index
    %1404 = vector.load %arg2[%c62, %1403, %c0_218] : memref<105x8x128xf32, #tpu.memory_space<vmem>>, vector<1x8x128xf32>
    %1405 = vector.shape_cast %1404 : vector<1x8x128xf32> to vector<8x128xf32>
    %1406 = vector.shape_cast %1394 : vector<8x128xf32> to vector<1x8x128xf32>
    tpu.vector_store %arg2[%c62, %1403, %c0_218], %1406 {strides = array<i32>} : memref<105x8x128xf32, #tpu.memory_space<vmem>>, vector<1x8x128xf32>,
    %1407 = arith.mulf %18, %1390 : vector<8x128xf32>
    %1408 = arith.mulf %21, %1392 : vector<8x128xf32>
    %1409 = arith.addf %1407, %1408 : vector<8x128xf32>
    %1410 = arith.mulf %24, %1394 : vector<8x128xf32>
    %1411 = arith.addf %1409, %1410 : vector<8x128xf32>
    %1412 = arith.mulf %27, %1390 : vector<8x128xf32>
    %1413 = arith.mulf %30, %1392 : vector<8x128xf32>
    %1414 = arith.addf %1412, %1413 : vector<8x128xf32>
    %1415 = arith.mulf %33, %1394 : vector<8x128xf32>
    %1416 = arith.addf %1414, %1415 : vector<8x128xf32>
    %1417 = arith.mulf %36, %1390 : vector<8x128xf32>
    %1418 = arith.mulf %39, %1392 : vector<8x128xf32>
    %1419 = arith.addf %1417, %1418 : vector<8x128xf32>
    %1420 = arith.mulf %42, %1394 : vector<8x128xf32>
    %1421 = arith.addf %1419, %1420 : vector<8x128xf32>
    %1422 = tpu.reciprocal %1421 {approx = true} : vector<8x128xf32> -> vector<8x128xf32>
    %1423 = arith.mulf %1421, %1422 : vector<8x128xf32>
    %cst_219 = arith.constant 2.000000e+00 : f32
    %1424 = vector.broadcast %cst_219 : f32 to vector<8x128xf32>
    %1425 = arith.subf %1424, %1423 : vector<8x128xf32>
    %1426 = arith.mulf %1422, %1425 : vector<8x128xf32>
    %1427 = arith.mulf %1411, %1426 : vector<8x128xf32>
    %c103 = arith.constant 103 : index
    %1428 = arith.index_cast %3 : i32 to index
    %c0_220 = arith.constant 0 : index
    %1429 = vector.load %arg2[%c103, %1428, %c0_220] : memref<105x8x128xf32, #tpu.memory_space<vmem>>, vector<1x8x128xf32>
    %1430 = vector.shape_cast %1429 : vector<1x8x128xf32> to vector<8x128xf32>
    %1431 = vector.shape_cast %1427 : vector<8x128xf32> to vector<1x8x128xf32>
    tpu.vector_store %arg2[%c103, %1428, %c0_220], %1431 {strides = array<i32>} : memref<105x8x128xf32, #tpu.memory_space<vmem>>, vector<1x8x128xf32>,
    %1432 = arith.mulf %1416, %1426 : vector<8x128xf32>
    %c104 = arith.constant 104 : index
    %1433 = arith.index_cast %3 : i32 to index
    %c0_221 = arith.constant 0 : index
    %1434 = vector.load %arg2[%c104, %1433, %c0_221] : memref<105x8x128xf32, #tpu.memory_space<vmem>>, vector<1x8x128xf32>
    %1435 = vector.shape_cast %1434 : vector<1x8x128xf32> to vector<8x128xf32>
    %1436 = vector.shape_cast %1432 : vector<8x128xf32> to vector<1x8x128xf32>
    tpu.vector_store %arg2[%c104, %1433, %c0_221], %1436 {strides = array<i32>} : memref<105x8x128xf32, #tpu.memory_space<vmem>>, vector<1x8x128xf32>,
    %c24_222 = arith.constant 24 : index
    %1437 = arith.index_cast %3 : i32 to index
    %c0_223 = arith.constant 0 : index
    %1438 = vector.load %arg1[%c24_222, %1437, %c0_223] : memref<59x8x128xf32, #tpu.memory_space<vmem>>, vector<1x8x128xf32>
    %1439 = vector.shape_cast %1438 : vector<1x8x128xf32> to vector<8x128xf32>
    %1440 = math.sin %1439 : vector<8x128xf32>
    %1441 = math.cos %1439 : vector<8x128xf32>
    %1442 = arith.mulf %1359, %1441 : vector<8x128xf32>
    %1443 = arith.mulf %1374, %1440 : vector<8x128xf32>
    %1444 = arith.addf %1442, %1443 : vector<8x128xf32>
    %1445 = arith.mulf %1362, %1441 : vector<8x128xf32>
    %1446 = arith.mulf %1379, %1440 : vector<8x128xf32>
    %1447 = arith.addf %1445, %1446 : vector<8x128xf32>
    %1448 = arith.mulf %1365, %1441 : vector<8x128xf32>
    %1449 = arith.mulf %1384, %1440 : vector<8x128xf32>
    %1450 = arith.addf %1448, %1449 : vector<8x128xf32>
    %1451 = arith.mulf %1374, %1441 : vector<8x128xf32>
    %1452 = arith.mulf %1359, %1440 : vector<8x128xf32>
    %1453 = arith.subf %1451, %1452 : vector<8x128xf32>
    %1454 = arith.mulf %1379, %1441 : vector<8x128xf32>
    %1455 = arith.mulf %1362, %1440 : vector<8x128xf32>
    %1456 = arith.subf %1454, %1455 : vector<8x128xf32>
    %1457 = arith.mulf %1384, %1441 : vector<8x128xf32>
    %1458 = arith.mulf %1365, %1440 : vector<8x128xf32>
    %1459 = arith.subf %1457, %1458 : vector<8x128xf32>
    %c43_224 = arith.constant 43 : index
    %1460 = arith.index_cast %3 : i32 to index
    %c0_225 = arith.constant 0 : index
    %1461 = vector.load %arg1[%c43_224, %1460, %c0_225] : memref<59x8x128xf32, #tpu.memory_space<vmem>>, vector<1x8x128xf32>
    %1462 = vector.shape_cast %1461 : vector<1x8x128xf32> to vector<8x128xf32>
    %1463 = arith.mulf %1462, %6 : vector<8x128xf32>
    %1464 = arith.mulf %1463, %1453 : vector<8x128xf32>
    %1465 = arith.addf %1390, %1464 : vector<8x128xf32>
    %1466 = arith.mulf %1463, %1456 : vector<8x128xf32>
    %1467 = arith.addf %1392, %1466 : vector<8x128xf32>
    %1468 = arith.mulf %1463, %1459 : vector<8x128xf32>
    %1469 = arith.addf %1394, %1468 : vector<8x128xf32>
    %c57_226 = arith.constant 57 : index
    %1470 = arith.index_cast %3 : i32 to index
    %c0_227 = arith.constant 0 : index
    %1471 = vector.load %arg2[%c57_226, %1470, %c0_227] : memref<105x8x128xf32, #tpu.memory_space<vmem>>, vector<1x8x128xf32>
    %1472 = vector.shape_cast %1471 : vector<1x8x128xf32> to vector<8x128xf32>
    %1473 = vector.shape_cast %1465 : vector<8x128xf32> to vector<1x8x128xf32>
    tpu.vector_store %arg2[%c57_226, %1470, %c0_227], %1473 {strides = array<i32>} : memref<105x8x128xf32, #tpu.memory_space<vmem>>, vector<1x8x128xf32>,
    %c58_228 = arith.constant 58 : index
    %1474 = arith.index_cast %3 : i32 to index
    %c0_229 = arith.constant 0 : index
    %1475 = vector.load %arg2[%c58_228, %1474, %c0_229] : memref<105x8x128xf32, #tpu.memory_space<vmem>>, vector<1x8x128xf32>
    %1476 = vector.shape_cast %1475 : vector<1x8x128xf32> to vector<8x128xf32>
    %1477 = vector.shape_cast %1467 : vector<8x128xf32> to vector<1x8x128xf32>
    tpu.vector_store %arg2[%c58_228, %1474, %c0_229], %1477 {strides = array<i32>} : memref<105x8x128xf32, #tpu.memory_space<vmem>>, vector<1x8x128xf32>,
    %c59 = arith.constant 59 : index
    %1478 = arith.index_cast %3 : i32 to index
    %c0_230 = arith.constant 0 : index
    %1479 = vector.load %arg2[%c59, %1478, %c0_230] : memref<105x8x128xf32, #tpu.memory_space<vmem>>, vector<1x8x128xf32>
    %1480 = vector.shape_cast %1479 : vector<1x8x128xf32> to vector<8x128xf32>
    %1481 = vector.shape_cast %1469 : vector<8x128xf32> to vector<1x8x128xf32>
    tpu.vector_store %arg2[%c59, %1478, %c0_230], %1481 {strides = array<i32>} : memref<105x8x128xf32, #tpu.memory_space<vmem>>, vector<1x8x128xf32>,
    %1482 = arith.mulf %18, %1465 : vector<8x128xf32>
    %1483 = arith.mulf %21, %1467 : vector<8x128xf32>
    %1484 = arith.addf %1482, %1483 : vector<8x128xf32>
    %1485 = arith.mulf %24, %1469 : vector<8x128xf32>
    %1486 = arith.addf %1484, %1485 : vector<8x128xf32>
    %1487 = arith.mulf %27, %1465 : vector<8x128xf32>
    %1488 = arith.mulf %30, %1467 : vector<8x128xf32>
    %1489 = arith.addf %1487, %1488 : vector<8x128xf32>
    %1490 = arith.mulf %33, %1469 : vector<8x128xf32>
    %1491 = arith.addf %1489, %1490 : vector<8x128xf32>
    %1492 = arith.mulf %36, %1465 : vector<8x128xf32>
    %1493 = arith.mulf %39, %1467 : vector<8x128xf32>
    %1494 = arith.addf %1492, %1493 : vector<8x128xf32>
    %1495 = arith.mulf %42, %1469 : vector<8x128xf32>
    %1496 = arith.addf %1494, %1495 : vector<8x128xf32>
    %1497 = tpu.reciprocal %1496 {approx = true} : vector<8x128xf32> -> vector<8x128xf32>
    %1498 = arith.mulf %1496, %1497 : vector<8x128xf32>
    %cst_231 = arith.constant 2.000000e+00 : f32
    %1499 = vector.broadcast %cst_231 : f32 to vector<8x128xf32>
    %1500 = arith.subf %1499, %1498 : vector<8x128xf32>
    %1501 = arith.mulf %1497, %1500 : vector<8x128xf32>
    %1502 = arith.mulf %1486, %1501 : vector<8x128xf32>
    %c101 = arith.constant 101 : index
    %1503 = arith.index_cast %3 : i32 to index
    %c0_232 = arith.constant 0 : index
    %1504 = vector.load %arg2[%c101, %1503, %c0_232] : memref<105x8x128xf32, #tpu.memory_space<vmem>>, vector<1x8x128xf32>
    %1505 = vector.shape_cast %1504 : vector<1x8x128xf32> to vector<8x128xf32>
    %1506 = vector.shape_cast %1502 : vector<8x128xf32> to vector<1x8x128xf32>
    tpu.vector_store %arg2[%c101, %1503, %c0_232], %1506 {strides = array<i32>} : memref<105x8x128xf32, #tpu.memory_space<vmem>>, vector<1x8x128xf32>,
    %1507 = arith.mulf %1491, %1501 : vector<8x128xf32>
    %c102 = arith.constant 102 : index
    %1508 = arith.index_cast %3 : i32 to index
    %c0_233 = arith.constant 0 : index
    %1509 = vector.load %arg2[%c102, %1508, %c0_233] : memref<105x8x128xf32, #tpu.memory_space<vmem>>, vector<1x8x128xf32>
    %1510 = vector.shape_cast %1509 : vector<1x8x128xf32> to vector<8x128xf32>
    %1511 = vector.shape_cast %1507 : vector<8x128xf32> to vector<1x8x128xf32>
    tpu.vector_store %arg2[%c102, %1508, %c0_233], %1511 {strides = array<i32>} : memref<105x8x128xf32, #tpu.memory_space<vmem>>, vector<1x8x128xf32>,
    %c25_234 = arith.constant 25 : index
    %1512 = arith.index_cast %3 : i32 to index
    %c0_235 = arith.constant 0 : index
    %1513 = vector.load %arg1[%c25_234, %1512, %c0_235] : memref<59x8x128xf32, #tpu.memory_space<vmem>>, vector<1x8x128xf32>
    %1514 = vector.shape_cast %1513 : vector<1x8x128xf32> to vector<8x128xf32>
    %1515 = math.sin %1514 : vector<8x128xf32>
    %1516 = math.cos %1514 : vector<8x128xf32>
    %1517 = arith.mulf %1453, %1516 : vector<8x128xf32>
    %1518 = arith.mulf %1444, %1515 : vector<8x128xf32>
    %1519 = arith.subf %1517, %1518 : vector<8x128xf32>
    %1520 = arith.mulf %1456, %1516 : vector<8x128xf32>
    %1521 = arith.mulf %1447, %1515 : vector<8x128xf32>
    %1522 = arith.subf %1520, %1521 : vector<8x128xf32>
    %1523 = arith.mulf %1459, %1516 : vector<8x128xf32>
    %1524 = arith.mulf %1450, %1515 : vector<8x128xf32>
    %1525 = arith.subf %1523, %1524 : vector<8x128xf32>
    %c44_236 = arith.constant 44 : index
    %1526 = arith.index_cast %3 : i32 to index
    %c0_237 = arith.constant 0 : index
    %1527 = vector.load %arg1[%c44_236, %1526, %c0_237] : memref<59x8x128xf32, #tpu.memory_space<vmem>>, vector<1x8x128xf32>
    %1528 = vector.shape_cast %1527 : vector<1x8x128xf32> to vector<8x128xf32>
    %1529 = arith.mulf %1528, %6 : vector<8x128xf32>
    %1530 = arith.mulf %1529, %1519 : vector<8x128xf32>
    %1531 = arith.addf %1465, %1530 : vector<8x128xf32>
    %1532 = arith.mulf %1529, %1522 : vector<8x128xf32>
    %1533 = arith.addf %1467, %1532 : vector<8x128xf32>
    %1534 = arith.mulf %1529, %1525 : vector<8x128xf32>
    %1535 = arith.addf %1469, %1534 : vector<8x128xf32>
    %c54_238 = arith.constant 54 : index
    %1536 = arith.index_cast %3 : i32 to index
    %c0_239 = arith.constant 0 : index
    %1537 = vector.load %arg2[%c54_238, %1536, %c0_239] : memref<105x8x128xf32, #tpu.memory_space<vmem>>, vector<1x8x128xf32>
    %1538 = vector.shape_cast %1537 : vector<1x8x128xf32> to vector<8x128xf32>
    %1539 = vector.shape_cast %1531 : vector<8x128xf32> to vector<1x8x128xf32>
    tpu.vector_store %arg2[%c54_238, %1536, %c0_239], %1539 {strides = array<i32>} : memref<105x8x128xf32, #tpu.memory_space<vmem>>, vector<1x8x128xf32>,
    %c55_240 = arith.constant 55 : index
    %1540 = arith.index_cast %3 : i32 to index
    %c0_241 = arith.constant 0 : index
    %1541 = vector.load %arg2[%c55_240, %1540, %c0_241] : memref<105x8x128xf32, #tpu.memory_space<vmem>>, vector<1x8x128xf32>
    %1542 = vector.shape_cast %1541 : vector<1x8x128xf32> to vector<8x128xf32>
    %1543 = vector.shape_cast %1533 : vector<8x128xf32> to vector<1x8x128xf32>
    tpu.vector_store %arg2[%c55_240, %1540, %c0_241], %1543 {strides = array<i32>} : memref<105x8x128xf32, #tpu.memory_space<vmem>>, vector<1x8x128xf32>,
    %c56_242 = arith.constant 56 : index
    %1544 = arith.index_cast %3 : i32 to index
    %c0_243 = arith.constant 0 : index
    %1545 = vector.load %arg2[%c56_242, %1544, %c0_243] : memref<105x8x128xf32, #tpu.memory_space<vmem>>, vector<1x8x128xf32>
    %1546 = vector.shape_cast %1545 : vector<1x8x128xf32> to vector<8x128xf32>
    %1547 = vector.shape_cast %1535 : vector<8x128xf32> to vector<1x8x128xf32>
    tpu.vector_store %arg2[%c56_242, %1544, %c0_243], %1547 {strides = array<i32>} : memref<105x8x128xf32, #tpu.memory_space<vmem>>, vector<1x8x128xf32>,
    %1548 = arith.mulf %18, %1531 : vector<8x128xf32>
    %1549 = arith.mulf %21, %1533 : vector<8x128xf32>
    %1550 = arith.addf %1548, %1549 : vector<8x128xf32>
    %1551 = arith.mulf %24, %1535 : vector<8x128xf32>
    %1552 = arith.addf %1550, %1551 : vector<8x128xf32>
    %1553 = arith.mulf %27, %1531 : vector<8x128xf32>
    %1554 = arith.mulf %30, %1533 : vector<8x128xf32>
    %1555 = arith.addf %1553, %1554 : vector<8x128xf32>
    %1556 = arith.mulf %33, %1535 : vector<8x128xf32>
    %1557 = arith.addf %1555, %1556 : vector<8x128xf32>
    %1558 = arith.mulf %36, %1531 : vector<8x128xf32>
    %1559 = arith.mulf %39, %1533 : vector<8x128xf32>
    %1560 = arith.addf %1558, %1559 : vector<8x128xf32>
    %1561 = arith.mulf %42, %1535 : vector<8x128xf32>
    %1562 = arith.addf %1560, %1561 : vector<8x128xf32>
    %1563 = tpu.reciprocal %1562 {approx = true} : vector<8x128xf32> -> vector<8x128xf32>
    %1564 = arith.mulf %1562, %1563 : vector<8x128xf32>
    %cst_244 = arith.constant 2.000000e+00 : f32
    %1565 = vector.broadcast %cst_244 : f32 to vector<8x128xf32>
    %1566 = arith.subf %1565, %1564 : vector<8x128xf32>
    %1567 = arith.mulf %1563, %1566 : vector<8x128xf32>
    %1568 = arith.mulf %1552, %1567 : vector<8x128xf32>
    %c99 = arith.constant 99 : index
    %1569 = arith.index_cast %3 : i32 to index
    %c0_245 = arith.constant 0 : index
    %1570 = vector.load %arg2[%c99, %1569, %c0_245] : memref<105x8x128xf32, #tpu.memory_space<vmem>>, vector<1x8x128xf32>
    %1571 = vector.shape_cast %1570 : vector<1x8x128xf32> to vector<8x128xf32>
    %1572 = vector.shape_cast %1568 : vector<8x128xf32> to vector<1x8x128xf32>
    tpu.vector_store %arg2[%c99, %1569, %c0_245], %1572 {strides = array<i32>} : memref<105x8x128xf32, #tpu.memory_space<vmem>>, vector<1x8x128xf32>,
    %1573 = arith.mulf %1557, %1567 : vector<8x128xf32>
    %c100 = arith.constant 100 : index
    %1574 = arith.index_cast %3 : i32 to index
    %c0_246 = arith.constant 0 : index
    %1575 = vector.load %arg2[%c100, %1574, %c0_246] : memref<105x8x128xf32, #tpu.memory_space<vmem>>, vector<1x8x128xf32>
    %1576 = vector.shape_cast %1575 : vector<1x8x128xf32> to vector<8x128xf32>
    %1577 = vector.shape_cast %1573 : vector<8x128xf32> to vector<1x8x128xf32>
    tpu.vector_store %arg2[%c100, %1574, %c0_246], %1577 {strides = array<i32>} : memref<105x8x128xf32, #tpu.memory_space<vmem>>, vector<1x8x128xf32>,
    %c45_247 = arith.constant 45 : index
    %1578 = arith.index_cast %3 : i32 to index
    %c0_248 = arith.constant 0 : index
    %1579 = vector.load %arg1[%c45_247, %1578, %c0_248] : memref<59x8x128xf32, #tpu.memory_space<vmem>>, vector<1x8x128xf32>
    %1580 = vector.shape_cast %1579 : vector<1x8x128xf32> to vector<8x128xf32>
    %1581 = arith.mulf %1580, %6 : vector<8x128xf32>
    %1582 = arith.mulf %1581, %1519 : vector<8x128xf32>
    %1583 = arith.addf %1531, %1582 : vector<8x128xf32>
    %1584 = arith.mulf %1581, %1522 : vector<8x128xf32>
    %1585 = arith.addf %1533, %1584 : vector<8x128xf32>
    %1586 = arith.mulf %1581, %1525 : vector<8x128xf32>
    %1587 = arith.addf %1535, %1586 : vector<8x128xf32>
    %c51_249 = arith.constant 51 : index
    %1588 = arith.index_cast %3 : i32 to index
    %c0_250 = arith.constant 0 : index
    %1589 = vector.load %arg2[%c51_249, %1588, %c0_250] : memref<105x8x128xf32, #tpu.memory_space<vmem>>, vector<1x8x128xf32>
    %1590 = vector.shape_cast %1589 : vector<1x8x128xf32> to vector<8x128xf32>
    %1591 = vector.shape_cast %1583 : vector<8x128xf32> to vector<1x8x128xf32>
    tpu.vector_store %arg2[%c51_249, %1588, %c0_250], %1591 {strides = array<i32>} : memref<105x8x128xf32, #tpu.memory_space<vmem>>, vector<1x8x128xf32>,
    %c52_251 = arith.constant 52 : index
    %1592 = arith.index_cast %3 : i32 to index
    %c0_252 = arith.constant 0 : index
    %1593 = vector.load %arg2[%c52_251, %1592, %c0_252] : memref<105x8x128xf32, #tpu.memory_space<vmem>>, vector<1x8x128xf32>
    %1594 = vector.shape_cast %1593 : vector<1x8x128xf32> to vector<8x128xf32>
    %1595 = vector.shape_cast %1585 : vector<8x128xf32> to vector<1x8x128xf32>
    tpu.vector_store %arg2[%c52_251, %1592, %c0_252], %1595 {strides = array<i32>} : memref<105x8x128xf32, #tpu.memory_space<vmem>>, vector<1x8x128xf32>,
    %c53_253 = arith.constant 53 : index
    %1596 = arith.index_cast %3 : i32 to index
    %c0_254 = arith.constant 0 : index
    %1597 = vector.load %arg2[%c53_253, %1596, %c0_254] : memref<105x8x128xf32, #tpu.memory_space<vmem>>, vector<1x8x128xf32>
    %1598 = vector.shape_cast %1597 : vector<1x8x128xf32> to vector<8x128xf32>
    %1599 = vector.shape_cast %1587 : vector<8x128xf32> to vector<1x8x128xf32>
    tpu.vector_store %arg2[%c53_253, %1596, %c0_254], %1599 {strides = array<i32>} : memref<105x8x128xf32, #tpu.memory_space<vmem>>, vector<1x8x128xf32>,
    %1600 = arith.mulf %18, %1583 : vector<8x128xf32>
    %1601 = arith.mulf %21, %1585 : vector<8x128xf32>
    %1602 = arith.addf %1600, %1601 : vector<8x128xf32>
    %1603 = arith.mulf %24, %1587 : vector<8x128xf32>
    %1604 = arith.addf %1602, %1603 : vector<8x128xf32>
    %1605 = arith.mulf %27, %1583 : vector<8x128xf32>
    %1606 = arith.mulf %30, %1585 : vector<8x128xf32>
    %1607 = arith.addf %1605, %1606 : vector<8x128xf32>
    %1608 = arith.mulf %33, %1587 : vector<8x128xf32>
    %1609 = arith.addf %1607, %1608 : vector<8x128xf32>
    %1610 = arith.mulf %36, %1583 : vector<8x128xf32>
    %1611 = arith.mulf %39, %1585 : vector<8x128xf32>
    %1612 = arith.addf %1610, %1611 : vector<8x128xf32>
    %1613 = arith.mulf %42, %1587 : vector<8x128xf32>
    %1614 = arith.addf %1612, %1613 : vector<8x128xf32>
    %1615 = tpu.reciprocal %1614 {approx = true} : vector<8x128xf32> -> vector<8x128xf32>
    %1616 = arith.mulf %1614, %1615 : vector<8x128xf32>
    %cst_255 = arith.constant 2.000000e+00 : f32
    %1617 = vector.broadcast %cst_255 : f32 to vector<8x128xf32>
    %1618 = arith.subf %1617, %1616 : vector<8x128xf32>
    %1619 = arith.mulf %1615, %1618 : vector<8x128xf32>
    %1620 = arith.mulf %1604, %1619 : vector<8x128xf32>
    %c97 = arith.constant 97 : index
    %1621 = arith.index_cast %3 : i32 to index
    %c0_256 = arith.constant 0 : index
    %1622 = vector.load %arg2[%c97, %1621, %c0_256] : memref<105x8x128xf32, #tpu.memory_space<vmem>>, vector<1x8x128xf32>
    %1623 = vector.shape_cast %1622 : vector<1x8x128xf32> to vector<8x128xf32>
    %1624 = vector.shape_cast %1620 : vector<8x128xf32> to vector<1x8x128xf32>
    tpu.vector_store %arg2[%c97, %1621, %c0_256], %1624 {strides = array<i32>} : memref<105x8x128xf32, #tpu.memory_space<vmem>>, vector<1x8x128xf32>,
    %1625 = arith.mulf %1609, %1619 : vector<8x128xf32>
    %c98 = arith.constant 98 : index
    %1626 = arith.index_cast %3 : i32 to index
    %c0_257 = arith.constant 0 : index
    %1627 = vector.load %arg2[%c98, %1626, %c0_257] : memref<105x8x128xf32, #tpu.memory_space<vmem>>, vector<1x8x128xf32>
    %1628 = vector.shape_cast %1627 : vector<1x8x128xf32> to vector<8x128xf32>
    %1629 = vector.shape_cast %1625 : vector<8x128xf32> to vector<1x8x128xf32>
    tpu.vector_store %arg2[%c98, %1626, %c0_257], %1629 {strides = array<i32>} : memref<105x8x128xf32, #tpu.memory_space<vmem>>, vector<1x8x128xf32>,
    %c1_i32_258 = arith.constant 1 : i32
    return
  }
  func.func @transform_0(%arg0: i32) -> (i32, i32, i32) {
    %c0_i32 = arith.constant 0 : i32
    %c0_i32_0 = arith.constant 0 : i32
    %c0_i32_1 = arith.constant 0 : i32
    return %c0_i32, %arg0, %c0_i32_0 : i32, i32, i32
  }
  func.func @transform_1(%arg0: i32) -> (i32, i32, i32) {
    %c0_i32 = arith.constant 0 : i32
    %c0_i32_0 = arith.constant 0 : i32
    %c0_i32_1 = arith.constant 0 : i32
    return %c0_i32, %arg0, %c0_i32_0 : i32, i32, i32
  }
}

</mosaic_0001>

<bundles_post_ra>
// kernel: tpu_custom_call.1
= control target key start
LH: loop header
LB: loop body
LE: loop exit
PB: predicated region body
PF: predicated region fallthrough
CT: control target
= control target key end

     0   :  { %6 = vsyncpa [#allocation3], 0  ;;  %s11670_s0 = inlined_call_operand.hbm [shape: f32[59,8,128], index: 0, kind: input, shape index: {}]   ;;  %s11671_s1 = inlined_call_operand.hbm [shape: f32[105,8,128], index: 1, kind: output, shape index: {}]  }
   0x1   :  { %7 = vsyncpa [#allocation4], 0  ;;  %s7549_s6 = smov [#allocation2]   ;;  %s7501_s10 = scalar_lea.hbm %s11670_s0, 7552 }
   0x2   :  { %s13_s7 = sshll.u32 %s7549_s6, 4  ;;  %p7502_p0 = scmp.ne.s32.totalorder %s11670_s0, %s7501_s10  ;;  %s14_s7 = int_to_ptr.vmem [resolvable:$true] %s13_s7 }
   0x3   :  { %p7505_p1 = scmp.lt.u32.totalorder %s7501_s10, %s11670_s0 }
   0x5   :  { %p7507_p2 = pnand %p7505_p1, %p7502_p0 }
   0x7   :  { %7510 = shalt.err (!%p7507_p2)
}
   0x8   :  { %s7511_s15 = scalar_lea.vmem %s14_s7, 7552  ;;  %p7516_p4 = scmp.lt.s32.totalorder %s14_s7, %s14_s7 }
   0x9   :  { %p7512_p3 = scmp.ne.s32.totalorder %s14_s7, %s7511_s15  ;;  %p7517_p5 = scmp.lt.s32.totalorder %s7511_s15, %s7511_s15 }
   0xb   :  { %p7518_p6 = por %p7517_p5, %p7516_p4 }
   0xd   :  { %p7519_p7 = pnand %p7518_p6, %p7512_p3 }
   0xf   :  { %7522 = shalt.err (!%p7519_p7)
}
  0x10   :  { %s7550_s16 = smov 128   ;;  %s7551_s17 = smov 8  }
  0x11   :  { %19 = dma.hbm_to_vmem [thread:$0]  %s11670_s0, 7552, %s14_s7, [#allocation3], %s7550_s16, %s7550_s16, %s7551_s17  }
  0x12   :  { %7545 = dma.done.wait [#allocation3], 7552  }
  0x13   :  { %7546 = vsyncadd [#allocation3], 4294959744  ;;  %v28_v0 = vld [vmem:[#allocation2 + $0x178] sm:$0xff]  ;;  %v31_v1 = vld [vmem:[#allocation2 + $0x180] sm:$0xff]  ;;  %v11686_v52 = vmov 683565275  }
  0x14   :  { %v34_v2 = vld [vmem:[#allocation2 + $0x188] sm:$0xff]  ;;  %62 = vst [vmem:[#allocation5] sm:$0xff] %v28_v0  ;;  %65 = vst [vmem:[#allocation5 + $0x8] sm:$0xff] %v31_v1  ;;  %v55_v3 = vld [vmem:[#allocation2 + $0x1c0] sm:$0xff]  ;;  %v11682_v54 = vmov 2475754826  }
  0x15   :  { %68 = vst [vmem:[#allocation5 + $0x10] sm:$0xff] %v34_v2  ;;  %v58_v4 = vld [vmem:[#allocation2 + $0x1c8] sm:$0xff]  ;;  %v61_v5 = vld [vmem:[#allocation2 + $0x1d0] sm:$0xff]  ;;  %v40_v7 = vld [vmem:[#allocation2 + $0x198] sm:$0xff]  ;;  %v79_v8 = vmul.f32 %v55_v3, %v28_v0  ;;  %v11680_v56 = vmov 2131351028  }
  0x16   :  { %v37_v6 = vld [vmem:[#allocation2 + $0x190] sm:$0xff]  ;;  %v80_v9 = vmul.f32 %v58_v4, %v31_v1  ;;  %v82_v10 = vmul.f32 %v61_v5, %v34_v2  ;;  %v46_v11 = vld [vmem:[#allocation2 + $0x1a8] sm:$0xff]  ;;  %v7584_v13 = vld [vmem:[#allocation2] sm:$0xff]  ;;  %v70_v19 = vmul.f32 %v40_v7, %v31_v1  ;;  %v11678_v58 = vmov 2102212464   ;;  %s7558_s0 = smov [#allocation5]  }
  0x17   :  { %v49_v12 = vld [vmem:[#allocation2 + $0x1b0] sm:$0xff]  ;;  %v7586_v15 = vld [vmem:[#allocation2 + $0x8] sm:$0xff]  ;;  %v101_v16 = vand.u32 2147483647, %v7584_v13  ;;  %v104_v17 = vand.u32 2139095040, %v7584_v13  ;;  %v69_v18 = vmul.f32 %v37_v6, %v28_v0  ;;  %v43_v20 = vld [vmem:[#allocation2 + $0x1a0] sm:$0xff]  ;;  %v74_v23 = vmul.f32 %v46_v11, %v28_v0 }
  0x18   :  { %v81_v14 = vadd.f32 %v80_v9, %v79_v8  ;;  %v52_v22 = vld [vmem:[#allocation2 + $0x1b8] sm:$0xff]  ;;  %v75_v24 = vmul.f32 %v49_v12, %v31_v1  ;;  %v7590_v26 = vld [vmem:[#allocation2 + $0x10] sm:$0xff]  ;;  %v308_v28 = vand.u32 2147483647, %v7586_v15  ;;  %v311_v29 = vand.u32 2139095040, %v7586_v15  ;;  %s6780_s20 = sshll.u32 %s7558_s0, 4  ;;  %s6781_s20 = int_to_ptr.vmem [resolvable:$true] %s6780_s20 }
  0x19   :  { %v105_v25 = vshrl.u32 %v104_v17, 23  ;;  %v108_v27 = vand.u32 8388607, %v101_v16  ;;  %v71_v31 = vadd.f32 %v70_v19, %v69_v18  ;;  %v72_v32 = vmul.f32 %v43_v20, %v34_v2  ;;  %s7523_s21 = scalar_lea.vmem %s6781_s20, 13440  ;;  %p7528_p9 = scmp.lt.s32.totalorder %s6781_s20, %s6781_s20 }
  0x1a   :  { %v83_v21 = vadd.f32 %v82_v10, %v81_v14  ;;  %v312_v33 = vshrl.u32 %v311_v29, 23  ;;  %v76_v34 = vadd.f32 %v75_v24, %v74_v23  ;;  %v77_v35 = vmul.f32 %v52_v22, %v34_v2  ;;  %p7524_p8 = scmp.ne.s32.totalorder %s6781_s20, %s7523_s21  ;;  %p7529_p10 = scmp.lt.s32.totalorder %s7523_s21, %s7523_s21 }
  0x1b   :  { %v6954_v30 = vadd.s32 4294967169, %v105_v25  ;;  %v518_v37 = vand.u32 2139095040, %v7590_v26  ;;  %v109_v38 = vor.u32 8388608, %v108_v27  ;;  %v7599_v40 = vand.u32 8388607, %v308_v28 }
  0x1c   :  { %7276 = vrcp.f32 %v83_v21  ;;  %v6962_v39 = vadd.s32 4294967169, %v312_v33  ;;  %v73_v44 = vadd.f32 %v72_v32, %v71_v31  ;;  %v78_v45 = vadd.f32 %v77_v35, %v76_v34  ;;  %p7530_p11 = por %p7529_p10, %p7528_p9 }
  0x1d   :  { %v111_v36 = vadd.s32 1, %v6954_v30  ;;  %v519_v41 = vshrl.u32 %v518_v37, 23  ;;  %v7601_v48 = vshll.u32 %v109_v38, 8  ;;  %v316_v49 = vor.u32 8388608, %v7599_v40 }
  0x1e   :  { %v318_v43 = vadd.s32 1, %v6962_v39  ;;  %v11676_v60 = vmov 920167782   ;;  %v11674_v5 = vmov 1326507024   ;;  %p7531_p12 = pnand %p7530_p11, %p7524_p8 }
  0x1f   :  { %vm112_vm0 = vcmp.gt.s32.totalorder %v111_v36, 0  ;;  %v7604_v50 = vadd.s32 4294967169, %v519_v41  ;;  %v7641_v41 = vshll.u32 %v316_v49, 8 }
  0x20   :  { %v113_v42 = vsel %vm112_vm0, %v111_v36, 0  ;;  %vm319_vm1 = vcmp.gt.s32.totalorder %v318_v43, 0 }
  0x21   :  { %v114_v46 = vshrl.u32 %v113_v42, 5  ;;  %v115_v47 = vand.u32 31, %v113_v42  ;;  %v320_v14 = vsel %vm319_vm1, %v318_v43, 0 }
  0x22   :  { %v7625_v30 = vshrl.u32 %v320_v14, 5  ;;  %v322_v39 = vand.u32 31, %v320_v14 }
  0x23   :  { %v116_v51 = vsub.s32 32, %v115_v47  ;;  %v118_v53 = vshll.u32 %v11686_v52, %v115_v47  ;;  %v121_v55 = vshll.u32 %v11682_v54, %v115_v47  ;;  %v124_v57 = vshll.u32 %v11680_v56, %v115_v47 }
  0x24   :  { %v127_v59 = vshll.u32 %v11678_v58, %v115_v47  ;;  %v130_v61 = vshll.u32 %v11676_v60, %v115_v47  ;;  %vm133_vm2 = vcmp.lt.s32.totalorder %v114_v46, 1  ;;  %vm134_vm3 = vcmp.lt.s32.totalorder %v114_v46, 2 }
  0x25   :  { %v117_v63 = vshrl.u32 %v11686_v52, %v116_v51  ;;  %v119_v0 = vshrl.u32 %v11682_v54, %v116_v51  ;;  %v122_v1 = vshrl.u32 %v11680_v56, %v116_v51  ;;  %v125_v2 = vshrl.u32 %v11678_v58, %v116_v51 }
  0x26   :  { %v7277_v62 = vpop.eup %7276  ;;  %v128_v4 = vshrl.u32 %v11676_v60, %v116_v51  ;;  %v131_v6 = vshrl.u32 %v11674_v5, %v116_v51  ;;  %vm135_vm4 = vcmp.lt.s32.totalorder %v114_v46, 3  ;;  %vm136_vm5 = vcmp.lt.s32.totalorder %v114_v46, 4 }
  0x27   :  { %v85_v3 = vmul.f32 %v7277_v62, %v83_v21  ;;  %v120_v7 = vor.u32 %v119_v0, %v118_v53  ;;  %v123_v8 = vor.u32 %v122_v1, %v121_v55  ;;  %v126_v9 = vor.u32 %v125_v2, %v124_v57 }
  0x28   :  { %v129_v11 = vor.u32 %v128_v4, %v127_v59  ;;  %v132_v12 = vor.u32 %v131_v6, %v130_v61  ;;  %vm340_vm6 = vcmp.lt.s32.totalorder %v7625_v30, 1  ;;  %vm343_vm7 = vcmp.lt.s32.totalorder %v7625_v30, 4 }
  0x29   :  { %v86_v10 = vsub.f32 2.0, %v85_v3  ;;  %v137_v17 = vsel %vm133_vm2, %v117_v63, %v120_v7  ;;  %v138_v18 = vsel %vm136_vm5, %v126_v9, 2102212464  ;;  %v141_v19 = vsel %vm133_vm2, %v120_v7, %v123_v8 }
  0x2a   :  { %v145_v20 = vsel %vm133_vm2, %v123_v8, %v126_v9  ;;  %v139_v22 = vsel %vm135_vm4, %v123_v8, %v138_v18  ;;  %v142_v23 = vsel %vm136_vm5, %v129_v11, 920167782  ;;  %v146_v24 = vsel %vm136_vm5, %v132_v12, 1326507024 }
  0x2b   :  { %v87_v21 = vmul.f32 %v7277_v62, %v86_v10  ;;  %v140_v25 = vsel %vm134_vm3, %v137_v17, %v139_v22  ;;  %v143_v27 = vsel %vm135_vm4, %v126_v9, %v142_v23  ;;  %v147_v29 = vsel %vm135_vm4, %v129_v11, %v146_v24 }
  0x2c   :  { %v144_v33 = vsel %vm134_vm3, %v141_v19, %v143_v27  ;;  %v148_v34 = vsel %vm134_vm3, %v145_v20, %v147_v29  ;;  %v156_v40 = vmul.u32 %v7601_v48, %v140_v25  ;;  %v323_v42 = vsub.s32 32, %v322_v39 }
  0x2d   :  { %v88_v31 = vmul.f32 %v87_v21, %v73_v44  ;;  %v92_v32 = vmul.f32 %v87_v21, %v78_v45  ;;  %v7630_v35 = vmul.u32.u64.low %v7601_v48, %v148_v34  ;;  %v7631_v36 = vmul.u32.u64.high %v7601_v48, %v148_v34, %v7630_v35 }
  0x2e   :  { %v7634_v37 = vmul.u32.u64.low %v7601_v48, %v144_v33  ;;  %v7635_v38 = vmul.u32.u64.high %v7601_v48, %v144_v33, %v7634_v37  ;;  %v325_v43 = vshll.u32 %v11686_v52, %v322_v39  ;;  %v328_v44 = vshll.u32 %v11682_v54, %v322_v39 }
  0x2f   :  { %91 = vst [vmem:[#allocation5 + $0x1f8] sm:$0xff] %v88_v31  ;;  %95 = vst [vmem:[#allocation5 + $0x200] sm:$0xff] %v92_v32  ;;  %v331_v45 = vshll.u32 %v11680_v56, %v322_v39  ;;  %v334_v47 = vshll.u32 %v11678_v58, %v322_v39  ;;  %v525_v48 = vadd.s32 1, %v7604_v50  ;;  %v324_v51 = vshrl.u32 %v11686_v52, %v323_v42 }
  0x30   :  { %vm158_vm8 = vc.u32 %v7631_v36, %v7634_v37  ;;  %v159_v46 = vadd.s32 1, %v7635_v38  ;;  %v326_v49 = vshrl.u32 %v11682_v54, %v323_v42  ;;  %v329_v53 = vshrl.u32 %v11680_v56, %v323_v42 }
  0x31   :  { %v332_v55 = vshrl.u32 %v11678_v58, %v323_v42  ;;  %v335_v59 = vshrl.u32 %v11676_v60, %v323_v42  ;;  %v337_v61 = vshll.u32 %v11676_v60, %v322_v39  ;;  %v338_v62 = vshrl.u32 %v11674_v5, %v323_v42  ;;  %v7694_v39 = vld [vmem:[#allocation2 + $0x18] sm:$0xff] }
  0x32   :  { %v160_v57 = vsel %vm158_vm8, %v159_v46, %v7635_v38  ;;  %v327_v0 = vor.u32 %v326_v49, %v325_v43  ;;  %v330_v1 = vor.u32 %v329_v53, %v328_v44  ;;  %vm341_vm9 = vcmp.lt.s32.totalorder %v7625_v30, 2 }
  0x33   :  { %v161_v63 = vadd.s32 %v160_v57, %v156_v40  ;;  %v333_v50 = vor.u32 %v332_v55, %v331_v45  ;;  %v336_v2 = vor.u32 %v335_v59, %v334_v47  ;;  %v339_v3 = vor.u32 %v338_v62, %v337_v61 }
  0x34   :  { %vm342_vm10 = vcmp.lt.s32.totalorder %v7625_v30, 3  ;;  %v348_v7 = vsel %vm340_vm6, %v327_v0, %v330_v1  ;;  %vm526_vm11 = vcmp.gt.s32.totalorder %v525_v48, 0  ;;  %v344_v12 = vsel %vm340_vm6, %v324_v51, %v327_v0 }
  0x35   :  { %v162_v4 = vadd.s32 536870912, %v161_v63  ;;  %v345_v6 = vsel %vm343_vm7, %v333_v50, 2102212464  ;;  %v349_v8 = vsel %vm343_vm7, %v336_v2, 920167782  ;;  %v352_v9 = vsel %vm340_vm6, %v330_v1, %v333_v50 }
  0x36   :  { %v353_v10 = vsel %vm343_vm7, %v339_v3, 1326507024  ;;  %v350_v14 = vsel %vm342_vm10, %v333_v50, %v349_v8  ;;  %v346_v18 = vsel %vm342_vm10, %v330_v1, %v345_v6  ;;  %v527_v21 = vsel %vm526_vm11, %v525_v48, 0 }
  0x37   :  { %v7671_v11 = vshrl.u32 %v162_v4, 30  ;;  %v354_v17 = vsel %vm342_vm10, %v336_v2, %v353_v10  ;;  %v351_v19 = vsel %vm341_vm9, %v348_v7, %v350_v14  ;;  %v515_v25 = vand.u32 2147483647, %v7590_v26 }
  0x38   :  { %v355_v20 = vsel %vm341_vm9, %v352_v9, %v354_v17  ;;  %v7686_v27 = vmul.u32.u64.low %v7641_v41, %v351_v19  ;;  %v7687_v29 = vmul.u32.u64.high %v7641_v41, %v351_v19, %v7686_v27  ;;  %v529_v31 = vand.u32 31, %v527_v21 }
  0x39   :  { %v164_v22 = vshll.u32 %v7671_v11, 30  ;;  %v7681_v23 = vmul.u32.u64.low %v7641_v41, %v355_v20  ;;  %v7682_v24 = vmul.u32.u64.high %v7641_v41, %v355_v20, %v7681_v23  ;;  %v347_v33 = vsel %vm341_vm9, %v344_v12, %v346_v18 }
  0x3a   :  { %v530_v34 = vsub.s32 32, %v529_v31  ;;  %v522_v38 = vand.u32 8388607, %v515_v25  ;;  %v363_v40 = vmul.u32 %v7641_v41, %v347_v33  ;;  %v366_v42 = vadd.s32 1, %v7687_v29 }
  0x3b   :  { %v165_v32 = vsub.s32 %v161_v63, %v164_v22  ;;  %vm365_vm12 = vc.u32 %v7682_v24, %v7686_v27  ;;  %v532_v30 = vshll.u32 %v11686_v52, %v529_v31  ;;  %v757_v46 = vand.u32 2139095040, %v7694_v39 }
  0x3c   :  { %v367_v44 = vsel %vm365_vm12, %v366_v42, %v7687_v29  ;;  %v533_v45 = vshrl.u32 %v11682_v54, %v530_v34  ;;  %v523_v48 = vor.u32 8388608, %v522_v38  ;;  %v528_v51 = vshrl.u32 %v527_v21, 5 }
  0x3d   :  { %v167_v35 = vsub.s32 0, %v165_v32  ;;  %v368_v49 = vadd.s32 %v367_v44, %v363_v40  ;;  %v535_v41 = vshll.u32 %v11682_v54, %v529_v31  ;;  %v536_v53 = vshrl.u32 %v11680_v56, %v530_v34 }
  0x3e   :  { %v538_v55 = vshll.u32 %v11680_v56, %v529_v31  ;;  %v539_v59 = vshrl.u32 %v11678_v58, %v530_v34  ;;  %v541_v61 = vshll.u32 %v11678_v58, %v529_v31  ;;  %v542_v62 = vshrl.u32 %v11676_v60, %v530_v34 }
  0x3f   :  { %v6955_v43 = vmin.u32 %v167_v35, %v165_v32  ;;  %v157_v63 = vadd.s32 %v7634_v37, %v7631_v36  ;;  %v369_v0 = vadd.s32 536870912, %v368_v49  ;;  %v534_v1 = vor.u32 %v533_v45, %v532_v30 }
  0x40   :  { %v758_v50 = vshrl.u32 %v757_v46, 23  ;;  %v543_v2 = vor.u32 %v542_v62, %v541_v61  ;;  %v544_v3 = vshll.u32 %v11676_v60, %v529_v31  ;;  %v545_v4 = vshrl.u32 %v11674_v5, %v530_v34 }
  0x41   :  { %v169_v47 = vclz %v6955_v43  ;;  %v7714_v7 = vshrl.u32 %v369_v0, 30  ;;  %v537_v8 = vor.u32 %v536_v53, %v535_v41  ;;  %vm550_vm14 = vcmp.lt.s32.totalorder %v528_v51, 4 }
  0x42   :  { %v540_v14 = vor.u32 %v539_v59, %v538_v55  ;;  %vm547_vm15 = vcmp.lt.s32.totalorder %v528_v51, 1  ;;  %vm549_vm0 = vcmp.lt.s32.totalorder %v528_v51, 3  ;;  %v6978_v37 = vadd.s32 4294967169, %v758_v50 }
  0x43   :  { %v6956_v57 = vadd.s32 4294967294, %v169_v47  ;;  %v371_v36 = vshll.u32 %v7714_v7, 30  ;;  %v546_v19 = vor.u32 %v545_v4, %v544_v3  ;;  %v556_v20 = vsel %vm550_vm14, %v543_v2, 920167782 }
  0x44   :  { %v531_v22 = vshrl.u32 %v11686_v52, %v530_v34  ;;  %vm548_vm1 = vcmp.lt.s32.totalorder %v528_v51, 2  ;;  %v555_v31 = vsel %vm547_vm15, %v534_v1, %v537_v8  ;;  %v552_v35 = vsel %vm550_vm14, %v540_v14, 2102212464 }
  0x45   :  { %vm6957_vm13 = vcmp.lt.s32.totalorder %v6956_v57, 0  ;;  %v372_v21 = vsub.s32 %v368_v49, %v371_v36  ;;  %v560_v40 = vsel %vm550_vm14, %v546_v19, 1326507024  ;;  %v563_v42 = vshll.u32 %v523_v48, 8 }
  0x46   :  { %v172_v6 = vsel %vm6957_vm13, 0, %v6956_v57  ;;  %v764_v43 = vadd.s32 1, %v6978_v37  ;;  %v551_v30 = vsel %vm547_vm15, %v531_v22, %v534_v1  ;;  %v559_v45 = vsel %vm547_vm15, %v537_v8, %v540_v14 }
  0x47   :  { %v173_v9 = vsub.s32 32, %v172_v6  ;;  %v174_v10 = vshll.u32 %v165_v32, %v172_v6  ;;  %v177_v12 = vsub.s32 4294967266, %v172_v6  ;;  %v557_v32 = vsel %vm549_vm0, %v540_v14, %v556_v20 }
  0x48   :  { %v374_v33 = vsub.s32 0, %v372_v21  ;;  %v558_v34 = vsel %vm548_vm1, %v555_v31, %v557_v32  ;;  %v553_v49 = vsel %vm549_vm0, %v537_v8, %v552_v35  ;;  %v561_v41 = vsel %vm549_vm0, %v543_v2, %v560_v40 }
  0x49   :  { %v175_v17 = vshrl.u32 %v157_v63, %v173_v9  ;;  %v178_v18 = vadd.s32 127, %v177_v12  ;;  %v562_v55 = vsel %vm548_vm1, %v559_v45, %v561_v41  ;;  %vm765_vm2 = vcmp.gt.s32.totalorder %v764_v43, 0 }
  0x4a   :  { %v6963_v44 = vmin.u32 %v374_v33, %v372_v21  ;;  %v7729_v57 = vmul.u32.u64.low %v563_v42, %v558_v34  ;;  %v7730_v59 = vmul.u32.u64.high %v563_v42, %v558_v34, %v7729_v57  ;;  %v554_v61 = vsel %vm548_vm1, %v551_v30, %v553_v49 }
  0x4b   :  { %v176_v23 = vor.u32 %v175_v17, %v174_v10  ;;  %v179_v29 = vshll.u32 %v178_v18, 23  ;;  %v7734_v62 = vmul.u32.u64.low %v563_v42, %v562_v55  ;;  %v7735_v63 = vmul.u32.u64.high %v563_v42, %v562_v55, %v7734_v62 }
  0x4c   :  { %v376_v53 = vclz %v6963_v44  ;;  %v364_v1 = vadd.s32 %v7686_v27, %v7682_v24  ;;  %v766_v50 = vsel %vm765_vm2, %v764_v43, 0  ;;  %v570_v3 = vmul.u32 %v563_v42, %v554_v61 }
  0x4d   :  { %v180_v38 = vor.u32 4788187, %v179_v29  ;;  %v183_v47 = vcvt.s32.f32 %v176_v23  ;;  %v573_v4 = vadd.s32 1, %v7730_v59  ;;  %v187_v51 = vsub.s32 4, %v7671_v11 }
  0x4e   :  { %v6964_v48 = vadd.s32 4294967294, %v376_v53  ;;  %vm572_vm4 = vc.u32 %v7735_v63, %v7729_v57  ;;  %v768_v12 = vand.u32 31, %v766_v50  ;;  %vm103_vm5 = vcmp.lt.s32.totalorder %v7584_v13, 0 }
  0x4f   :  { %v181_v46 = vand.u32 2147483647, %v180_v38  ;;  %v574_v27 = vsel %vm572_vm4, %v573_v4, %v7730_v59  ;;  %v754_v37 = vand.u32 2147483647, %v7694_v39  ;;  %vm102_vm6 = vcmp.le.f32.partialorder %v101_v16, 0.7853982 }
  0x50   :  { %vm6965_vm3 = vcmp.lt.s32.totalorder %v6964_v48, 0  ;;  %v575_v36 = vadd.s32 %v574_v27, %v570_v3  ;;  %v188_v20 = vsel %vm103_vm5, %v187_v51, %v7671_v11  ;;  %v769_v22 = vsub.s32 32, %v768_v12 }
  0x51   :  { %v184_v0 = vmul.f32 %v183_v47, %v181_v46  ;;  %v379_v2 = vsel %vm6965_vm3, 0, %v6964_v48  ;;  %vm310_vm7 = vcmp.lt.s32.totalorder %v7586_v15, 0  ;;  %v761_v32 = vand.u32 8388607, %v754_v37 }
  0x52   :  { %v380_v6 = vsub.s32 32, %v379_v2  ;;  %v381_v8 = vshll.u32 %v372_v21, %v379_v2  ;;  %v384_v9 = vsub.s32 4294967266, %v379_v2  ;;  %v576_v21 = vadd.s32 536870912, %v575_v36 }
  0x53   :  { %v185_v10 = vxor.u32 2147483648, %v184_v0  ;;  %v190_v35 = vsel %vm102_vm6, 0, %v188_v20  ;;  %v7755_v38 = vshrl.u32 %v766_v50, 5  ;;  %v771_v11 = vshll.u32 %v11686_v52, %v768_v12  ;;  %v7803_v20 = vld [vmem:[#allocation2 + $0x20] sm:$0xff] }
  0x54   :  { %v382_v14 = vshrl.u32 %v364_v1, %v380_v6  ;;  %v385_v24 = vadd.s32 127, %v384_v9  ;;  %v7750_v31 = vshrl.u32 %v576_v21, 30  ;;  %v780_v42 = vshll.u32 %v11678_v58, %v768_v12 }
  0x55   :  { %v186_v19 = vsel %vm103_vm5, %v185_v10, %v184_v0  ;;  %v781_v43 = vshrl.u32 %v11676_v60, %v769_v22  ;;  %v772_v30 = vshrl.u32 %v11682_v54, %v769_v22  ;;  %v774_v34 = vshll.u32 %v11682_v54, %v768_v12 }
  0x56   :  { %v383_v17 = vor.u32 %v382_v14, %v381_v8  ;;  %v386_v18 = vshll.u32 %v385_v24, 23  ;;  %v189_v33 = vsel %vm102_vm6, %v7584_v13, %v186_v19  ;;  %v578_v40 = vshll.u32 %v7750_v31, 30 }
  0x57   :  { %v775_v45 = vshrl.u32 %v11680_v56, %v769_v22  ;;  %v762_v47 = vor.u32 8388608, %v761_v32  ;;  %v777_v49 = vshll.u32 %v11680_v56, %v768_v12  ;;  %v778_v41 = vshrl.u32 %v11678_v58, %v769_v22 }
  0x58   :  { %v387_v23 = vor.u32 4788187, %v386_v18  ;;  %v390_v29 = vcvt.s32.f32 %v383_v17  ;;  %v7764_v46 = vsub.s32 %v575_v36, %v578_v40  ;;  %7278 = vcosq.f32 %v189_v33 }
  0x59   :  { %v194_v53 = vadd.s32 3, %v190_v35  ;;  %v783_v55 = vshll.u32 %v11676_v60, %v768_v12  ;;  %v784_v59 = vshrl.u32 %v11674_v5, %v769_v22  ;;  %7280 = vsinq.f32 %v189_v33 }
  0x5a   :  { %v388_v16 = vand.u32 2147483647, %v387_v23  ;;  %v394_v48 = vsub.s32 4, %v7714_v7  ;;  %v581_v61 = vsub.s32 0, %v7764_v46  ;;  %v782_v62 = vor.u32 %v781_v43, %v780_v42 }
  0x5b   :  { %v773_v1 = vor.u32 %v772_v30, %v771_v11  ;;  %v776_v50 = vor.u32 %v775_v45, %v774_v34  ;;  %vm789_vm8 = vcmp.lt.s32.totalorder %v7755_v38, 4  ;;  %v770_v3 = vshrl.u32 %v11686_v52, %v769_v22 }
  0x5c   :  { %v391_v44 = vmul.f32 %v390_v29, %v388_v16  ;;  %v6971_v2 = vmin.u32 %v581_v61, %v7764_v46  ;;  %v779_v4 = vor.u32 %v778_v41, %v777_v49  ;;  %vm786_vm9 = vcmp.lt.s32.totalorder %v7755_v38, 1 }
  0x5d   :  { %v7776_v6 = vand.u32 3, %v194_v53  ;;  %v7778_v8 = vand.u32 3, %v190_v35  ;;  %vm7782_vm10 = vcmp.le.f32.partialorder %v308_v28, 0.7853982  ;;  %v785_v10 = vor.u32 %v784_v59, %v783_v55 }
  0x5e   :  { %v392_v0 = vxor.u32 2147483648, %v391_v44  ;;  %v583_v51 = vclz %v6971_v2  ;;  %vm788_vm11 = vcmp.lt.s32.totalorder %v7755_v38, 3  ;;  %v791_v12 = vsel %vm789_vm8, %v779_v4, 2102212464 }
  0x5f   :  { %v795_v14 = vsel %vm789_vm8, %v782_v62, 920167782  ;;  %vm787_vm12 = vcmp.lt.s32.totalorder %v7755_v38, 2  ;;  %v794_v28 = vsel %vm786_vm9, %v773_v1, %v776_v50  ;;  %v802_v27 = vshll.u32 %v762_v47, 8 }
  0x60   :  { %v393_v24 = vsel %vm310_vm7, %v392_v0, %v391_v44  ;;  %v395_v36 = vsel %vm310_vm7, %v394_v48, %v7714_v7  ;;  %v571_v17 = vadd.s32 %v7729_v57, %v7735_v63  ;;  %v6972_v18 = vadd.s32 4294967294, %v583_v51 }
  0x61   :  { %v790_v19 = vsel %vm786_vm9, %v770_v3, %v773_v1  ;;  %v792_v21 = vsel %vm788_vm11, %v776_v50, %v791_v12  ;;  %v796_v22 = vsel %vm788_vm11, %v779_v4, %v795_v14  ;;  %v798_v23 = vsel %vm786_vm9, %v776_v50, %v779_v4 }
  0x62   :  { %v799_v7 = vsel %vm789_vm8, %v785_v10, 1326507024  ;;  %vm300_vm13 = vcmp.eq.s32.totalorder %v7778_v8, 0  ;;  %v396_v57 = vsel %vm7782_vm10, %v7586_v15, %v393_v24  ;;  %vm517_vm14 = vcmp.lt.s32.totalorder %v7590_v26, 0  ;;  %v7279_v32 = vpop.eup %7278 }
  0x63   :  { %vm6973_vm15 = vcmp.lt.s32.totalorder %v6972_v18, 0  ;;  %v797_v63 = vsel %vm787_vm12, %v794_v28, %v796_v22  ;;  %v800_v29 = vsel %vm788_vm11, %v782_v62, %v799_v7  ;;  %v7281_v11 = vpop.eup %7280  ;;  %v964_v30 = vand.u32 2139095040, %v7803_v20 }
  0x64   :  { %v586_v33 = vsel %vm6973_vm15, 0, %v6972_v18  ;;  %v801_v35 = vsel %vm787_vm12, %v798_v23, %v800_v29  ;;  %v7824_v16 = vmul.u32.u64.low %v802_v27, %v797_v63  ;;  %v7825_v40 = vmul.u32.u64.high %v802_v27, %v797_v63, %v7824_v16 }
  0x65   :  { %v587_v42 = vsub.s32 32, %v586_v33  ;;  %v588_v43 = vshll.u32 %v7764_v46, %v586_v33  ;;  %v591_v44 = vsub.s32 4294967266, %v586_v33  ;;  %vm299_vm0 = vcmp.lt.s32.totalorder %v7778_v8, 2 }
  0x66   :  { %v397_v34 = vsel %vm7782_vm10, 0, %v395_v36  ;;  %vm7835_vm1 = vcmp.le.f32.partialorder %v515_v25, 0.7853982  ;;  %v793_v47 = vsel %vm787_vm12, %v790_v19, %v792_v21  ;;  %v601_v55 = vsub.s32 4, %v7750_v31 }
  0x67   :  { %v7841_v49 = vmul.u32.u64.low %v802_v27, %v801_v35  ;;  %v7842_v41 = vmul.u32.u64.high %v802_v27, %v801_v35, %v7841_v49  ;;  %v589_v46 = vshrl.u32 %v571_v17, %v587_v42  ;;  %v592_v53 = vadd.s32 127, %v591_v44 }
  0x68   :  { %v965_v59 = vshrl.u32 %v964_v30, 23  ;;  %v198_v48 = vxor.u32 2147483648, %v7281_v11  ;;  %v201_v61 = vxor.u32 2147483648, %v7279_v32  ;;  %7282 = vcosq.f32 %v396_v57 }
  0x69   :  { %v812_v62 = vadd.s32 1, %v7825_v40  ;;  %v590_v25 = vor.u32 %v589_v46, %v588_v43  ;;  %v593_v0 = vshll.u32 %v592_v53, 23  ;;  %v809_v1 = vmul.u32 %v802_v27, %v793_v47 }
  0x6a   :  { %v6986_v50 = vadd.s32 4294967169, %v965_v59  ;;  %vm197_vm2 = vcmp.eq.s32.totalorder %v7776_v6, 0  ;;  %vm200_vm3 = vcmp.eq.s32.totalorder %v7776_v6, 2  ;;  %7284 = vsinq.f32 %v396_v57 }
  0x6b   :  { %vm811_vm4 = vc.u32 %v7842_v41, %v7824_v16  ;;  %vm196_vm5 = vcmp.lt.s32.totalorder %v7776_v6, 2  ;;  %vm303_vm6 = vcmp.eq.s32.totalorder %v7778_v8, 2  ;;  %v594_v38 = vor.u32 4788187, %v593_v0 }
  0x6c   :  { %v597_v2 = vcvt.s32.f32 %v590_v25  ;;  %v401_v3 = vadd.s32 3, %v397_v34  ;;  %v602_v4 = vsel %vm517_vm14, %v601_v55, %v7750_v31  ;;  %v813_v9 = vsel %vm811_vm4, %v812_v62, %v7825_v40 }
  0x6d   :  { %v971_v10 = vadd.s32 1, %v6986_v50  ;;  %v199_v51 = vsel %vm197_vm2, %v7279_v32, %v198_v48  ;;  %v202_v12 = vsel %vm200_vm3, %v201_v61, %v7281_v11  ;;  %v595_v14 = vand.u32 2147483647, %v594_v38 }
  0x6e   :  { %v814_v24 = vadd.s32 %v813_v9, %v809_v1  ;;  %v302_v28 = vsel %vm300_vm13, %v7279_v32, %v198_v48  ;;  %v305_v27 = vsel %vm303_vm6, %v201_v61, %v7281_v11  ;;  %v961_v36 = vand.u32 2147483647, %v7803_v20 }
  0x6f   :  { %vm972_vm7 = vcmp.gt.s32.totalorder %v971_v10, 0  ;;  %v7859_v17 = vand.u32 3, %v397_v34  ;;  %v598_v18 = vmul.f32 %v597_v2, %v595_v14  ;;  %v604_v31 = vsel %vm7835_vm1, 0, %v602_v4 }
  0x70   :  { %vm193_vm8 = vweird.f32 %v7584_v13  ;;  %v203_v19 = vsel %vm196_vm5, %v199_v51, %v202_v12  ;;  %v815_v21 = vadd.s32 536870912, %v814_v24  ;;  %v973_v22 = vsel %vm972_vm7, %v971_v10, 0 }
  0x71   :  { %v306_v23 = vsel %vm299_vm0, %v302_v28, %v305_v27  ;;  %v7868_v7 = vand.u32 3, %v401_v3  ;;  %v599_v57 = vxor.u32 2147483648, %v598_v18  ;;  %v975_v63 = vand.u32 31, %v973_v22  ;;  %v7926_v28 = vld [vmem:[#allocation2 + $0x28] sm:$0xff] }
  0x72   :  { %v7283_v29 = vpop.eup %7282  ;;  %v608_v32 = vadd.s32 3, %v604_v31  ;;  %v7870_v33 = vshrl.u32 %v815_v21, 30  ;;  %v968_v35 = vand.u32 8388607, %v961_v36  ;;  %v7876_v6 = vsel %vm193_vm8, nan, %v203_v19 }
  0x73   :  { %vm507_vm9 = vcmp.eq.s32.totalorder %v7859_v17, 0  ;;  %v600_v8 = vsel %vm517_vm14, %v599_v57, %v598_v18  ;;  %v7883_v11 = vsel %vm193_vm8, nan, %v306_v23  ;;  %vm510_vm10 = vcmp.eq.s32.totalorder %v7859_v17, 2 }
  0x74   :  { %v7285_v40 = vpop.eup %7284  ;;  %v603_v42 = vsel %vm7835_vm1, %v7590_v26, %v600_v8  ;;  %v817_v43 = vshll.u32 %v7870_v33, 30  ;;  %vm403_vm11 = vcmp.lt.s32.totalorder %v7868_v7, 2  ;;  %vm404_vm12 = vcmp.eq.s32.totalorder %v7868_v7, 0 }
  0x75   :  { %vm407_vm13 = vcmp.eq.s32.totalorder %v7868_v7, 2  ;;  %vm506_vm14 = vcmp.lt.s32.totalorder %v7859_v17, 2  ;;  %v7894_v44 = vand.u32 3, %v604_v31  ;;  %v976_v13 = vsub.s32 32, %v975_v63 }
  0x76   :  { %v7896_v30 = vand.u32 3, %v608_v32  ;;  %v734_v34 = vsub.f32 0.0, %v7876_v6  ;;  %v7899_v47 = vsub.s32 %v814_v24, %v817_v43  ;;  %v969_v45 = vor.u32 8388608, %v968_v35 }
  0x77   :  { %v405_v49 = vxor.u32 2147483648, %v7285_v40  ;;  %v408_v46 = vxor.u32 2147483648, %v7283_v29  ;;  %7286 = vcosq.f32 %v603_v42  ;;  %v727_v53 = vsub.f32 0.0, %v7883_v11 }
  0x78   :  { %7288 = vsinq.f32 %v603_v42  ;;  %vm756_vm15 = vcmp.lt.s32.totalorder %v7694_v39, 0  ;;  %v820_v55 = vsub.s32 0, %v7899_v47  ;;  %v7904_v59 = vshrl.u32 %v973_v22, 5 }
  0x79   :  { %v981_v48 = vshll.u32 %v11682_v54, %v975_v63  ;;  %v987_v61 = vshll.u32 %v11678_v58, %v975_v63  ;;  %v988_v62 = vshrl.u32 %v11676_v60, %v976_v13  ;;  %v990_v25 = vshll.u32 %v11676_v60, %v975_v63 }
  0x7a   :  { %v991_v0 = vshrl.u32 %v11674_v5, %v976_v13  ;;  %vm400_vm0 = vweird.f32 %v7586_v15  ;;  %v6979_v1 = vmin.u32 %v820_v55, %v7899_v47  ;;  %v982_v50 = vshrl.u32 %v11680_v56, %v976_v13 }
  0x7b   :  { %v984_v38 = vshll.u32 %v11680_v56, %v975_v63  ;;  %v985_v2 = vshrl.u32 %v11678_v58, %v976_v13  ;;  %v409_v3 = vsel %vm407_vm13, %v408_v46, %v7285_v40  ;;  %v512_v4 = vsel %vm510_vm10, %v408_v46, %v7285_v40 }
  0x7c   :  { %v810_v9 = vadd.s32 %v7824_v16, %v7842_v41  ;;  %v992_v10 = vor.u32 %v991_v0, %v990_v25  ;;  %v406_v51 = vsel %vm404_vm12, %v7283_v29, %v405_v49  ;;  %v822_v12 = vclz %v6979_v1 }
  0x7d   :  { %v978_v14 = vshll.u32 %v11686_v52, %v975_v63  ;;  %v979_v24 = vshrl.u32 %v11682_v54, %v976_v13  ;;  %v509_v27 = vsel %vm507_vm9, %v7283_v29, %v405_v49  ;;  %vm614_vm1 = vcmp.eq.s32.totalorder %v7896_v30, 2 }
  0x7e   :  { %vm717_vm2 = vcmp.eq.s32.totalorder %v7894_v44, 2  ;;  %vm7934_vm3 = vcmp.le.f32.partialorder %v754_v37, 0.7853982  ;;  %v840_v41 = vsub.s32 4, %v7870_v33  ;;  %v989_v18 = vor.u32 %v988_v62, %v987_v61 }
  0x7f   :  { %vm996_vm4 = vcmp.lt.s32.totalorder %v7904_v59, 4  ;;  %vm611_vm5 = vcmp.eq.s32.totalorder %v7896_v30, 0  ;;  %vm714_vm6 = vcmp.eq.s32.totalorder %v7894_v44, 0  ;;  %v6980_v31 = vadd.s32 4294967294, %v822_v12 }
  0x80   :  { %v983_v19 = vor.u32 %v982_v50, %v981_v48  ;;  %v986_v21 = vor.u32 %v985_v2, %v984_v38  ;;  %v7942_v22 = vshll.u32 %v969_v45, 8  ;;  %vm993_vm7 = vcmp.lt.s32.totalorder %v7904_v59, 1 }
  0x81   :  { %vm995_vm8 = vcmp.lt.s32.totalorder %v7904_v59, 3  ;;  %v1006_v37 = vsel %vm996_vm4, %v992_v10, 1326507024  ;;  %v1171_v23 = vand.u32 2139095040, %v7926_v28  ;;  %v410_v57 = vsel %vm403_vm11, %v406_v51, %v409_v3  ;;  %v7287_v32 = vpop.eup %7286 }
  0x82   :  { %v513_v63 = vsel %vm506_vm14, %v509_v27, %v512_v4  ;;  %vm6981_vm9 = vcmp.lt.s32.totalorder %v6980_v31, 0  ;;  %v980_v29 = vor.u32 %v979_v24, %v978_v14  ;;  %vm610_vm10 = vcmp.lt.s32.totalorder %v7896_v30, 2  ;;  %v7289_v42 = vpop.eup %7288 }
  0x83   :  { %vm713_vm12 = vcmp.lt.s32.totalorder %v7894_v44, 2  ;;  %v825_v35 = vsel %vm6981_vm9, 0, %v6980_v31  ;;  %v841_v8 = vsel %vm756_vm15, %v840_v41, %v7870_v33  ;;  %v977_v40 = vshrl.u32 %v11686_v52, %v976_v13 }
  0x84   :  { %v1002_v7 = vsel %vm996_vm4, %v989_v18, 920167782  ;;  %v826_v17 = vsub.s32 32, %v825_v35  ;;  %vm994_vm11 = vcmp.lt.s32.totalorder %v7904_v59, 2  ;;  %v1005_v43 = vsel %vm993_vm7, %v983_v19, %v986_v21 }
  0x85   :  { %v1007_v45 = vsel %vm995_vm8, %v989_v18, %v1006_v37  ;;  %v827_v49 = vshll.u32 %v7899_v47, %v825_v35  ;;  %v830_v46 = vsub.s32 4294967266, %v825_v35  ;;  %v998_v33 = vsel %vm996_vm4, %v986_v21, 2102212464 }
  0x86   :  { %v1172_v13 = vshrl.u32 %v1171_v23, 23  ;;  %vm607_vm13 = vweird.f32 %v7590_v26  ;;  %v615_v55 = vxor.u32 2147483648, %v7287_v32  ;;  %v828_v48 = vshrl.u32 %v810_v9, %v826_v17 }
  0x87   :  { %v1001_v61 = vsel %vm993_vm7, %v980_v29, %v983_v19  ;;  %v1003_v62 = vsel %vm995_vm8, %v986_v21, %v1002_v7  ;;  %v7976_v25 = vsel %vm400_vm0, nan, %v410_v57  ;;  %v612_v47 = vxor.u32 2147483648, %v7289_v42 }
  0x88   :  { %11751 = vst [vmem:[#allocation8_spill] sm:$0xff] %v7976_v25  ;;  %v831_v0 = vadd.s32 127, %v830_v46  ;;  %v1008_v1 = vsel %vm994_vm11, %v1005_v43, %v1007_v45  ;;  %v7982_v50 = vsel %vm400_vm0, nan, %v513_v63  ;;  %v843_v38 = vsel %vm7934_vm3, 0, %v841_v8 }
  0x89   :  { %v997_v2 = vsel %vm993_vm7, %v977_v40, %v980_v29  ;;  %v999_v3 = vsel %vm995_vm8, %v983_v19, %v998_v33  ;;  %v829_v4 = vor.u32 %v828_v48, %v827_v49  ;;  %v1004_v10 = vsel %vm994_vm11, %v1001_v61, %v1003_v62  ;;  %v8043_v33 = vld [vmem:[#allocation2 + $0x30] sm:$0xff] }
  0x8a   :  { %v832_v9 = vshll.u32 %v831_v0, 23  ;;  %v6994_v51 = vadd.s32 4294967169, %v1172_v13  ;;  %v616_v15 = vsel %vm614_vm1, %v615_v55, %v7289_v42  ;;  %v719_v12 = vsel %vm717_vm2, %v615_v55, %v7289_v42 }
  0x8b   :  { %v7997_v14 = vmul.u32.u64.low %v7942_v22, %v1008_v1  ;;  %v7998_v24 = vmul.u32.u64.high %v7942_v22, %v1008_v1, %v7997_v14  ;;  %v613_v27 = vsel %vm611_vm5, %v7287_v32, %v612_v47  ;;  %v716_v41 = vsel %vm714_vm6, %v7287_v32, %v612_v47 }
  0x8c   :  { %v833_v18 = vor.u32 4788187, %v832_v9  ;;  %v836_v31 = vcvt.s32.f32 %v829_v4  ;;  %v1000_v19 = vsel %vm994_vm11, %v997_v2, %v999_v3  ;;  %v1168_v23 = vand.u32 2147483647, %v7926_v28 }
  0x8d   :  { %v8007_v21 = vmul.u32.u64.low %v7942_v22, %v1004_v10  ;;  %v8008_v37 = vmul.u32.u64.high %v7942_v22, %v1004_v10, %v8007_v21  ;;  %v732_v57 = vsub.f32 0.0, %v7982_v50  ;;  %v735_v63 = vmul.f32 %v734_v34, %v7976_v25 }
  0x8e   :  { %v834_v29 = vand.u32 2147483647, %v833_v18  ;;  %v1178_v32 = vadd.s32 1, %v6994_v51  ;;  %v617_v35 = vsel %vm610_vm10, %v613_v27, %v616_v15  ;;  %v720_v59 = vsel %vm713_vm12, %v716_v41, %v719_v12 }
  0x8f   :  { %v739_v8 = vmul.f32 %v7976_v25, %v7883_v11  ;;  %v847_v40 = vadd.s32 3, %v843_v38  ;;  %v1016_v42 = vmul.u32 %v7942_v22, %v1000_v19  ;;  %vm1018_vm14 = vc.u32 %v7998_v24, %v8007_v21 }
  0x90   :  { %v837_v7 = vmul.f32 %v836_v31, %v834_v29  ;;  %vm1179_vm0 = vcmp.gt.s32.totalorder %v1178_v32, 0  ;;  %v8028_v17 = vmul.f32 %v734_v34, %v7982_v50  ;;  %v8032_v44 = vmul.f32 %v7982_v50, %v7883_v11 }
  0x91   :  { %v1019_v30 = vadd.s32 1, %v8008_v37  ;;  %v1180_v43 = vsel %vm1179_vm0, %v1178_v32, 0  ;;  %v8037_v45 = vsel %vm607_vm13, nan, %v617_v35  ;;  %v8041_v22 = vsel %vm607_vm13, nan, %v720_v59 }
  0x92   :  { %11752 = vst [vmem:[#allocation9_spill] sm:$0xff] %v8028_v17  ;;  %11753 = vst [vmem:[#allocation10_spill] sm:$0xff] %v8032_v44  ;;  %v838_v49 = vxor.u32 2147483648, %v837_v7  ;;  %v1182_v46 = vand.u32 31, %v1180_v43  ;;  %v8045_v34 = vand.u32 3, %v843_v38  ;;  %v723_v55 = vmul.f32 %v7976_v25, %v7876_v6 }
  0x93   :  { %v1020_v13 = vsel %vm1018_vm14, %v1019_v30, %v8008_v37  ;;  %v728_v48 = vmul.f32 %v727_v53, %v7976_v25  ;;  %v8053_v61 = vand.u32 3, %v847_v40  ;;  %v1175_v62 = vand.u32 8388607, %v1168_v23 }
  0x94   :  { %v1021_v26 = vadd.s32 %v1020_v13, %v1016_v42  ;;  %v1183_v47 = vsub.s32 32, %v1182_v46  ;;  %v8059_v0 = vmul.f32 %v8041_v22, %v7982_v50  ;;  %v736_v1 = vmul.f32 %v735_v63, %v8037_v45 }
  0x95   :  { %v737_v38 = vmul.f32 %v8041_v22, %v7883_v11  ;;  %v1495_v2 = vand.u32 2139095040, %v8043_v33  ;;  %v839_v53 = vsel %vm756_vm15, %v838_v49, %v837_v7  ;;  %v8067_v4 = vshrl.u32 %v1180_v43, 5 }
  0x96   :  { %11754 = vst [vmem:[#allocation11_spill] sm:$0xff] %v8059_v0  ;;  %v1022_v3 = vadd.s32 536870912, %v1021_v26  ;;  %v1194_v9 = vshll.u32 %v11678_v58, %v1182_v46  ;;  %v1188_v10 = vshll.u32 %v11682_v54, %v1182_v46  ;;  %v1189_v50 = vshrl.u32 %v11680_v56, %v1183_v47 }
  0x97   :  { %v1191_v51 = vshll.u32 %v11680_v56, %v1182_v46  ;;  %v1195_v15 = vshrl.u32 %v11676_v60, %v1183_v47  ;;  %vm963_vm1 = vcmp.lt.s32.totalorder %v7803_v20, 0  ;;  %v1192_v14 = vshrl.u32 %v11678_v58, %v1183_v47 }
  0x98   :  { %v1023_v12 = vshrl.u32 %v1022_v3, 30  ;;  %v1197_v27 = vshll.u32 %v11676_v60, %v1182_v46  ;;  %v1198_v41 = vshrl.u32 %v11674_v5, %v1183_v47  ;;  %v8079_v18 = vmul.f32 %v732_v57, %v8037_v45 }
  0x99   :  { %v740_v31 = vmul.f32 %v739_v8, %v8037_v45  ;;  %v1185_v19 = vshll.u32 %v11686_v52, %v1182_v46  ;;  %v1186_v37 = vshrl.u32 %v11682_v54, %v1183_v47  ;;  %v8084_v63 = vadd.f32 %v737_v38, %v736_v1 }
  0x9a   :  { %11755 = vst [vmem:[#allocation12_spill] sm:$0xff] %v8079_v18  ;;  %v741_v29 = vmul.f32 %v8041_v22, %v7876_v6  ;;  %v1024_v32 = vshll.u32 %v1023_v12, 30  ;;  %v1196_v35 = vor.u32 %v1195_v15, %v1194_v9  ;;  %v842_v59 = vsel %vm7934_vm3, %v7694_v39, %v839_v53 }
  0x9b   :  { %11756 = vst [vmem:[#allocation13_spill] sm:$0xff] %v8084_v63  ;;  %vm8093_vm15 = vcmp.le.f32.partialorder %v961_v36, 0.7853982  ;;  %v1176_v8 = vor.u32 8388608, %v1175_v62  ;;  %v1199_v40 = vor.u32 %v1198_v41, %v1197_v27  ;;  %vm1203_vm2 = vcmp.lt.s32.totalorder %v8067_v4, 4 }
  0x9c   :  { %v8098_v7 = vsub.s32 %v1021_v26, %v1024_v32  ;;  %v1190_v42 = vor.u32 %v1189_v50, %v1188_v10  ;;  %v1193_v30 = vor.u32 %v1192_v14, %v1191_v51  ;;  %v1496_v43 = vshrl.u32 %v1495_v2, 23 }
  0x9d   :  { %v1047_v49 = vsub.s32 4, %v1023_v12  ;;  %v724_v46 = vmul.f32 %v723_v55, %v8041_v22  ;;  %v1187_v16 = vor.u32 %v1186_v37, %v1185_v19  ;;  %vm1200_vm3 = vcmp.lt.s32.totalorder %v8067_v4, 1 }
  0x9e   :  { %7290 = vcosq.f32 %v842_v59  ;;  %v1027_v36 = vsub.s32 0, %v8098_v7  ;;  %vm1202_vm4 = vcmp.lt.s32.totalorder %v8067_v4, 3  ;;  %v1209_v13 = vsel %vm1203_vm2, %v1196_v35, 920167782 }
  0x9f   :  { %v1184_v26 = vshrl.u32 %v11686_v52, %v1183_v47  ;;  %vm1201_vm5 = vcmp.lt.s32.totalorder %v8067_v4, 2  ;;  %v1213_v62 = vsel %vm1203_vm2, %v1199_v40, 1326507024  ;;  %v8110_v1 = vshll.u32 %v1176_v8, 8 }
  0xa0   :  { %v6987_v55 = vmin.u32 %v1027_v36, %v8098_v7  ;;  %v1205_v38 = vsel %vm1203_vm2, %v1193_v30, 2102212464  ;;  %v1212_v2 = vsel %vm1200_vm3, %v1190_v42, %v1193_v30  ;;  %v7002_v53 = vadd.s32 4294967169, %v1496_v43 }
  0xa1   :  { %v1048_v3 = vsel %vm963_vm1, %v1047_v49, %v1023_v12  ;;  %v1208_v47 = vsel %vm1200_vm3, %v1187_v16, %v1190_v42  ;;  %v1210_v9 = vsel %vm1202_vm4, %v1193_v30, %v1209_v13  ;;  %v1214_v10 = vsel %vm1202_vm4, %v1196_v35, %v1213_v62 }
  0xa2   :  { %v8125_v50 = vadd.f32 %v741_v29, %v740_v31  ;;  %v1029_v51 = vclz %v6987_v55  ;;  %v725_v15 = vmul.f32 %v8037_v45, %v7883_v11  ;;  %v729_v14 = vmul.f32 %v728_v48, %v8041_v22 }
  0xa3   :  { %7292 = vsinq.f32 %v842_v59  ;;  %v1204_v12 = vsel %vm1200_vm3, %v1184_v26, %v1187_v16  ;;  %v1206_v27 = vsel %vm1202_vm4, %v1190_v42, %v1205_v38  ;;  %v1215_v41 = vsel %vm1201_vm5, %v1212_v2, %v1214_v10 }
  0xa4   :  { %11759 = vst [vmem:[#allocation14_spill] sm:$0xff] %v8125_v50  ;;  %v6988_v19 = vadd.s32 4294967294, %v1029_v51  ;;  %v1050_v31 = vsel %vm8093_vm15, 0, %v1048_v3  ;;  %v1211_v37 = vsel %vm1201_vm5, %v1208_v47, %v1210_v9  ;;  %v1502_v11 = vadd.s32 1, %v7002_v53 }
  0xa5   :  { %v730_v22 = vmul.f32 %v8037_v45, %v7876_v6  ;;  %v8143_v48 = vmul.u32.u64.low %v8110_v1, %v1215_v41  ;;  %v8144_v29 = vmul.u32.u64.high %v8110_v1, %v1215_v41, %v8143_v48  ;;  %v11673_v32 = vand.u32 2147483647, %v8043_v33 }
  0xa6   :  { %vm853_vm6 = vcmp.eq.s32.totalorder %v8053_v61, 2  ;;  %v1017_v35 = vadd.s32 %v8007_v21, %v7998_v24  ;;  %vm6989_vm7 = vcmp.lt.s32.totalorder %v6988_v19, 0  ;;  %v1207_v59 = vsel %vm1201_vm5, %v1204_v12, %v1206_v27 }
  0xa7   :  { %vm1503_vm8 = vcmp.gt.s32.totalorder %v1502_v11, 0  ;;  %v1032_v8 = vsel %vm6989_vm7, 0, %v6988_v19  ;;  %v1054_v40 = vadd.s32 3, %v1050_v31  ;;  %v8160_v16 = vadd.f32 %v725_v15, %v724_v46 }
  0xa8   :  { %v8153_v6 = vmul.u32.u64.low %v8110_v1, %v1211_v37  ;;  %v8154_v45 = vmul.u32.u64.high %v8110_v1, %v1211_v37, %v8153_v6  ;;  %v8157_v42 = vpop.eup %7290  ;;  %v1033_v30 = vsub.s32 32, %v1032_v8  ;;  %v1034_v43 = vshll.u32 %v8098_v7, %v1032_v8 }
  0xa9   :  { %v1037_v49 = vsub.s32 4294967266, %v1032_v8  ;;  %11760 = vst [vmem:[#allocation15_spill] sm:$0xff] %v8160_v16  ;;  %v8162_v24 = vadd.f32 %v730_v22, %v729_v14  ;;  %v1223_v21 = vmul.u32 %v8110_v1, %v1207_v59  ;;  %v1499_v4 = vand.u32 8388607, %v11673_v32  ;;  %v8424_v32 = vld [vmem:[#allocation2 + $0x1a0] sm:$0xff] }
  0xaa   :  { %v1504_v36 = vsel %vm1503_vm8, %v1502_v11, 0  ;;  %vm850_vm9 = vcmp.eq.s32.totalorder %v8053_v61, 0  ;;  %v1035_v13 = vshrl.u32 %v1017_v35, %v1033_v30  ;;  %vm1225_vm10 = vc.u32 %v8144_v29, %v8153_v6  ;;  %11772 = vst [vmem:[#allocation25_spill] sm:$0xff] %v8424_v32 }
  0xab   :  { %11761 = vst [vmem:[#allocation16_spill] sm:$0xff] %v8162_v24  ;;  %v1038_v26 = vadd.s32 127, %v1037_v49  ;;  %v1506_v62 = vand.u32 31, %v1504_v36  ;;  %v854_v7 = vxor.u32 2147483648, %v8157_v42  ;;  %v8171_v46 = vand.u32 3, %v1054_v40 }
  0xac   :  { %v8173_v55 = vand.u32 3, %v1050_v31  ;;  %v1226_v1 = vadd.s32 1, %v8154_v45  ;;  %v1036_v38 = vor.u32 %v1035_v13, %v1034_v43  ;;  %v8176_v53 = vshrl.u32 %v1504_v36, 5 }
  0xad   :  { %v1039_v2 = vshll.u32 %v1038_v26, 23  ;;  %v1507_v3 = vsub.s32 32, %v1506_v62  ;;  %v8178_v47 = vpop.eup %7292  ;;  %v1509_v10 = vshll.u32 %v11686_v52, %v1506_v62  ;;  %v1512_v51 = vshll.u32 %v11682_v54, %v1506_v62 }
  0xae   :  { %v1227_v9 = vsel %vm1225_vm10, %v1226_v1, %v8154_v45  ;;  %v1518_v15 = vshll.u32 %v11678_v58, %v1506_v62  ;;  %v1043_v12 = vcvt.s32.f32 %v1036_v38  ;;  %v1515_v41 = vshll.u32 %v11680_v56, %v1506_v62 }
  0xaf   :  { %v1040_v14 = vor.u32 4788187, %v1039_v2  ;;  %v1228_v27 = vadd.s32 %v1227_v9, %v1223_v21  ;;  %vm953_vm12 = vcmp.eq.s32.totalorder %v8045_v34, 0  ;;  %vm956_vm11 = vcmp.eq.s32.totalorder %v8045_v34, 2 }
  0xb0   :  { %v1510_v19 = vshrl.u32 %v11682_v54, %v1507_v3  ;;  %v1513_v31 = vshrl.u32 %v11680_v56, %v1507_v3  ;;  %v1516_v37 = vshrl.u32 %v11678_v58, %v1507_v3  ;;  %v1519_v11 = vshrl.u32 %v11676_v60, %v1507_v3  ;;  %v8428_v58 = vld [vmem:[#allocation2 + $0x1b8] sm:$0xff] }
  0xb1   :  { %vm849_vm13 = vcmp.lt.s32.totalorder %v8053_v61, 2  ;;  %v1041_v22 = vand.u32 2147483647, %v1040_v14  ;;  %v1229_v48 = vadd.s32 536870912, %v1228_v27  ;;  %v1521_v35 = vshll.u32 %v11676_v60, %v1506_v62  ;;  %11773 = vst [vmem:[#allocation26_spill] sm:$0xff] %v8428_v58 }
  0xb2   :  { %v1522_v59 = vshrl.u32 %v11674_v5, %v1507_v3  ;;  %v851_v8 = vxor.u32 2147483648, %v8178_v47  ;;  %v855_v40 = vsel %vm853_vm6, %v854_v7, %v8178_v47  ;;  %v1500_v45 = vor.u32 8388608, %v1499_v4  ;;  %v8206_v4 = vld [vmem:[#allocation2 + $0x38] sm:$0xff] }
  0xb3   :  { %v1520_v30 = vor.u32 %v1519_v11, %v1518_v15  ;;  %vm952_vm14 = vcmp.lt.s32.totalorder %v8045_v34, 2  ;;  %v1044_v43 = vmul.f32 %v1043_v12, %v1041_v22  ;;  %v1230_v49 = vshrl.u32 %v1229_v48, 30 }
  0xb4   :  { %v1511_v21 = vor.u32 %v1510_v19, %v1509_v10  ;;  %v1514_v36 = vor.u32 %v1513_v31, %v1512_v51  ;;  %vm846_vm0 = vweird.f32 %v7694_v39  ;;  %v1517_v13 = vor.u32 %v1516_v37, %v1515_v41 }
  0xb5   :  { %v1523_v26 = vor.u32 %v1522_v59, %v1521_v35  ;;  %vm1524_vm2 = vcmp.lt.s32.totalorder %v8176_v53, 1  ;;  %vm1527_vm3 = vcmp.lt.s32.totalorder %v8176_v53, 4  ;;  %v1045_v62 = vxor.u32 2147483648, %v1044_v43 }
  0xb6   :  { %v1231_v1 = vshll.u32 %v1230_v49, 30  ;;  %v1508_v38 = vshrl.u32 %v11686_v52, %v1507_v3  ;;  %vm1526_vm4 = vcmp.lt.s32.totalorder %v8176_v53, 3  ;;  %v852_v2 = vsel %vm850_vm9, %v8157_v42, %v851_v8 }
  0xb7   :  { %vm1170_vm5 = vcmp.lt.s32.totalorder %v7926_v28, 0  ;;  %vm1525_vm6 = vcmp.lt.s32.totalorder %v8176_v53, 2  ;;  %v1533_v9 = vsel %vm1527_vm3, %v1520_v30, 920167782  ;;  %v1540_v10 = vshll.u32 %v1500_v45, 8 }
  0xb8   :  { %v1046_v51 = vsel %vm963_vm1, %v1045_v62, %v1044_v43  ;;  %v8217_v3 = vsub.s32 %v1228_v27, %v1231_v1  ;;  %v1529_v15 = vsel %vm1527_vm3, %v1517_v13, 2102212464  ;;  %v1532_v14 = vsel %vm1524_vm2, %v1511_v21, %v1514_v36 }
  0xb9   :  { %v1049_v12 = vsel %vm8093_vm15, %v7803_v20, %v1046_v51  ;;  %v1534_v41 = vsel %vm1526_vm4, %v1517_v13, %v1533_v9  ;;  %v1537_v19 = vsel %vm1527_vm3, %v1523_v26, 1326507024  ;;  %v1705_v31 = vand.u32 2139095040, %v8206_v4 }
  0xba   :  { %7294 = vcosq.f32 %v1049_v12  ;;  %vm8233_vm1 = vcmp.le.f32.partialorder %v1168_v23, 0.7853982  ;;  %v1234_v37 = vsub.s32 0, %v8217_v3  ;;  %v1528_v57 = vsel %vm1524_vm2, %v1508_v38, %v1511_v21 }
  0xbb   :  { %v1536_v11 = vsel %vm1524_vm2, %v1514_v36, %v1517_v13  ;;  %7296 = vsinq.f32 %v1049_v12  ;;  %v1530_v22 = vsel %vm1526_vm4, %v1514_v36, %v1529_v15  ;;  %v1535_v48 = vsel %vm1525_vm6, %v1532_v14, %v1534_v41 }
  0xbc   :  { %v1538_v23 = vsel %vm1526_vm4, %v1520_v30, %v1537_v19  ;;  %v955_v35 = vsel %vm953_vm12, %v8157_v42, %v851_v8  ;;  %v958_v59 = vsel %vm956_vm11, %v854_v7, %v8178_v47  ;;  %v6995_v45 = vmin.u32 %v1234_v37, %v8217_v3 }
  0xbd   :  { %v1254_v43 = vsub.s32 4, %v1230_v49  ;;  %v856_v21 = vsel %vm849_vm13, %v852_v2, %v855_v40  ;;  %v1539_v36 = vsel %vm1525_vm6, %v1536_v11, %v1538_v23  ;;  %vm1159_vm15 = vcmp.lt.s32.totalorder %v8173_v55, 2 }
  0xbe   :  { %v8261_v30 = vmul.u32.u64.low %v1540_v10, %v1535_v48  ;;  %v8262_v13 = vmul.u32.u64.high %v1540_v10, %v1535_v48, %v8261_v30  ;;  %vm1160_vm7 = vcmp.eq.s32.totalorder %v8173_v55, 0  ;;  %vm1163_vm8 = vcmp.eq.s32.totalorder %v8173_v55, 2 }
  0xbf   :  { %v1236_v42 = vclz %v6995_v45  ;;  %v1531_v7 = vsel %vm1525_vm6, %v1528_v57, %v1530_v22  ;;  %v959_v61 = vsel %vm952_vm14, %v955_v35, %v958_v59  ;;  %vm1053_vm9 = vweird.f32 %v7803_v20 }
  0xc0   :  { %v8273_v47 = vmul.u32.u64.low %v1540_v10, %v1539_v36  ;;  %v8274_v8 = vmul.u32.u64.high %v1540_v10, %v1539_v36, %v8273_v47  ;;  %v1706_v40 = vshrl.u32 %v1705_v31, 23  ;;  %v8278_v26 = vsel %vm846_vm0, nan, %v856_v21 }
  0xc1   :  { %vm1056_vm10 = vcmp.lt.s32.totalorder %v8171_v46, 2  ;;  %v6996_v62 = vadd.s32 4294967294, %v1236_v42  ;;  %v1255_v53 = vsel %vm1170_vm5, %v1254_v43, %v1230_v49  ;;  %vm1057_vm12 = vcmp.eq.s32.totalorder %v8171_v46, 0 }
  0xc2   :  { %v1547_v34 = vmul.u32 %v1540_v10, %v1531_v7  ;;  %v1550_v1 = vadd.s32 1, %v8262_v13  ;;  %v7010_v38 = vadd.s32 4294967169, %v1706_v40  ;;  %v8287_v2 = vsel %vm846_vm0, nan, %v959_v61 }
  0xc3   :  { %vm1060_vm11 = vcmp.eq.s32.totalorder %v8171_v46, 2  ;;  %v1224_v9 = vadd.s32 %v8153_v6, %v8144_v29  ;;  %vm6997_vm13 = vcmp.lt.s32.totalorder %v6996_v62, 0  ;;  %v1387_v51 = vsub.f32 0.0, %v8278_v26 }
  0xc4   :  { %v1239_v15 = vsel %vm6997_vm13, 0, %v6996_v62  ;;  %v1257_v49 = vsel %vm8233_vm1, 0, %v1255_v53  ;;  %vm1549_vm14 = vc.u32 %v8274_v8, %v8261_v30  ;;  %v7295_v10 = vpop.eup %7294  ;;  %v1380_v29 = vsub.f32 0.0, %v8287_v2 }
  0xc5   :  { %v1240_v14 = vsub.s32 32, %v1239_v15  ;;  %v1241_v39 = vshll.u32 %v8217_v3, %v1239_v15  ;;  %v1244_v12 = vsub.s32 4294967266, %v1239_v15  ;;  %v1551_v41 = vsel %vm1549_vm14, %v1550_v1, %v8262_v13  ;;  %v7297_v19 = vpop.eup %7296  ;;  %v8327_v1 = vld [vmem:[#allocation2 + $0x170] sm:$0xff] }
  0xc6   :  { %v1061_v31 = vxor.u32 2147483648, %v7295_v10  ;;  %v1552_v6 = vadd.s32 %v1551_v41, %v1547_v34  ;;  %v1712_v37 = vadd.s32 1, %v7010_v38  ;;  %v1058_v57 = vxor.u32 2147483648, %v7297_v19  ;;  %v1445_v38 = vld [vmem:[#allocation2 + $0xd0] sm:$0xff] }
  0xc7   :  { %v1242_v11 = vshrl.u32 %v1224_v9, %v1240_v14  ;;  %v1245_v22 = vadd.s32 127, %v1244_v12  ;;  %v11672_v48 = vand.u32 2147483647, %v8206_v4  ;;  %v1261_v35 = vadd.s32 3, %v1257_v49 }
  0xc8   :  { %v1062_v23 = vsel %vm1060_vm11, %v1061_v31, %v7297_v19  ;;  %v1165_v3 = vsel %vm1163_vm8, %v1061_v31, %v7297_v19  ;;  %v1553_v59 = vadd.s32 536870912, %v1552_v6  ;;  %v1059_v45 = vsel %vm1057_vm12, %v7295_v10, %v1058_v57 }
  0xc9   :  { %v1162_v43 = vsel %vm1160_vm7, %v7295_v10, %v1058_v57  ;;  %v1243_v21 = vor.u32 %v1242_v11, %v1241_v39  ;;  %v1246_v36 = vshll.u32 %v1245_v22, 23  ;;  %v1063_v13 = vsel %vm1056_vm10, %v1059_v45, %v1062_v23 }
  0xca   :  { %v1166_v42 = vsel %vm1159_vm15, %v1162_v43, %v1165_v3  ;;  %v8313_v7 = vshrl.u32 %v1553_v59, 30  ;;  %vm1713_vm0 = vcmp.gt.s32.totalorder %v1712_v37, 0  ;;  %v1064_v61 = vsel %vm1053_vm9, nan, %v1063_v13 }
  0xcb   :  { %v8319_v47 = vsel %vm1053_vm9, nan, %v1166_v42  ;;  %v1247_v40 = vor.u32 4788187, %v1246_v36  ;;  %v1250_v62 = vcvt.s32.f32 %v1243_v21  ;;  %v8321_v53 = vmul.f32 %v1387_v51, %v1064_v61 }
  0xcc   :  { %v1396_v46 = vmul.f32 %v1387_v51, %v8319_v47  ;;  %v1397_v55 = vmul.f32 %v8319_v47, %v8287_v2  ;;  %v1428_v34 = vmul.f32 %v1064_v61, %v8059_v0  ;;  %v1433_v9 = vmul.f32 %v1064_v61, %v8160_v16 }
  0xcd   :  { %v1438_v20 = vmul.f32 %v1064_v61, %v8162_v24  ;;  %v1248_v15 = vand.u32 2147483647, %v1247_v40  ;;  %v8332_v10 = vmul.f32 %v1064_v61, %v8278_v26  ;;  %v8340_v57 = vmul.f32 %v1380_v29, %v1064_v61 }
  0xce   :  { %v1429_v14 = vmul.f32 %v1396_v46, %v8079_v18  ;;  %v1431_v51 = vmul.f32 %v1397_v55, %v7976_v25  ;;  %v1434_v39 = vmul.f32 %v1396_v46, %v8084_v63  ;;  %v1436_v12 = vmul.f32 %v1397_v55, %v8028_v17 }
  0xcf   :  { %v1439_v41 = vmul.f32 %v1396_v46, %v8125_v50  ;;  %v1441_v19 = vmul.f32 %v1397_v55, %v8032_v44  ;;  %v1251_v31 = vmul.f32 %v1250_v62, %v1248_v15  ;;  %v1446_v22 = vmul.f32 %v1445_v38, %v8327_v1 }
  0xd0   :  { %v1430_v11 = vadd.f32 %v1429_v14, %v1428_v34  ;;  %v1435_v23 = vadd.f32 %v1434_v39, %v1433_v9  ;;  %v8344_v3 = vmul.f32 %v1064_v61, %v8287_v2  ;;  %v8346_v43 = vand.u32 3, %v1257_v49  ;;  %v7424_v14 = vld [vmem:[#allocation5 + $0x10] sm:$0xff] }
  0xd1   :  { %v1440_v59 = vadd.f32 %v1439_v41, %v1438_v20  ;;  %v1252_v45 = vxor.u32 2147483648, %v1251_v31  ;;  %v1555_v21 = vshll.u32 %v8313_v7, 30  ;;  %v8353_v42 = vand.u32 3, %v1261_v35  ;;  %v7423_v20 = vld [vmem:[#allocation5 + $0x8] sm:$0xff]  ;;  %v8386_v41 = vld [vmem:[#allocation2 + $0x190] sm:$0xff] }
  0xd2   :  { %v8349_v36 = vadd.f32 %v1431_v51, %v1430_v11  ;;  %v8351_v13 = vadd.f32 %v1436_v12, %v1435_v23  ;;  %v1714_v29 = vsel %vm1713_vm0, %v1712_v37, 0  ;;  %v1709_v49 = vand.u32 8388607, %v11672_v48  ;;  %v8382_v12 = vld [vmem:[#allocation2 + $0x40] sm:$0xff]  ;;  %11765 = vst [vmem:[#allocation18_spill] sm:$0xff] %v8386_v41 }
  0xd3   :  { %v8356_v40 = vadd.f32 %v1441_v19, %v1440_v59  ;;  %v1253_v61 = vsel %vm1170_vm5, %v1252_v45, %v1251_v31  ;;  %v8360_v62 = vsub.s32 %v1552_v6, %v1555_v21  ;;  %v8371_v38 = vand.u32 31, %v1714_v29  ;;  %v7422_v6 = vld [vmem:[#allocation5] sm:$0xff]  ;;  %v8398_v59 = vld [vmem:[#allocation2 + $0x1c8] sm:$0xff]  ;;  %v8405_v21 = vld [vmem:[#allocation2 + $0x1d0] sm:$0xff] }
  0xd4   :  { %v1447_v46 = vmul.f32 %v1446_v22, %v8349_v36  ;;  %v1449_v55 = vmul.f32 %v1446_v22, %v8351_v13  ;;  %v1256_v35 = vsel %vm8233_vm1, %v7926_v28, %v1253_v61  ;;  %vm1267_vm2 = vcmp.eq.s32.totalorder %v8353_v42, 2  ;;  %v8390_v31 = vld [vmem:[#allocation2 + $0x198] sm:$0xff]  ;;  %11768 = vst [vmem:[#allocation21_spill] sm:$0xff] %v8398_v59  ;;  %11769 = vst [vmem:[#allocation22_spill] sm:$0xff] %v8405_v21 }
  0xd5   :  { %v1451_v37 = vmul.f32 %v1446_v22, %v8356_v40  ;;  %7298 = vcosq.f32 %v1256_v35  ;;  %v1558_v34 = vsub.s32 0, %v8360_v62  ;;  %vm1370_vm3 = vcmp.eq.s32.totalorder %v8346_v43, 2  ;;  %11766 = vst [vmem:[#allocation19_spill] sm:$0xff] %v8390_v31  ;;  %v8394_v22 = vld [vmem:[#allocation2 + $0x1c0] sm:$0xff] }
  0xd6   :  { %v8373_v9 = vadd.f32 %v7422_v6, %v1447_v46  ;;  %v8375_v15 = vadd.f32 %v7423_v20, %v1449_v55  ;;  %7300 = vsinq.f32 %v1256_v35  ;;  %v1710_v39 = vor.u32 8388608, %v1709_v49  ;;  %11767 = vst [vmem:[#allocation20_spill] sm:$0xff] %v8394_v22  ;;  %v8409_v49 = vld [vmem:[#allocation2 + $0x1a8] sm:$0xff]  ;;  %v8413_v55 = vld [vmem:[#allocation2 + $0x1b0] sm:$0xff] }
  0xd7   :  { %v8377_v51 = vadd.f32 %v7424_v14, %v1451_v37  ;;  %v7003_v27 = vmin.u32 %v1558_v34, %v8360_v62  ;;  %vm1264_vm4 = vcmp.eq.s32.totalorder %v8353_v42, 0  ;;  %vm1367_vm5 = vcmp.eq.s32.totalorder %v8346_v43, 0  ;;  %11770 = vst [vmem:[#allocation23_spill] sm:$0xff] %v8409_v49  ;;  %11771 = vst [vmem:[#allocation24_spill] sm:$0xff] %v8413_v55 }
  0xd8   :  { %1455 = vst [vmem:[#allocation5 + $0x60] sm:$0xff] %v8373_v9  ;;  %1458 = vst [vmem:[#allocation5 + $0x68] sm:$0xff] %v8375_v15  ;;  %v1462_v19 = vmul.f32 %v8386_v41, %v8373_v9  ;;  %v1463_v11 = vmul.f32 %v8390_v31, %v8375_v15  ;;  %v1472_v23 = vmul.f32 %v8394_v22, %v8373_v9  ;;  %vm1263_vm6 = vcmp.lt.s32.totalorder %v8353_v42, 2 }
  0xd9   :  { %11764 = vst [vmem:[#allocation17_spill] sm:$0xff] %v8377_v51  ;;  %v1473_v45 = vmul.f32 %v8398_v59, %v8375_v15  ;;  %1461 = vst [vmem:[#allocation5 + $0x70] sm:$0xff] %v8377_v51  ;;  %v1475_v61 = vmul.f32 %v8405_v21, %v8377_v51  ;;  %v1467_v46 = vmul.f32 %v8409_v49, %v8373_v9  ;;  %vm1366_vm1 = vcmp.lt.s32.totalorder %v8346_v43, 2 }
  0xda   :  { %v1468_v35 = vmul.f32 %v8413_v55, %v8375_v15  ;;  %v1717_v37 = vsub.s32 32, %v8371_v38  ;;  %vm1260_vm15 = vweird.f32 %v7926_v28  ;;  %v1560_v6 = vclz %v7003_v27 }
  0xdb   :  { %v1474_v34 = vadd.f32 %v1473_v45, %v1472_v23  ;;  %v1719_v20 = vshll.u32 %v11686_v52, %v8371_v38  ;;  %v1464_v48 = vadd.f32 %v1463_v11, %v1462_v19  ;;  %v1465_v5 = vmul.f32 %v8424_v32, %v8377_v51 }
  0xdc   :  { %v1469_v60 = vadd.f32 %v1468_v35, %v1467_v46  ;;  %v1470_v23 = vmul.f32 %v8428_v58, %v8377_v51  ;;  %v1548_v27 = vadd.s32 %v8261_v30, %v8274_v8  ;;  %v7004_v56 = vadd.s32 4294967294, %v1560_v6 }
  0xdd   :  { %v1476_v45 = vadd.f32 %v1475_v61, %v1474_v34  ;;  %v8434_v54 = vshll.u32 %v1710_v39, 8  ;;  %v1385_v19 = vsub.f32 0.0, %v8319_v47  ;;  %v8437_v11 = vshrl.u32 %v1714_v29, 5 }
  0xde   :  { %v8440_v14 = vshrl.u32 %v11686_v52, %v1717_v37  ;;  %v11774_v46 = vmov 2475754826   ;;  %vm7005_vm7 = vcmp.lt.s32.totalorder %v7004_v56, 0  ;;  %v11775_v34 = vmov 2131351028  }
  0xdf   :  { %v1720_v35 = vshrl.u32 %v11774_v46, %v1717_v37  ;;  %7302 = vrcp.f32 %v1476_v45  ;;  %v1722_v61 = vshll.u32 %v11774_v46, %v8371_v38  ;;  %v1723_v58 = vshrl.u32 %v11775_v34, %v1717_v37  ;;  %v7299_v30 = vpop.eup %7298 }
  0xe0   :  { %v8446_v8 = vadd.f32 %v1465_v5, %v1464_v48  ;;  %v8448_v39 = vadd.f32 %v1470_v23, %v1469_v60  ;;  %v1563_v6 = vsel %vm7005_vm7, 0, %v7004_v56  ;;  %v7301_v55 = vpop.eup %7300  ;;  %v1268_v52 = vxor.u32 2147483648, %v7299_v30 }
  0xe1   :  { %v8450_v29 = vor.u32 %v1720_v35, %v1719_v20  ;;  %v1564_v49 = vsub.s32 32, %v1563_v6  ;;  %v1565_v21 = vshll.u32 %v8360_v62, %v1563_v6  ;;  %v1568_v59 = vsub.s32 4294967266, %v1563_v6 }
  0xe2   :  { %v1265_v32 = vxor.u32 2147483648, %v7301_v55  ;;  %v8453_v22 = vor.u32 %v1723_v58, %v1722_v61  ;;  %v1725_v31 = vshll.u32 %v11775_v34, %v8371_v38  ;;  %v11776_v41 = vmov 2102212464  }
  0xe3   :  { %v1726_v5 = vshrl.u32 %v11776_v41, %v1717_v37  ;;  %v1269_v60 = vsel %vm1267_vm2, %v1268_v52, %v7301_v55  ;;  %v1372_v56 = vsel %vm1370_vm3, %v1268_v52, %v7301_v55  ;;  %v1566_v48 = vshrl.u32 %v1548_v27, %v1564_v49 }
  0xe4   :  { %v1569_v20 = vadd.s32 127, %v1568_v59  ;;  %v1266_v62 = vsel %vm1264_vm4, %v7299_v30, %v1265_v32  ;;  %v1369_v58 = vsel %vm1367_vm5, %v7299_v30, %v1265_v32  ;;  %v1728_v23 = vshll.u32 %v11776_v41, %v8371_v38 }
  0xe5   :  { %v11777_v35 = vmov 920167782   ;;  %v1270_v6 = vsel %vm1263_vm6, %v1266_v62, %v1269_v60  ;;  %v1373_v51 = vsel %vm1366_vm1, %v1369_v58, %v1372_v56  ;;  %v8473_v52 = vor.u32 %v1566_v48, %v1565_v21 }
  0xe6   :  { %v1729_v61 = vshrl.u32 %v11777_v35, %v1717_v37  ;;  %v1731_v59 = vshll.u32 %v11777_v35, %v8371_v38  ;;  %v1271_v49 = vsel %vm1260_vm15, nan, %v1270_v6  ;;  %v1374_v32 = vsel %vm1260_vm15, nan, %v1373_v51 }
  0xe7   :  { %v1570_v55 = vshll.u32 %v1569_v20, 23  ;;  %v11778_v27 = vmov 1326507024   ;;  %v8483_v42 = vmul.f32 %v1374_v32, %v8319_v47  ;;  %v1377_v43 = vmul.f32 %v8332_v10, %v1374_v32 }
  0xe8   :  { %v1732_v30 = vshrl.u32 %v11778_v27, %v1717_v37  ;;  %v1378_v21 = vmul.f32 %v1271_v49, %v8287_v2  ;;  %v1382_v60 = vmul.f32 %v8340_v57, %v1374_v32  ;;  %v1383_v38 = vmul.f32 %v1271_v49, %v8278_v26 }
  0xe9   :  { %v8489_v56 = vmul.f32 %v1385_v19, %v1271_v49  ;;  %v1389_v48 = vmul.f32 %v8321_v53, %v1271_v49  ;;  %v1390_v28 = vmul.f32 %v1374_v32, %v8287_v2  ;;  %v7303_v51 = vpop.eup %7302  ;;  %v1393_v47 = vmul.f32 %v8344_v3, %v1271_v49 }
  0xea   :  { %v8493_v20 = vadd.f32 %v1378_v21, %v1377_v43  ;;  %v1394_v37 = vmul.f32 %v1374_v32, %v8278_v26  ;;  %v1398_v10 = vmul.f32 %v8483_v42, %v8059_v0  ;;  %v1478_v62 = vmul.f32 %v7303_v51, %v1476_v45 }
  0xeb   :  { %v8499_v57 = vadd.f32 %v1383_v38, %v1382_v60  ;;  %v8501_v58 = vadd.f32 %v1390_v28, %v1389_v48  ;;  %v1413_v53 = vmul.f32 %v8489_v56, %v8059_v0  ;;  %v1727_v6 = vor.u32 %v1726_v5, %v1725_v31 }
  0xec   :  { %v8505_v19 = vadd.f32 %v1394_v37, %v1393_v47  ;;  %v1399_v2 = vmul.f32 %v8493_v20, %v8079_v18  ;;  %v1730_v3 = vor.u32 %v1729_v61, %v1728_v23  ;;  %v1479_v49 = vsub.f32 2.0, %v1478_v62 }
  0xed   :  { %v1401_v26 = vmul.f32 %v8499_v57, %v7976_v25  ;;  %v1414_v45 = vmul.f32 %v8501_v58, %v8079_v18  ;;  %v1571_v32 = vor.u32 4788187, %v1570_v55  ;;  %v1574_v60 = vcvt.s32.f32 %v8473_v52 }
  0xee   :  { %v1400_v43 = vadd.f32 %v1399_v2, %v1398_v10  ;;  %v1416_v21 = vmul.f32 %v8505_v19, %v7976_v25  ;;  %v1733_v38 = vor.u32 %v1732_v30, %v1731_v59  ;;  %v1480_v48 = vmul.f32 %v7303_v51, %v1479_v49 }
  0xef   :  { %v1415_v28 = vadd.f32 %v1414_v45, %v1413_v53  ;;  %vm1734_vm8 = vcmp.lt.s32.totalorder %v8437_v11, 1  ;;  %vm1735_vm9 = vcmp.lt.s32.totalorder %v8437_v11, 2  ;;  %vm1736_vm10 = vcmp.lt.s32.totalorder %v8437_v11, 3 }
  0xf0   :  { %v8518_v31 = vadd.f32 %v1401_v26, %v1400_v43  ;;  %vm1737_vm12 = vcmp.lt.s32.totalorder %v8437_v11, 4  ;;  %v1738_v5 = vsel %vm1734_vm8, %v8440_v14, %v8450_v29  ;;  %v1481_v23 = vmul.f32 %v1480_v48, %v8446_v8 }
  0xf1   :  { %v1485_v61 = vmul.f32 %v1480_v48, %v8448_v39  ;;  %v8528_v52 = vadd.f32 %v1416_v21, %v1415_v28  ;;  %v1739_v59 = vsel %vm1737_vm12, %v1727_v6, 2102212464  ;;  %v1572_v55 = vand.u32 2147483647, %v1571_v32 }
  0xf2   :  { %v1740_v30 = vsel %vm1736_vm10, %v8453_v22, %v1739_v59  ;;  %v1742_v51 = vsel %vm1734_vm8, %v8450_v29, %v8453_v22  ;;  %v1743_v47 = vsel %vm1737_vm12, %v1730_v3, 920167782  ;;  %1484 = vst [vmem:[#allocation5 + $0x238] sm:$0xff] %v1481_v23  ;;  %v1746_v8 = vsel %vm1734_vm8, %v8453_v22, %v1727_v6 }
  0xf3   :  { %1488 = vst [vmem:[#allocation5 + $0x240] sm:$0xff] %v1485_v61  ;;  %v1744_v14 = vsel %vm1736_vm10, %v1727_v6, %v1743_v47  ;;  %v1747_v39 = vsel %vm1737_vm12, %v1733_v38, 1326507024  ;;  %v1741_v37 = vsel %vm1735_vm9, %v1738_v5, %v1740_v30  ;;  %v1578_v62 = vsub.s32 4, %v8313_v7 }
  0xf4   :  { %v1745_v10 = vsel %vm1735_vm9, %v1742_v51, %v1744_v14  ;;  %v1748_v29 = vsel %vm1736_vm10, %v1730_v3, %v1747_v39  ;;  %v1575_v22 = vmul.f32 %v1574_v60, %v1572_v55  ;;  %v11779_v45 = vand.u32 2139095040, %v8382_v12 }
  0xf5   :  { %v1749_v53 = vsel %vm1735_vm9, %v1746_v8, %v1748_v29  ;;  %v8552_v2 = vmul.u32.u64.low %v8434_v54, %v1745_v10  ;;  %v8553_v49 = vmul.u32.u64.high %v8434_v54, %v1745_v10, %v8552_v2  ;;  %vm1494_vm11 = vcmp.lt.s32.totalorder %v8043_v33, 0 }
  0xf6   :  { %v8557_v6 = vmul.u32.u64.low %v8434_v54, %v1749_v53  ;;  %v8558_v26 = vmul.u32.u64.high %v8434_v54, %v1749_v53, %v8557_v6  ;;  %v1916_v32 = vshrl.u32 %v11779_v45, 23  ;;  %v1757_v3 = vmul.u32 %v8434_v54, %v1741_v37 }
  0xf7   :  { %v11696_v11 = vand.u32 2147483647, %v8382_v12  ;;  %v1403_v21 = vmul.f32 %v8483_v42, %v8160_v16  ;;  %v1404_v60 = vmul.f32 %v8493_v20, %v8084_v63  ;;  %v1406_v38 = vmul.f32 %v8499_v57, %v8028_v17 }
  0xf8   :  { %v7018_v43 = vadd.s32 4294967169, %v1916_v32  ;;  %v1579_v48 = vsel %vm1494_vm11, %v1578_v62, %v8313_v7  ;;  %v1760_v28 = vadd.s32 1, %v8553_v49  ;;  %v1418_v54 = vmul.f32 %v8489_v56, %v8160_v16 }
  0xf9   :  { %v1419_v5 = vmul.f32 %v8501_v58, %v8084_v63  ;;  %v1576_v23 = vxor.u32 2147483648, %v1575_v22  ;;  %vm1759_vm13 = vc.u32 %v8558_v26, %v8552_v2  ;;  %v1405_v59 = vadd.f32 %v1404_v60, %v1403_v21 }
  0xfa   :  { %v1922_v61 = vadd.s32 1, %v7018_v43  ;;  %v1761_v55 = vsel %vm1759_vm13, %v1760_v28, %v8553_v49  ;;  %v1421_v7 = vmul.f32 %v8505_v19, %v8028_v17  ;;  %v1408_v51 = vmul.f32 %v8483_v42, %v8162_v24 }
  0xfb   :  { %v1420_v30 = vadd.f32 %v1419_v5, %v1418_v54  ;;  %v1762_v47 = vadd.s32 %v1761_v55, %v1757_v3  ;;  %v8586_v14 = vadd.f32 %v1406_v38, %v1405_v59  ;;  %v1409_v8 = vmul.f32 %v8493_v20, %v8125_v50 }
  0xfc   :  { %vm1923_vm14 = vcmp.gt.s32.totalorder %v1922_v61, 0  ;;  %v11780_v39 = vand.u32 2147483647, %v8043_v33  ;;  %v1919_v37 = vand.u32 8388607, %v11696_v11  ;;  %v1577_v6 = vsel %vm1494_vm11, %v1576_v23, %v1575_v22 }
  0xfd   :  { %v1924_v10 = vsel %vm1923_vm14, %v1922_v61, 0  ;;  %v8594_v29 = vadd.f32 %v1421_v7, %v1420_v30  ;;  %v1763_v53 = vadd.s32 536870912, %v1762_v47  ;;  %v8596_v42 = vadd.f32 %v1409_v8, %v1408_v51 }
  0xfe   :  { %vm1493_vm0 = vcmp.le.f32.partialorder %v11780_v39, 0.7853982  ;;  %v1926_v49 = vand.u32 31, %v1924_v10  ;;  %v1920_v21 = vor.u32 8388608, %v1919_v37  ;;  %v11781_v38 = vmov 683565275  }
  0xff   :  { %v1581_v62 = vsel %vm1493_vm0, 0, %v1579_v48  ;;  %v8600_v45 = vshrl.u32 %v1763_v53, 30  ;;  %v1580_v3 = vsel %vm1493_vm0, %v8043_v33, %v1577_v6  ;;  %v1925_v61 = vshrl.u32 %v1924_v10, 5 }
 0x100   :  { %v1927_v20 = vsub.s32 32, %v1926_v49  ;;  %v1585_v32 = vadd.s32 3, %v1581_v62  ;;  %v8604_v60 = vand.u32 3, %v1581_v62  ;;  %v1929_v48 = vshll.u32 %v11781_v38, %v1926_v49 }
 0x101   :  { %v1765_v43 = vshll.u32 %v8600_v45, 30  ;;  %v1932_v5 = vshll.u32 %v11774_v46, %v1926_v49  ;;  %7304 = vcosq.f32 %v1580_v3  ;;  %v1935_v33 = vshll.u32 %v11775_v34, %v1926_v49 }
 0x102   :  { %v1930_v54 = vshrl.u32 %v11774_v46, %v1927_v20  ;;  %v1933_v22 = vshrl.u32 %v11775_v34, %v1927_v20  ;;  %v8612_v23 = vand.u32 3, %v1585_v32  ;;  %7306 = vsinq.f32 %v1580_v3 }
 0x103   :  { %v8607_v28 = vsub.s32 %v1762_v47, %v1765_v43  ;;  %v1938_v55 = vshll.u32 %v11776_v41, %v1926_v49  ;;  %v8617_v30 = vshll.u32 %v1920_v21, 8  ;;  %v1928_v7 = vshrl.u32 %v11781_v38, %v1927_v20 }
 0x104   :  { %v1936_v51 = vshrl.u32 %v11776_v41, %v1927_v20  ;;  %v1939_v47 = vshrl.u32 %v11777_v35, %v1927_v20  ;;  %v1941_v8 = vshll.u32 %v11777_v35, %v1926_v49  ;;  %v1931_v37 = vor.u32 %v1930_v54, %v1929_v48 }
 0x105   :  { %v1768_v59 = vsub.s32 0, %v8607_v28  ;;  %v1934_v10 = vor.u32 %v1933_v22, %v1932_v5  ;;  %v1942_v62 = vshrl.u32 %v11778_v27, %v1927_v20  ;;  %v1758_v53 = vadd.s32 %v8552_v2, %v8558_v26 }
 0x106   :  { %v1937_v6 = vor.u32 %v1936_v51, %v1935_v33  ;;  %vm1944_vm2 = vcmp.lt.s32.totalorder %v1925_v61, 1  ;;  %v1411_v32 = vmul.f32 %v8499_v57, %v8032_v44  ;;  %vm1704_vm3 = vcmp.lt.s32.totalorder %v8206_v4, 0 }
 0x107   :  { %v7011_v39 = vmin.u32 %v1768_v59, %v8607_v28  ;;  %v1423_v49 = vmul.f32 %v8489_v56, %v8162_v24  ;;  %v1424_v43 = vmul.f32 %v8501_v58, %v8125_v50  ;;  %v1426_v20 = vmul.f32 %v8505_v19, %v8032_v44 }
 0x108   :  { %v1940_v21 = vor.u32 %v1939_v47, %v1938_v55  ;;  %v1943_v48 = vor.u32 %v1942_v62, %v1941_v8  ;;  %vm1945_vm4 = vcmp.lt.s32.totalorder %v1925_v61, 2  ;;  %vm1946_vm5 = vcmp.lt.s32.totalorder %v1925_v61, 3 }
 0x109   :  { %v1770_v3 = vclz %v7011_v39  ;;  %vm1591_vm6 = vcmp.eq.s32.totalorder %v8612_v23, 2  ;;  %vm1947_vm1 = vcmp.lt.s32.totalorder %v1925_v61, 4  ;;  %v1948_v57 = vsel %vm1944_vm2, %v1928_v7, %v1931_v37 }
 0x10a   :  { %v1952_v26 = vsel %vm1944_vm2, %v1931_v37, %v1934_v10  ;;  %vm1588_vm15 = vcmp.eq.s32.totalorder %v8612_v23, 0  ;;  %v11782_v56 = vand.u32 2147483647, %v8206_v4  ;;  %v1949_v19 = vsel %vm1947_vm1, %v1937_v6, 2102212464 }
 0x10b   :  { %v7012_v2 = vadd.s32 4294967294, %v1770_v3  ;;  %v1953_v54 = vsel %vm1947_vm1, %v1940_v21, 920167782  ;;  %v1956_v5 = vsel %vm1944_vm2, %v1934_v10, %v1937_v6  ;;  %v1957_v22 = vsel %vm1947_vm1, %v1943_v48, 1326507024  ;;  %v7305_v7 = vpop.eup %7304  ;;  %v8652_v48 = vld [vmem:[#allocation2 + $0x48] sm:$0xff] }
 0x10c   :  { %vm8642_vm7 = vcmp.le.f32.partialorder %v11782_v56, 0.7853982  ;;  %v1950_v33 = vsel %vm1946_vm5, %v1934_v10, %v1949_v19  ;;  %v1954_v59 = vsel %vm1946_vm5, %v1937_v6, %v1953_v54  ;;  %v1958_v55 = vsel %vm1946_vm5, %v1940_v21, %v1957_v22  ;;  %v7307_v37 = vpop.eup %7306 }
 0x10d   :  { %vm7013_vm8 = vcmp.lt.s32.totalorder %v7012_v2, 0  ;;  %v1788_v47 = vsub.s32 4, %v8600_v45  ;;  %v1955_v8 = vsel %vm1945_vm4, %v1952_v26, %v1954_v59  ;;  %v1959_v39 = vsel %vm1945_vm4, %v1956_v5, %v1958_v55 }
 0x10e   :  { %v1773_v51 = vsel %vm7013_vm8, 0, %v7012_v2  ;;  %v1951_v11 = vsel %vm1945_vm4, %v1948_v57, %v1950_v33  ;;  %v8655_v10 = vmul.u32.u64.low %v8617_v30, %v1959_v39  ;;  %v8656_v6 = vmul.u32.u64.high %v8617_v30, %v1959_v39, %v8655_v10 }
 0x10f   :  { %v1774_v62 = vsub.s32 32, %v1773_v51  ;;  %v1775_v3 = vshll.u32 %v8607_v28, %v1773_v51  ;;  %v1778_v56 = vsub.s32 4294967266, %v1773_v51  ;;  %v1592_v26 = vxor.u32 2147483648, %v7305_v7 }
 0x110   :  { %v8659_v21 = vmul.u32.u64.low %v8617_v30, %v1955_v8  ;;  %v8660_v2 = vmul.u32.u64.high %v8617_v30, %v1955_v8, %v8659_v21  ;;  %vm1691_vm9 = vcmp.eq.s32.totalorder %v8604_v60, 0  ;;  %v1789_v28 = vsel %vm1704_vm3, %v1788_v47, %v8600_v45  ;;  %v8685_v47 = vld [vmem:[#allocation2 + $0x50] sm:$0xff] }
 0x111   :  { %v1776_v19 = vshrl.u32 %v1758_v53, %v1774_v62  ;;  %v1779_v54 = vadd.s32 127, %v1778_v56  ;;  %v8668_v61 = vadd.f32 %v1411_v32, %v8596_v42  ;;  %v1425_v57 = vadd.f32 %v1424_v43, %v1423_v49  ;;  %11785 = vst [vmem:[#allocation27_spill] sm:$0xff] %v8685_v47 }
 0x112   :  { %v2213_v5 = vand.u32 2139095040, %v8652_v48  ;;  %v1589_v22 = vxor.u32 2147483648, %v7307_v37  ;;  %v1967_v55 = vmul.u32 %v8617_v30, %v1951_v11  ;;  %vm1694_vm10 = vcmp.eq.s32.totalorder %v8604_v60, 2 }
 0x113   :  { %v1777_v33 = vor.u32 %v1776_v19, %v1775_v3  ;;  %v1780_v59 = vshll.u32 %v1779_v54, 23  ;;  %vm1969_vm12 = vc.u32 %v8656_v6, %v8659_v21  ;;  %v1970_v53 = vadd.s32 1, %v8660_v2 }
 0x114   :  { %v8676_v51 = vadd.f32 %v1426_v20, %v1425_v57  ;;  %v1791_v32 = vsel %vm8642_vm7, 0, %v1789_v28  ;;  %v2214_v49 = vshrl.u32 %v2213_v5, 23  ;;  %vm1587_vm11 = vcmp.lt.s32.totalorder %v8612_v23, 2  ;;  %v7434_v57 = vld [vmem:[#allocation2 + $0x30] sm:$0xff] }
 0x115   :  { %v1781_v45 = vor.u32 4788187, %v1780_v59  ;;  %v1784_v42 = vcvt.s32.f32 %v1777_v33  ;;  %v1593_v11 = vsel %vm1591_vm6, %v1592_v26, %v7307_v37  ;;  %v1971_v30 = vsel %vm1969_vm12, %v1970_v53, %v8660_v2 }
 0x116   :  { %v11698_v43 = vand.u32 2147483647, %v8652_v48  ;;  %v1590_v20 = vsel %vm1588_vm15, %v7305_v7, %v1589_v22  ;;  %v1972_v39 = vadd.s32 %v1971_v30, %v1967_v55  ;;  %v7026_v62 = vadd.s32 4294967169, %v2214_v49  ;;  %v2164_v55 = vld [vmem:[#allocation2 + $0xd8] sm:$0xff] }
 0x117   :  { %v1782_v8 = vand.u32 2147483647, %v1781_v45  ;;  %vm1690_vm13 = vcmp.lt.s32.totalorder %v8604_v60, 2  ;;  %v1693_v3 = vsel %vm1691_vm9, %v7305_v7, %v1589_v22  ;;  %v1696_v56 = vsel %vm1694_vm10, %v1592_v26, %v7307_v37 }
 0x118   :  { %v1795_v10 = vadd.s32 3, %v1791_v32  ;;  %v1973_v19 = vadd.s32 536870912, %v1972_v39  ;;  %v2220_v54 = vadd.s32 1, %v7026_v62  ;;  %v2517_v28 = vand.u32 2139095040, %v8685_v47 }
 0x119   :  { %v1785_v2 = vmul.f32 %v1784_v42, %v1782_v8  ;;  %vm1584_vm14 = vweird.f32 %v7434_v57  ;;  %v1594_v5 = vsel %vm1587_vm11, %v1590_v20, %v1593_v11  ;;  %v2217_v7 = vand.u32 8388607, %v11698_v43 }
 0x11a   :  { %v1974_v59 = vshrl.u32 %v1973_v19, 30  ;;  %vm2221_vm0 = vcmp.gt.s32.totalorder %v2220_v54, 0  ;;  %v1697_v37 = vsel %vm1690_vm13, %v1693_v3, %v1696_v56  ;;  %v8701_v26 = vand.u32 3, %v1791_v32 }
 0x11b   :  { %v1786_v33 = vxor.u32 2147483648, %v1785_v2  ;;  %vm1914_vm2 = vcmp.lt.s32.totalorder %v8382_v12, 0  ;;  %v2222_v22 = vsel %vm2221_vm0, %v2220_v54, 0  ;;  %v8706_v23 = vand.u32 3, %v1795_v10 }
 0x11c   :  { %v1975_v45 = vshll.u32 %v1974_v59, 30  ;;  %v2518_v42 = vshrl.u32 %v2517_v28, 23  ;;  %v8709_v49 = vsel %vm1584_vm14, nan, %v1594_v5  ;;  %v11786_v32 = vand.u32 2147483647, %v8382_v12 }
 0x11d   :  { %v1787_v53 = vsel %vm1704_vm3, %v1786_v33, %v1785_v2  ;;  %v8721_v30 = vmul.f32 %v2164_v55, %v8327_v1  ;;  %v2224_v20 = vand.u32 31, %v2222_v22  ;;  %v8724_v8 = vsel %vm1584_vm14, nan, %v1697_v37 }
 0x11e   :  { %v1790_v60 = vsel %vm8642_vm7, %v8206_v4, %v1787_v53  ;;  %vm8716_vm4 = vcmp.le.f32.partialorder %v11786_v32, 0.7853982  ;;  %v8726_v62 = vsub.s32 %v1972_v39, %v1975_v45  ;;  %v2218_v3 = vor.u32 8388608, %v2217_v7 }
 0x11f   :  { %7308 = vcosq.f32 %v1790_v60  ;;  %v1998_v58 = vsub.s32 4, %v1974_v59  ;;  %v2225_v56 = vsub.s32 32, %v2224_v20  ;;  %v11697_v10 = vand.u32 2147483647, %v8685_v47 }
 0x120   :  { %7310 = vsinq.f32 %v1790_v60  ;;  %vm1801_vm3 = vcmp.eq.s32.totalorder %v8706_v23, 2  ;;  %vm1904_vm5 = vcmp.eq.s32.totalorder %v8701_v26, 2  ;;  %v1978_v1 = vsub.s32 0, %v8726_v62 }
 0x121   :  { %v8732_v2 = vshrl.u32 %v2222_v22, 5  ;;  %v7034_v19 = vadd.s32 4294967169, %v2518_v42  ;;  %vm1798_vm6 = vcmp.eq.s32.totalorder %v8706_v23, 0  ;;  %vm1901_vm1 = vcmp.eq.s32.totalorder %v8701_v26, 0 }
 0x122   :  { %v2227_v39 = vshll.u32 %v11781_v38, %v2224_v20  ;;  %v2228_v54 = vshrl.u32 %v11774_v46, %v2225_v56  ;;  %v2230_v28 = vshll.u32 %v11774_v46, %v2224_v20  ;;  %v2231_v57 = vshrl.u32 %v11775_v34, %v2225_v56 }
 0x123   :  { %vm1797_vm15 = vcmp.lt.s32.totalorder %v8706_v23, 2  ;;  %vm1900_vm7 = vcmp.lt.s32.totalorder %v8701_v26, 2  ;;  %v1968_v5 = vadd.s32 %v8659_v21, %v8656_v6  ;;  %v7019_v33 = vmin.u32 %v1978_v1, %v8726_v62 }
 0x124   :  { %v2129_v55 = vsub.f32 0.0, %v8709_v49  ;;  %v2233_v7 = vshll.u32 %v11775_v34, %v2224_v20  ;;  %v1999_v37 = vsel %vm1914_vm2, %v1998_v58, %v1974_v59  ;;  %v2234_v22 = vshrl.u32 %v11776_v41, %v2225_v56 }
 0x125   :  { %v8750_v53 = vshll.u32 %v2218_v3, 8  ;;  %v8754_v45 = vand.u32 8388607, %v11697_v10  ;;  %vm1794_vm8 = vweird.f32 %v8206_v4  ;;  %v1980_v6 = vclz %v7019_v33 }
 0x126   :  { %v2226_v21 = vshrl.u32 %v11781_v38, %v2225_v56  ;;  %vm2242_vm9 = vcmp.lt.s32.totalorder %v8732_v2, 1  ;;  %v8759_v42 = vadd.s32 1, %v7034_v19  ;;  %v2229_v60 = vor.u32 %v2228_v54, %v2227_v39 }
 0x127   :  { %v2232_v32 = vor.u32 %v2231_v57, %v2230_v28  ;;  %v2236_v59 = vshll.u32 %v11776_v41, %v2224_v20  ;;  %v2237_v3 = vshrl.u32 %v11777_v35, %v2225_v56  ;;  %v7020_v58 = vadd.s32 4294967294, %v1980_v6 }
 0x128   :  { %v8765_v1 = vsel %vm8716_vm4, 0, %v1999_v37  ;;  %v2235_v10 = vor.u32 %v2234_v22, %v2233_v7  ;;  %v2239_v33 = vshll.u32 %v11777_v35, %v2224_v20  ;;  %v2240_v44 = vshrl.u32 %v11778_v27, %v2225_v56 }
 0x129   :  { %v2238_v43 = vor.u32 %v2237_v3, %v2236_v59  ;;  %vm2243_vm10 = vcmp.lt.s32.totalorder %v8732_v2, 2  ;;  %vm2245_vm12 = vcmp.lt.s32.totalorder %v8732_v2, 4  ;;  %v7309_v19 = vpop.eup %7308  ;;  %vm7021_vm11 = vcmp.lt.s32.totalorder %v7020_v58, 0 }
 0x12a   :  { %vm2244_vm13 = vcmp.lt.s32.totalorder %v8732_v2, 3  ;;  %v2246_v39 = vsel %vm2242_vm9, %v2226_v21, %v2229_v60  ;;  %v2247_v54 = vsel %vm2245_vm12, %v2235_v10, 2102212464  ;;  %v7311_v28 = vpop.eup %7310  ;;  %v1802_v57 = vxor.u32 2147483648, %v7309_v19 }
 0x12b   :  { %v1983_v20 = vsel %vm7021_vm11, 0, %v7020_v58  ;;  %v2248_v56 = vsel %vm2244_vm13, %v2232_v32, %v2247_v54  ;;  %v2250_v7 = vsel %vm2242_vm9, %v2229_v60, %v2232_v32  ;;  %v1799_v37 = vxor.u32 2147483648, %v7311_v28 }
 0x12c   :  { %v1984_v22 = vsub.s32 32, %v1983_v20  ;;  %v1985_v6 = vshll.u32 %v8726_v62, %v1983_v20  ;;  %v1988_v59 = vsub.s32 4294967266, %v1983_v20  ;;  %v1803_v21 = vsel %vm1801_vm3, %v1802_v57, %v7311_v28 }
 0x12d   :  { %v1906_v3 = vsel %vm1904_vm5, %v1802_v57, %v7311_v28  ;;  %v2241_v50 = vor.u32 %v2240_v44, %v2239_v33  ;;  %v2251_v58 = vsel %vm2245_vm12, %v2238_v43, 920167782  ;;  %v1800_v54 = vsel %vm1798_vm6, %v7309_v19, %v1799_v37 }
 0x12e   :  { %v1903_v60 = vsel %vm1901_vm1, %v7309_v19, %v1799_v37  ;;  %v1986_v17 = vshrl.u32 %v1968_v5, %v1984_v22  ;;  %v1989_v24 = vadd.s32 127, %v1988_v59  ;;  %v1804_v62 = vsel %vm1797_vm15, %v1800_v54, %v1803_v21 }
 0x12f   :  { %v1907_v20 = vsel %vm1900_vm7, %v1903_v60, %v1906_v3  ;;  %v8797_v44 = vsel %vm2243_vm10, %v2246_v39, %v2248_v56  ;;  %v2254_v33 = vsel %vm2242_vm9, %v2232_v32, %v2235_v10  ;;  %v2252_v23 = vsel %vm2244_vm13, %v2235_v10, %v2251_v58 }
 0x130   :  { %v8803_v28 = vsel %vm1794_vm8, nan, %v1907_v20  ;;  %v1987_v19 = vor.u32 %v1986_v17, %v1985_v6  ;;  %v1990_v5 = vshll.u32 %v1989_v24, 23  ;;  %v8809_v26 = vsel %vm1794_vm8, nan, %v1804_v62 }
 0x131   :  { %v2130_v57 = vmul.f32 %v2129_v55, %v8803_v28  ;;  %v2131_v39 = vmul.f32 %v8803_v28, %v8724_v8  ;;  %v2255_v32 = vsel %vm2245_vm12, %v2241_v50, 1326507024  ;;  %v2147_v17 = vmul.f32 %v8809_v26, %v8518_v31 }
 0x132   :  { %v1991_v56 = vor.u32 4788187, %v1990_v5  ;;  %v1994_v37 = vcvt.s32.f32 %v1987_v19  ;;  %v2152_v24 = vmul.f32 %v8809_v26, %v8586_v14  ;;  %v2157_v50 = vmul.f32 %v8809_v26, %v8668_v61  ;;  %v8835_v5 = vld [vmem:[#allocation2 + $0x58] sm:$0xff] }
 0x133   :  { %v2148_v4 = vmul.f32 %v2130_v57, %v8528_v52  ;;  %v2150_v10 = vmul.f32 %v2131_v39, %v8349_v36  ;;  %v2153_v55 = vmul.f32 %v2130_v57, %v8594_v29  ;;  %v2155_v22 = vmul.f32 %v2131_v39, %v8351_v13 }
 0x134   :  { %v1992_v6 = vand.u32 2147483647, %v1991_v56  ;;  %v2158_v59 = vmul.f32 %v2130_v57, %v8676_v51  ;;  %v2160_v21 = vmul.f32 %v2131_v39, %v8356_v40  ;;  %v2253_v54 = vsel %vm2243_vm10, %v2250_v7, %v2252_v23 }
 0x135   :  { %v2149_v3 = vadd.f32 %v2148_v4, %v2147_v17  ;;  %v2154_v58 = vadd.f32 %v2153_v55, %v2152_v24  ;;  %v2256_v60 = vsel %vm2244_vm13, %v2238_v43, %v2255_v32  ;;  %vm2525_vm14 = vcmp.gt.s32.totalorder %v8759_v42, 0 }
 0x136   :  { %v1995_v62 = vmul.f32 %v1994_v37, %v1992_v6  ;;  %v2159_v20 = vadd.f32 %v2158_v59, %v2157_v50  ;;  %v2257_v19 = vsel %vm2243_vm10, %v2254_v33, %v2256_v60  ;;  %v2522_v37 = vor.u32 8388608, %v8754_v45  ;;  %v11796_v60 = vld [vmem:[#allocation21_spill] sm:$0xff] }
 0x137   :  { %v8837_v57 = vadd.f32 %v2150_v10, %v2149_v3  ;;  %v8839_v39 = vadd.f32 %v2155_v22, %v2154_v58  ;;  %v8842_v56 = vmul.u32.u64.low %v8750_v53, %v2257_v19  ;;  %v8843_v17 = vmul.u32.u64.high %v8750_v53, %v2257_v19, %v8842_v56  ;;  %v11795_v58 = vld [vmem:[#allocation25_spill] sm:$0xff] }
 0x138   :  { %v1996_v7 = vxor.u32 2147483648, %v1995_v62  ;;  %v8845_v23 = vadd.f32 %v2160_v21, %v2159_v20  ;;  %v8848_v43 = vmul.u32.u64.low %v8750_v53, %v2253_v54  ;;  %v8849_v32 = vmul.u32.u64.high %v8750_v53, %v2253_v54, %v8848_v43  ;;  %v11790_v21 = vld [vmem:[#allocation17_spill] sm:$0xff]  ;;  %v11797_v20 = vld [vmem:[#allocation22_spill] sm:$0xff]  ;;  %v11798_v56 = vld [vmem:[#allocation23_spill] sm:$0xff] }
 0x139   :  { %v2166_v2 = vmul.f32 %v8721_v30, %v8837_v57  ;;  %v2168_v33 = vmul.f32 %v8721_v30, %v8839_v39  ;;  %v2726_v24 = vand.u32 2139095040, %v8835_v5  ;;  %v2005_v10 = vadd.s32 3, %v8765_v1 }
 0x13a   :  { %v1997_v4 = vsel %vm1914_vm2, %v1996_v7, %v1995_v62  ;;  %v2170_v55 = vmul.f32 %v8721_v30, %v8845_v23  ;;  %v2265_v22 = vmul.u32 %v8750_v53, %v8797_v44  ;;  %v2526_v59 = vsel %vm2525_vm14, %v8759_v42, 0  ;;  %v11793_v53 = vld [vmem:[#allocation19_spill] sm:$0xff]  ;;  %v11794_v44 = vld [vmem:[#allocation20_spill] sm:$0xff] }
 0x13b   :  { %v2000_v6 = vsel %vm8716_vm4, %v8382_v12, %v1997_v4  ;;  %v8869_v50 = vadd.f32 %v2166_v2, %v8373_v9  ;;  %v8872_v45 = vadd.f32 %v2168_v33, %v8375_v15  ;;  %vm2267_vm0 = vc.u32 %v8843_v17, %v8848_v43  ;;  %v11792_v9 = vld [vmem:[#allocation18_spill] sm:$0xff]  ;;  %v11799_v33 = vld [vmem:[#allocation24_spill] sm:$0xff] }
 0x13c   :  { %7312 = vcosq.f32 %v2000_v6  ;;  %v8878_v30 = vadd.f32 %v2170_v55, %v11790_v21  ;;  %v2268_v11 = vadd.s32 1, %v8849_v32  ;;  %v11800_v55 = vld [vmem:[#allocation26_spill] sm:$0xff]  ;;  %vm2004_vm2 = vweird.f32 %v8382_v12 }
 0x13d   :  { %11789 = vst [vmem:[#allocation28_spill] sm:$0xff] %v8872_v45  ;;  %7314 = vsinq.f32 %v2000_v6  ;;  %2174 = vst [vmem:[#allocation5 + $0x48] sm:$0xff] %v8869_v50  ;;  %v2181_v15 = vmul.f32 %v11792_v9, %v8869_v50  ;;  %v2182_v42 = vmul.f32 %v11793_v53, %v8872_v45  ;;  %v2191_v3 = vmul.f32 %v11794_v44, %v8869_v50 }
 0x13e   :  { %11791 = vst [vmem:[#allocation17_spill] sm:$0xff] %v8878_v30  ;;  %2177 = vst [vmem:[#allocation5 + $0x50] sm:$0xff] %v8872_v45  ;;  %v2184_v54 = vmul.f32 %v11795_v58, %v8878_v30  ;;  %v2192_v62 = vmul.f32 %v11796_v60, %v8872_v45  ;;  %v2194_v19 = vmul.f32 %v11797_v20, %v8878_v30  ;;  %v2109_v9 = vand.u32 3, %v8765_v1 }
 0x13f   :  { %2180 = vst [vmem:[#allocation5 + $0x58] sm:$0xff] %v8878_v30  ;;  %v2186_v7 = vmul.f32 %v11798_v56, %v8869_v50  ;;  %v2183_v2 = vadd.f32 %v2182_v42, %v2181_v15  ;;  %v2187_v4 = vmul.f32 %v11799_v33, %v8872_v45  ;;  %v2189_v6 = vmul.f32 %v11800_v55, %v8878_v30 }
 0x140   :  { %v2269_v21 = vsel %vm2267_vm0, %v2268_v11, %v8849_v32  ;;  %v2193_v53 = vadd.f32 %v2192_v62, %v2191_v3  ;;  %v2006_v58 = vand.u32 3, %v2005_v10  ;;  %v2528_v15 = vand.u32 31, %v2526_v59 }
 0x141   :  { %v2270_v44 = vadd.s32 %v2269_v21, %v2265_v22  ;;  %v8909_v60 = vadd.f32 %v2184_v54, %v2183_v2  ;;  %v2188_v20 = vadd.f32 %v2187_v4, %v2186_v7  ;;  %v2727_v33 = vshrl.u32 %v2726_v24, 23 }
 0x142   :  { %v2195_v42 = vadd.f32 %v2194_v19, %v2193_v53  ;;  %v8915_v0 = vshll.u32 %v2522_v37, 8  ;;  %vm2110_vm4 = vcmp.lt.s32.totalorder %v2109_v9, 2  ;;  %vm2111_vm3 = vcmp.eq.s32.totalorder %v2109_v9, 0 }
 0x143   :  { %v2271_v56 = vadd.s32 536870912, %v2270_v44  ;;  %v8913_v16 = vadd.f32 %v2189_v6, %v2188_v20  ;;  %vm2007_vm5 = vcmp.lt.s32.totalorder %v2006_v58, 2  ;;  %vm2008_vm6 = vcmp.eq.s32.totalorder %v2006_v58, 0 }
 0x144   :  { %7316 = vrcp.f32 %v2195_v42  ;;  %vm2114_vm1 = vcmp.eq.s32.totalorder %v2109_v9, 2  ;;  %v2529_v32 = vsub.s32 32, %v2528_v15  ;;  %vm2011_vm15 = vcmp.eq.s32.totalorder %v2006_v58, 2 }
 0x145   :  { %v8917_v1 = vshrl.u32 %v2271_v56, 30  ;;  %v2120_v24 = vmul.f32 %v8809_v26, %v8709_v49  ;;  %v8922_v11 = vadd.s32 4294967169, %v2727_v33  ;;  %v2266_v54 = vadd.s32 %v8848_v43, %v8843_v17 }
 0x146   :  { %v7313_v10 = vpop.eup %7312  ;;  %v8926_v62 = vshrl.u32 %v2526_v59, 5  ;;  %v2531_v19 = vshll.u32 %v11781_v38, %v2528_v15  ;;  %v2534_v4 = vshll.u32 %v11774_v46, %v2528_v15  ;;  %v2537_v6 = vshll.u32 %v11775_v34, %v2528_v15 }
 0x147   :  { %v2273_v22 = vshll.u32 %v8917_v1, 30  ;;  %v7315_v37 = vpop.eup %7314  ;;  %v2012_v3 = vxor.u32 2147483648, %v7313_v10  ;;  %v2532_v20 = vshrl.u32 %v11774_v46, %v2529_v32  ;;  %v2535_v56 = vshrl.u32 %v11775_v34, %v2529_v32 }
 0x148   :  { %v2009_v7 = vxor.u32 2147483648, %v7315_v37  ;;  %v2540_v55 = vshll.u32 %v11776_v41, %v2528_v15  ;;  %vm2212_vm7 = vcmp.lt.s32.totalorder %v8652_v48, 0  ;;  %v2296_v47 = vsub.s32 4, %v8917_v1 }
 0x149   :  { %v8929_v2 = vsub.s32 %v2270_v44, %v2273_v22  ;;  %v2013_v21 = vsel %vm2011_vm15, %v2012_v3, %v7315_v37  ;;  %v2116_v53 = vsel %vm2114_vm1, %v2012_v3, %v7315_v37  ;;  %v2538_v44 = vshrl.u32 %v11776_v41, %v2529_v32 }
 0x14a   :  { %v2010_v17 = vsel %vm2008_vm6, %v7313_v10, %v2009_v7  ;;  %v2113_v43 = vsel %vm2111_vm3, %v7313_v10, %v2009_v7  ;;  %v2541_v37 = vshrl.u32 %v11777_v35, %v2529_v32  ;;  %v2543_v7 = vshll.u32 %v11777_v35, %v2528_v15 }
 0x14b   :  { %v2276_v59 = vsub.s32 0, %v8929_v2  ;;  %v2014_v33 = vsel %vm2007_vm5, %v2010_v17, %v2013_v21  ;;  %v2117_v22 = vsel %vm2110_vm4, %v2113_v43, %v2116_v53  ;;  %v2544_v53 = vshrl.u32 %v11778_v27, %v2529_v32 }
 0x14c   :  { %v8946_v3 = vsel %vm2004_vm2, nan, %v2014_v33  ;;  %v8950_v63 = vsel %vm2004_vm2, nan, %v2117_v22  ;;  %v2530_v43 = vshrl.u32 %v11781_v38, %v2529_v32  ;;  %v2533_v33 = vor.u32 %v2532_v20, %v2531_v19 }
 0x14d   :  { %v7027_v10 = vmin.u32 %v2276_v59, %v8929_v2  ;;  %v2119_v9 = vmul.f32 %v8950_v63, %v8803_v28  ;;  %v2122_v58 = vmul.f32 %v8946_v3, %v8724_v8  ;;  %v2121_v21 = vmul.f32 %v2120_v24, %v8950_v63 }
 0x14e   :  { %v7317_v17 = vpop.eup %7316  ;;  %v2536_v59 = vor.u32 %v2535_v56, %v2534_v4  ;;  %v2539_v28 = vor.u32 %v2538_v44, %v2537_v6  ;;  %v2542_v30 = vor.u32 %v2541_v37, %v2540_v55  ;;  %vm2546_vm8 = vcmp.lt.s32.totalorder %v8926_v62, 1 }
 0x14f   :  { %v2278_v12 = vclz %v7027_v10  ;;  %v2197_v22 = vmul.f32 %v7317_v17, %v2195_v42  ;;  %v2123_v15 = vadd.f32 %v2122_v58, %v2121_v21  ;;  %v2132_v25 = vmul.f32 %v2119_v9, %v8518_v31 }
 0x150   :  { %v11801_v10 = vand.u32 2147483647, %v8652_v48  ;;  %v2137_v42 = vmul.f32 %v2119_v9, %v8586_v14  ;;  %v2545_v19 = vor.u32 %v2544_v53, %v2543_v7  ;;  %vm2548_vm12 = vcmp.lt.s32.totalorder %v8926_v62, 3 }
 0x151   :  { %v7028_v18 = vadd.s32 4294967294, %v2278_v12  ;;  %v2198_v24 = vsub.f32 2.0, %v2197_v22  ;;  %v2133_v45 = vmul.f32 %v2123_v15, %v8528_v52  ;;  %v2138_v31 = vmul.f32 %v2123_v15, %v8594_v29 }
 0x152   :  { %vm8968_vm9 = vcmp.le.f32.partialorder %v11801_v10, 0.7853982  ;;  %vm2549_vm11 = vcmp.lt.s32.totalorder %v8926_v62, 4  ;;  %v2142_v6 = vmul.f32 %v2119_v9, %v8668_v61  ;;  %v2143_v7 = vmul.f32 %v2123_v15, %v8676_v51  ;;  %v2428_v10 = vld [vmem:[#allocation2 + $0xe0] sm:$0xff] }
 0x153   :  { %vm7029_vm10 = vcmp.lt.s32.totalorder %v7028_v18, 0  ;;  %v2199_v55 = vmul.f32 %v7317_v17, %v2198_v24  ;;  %v8976_v4 = vadd.f32 %v2133_v45, %v2132_v25  ;;  %v8980_v37 = vadd.f32 %v2138_v31, %v2137_v42 }
 0x154   :  { %v2281_v52 = vsel %vm7029_vm10, 0, %v7028_v18  ;;  %v2551_v58 = vsel %vm2549_vm11, %v2539_v28, 2102212464  ;;  %v2297_v18 = vsel %vm2212_vm7, %v2296_v47, %v8917_v1  ;;  %vm2547_vm13 = vcmp.lt.s32.totalorder %v8926_v62, 2 }
 0x155   :  { %v2282_v20 = vsub.s32 32, %v2281_v52  ;;  %v2283_v56 = vshll.u32 %v8929_v2, %v2281_v52  ;;  %v2286_v44 = vsub.s32 4294967266, %v2281_v52  ;;  %v2200_v14 = vmul.f32 %v2199_v55, %v8909_v60  ;;  %v2471_v52 = vld [vmem:[#allocation2 + $0xe8] sm:$0xff] }
 0x156   :  { %v2204_v29 = vmul.f32 %v2199_v55, %v8913_v16  ;;  %v8991_v61 = vadd.f32 %v2143_v7, %v2142_v6  ;;  %v2550_v16 = vsel %vm2546_vm8, %v2530_v43, %v2533_v33  ;;  %v2554_v51 = vsel %vm2546_vm8, %v2533_v33, %v2536_v59 }
 0x157   :  { %v2284_v25 = vshrl.u32 %v2266_v54, %v2282_v20  ;;  %v2287_v45 = vadd.s32 127, %v2286_v44  ;;  %2203 = vst [vmem:[#allocation5 + $0x228] sm:$0xff] %v2200_v14  ;;  %v2555_v60 = vsel %vm2549_vm11, %v2542_v30, 920167782  ;;  %v2552_v47 = vsel %vm2548_vm12, %v2536_v59, %v2551_v58 }
 0x158   :  { %2207 = vst [vmem:[#allocation5 + $0x230] sm:$0xff] %v2204_v29  ;;  %v2556_v1 = vsel %vm2548_vm12, %v2539_v28, %v2555_v60  ;;  %v11804_v9 = vsub.f32 0.0, %v8724_v8  ;;  %v2558_v17 = vsel %vm2546_vm8, %v2536_v59, %v2539_v28  ;;  %v2559_v12 = vsel %vm2549_vm11, %v2545_v19, 1326507024 }
 0x159   :  { %v2285_v54 = vor.u32 %v2284_v25, %v2283_v56  ;;  %v2288_v2 = vshll.u32 %v2287_v45, 23  ;;  %v2557_v53 = vsel %vm2547_vm13, %v2554_v51, %v2556_v1  ;;  %v2299_v22 = vsel %vm8968_vm9, 0, %v2297_v18  ;;  %v9034_v56 = vld [vmem:[#allocation2 + $0x170] sm:$0xff] }
 0x15a   :  { %v2125_v21 = vmul.f32 %v11804_v9, %v8809_v26  ;;  %v2560_v15 = vsel %vm2548_vm12, %v2542_v30, %v2559_v12  ;;  %v2553_v8 = vsel %vm2547_vm13, %v2550_v16, %v2552_v47  ;;  %v2733_v31 = vadd.s32 1, %v8922_v11  ;;  %v9040_v11 = vld [vmem:[#allocation2 + $0x60] sm:$0xff] }
 0x15b   :  { %v2289_v43 = vor.u32 4788187, %v2288_v2  ;;  %v2292_v33 = vcvt.s32.f32 %v2285_v54  ;;  %v2561_v26 = vsel %vm2547_vm13, %v2558_v17, %v2560_v15  ;;  %v2303_v55 = vadd.s32 3, %v2299_v22 }
 0x15c   :  { %v9021_v24 = vmul.u32.u64.low %v8915_v0, %v2557_v53  ;;  %v9022_v59 = vmul.u32.u64.high %v8915_v0, %v2557_v53, %v9021_v24  ;;  %v9026_v42 = vmul.u32.u64.low %v8915_v0, %v2561_v26  ;;  %v9027_v19 = vmul.u32.u64.high %v8915_v0, %v2561_v26, %v9026_v42 }
 0x15d   :  { %v2290_v28 = vand.u32 2147483647, %v2289_v43  ;;  %v2126_v30 = vmul.f32 %v2125_v21, %v8950_v63  ;;  %v2127_v62 = vmul.f32 %v8946_v3, %v8709_v49  ;;  %v2569_v20 = vmul.u32 %v8915_v0, %v2553_v8 }
 0x15e   :  { %vm2734_vm14 = vcmp.gt.s32.totalorder %v2733_v31, 0  ;;  %v9037_v44 = vmul.f32 %v9034_v56, %v2428_v10  ;;  %v2572_v14 = vadd.s32 1, %v9022_v59  ;;  %v9043_v7 = vmul.f32 %v9034_v56, %v2471_v52 }
 0x15f   :  { %v2293_v6 = vmul.f32 %v2292_v33, %v2290_v28  ;;  %v2735_v29 = vsel %vm2734_vm14, %v2733_v31, 0  ;;  %vm2571_vm0 = vc.u32 %v9027_v19, %v9021_v24  ;;  %v2723_v0 = vand.u32 2147483647, %v8835_v5 }
 0x160   :  { %v9048_v49 = vand.u32 3, %v2303_v55  ;;  %v9050_v3 = vand.u32 3, %v2299_v22  ;;  %v2573_v58 = vsel %vm2571_vm0, %v2572_v14, %v9022_v59  ;;  %v2737_v25 = vand.u32 31, %v2735_v29 }
 0x161   :  { %v2294_v63 = vxor.u32 2147483648, %v2293_v6  ;;  %v2128_v45 = vadd.f32 %v2127_v62, %v2126_v30  ;;  %v2574_v16 = vadd.s32 %v2573_v58, %v2569_v20  ;;  %v3007_v51 = vand.u32 2139095040, %v9040_v11 }
 0x162   :  { %v9059_v54 = vshrl.u32 %v2735_v29, 5  ;;  %v2738_v2 = vsub.s32 32, %v2737_v25  ;;  %v2740_v47 = vshll.u32 %v11781_v38, %v2737_v25  ;;  %v2746_v9 = vshll.u32 %v11775_v34, %v2737_v25 }
 0x163   :  { %v2295_v18 = vsel %vm2212_vm7, %v2294_v63, %v2293_v6  ;;  %v2575_v1 = vadd.s32 536870912, %v2574_v16  ;;  %v2749_v21 = vshll.u32 %v11776_v41, %v2737_v25  ;;  %v2743_v17 = vshll.u32 %v11774_v46, %v2737_v25 }
 0x164   :  { %v2298_v60 = vsel %vm8968_vm9, %v8652_v48, %v2295_v18  ;;  %v2741_v53 = vshrl.u32 %v11774_v46, %v2738_v2  ;;  %v2744_v12 = vshrl.u32 %v11775_v34, %v2738_v2  ;;  %vm2309_vm2 = vcmp.eq.s32.totalorder %v9048_v49, 2 }
 0x165   :  { %7318 = vcosq.f32 %v2298_v60  ;;  %vm2412_vm4 = vcmp.eq.s32.totalorder %v9050_v3, 2  ;;  %v9069_v32 = vshrl.u32 %v2575_v1, 30  ;;  %v2747_v43 = vshrl.u32 %v11776_v41, %v2738_v2 }
 0x166   :  { %7320 = vsinq.f32 %v2298_v60  ;;  %v2750_v33 = vshrl.u32 %v11777_v35, %v2738_v2  ;;  %v2752_v22 = vshll.u32 %v11777_v35, %v2737_v25  ;;  %v2135_v15 = vmul.f32 %v2128_v45, %v8349_v36 }
 0x167   :  { %vm2306_vm3 = vcmp.eq.s32.totalorder %v9048_v49, 0  ;;  %vm2409_vm5 = vcmp.eq.s32.totalorder %v9050_v3, 0  ;;  %v2140_v8 = vmul.f32 %v2128_v45, %v8351_v13  ;;  %v2730_v26 = vand.u32 8388607, %v2723_v0 }
 0x168   :  { %v2753_v59 = vshrl.u32 %v11778_v27, %v2738_v2  ;;  %vm2305_vm6 = vcmp.lt.s32.totalorder %v9048_v49, 2  ;;  %vm2408_vm1 = vcmp.lt.s32.totalorder %v9050_v3, 2  ;;  %v2577_v28 = vshll.u32 %v9069_v32, 30 }
 0x169   :  { %v2739_v10 = vshrl.u32 %v11781_v38, %v2738_v2  ;;  %v2748_v36 = vor.u32 %v2747_v43, %v2746_v9  ;;  %v2751_v42 = vor.u32 %v2750_v33, %v2749_v21  ;;  %vm2302_vm15 = vweird.f32 %v8652_v48 }
 0x16a   :  { %v2742_v31 = vor.u32 %v2741_v53, %v2740_v47  ;;  %v2745_v30 = vor.u32 %v2744_v12, %v2743_v17  ;;  %v2754_v13 = vor.u32 %v2753_v59, %v2752_v22  ;;  %vm2758_vm7 = vcmp.lt.s32.totalorder %v9059_v54, 4 }
 0x16b   :  { %v9087_v55 = vsub.s32 %v2574_v16, %v2577_v28  ;;  %vm2755_vm8 = vcmp.lt.s32.totalorder %v9059_v54, 1  ;;  %v2760_v52 = vsel %vm2758_vm7, %v2748_v36, 2102212464  ;;  %v3008_v62 = vshrl.u32 %v3007_v51, 23 }
 0x16c   :  { %v2145_v6 = vmul.f32 %v2128_v45, %v8356_v40  ;;  %v2731_v20 = vor.u32 8388608, %v2730_v26  ;;  %vm2757_vm9 = vcmp.lt.s32.totalorder %v9059_v54, 3  ;;  %v2764_v14 = vsel %vm2758_vm7, %v2751_v42, 920167782 }
 0x16d   :  { %v2136_v29 = vadd.f32 %v2135_v15, %v8976_v4  ;;  %v2141_v63 = vadd.f32 %v2140_v8, %v8980_v37  ;;  %v2580_v58 = vsub.s32 0, %v9087_v55  ;;  %vm2756_vm10 = vcmp.lt.s32.totalorder %v9059_v54, 2 }
 0x16e   :  { %v2759_v25 = vsel %vm2755_vm8, %v2739_v10, %v2742_v31  ;;  %v2761_v40 = vsel %vm2757_vm9, %v2745_v30, %v2760_v52  ;;  %v2763_v45 = vsel %vm2755_vm8, %v2742_v31, %v2745_v30  ;;  %v2768_v18 = vsel %vm2758_vm7, %v2754_v13, 1326507024 }
 0x16f   :  { %v7319_v16 = vpop.eup %7318  ;;  %v7035_v4 = vmin.u32 %v2580_v58, %v9087_v55  ;;  %v2765_v37 = vsel %vm2757_vm9, %v2748_v36, %v2764_v14  ;;  %v2767_v51 = vsel %vm2755_vm8, %v2745_v30, %v2748_v36  ;;  %v7050_v60 = vadd.s32 4294967169, %v3008_v62 }
 0x170   :  { %v7321_v2 = vpop.eup %7320  ;;  %v2310_v47 = vxor.u32 2147483648, %v7319_v16  ;;  %v2146_v1 = vadd.f32 %v2145_v6, %v8991_v61  ;;  %v2769_v9 = vsel %vm2757_vm9, %v2751_v42, %v2768_v18  ;;  %v9116_v21 = vshll.u32 %v2731_v20, 8 }
 0x171   :  { %v2307_v53 = vxor.u32 2147483648, %v7321_v2  ;;  %v2570_v17 = vadd.s32 %v9021_v24, %v9027_v19  ;;  %v2582_v12 = vclz %v7035_v4  ;;  %v9122_v43 = vsel %vm2756_vm10, %v2759_v25, %v2761_v40 }
 0x172   :  { %v2311_v33 = vsel %vm2309_vm2, %v2310_v47, %v7321_v2  ;;  %v2414_v61 = vsel %vm2412_vm4, %v2310_v47, %v7321_v2  ;;  %v2766_v22 = vsel %vm2756_vm10, %v2763_v45, %v2765_v37  ;;  %v2770_v15 = vsel %vm2756_vm10, %v2767_v51, %v2769_v9  ;;  %v11805_v51 = vld [vmem:[#allocation28_spill] sm:$0xff]  ;;  %v11806_v47 = vld [vmem:[#allocation17_spill] sm:$0xff] }
 0x173   :  { %v2308_v24 = vsel %vm2306_vm3, %v7319_v16, %v2307_v53  ;;  %v2411_v19 = vsel %vm2409_vm5, %v7319_v16, %v2307_v53  ;;  %v7036_v8 = vadd.s32 4294967294, %v2582_v12  ;;  %v3014_v26 = vadd.s32 1, %v7050_v60 }
 0x174   :  { %v2312_v59 = vsel %vm2305_vm6, %v2308_v24, %v2311_v33  ;;  %v2415_v28 = vsel %vm2408_vm1, %v2411_v19, %v2414_v61  ;;  %v9141_v10 = vmul.u32.u64.low %v9116_v21, %v2770_v15  ;;  %v9142_v36 = vmul.u32.u64.high %v9116_v21, %v2770_v15, %v9141_v10  ;;  %v9185_v24 = vld [vmem:[#allocation2 + $0x1a0] sm:$0xff] }
 0x175   :  { %v2313_v54 = vsel %vm2302_vm15, nan, %v2312_v59  ;;  %v2416_v42 = vsel %vm2302_vm15, nan, %v2415_v28  ;;  %vm7037_vm12 = vcmp.lt.s32.totalorder %v7036_v8, 0  ;;  %v2778_v31 = vmul.u32 %v9116_v21, %v9122_v43  ;;  %v9191_v59 = vld [vmem:[#allocation2 + $0x1a8] sm:$0xff]  ;;  %v9194_v10 = vld [vmem:[#allocation2 + $0x1b0] sm:$0xff] }
 0x176   :  { %v2417_v30 = vmul.f32 %v2313_v54, %v2136_v29  ;;  %v2418_v49 = vmul.f32 %v2416_v42, %v8837_v57  ;;  %v2420_v13 = vmul.f32 %v2313_v54, %v2141_v63  ;;  %v2421_v3 = vmul.f32 %v2416_v42, %v8839_v39 }
 0x177   :  { %v2423_v52 = vmul.f32 %v2313_v54, %v2146_v1  ;;  %v2424_v62 = vmul.f32 %v2416_v42, %v8845_v23  ;;  %v2585_v6 = vsel %vm7037_vm12, 0, %v7036_v8  ;;  %vm3015_vm11 = vcmp.gt.s32.totalorder %v3014_v26, 0  ;;  %v9188_v8 = vld [vmem:[#allocation2 + $0x1d0] sm:$0xff] }
 0x178   :  { %v2419_v20 = vadd.f32 %v2418_v49, %v2417_v30  ;;  %v2422_v14 = vadd.f32 %v2421_v3, %v2420_v13  ;;  %v2586_v58 = vsub.s32 32, %v2585_v6  ;;  %v2587_v48 = vshll.u32 %v9087_v55, %v2585_v6  ;;  %v9197_v49 = vld [vmem:[#allocation2 + $0x1b8] sm:$0xff] }
 0x179   :  { %v2425_v25 = vadd.f32 %v2424_v62, %v2423_v52  ;;  %v2590_v40 = vsub.s32 4294967266, %v2585_v6  ;;  %v9155_v45 = vmul.u32.u64.low %v9116_v21, %v2766_v22  ;;  %v9156_v29 = vmul.u32.u64.high %v9116_v21, %v2766_v22, %v9155_v45  ;;  %v9182_v22 = vld [vmem:[#allocation2 + $0x1c8] sm:$0xff] }
 0x17a   :  { %v2430_v57 = vmul.f32 %v9037_v44, %v2419_v20  ;;  %v2432_v39 = vmul.f32 %v9037_v44, %v2422_v14  ;;  %v2473_v23 = vmul.f32 %v9043_v7, %v2419_v20  ;;  %v9162_v63 = vsel %vm3015_vm11, %v3014_v26, 0 }
 0x17b   :  { %v2434_v18 = vmul.f32 %v9037_v44, %v2425_v25  ;;  %v2475_v16 = vmul.f32 %v9043_v7, %v2422_v14  ;;  %v2588_v55 = vshrl.u32 %v2570_v17, %v2586_v58  ;;  %v2591_v4 = vadd.s32 127, %v2590_v40  ;;  %v9173_v44 = vld [vmem:[#allocation2 + $0x190] sm:$0xff] }
 0x17c   :  { %v2431_v37 = vadd.f32 %v2430_v57, %v8869_v50  ;;  %v2433_v60 = vadd.f32 %v2432_v39, %v11805_v51  ;;  %v2477_v2 = vmul.f32 %v9043_v7, %v2425_v25  ;;  %vm2780_vm13 = vc.u32 %v9142_v36, %v9155_v45  ;;  %v9176_v50 = vld [vmem:[#allocation2 + $0x198] sm:$0xff]  ;;  %v9179_v7 = vld [vmem:[#allocation2 + $0x1c0] sm:$0xff] }
 0x17d   :  { %v2435_v1 = vadd.f32 %v2434_v18, %v11806_v47  ;;  %v2589_v9 = vor.u32 %v2588_v55, %v2587_v48  ;;  %v2592_v53 = vshll.u32 %v2591_v4, 23  ;;  %v2781_v12 = vadd.s32 1, %v9156_v29 }
 0x17e   :  { %2437 = vst [vmem:[#allocation5 + $0x30] sm:$0xff] %v2431_v37  ;;  %2439 = vst [vmem:[#allocation5 + $0x38] sm:$0xff] %v2433_v60  ;;  %v2442_v17 = vmul.f32 %v9173_v44, %v2431_v37  ;;  %v2443_v33 = vmul.f32 %v9176_v50, %v2433_v60  ;;  %v2452_v61 = vmul.f32 %v9179_v7, %v2431_v37  ;;  %vm2725_vm1 = vcmp.lt.s32.totalorder %v8835_v5, 0 }
 0x17f   :  { %v2453_v15 = vmul.f32 %v9182_v22, %v2433_v60  ;;  %2441 = vst [vmem:[#allocation5 + $0x40] sm:$0xff] %v2435_v1  ;;  %v2445_v19 = vmul.f32 %v9185_v24, %v2435_v1  ;;  %v2455_v26 = vmul.f32 %v9188_v8, %v2435_v1  ;;  %v2447_v28 = vmul.f32 %v9191_v59, %v2431_v37 }
 0x180   :  { %v2448_v54 = vmul.f32 %v9194_v10, %v2433_v60  ;;  %v2444_v42 = vadd.f32 %v2443_v33, %v2442_v17  ;;  %v2450_v13 = vmul.f32 %v9197_v49, %v2435_v1  ;;  %v2474_v3 = vadd.f32 %v2473_v23, %v2431_v37 }
 0x181   :  { %v2454_v30 = vadd.f32 %v2453_v15, %v2452_v61  ;;  %v2476_v62 = vadd.f32 %v2475_v16, %v2433_v60  ;;  %v2478_v6 = vadd.f32 %v2477_v2, %v2435_v1  ;;  %v2593_v20 = vor.u32 4788187, %v2592_v53 }
 0x182   :  { %v2449_v52 = vadd.f32 %v2448_v54, %v2447_v28  ;;  %v9200_v14 = vadd.f32 %v2445_v19, %v2444_v42  ;;  %2480 = vst [vmem:[#allocation5 + $0x18] sm:$0xff] %v2474_v3  ;;  %v2485_v48 = vmul.f32 %v9173_v44, %v2474_v3  ;;  %v2495_v25 = vmul.f32 %v9179_v7, %v2474_v3 }
 0x183   :  { %v2456_v58 = vadd.f32 %v2455_v26, %v2454_v30  ;;  %2482 = vst [vmem:[#allocation5 + $0x20] sm:$0xff] %v2476_v62  ;;  %2484 = vst [vmem:[#allocation5 + $0x28] sm:$0xff] %v2478_v6  ;;  %v2486_v57 = vmul.f32 %v9176_v50, %v2476_v62  ;;  %v2488_v39 = vmul.f32 %v9185_v24, %v2478_v6  ;;  %v2594_v60 = vand.u32 2147483647, %v2593_v20  ;;  %v11807_v26 = vld [vmem:[#allocation27_spill] sm:$0xff] }
 0x184   :  { %v9204_v40 = vadd.f32 %v2450_v13, %v2449_v52  ;;  %v2496_v23 = vmul.f32 %v9182_v22, %v2476_v62  ;;  %v2498_v18 = vmul.f32 %v9188_v8, %v2478_v6  ;;  %v2490_v16 = vmul.f32 %v9191_v59, %v2474_v3 }
 0x185   :  { %7322 = vrcp.f32 %v2456_v58  ;;  %v2491_v55 = vmul.f32 %v9194_v10, %v2476_v62  ;;  %v2487_v4 = vadd.f32 %v2486_v57, %v2485_v48  ;;  %v2493_v51 = vmul.f32 %v9197_v49, %v2478_v6 }
 0x186   :  { %v2497_v37 = vadd.f32 %v2496_v23, %v2495_v25  ;;  %v2596_v47 = vcvt.s32.f32 %v2589_v9  ;;  %v2782_v1 = vsel %vm2780_vm13, %v2781_v12, %v9156_v29  ;;  %v3018_v61 = vand.u32 31, %v9162_v63 }
 0x187   :  { %v2492_v2 = vadd.f32 %v2491_v55, %v2490_v16  ;;  %v9217_v53 = vadd.f32 %v2488_v39, %v2487_v4  ;;  %v2783_v33 = vadd.s32 %v2782_v1, %v2778_v31  ;;  %vm2516_vm14 = vcmp.lt.s32.totalorder %v11807_v26, 0 }
 0x188   :  { %v2499_v17 = vadd.f32 %v2498_v18, %v2497_v37  ;;  %v2597_v19 = vmul.f32 %v2596_v47, %v2594_v60  ;;  %v2600_v9 = vsub.s32 4, %v9069_v32  ;;  %v3019_v29 = vsub.s32 32, %v3018_v61 }
 0x189   :  { %v9223_v15 = vadd.f32 %v2493_v51, %v2492_v2  ;;  %v2784_v28 = vadd.s32 536870912, %v2783_v33  ;;  %v11808_v42 = vand.u32 2147483647, %v11807_v26  ;;  %v11722_v13 = vand.u32 2147483647, %v9040_v11 }
 0x18a   :  { %7324 = vrcp.f32 %v2499_v17  ;;  %v2598_v54 = vxor.u32 2147483648, %v2597_v19  ;;  %v2601_v31 = vsel %vm2516_vm14, %v2600_v9, %v9069_v32  ;;  %v9239_v52 = vshrl.u32 %v9162_v63, 5 }
 0x18b   :  { %v9227_v12 = vshrl.u32 %v2784_v28, 30  ;;  %vm9231_vm0 = vcmp.le.f32.partialorder %v11808_v42, 0.7853982  ;;  %v3024_v62 = vshll.u32 %v11774_v46, %v3018_v61  ;;  %v3025_v6 = vshrl.u32 %v11775_v34, %v3019_v29 }
 0x18c   :  { %v2599_v43 = vsel %vm2516_vm14, %v2598_v54, %v2597_v19  ;;  %v3027_v20 = vshll.u32 %v11775_v34, %v3018_v61  ;;  %v3033_v57 = vshll.u32 %v11777_v35, %v3018_v61  ;;  %v3028_v39 = vshrl.u32 %v11776_v41, %v3019_v29 }
 0x18d   :  { %v2786_v30 = vshll.u32 %v9227_v12, 30  ;;  %v2602_v25 = vsel %vm9231_vm0, %v11807_v26, %v2599_v43  ;;  %v3030_v63 = vshll.u32 %v11776_v41, %v3018_v61  ;;  %v3031_v23 = vshrl.u32 %v11777_v35, %v3019_v29 }
 0x18e   :  { %v3034_v18 = vshrl.u32 %v11778_v27, %v3019_v29  ;;  %v2603_v4 = vsel %vm9231_vm0, 0, %v2601_v31  ;;  %7326 = vcosq.f32 %v2602_v25  ;;  %v3021_v37 = vshll.u32 %v11781_v38, %v3018_v61 }
 0x18f   :  { %v7323_v3 = vpop.eup %7322  ;;  %v9247_v32 = vsub.s32 %v2783_v33, %v2786_v30  ;;  %v3022_v51 = vshrl.u32 %v11774_v46, %v3019_v29  ;;  %v3026_v1 = vor.u32 %v3025_v6, %v3024_v62  ;;  %v3029_v26 = vor.u32 %v3028_v39, %v3027_v20 }
 0x190   :  { %v2458_v48 = vmul.f32 %v7323_v3, %v2456_v58  ;;  %v3011_v58 = vand.u32 8388607, %v11722_v13  ;;  %v3035_v33 = vor.u32 %v3034_v18, %v3033_v57  ;;  %v3032_v9 = vor.u32 %v3031_v23, %v3030_v63 }
 0x191   :  { %v2789_v55 = vsub.s32 0, %v9247_v32  ;;  %vm3039_vm2 = vcmp.lt.s32.totalorder %v9239_v52, 4  ;;  %7328 = vsinq.f32 %v2602_v25  ;;  %v2607_v21 = vadd.s32 3, %v2603_v4 }
 0x192   :  { %v2459_v16 = vsub.f32 2.0, %v2458_v48  ;;  %v3012_v43 = vor.u32 8388608, %v3011_v58  ;;  %vm3036_vm4 = vcmp.lt.s32.totalorder %v9239_v52, 1  ;;  %v3023_v30 = vor.u32 %v3022_v51, %v3021_v37 }
 0x193   :  { %v7043_v47 = vmin.u32 %v2789_v55, %v9247_v32  ;;  %vm3038_vm3 = vcmp.lt.s32.totalorder %v9239_v52, 3  ;;  %vm3037_vm5 = vcmp.lt.s32.totalorder %v9239_v52, 2  ;;  %v3020_v62 = vshrl.u32 %v11781_v38, %v3019_v29 }
 0x194   :  { %v7325_v60 = vpop.eup %7324  ;;  %v2460_v2 = vmul.f32 %v7323_v3, %v2459_v16  ;;  %v3041_v6 = vsel %vm3039_vm2, %v3029_v26, 2102212464  ;;  %v3048_v20 = vsel %vm3036_vm4, %v3026_v1, %v3029_v26  ;;  %v3044_v29 = vsel %vm3036_vm4, %v3023_v30, %v3026_v1 }
 0x195   :  { %v2501_v19 = vmul.f32 %v7325_v60, %v2499_v17  ;;  %v2791_v42 = vclz %v7043_v47  ;;  %v3049_v17 = vsel %vm3039_vm2, %v3035_v33, 1326507024  ;;  %v3042_v37 = vsel %vm3038_vm3, %v3026_v1, %v3041_v6 }
 0x196   :  { %v2461_v28 = vmul.f32 %v2460_v2, %v9200_v14  ;;  %v2465_v54 = vmul.f32 %v2460_v2, %v9204_v40  ;;  %v2779_v14 = vadd.s32 %v9155_v45, %v9142_v36  ;;  %v3045_v40 = vsel %vm3039_vm2, %v3032_v9, 920167782 }
 0x197   :  { %v2502_v61 = vsub.f32 2.0, %v2501_v19  ;;  %v7044_v31 = vadd.s32 4294967294, %v2791_v42  ;;  %v3050_v36 = vsel %vm3038_vm3, %v3032_v9, %v3049_v17  ;;  %v3046_v63 = vsel %vm3038_vm3, %v3029_v26, %v3045_v40 }
 0x198   :  { %2464 = vst [vmem:[#allocation5 + $0x218] sm:$0xff] %v2461_v28  ;;  %2468 = vst [vmem:[#allocation5 + $0x220] sm:$0xff] %v2465_v54  ;;  %v7327_v23 = vpop.eup %7326  ;;  %v3051_v55 = vsel %vm3037_vm5, %v3048_v20, %v3050_v36  ;;  %v3047_v51 = vsel %vm3037_vm5, %v3044_v29, %v3046_v63  ;;  %v2608_v2 = vand.u32 3, %v2607_v21  ;;  %v2711_v47 = vand.u32 3, %v2603_v4  ;;  %v9304_v54 = vld [vmem:[#allocation2 + $0x68] sm:$0xff]  ;;  %v2959_v63 = vld [vmem:[#allocation2 + $0xf0] sm:$0xff] }
 0x199   :  { %v2503_v3 = vmul.f32 %v7325_v60, %v2502_v61  ;;  %vm7045_vm6 = vcmp.lt.s32.totalorder %v7044_v31, 0  ;;  %vm9308_vm15 = vcmp.le.f32.partialorder %v2723_v0, 0.7853982  ;;  %v3280_v0 = vand.u32 2139095040, %v9304_v54 }
 0x19a   :  { %v2794_v57 = vsel %vm7045_vm6, 0, %v7044_v31  ;;  %vm2610_vm7 = vcmp.eq.s32.totalorder %v2608_v2, 0  ;;  %vm2613_vm8 = vcmp.eq.s32.totalorder %v2608_v2, 2  ;;  %vm2713_vm9 = vcmp.eq.s32.totalorder %v2711_v47, 0 }
 0x19b   :  { %v2504_v48 = vmul.f32 %v2503_v3, %v9217_v53  ;;  %v2508_v25 = vmul.f32 %v2503_v3, %v9223_v15  ;;  %v2795_v45 = vsub.s32 32, %v2794_v57  ;;  %v2796_v39 = vshll.u32 %v9247_v32, %v2794_v57  ;;  %v7329_v60 = vpop.eup %7328 }
 0x19c   :  { %v2799_v18 = vsub.s32 4294967266, %v2794_v57  ;;  %v2809_v53 = vsub.s32 4, %v9227_v12  ;;  %v3052_v15 = vshll.u32 %v3012_v43, 8  ;;  %v3040_v32 = vsel %vm3036_vm4, %v3020_v62, %v3023_v30 }
 0x19d   :  { %2507 = vst [vmem:[#allocation5 + $0x208] sm:$0xff] %v2504_v48  ;;  %2511 = vst [vmem:[#allocation5 + $0x210] sm:$0xff] %v2508_v25  ;;  %v2797_v16 = vshrl.u32 %v2779_v14, %v2795_v45  ;;  %v3043_v4 = vsel %vm3037_vm5, %v3040_v32, %v3042_v37  ;;  %v2611_v21 = vxor.u32 2147483648, %v7329_v60  ;;  %vm2609_vm12 = vcmp.lt.s32.totalorder %v2608_v2, 2  ;;  %v9324_v48 = vld [vmem:[#allocation2 + $0x70] sm:$0xff] }
 0x19e   :  { %v2800_v58 = vadd.s32 127, %v2799_v18  ;;  %v2810_v26 = vsel %vm2725_vm1, %v2809_v53, %v9227_v12  ;;  %v9301_v9 = vmul.u32.u64.low %v3052_v15, %v3051_v55  ;;  %v9302_v28 = vmul.u32.u64.high %v3052_v15, %v3051_v55, %v9301_v9  ;;  %v7445_v25 = vld [vmem:[#allocation2 + $0x50] sm:$0xff] }
 0x19f   :  { %v2798_v33 = vor.u32 %v2797_v16, %v2796_v39  ;;  %v9314_v42 = vmul.u32.u64.low %v3052_v15, %v3047_v51  ;;  %v9315_v61 = vmul.u32.u64.high %v3052_v15, %v3047_v51, %v9314_v42  ;;  %v2614_v12 = vxor.u32 2147483648, %v7327_v23 }
 0x1a0   :  { %v2801_v19 = vshll.u32 %v2800_v58, 23  ;;  %v2812_v30 = vsel %vm9308_vm15, 0, %v2810_v26  ;;  %v3059_v3 = vmul.u32 %v3052_v15, %v3043_v4  ;;  %vm2716_vm11 = vcmp.eq.s32.totalorder %v2711_v47, 2  ;;  %v3231_v26 = vld [vmem:[#allocation2 + $0xf8] sm:$0xff] }
 0x1a1   :  { %v2805_v31 = vcvt.s32.f32 %v2798_v33  ;;  %vm3061_vm10 = vc.u32 %v9302_v28, %v9314_v42  ;;  %v3062_v52 = vadd.s32 1, %v9315_v61  ;;  %v3281_v14 = vshrl.u32 %v3280_v0, 23 }
 0x1a2   :  { %v2802_v43 = vor.u32 4788187, %v2801_v19  ;;  %v2612_v40 = vsel %vm2610_vm7, %v7327_v23, %v2611_v21  ;;  %v2615_v62 = vsel %vm2613_vm8, %v2614_v12, %v7329_v60  ;;  %v2816_v20 = vadd.s32 3, %v2812_v30 }
 0x1a3   :  { %vm2606_vm13 = vweird.f32 %v7445_v25  ;;  %vm2712_vm14 = vcmp.lt.s32.totalorder %v2711_v47, 2  ;;  %v3063_v57 = vsel %vm3061_vm10, %v3062_v52, %v9315_v61  ;;  %v7058_v36 = vadd.s32 4294967169, %v3281_v14  ;;  %v11816_v14 = vld [vmem:[#allocation13_spill] sm:$0xff] }
 0x1a4   :  { %v2803_v17 = vand.u32 2147483647, %v2802_v43  ;;  %v2715_v45 = vsel %vm2713_vm9, %v7327_v23, %v2611_v21  ;;  %v2718_v39 = vsel %vm2716_vm11, %v2614_v12, %v7329_v60  ;;  %v3064_v18 = vadd.s32 %v3063_v57, %v3059_v3 }
 0x1a5   :  { %v2616_v53 = vsel %vm2609_vm12, %v2612_v40, %v2615_v62  ;;  %v11721_v15 = vand.u32 2147483647, %v9304_v54  ;;  %v3287_v16 = vadd.s32 1, %v7058_v36  ;;  %v3590_v55 = vand.u32 2139095040, %v9324_v48 }
 0x1a6   :  { %v2806_v6 = vmul.f32 %v2805_v31, %v2803_v17  ;;  %v9333_v32 = vand.u32 3, %v2816_v20  ;;  %v9335_v37 = vand.u32 3, %v2812_v30  ;;  %v3065_v51 = vadd.s32 536870912, %v3064_v18  ;;  %v11814_v30 = vld [vmem:[#allocation12_spill] sm:$0xff] }
 0x1a7   :  { %v2719_v23 = vsel %vm2712_vm14, %v2715_v45, %v2718_v39  ;;  %v9342_v2 = vmul.f32 %v9034_v56, %v2959_v63  ;;  %vm3288_vm0 = vcmp.gt.s32.totalorder %v3287_v16, 0  ;;  %v9345_v33 = vsel %vm2606_vm13, nan, %v2616_v53  ;;  %v11815_v17 = vld [vmem:[#allocation8_spill] sm:$0xff] }
 0x1a8   :  { %v2807_v29 = vxor.u32 2147483648, %v2806_v6  ;;  %v3066_v19 = vshrl.u32 %v3065_v51, 30  ;;  %v3289_v9 = vsel %vm3288_vm0, %v3287_v16, 0  ;;  %v3284_v47 = vand.u32 8388607, %v11721_v15 }
 0x1a9   :  { %v3291_v4 = vand.u32 31, %v3289_v9  ;;  %v3591_v61 = vshrl.u32 %v3590_v55, 23  ;;  %vm2822_vm2 = vcmp.eq.s32.totalorder %v9333_v32, 2  ;;  %vm2925_vm4 = vcmp.eq.s32.totalorder %v9335_v37, 2 }
 0x1aa   :  { %v2808_v58 = vsel %vm2725_vm1, %v2807_v29, %v2806_v6  ;;  %vm3006_vm3 = vcmp.lt.s32.totalorder %v9040_v11, 0  ;;  %v3067_v1 = vshll.u32 %v3066_v19, 30  ;;  %v9353_v21 = vsel %vm2606_vm13, nan, %v2719_v23 }
 0x1ab   :  { %v2811_v60 = vsel %vm9308_vm15, %v8835_v5, %v2808_v58  ;;  %vm2819_vm5 = vcmp.eq.s32.totalorder %v9333_v32, 0  ;;  %vm2922_vm6 = vcmp.eq.s32.totalorder %v9335_v37, 0  ;;  %v2939_v12 = vsub.f32 0.0, %v9345_v33 }
 0x1ac   :  { %7330 = vcosq.f32 %v2811_v60  ;;  %v9359_v43 = vmul.f32 %v9034_v56, %v3231_v26  ;;  %v3292_v31 = vsub.s32 32, %v3291_v4  ;;  %vm2818_vm1 = vcmp.lt.s32.totalorder %v9333_v32, 2 }
 0x1ad   :  { %7332 = vsinq.f32 %v2811_v60  ;;  %vm2921_vm15 = vcmp.lt.s32.totalorder %v9335_v37, 2  ;;  %v9365_v0 = vmul.f32 %v9353_v21, %v11814_v30  ;;  %v9369_v3 = vmul.f32 %v9345_v33, %v11815_v17  ;;  %v11818_v37 = vld [vmem:[#allocation15_spill] sm:$0xff] }
 0x1ae   :  { %11813 = vst [vmem:[#allocation18_spill] sm:$0xff] %v9359_v43  ;;  %v9371_v52 = vsub.s32 %v3064_v18, %v3067_v1  ;;  %v9375_v40 = vmul.f32 %v9353_v21, %v11816_v14  ;;  %vm2815_vm7 = vweird.f32 %v8835_v5  ;;  %v3090_v56 = vsub.s32 4, %v3066_v19 }
 0x1af   :  { %v3285_v62 = vor.u32 8388608, %v3284_v47  ;;  %v3294_v6 = vshll.u32 %v11781_v38, %v3291_v4  ;;  %v7066_v20 = vadd.s32 4294967169, %v3591_v61  ;;  %v3295_v57 = vshrl.u32 %v11774_v46, %v3292_v31 }
 0x1b0   :  { %v3070_v25 = vsub.s32 0, %v9371_v52  ;;  %v3297_v36 = vshll.u32 %v11774_v46, %v3291_v4  ;;  %v3300_v45 = vshll.u32 %v11775_v34, %v3291_v4  ;;  %v3298_v39 = vshrl.u32 %v11775_v34, %v3292_v31 }
 0x1b1   :  { %v3301_v29 = vshrl.u32 %v11776_v41, %v3292_v31  ;;  %v3303_v63 = vshll.u32 %v11776_v41, %v3291_v4  ;;  %v3304_v18 = vshrl.u32 %v11777_v35, %v3292_v31  ;;  %v9388_v16 = vshrl.u32 %v3289_v9, 5 }
 0x1b2   :  { %v7051_v53 = vmin.u32 %v3070_v25, %v9371_v52  ;;  %v9391_v55 = vshll.u32 %v11777_v35, %v3291_v4  ;;  %v9394_v58 = vshrl.u32 %v11778_v27, %v3292_v31  ;;  %v3060_v51 = vadd.s32 %v9314_v42, %v9302_v28 }
 0x1b3   :  { %v9398_v23 = vshll.u32 %v3285_v62, 8  ;;  %v9401_v26 = vadd.s32 1, %v7066_v20  ;;  %v9405_v9 = vsel %vm3006_vm3, %v3090_v56, %v3066_v19  ;;  %v3293_v4 = vshrl.u32 %v11781_v38, %v3292_v31 }
 0x1b4   :  { %v3072_v61 = vclz %v7051_v53  ;;  %v3296_v1 = vor.u32 %v3295_v57, %v3294_v6  ;;  %v3299_v13 = vor.u32 %v3298_v39, %v3297_v36  ;;  %v3302_v43 = vor.u32 %v3301_v29, %v3300_v45 }
 0x1b5   :  { %v3305_v28 = vor.u32 %v3304_v18, %v3303_v63  ;;  %v3308_v20 = vor.u32 %v9394_v58, %v9391_v55  ;;  %vm3309_vm8 = vcmp.lt.s32.totalorder %v9388_v16, 1  ;;  %vm3310_vm9 = vcmp.lt.s32.totalorder %v9388_v16, 2  ;;  %v11817_v58 = vld [vmem:[#allocation11_spill] sm:$0xff] }
 0x1b6   :  { %v7331_v47 = vpop.eup %7330  ;;  %v7052_v62 = vadd.s32 4294967294, %v3072_v61  ;;  %vm3311_vm10 = vcmp.lt.s32.totalorder %v9388_v16, 3  ;;  %vm3312_vm12 = vcmp.lt.s32.totalorder %v9388_v16, 4  ;;  %v3313_v6 = vsel %vm3309_vm8, %v3293_v4, %v3296_v1  ;;  %v11819_v4 = vld [vmem:[#allocation16_spill] sm:$0xff] }
 0x1b7   :  { %v7333_v25 = vpop.eup %7332  ;;  %v2823_v15 = vxor.u32 2147483648, %v7331_v47  ;;  %v3314_v45 = vsel %vm3312_vm12, %v3302_v43, 2102212464  ;;  %v11823_v60 = vand.u32 2147483647, %v9040_v11  ;;  %vm3598_vm14 = vcmp.gt.s32.totalorder %v9401_v26, 0 }
 0x1b8   :  { %v2820_v42 = vxor.u32 2147483648, %v7333_v25  ;;  %vm7053_vm11 = vcmp.lt.s32.totalorder %v7052_v62, 0 }
 0x1b9   :  { %v2824_v53 = vsel %vm2822_vm2, %v2823_v15, %v7333_v25  ;;  %v2927_v19 = vsel %vm2925_vm4, %v2823_v15, %v7333_v25  ;;  %v3075_v36 = vsel %vm7053_vm11, 0, %v7052_v62  ;;  %vm9449_vm13 = vcmp.le.f32.partialorder %v11823_v60, 0.7853982 }
 0x1ba   :  { %v2821_v31 = vsel %vm2819_vm5, %v7331_v47, %v2820_v42  ;;  %v2924_v56 = vsel %vm2922_vm6, %v7331_v47, %v2820_v42  ;;  %v3076_v63 = vsub.s32 32, %v3075_v36  ;;  %v3077_v18 = vshll.u32 %v9371_v52, %v3075_v36 }
 0x1bb   :  { %v2825_v57 = vsel %vm2818_vm1, %v2821_v31, %v2824_v53  ;;  %v2928_v15 = vsel %vm2921_vm15, %v2924_v56, %v2927_v19  ;;  %v3080_v62 = vsub.s32 4294967266, %v3075_v36  ;;  %v3318_v53 = vsel %vm3312_vm12, %v3305_v28, 920167782  ;;  %v11821_v56 = vld [vmem:[#allocation14_spill] sm:$0xff] }
 0x1bc   :  { %v2826_v39 = vsel %vm2815_vm7, nan, %v2825_v57  ;;  %v2929_v29 = vsel %vm2815_vm7, nan, %v2928_v15  ;;  %v3078_v42 = vshrl.u32 %v3060_v51, %v3076_v63  ;;  %v11822_v15 = vld [vmem:[#allocation10_spill] sm:$0xff]  ;;  %v3321_v60 = vsel %vm3309_vm8, %v3299_v13, %v3302_v43 }
 0x1bd   :  { %v2940_v55 = vmul.f32 %v2939_v12, %v2929_v29  ;;  %v2941_v32 = vmul.f32 %v2929_v29, %v9353_v21  ;;  %v2942_v47 = vmul.f32 %v2826_v39, %v11817_v58  ;;  %v2947_v61 = vmul.f32 %v2826_v39, %v11818_v37  ;;  %v11820_v12 = vld [vmem:[#allocation9_spill] sm:$0xff] }
 0x1be   :  { %v2952_v25 = vmul.f32 %v2826_v39, %v11819_v4  ;;  %v3079_v36 = vor.u32 %v3078_v42, %v3077_v18  ;;  %v3081_v39 = vadd.s32 127, %v3080_v62  ;;  %v3317_v37 = vsel %vm3309_vm8, %v3296_v1, %v3299_v13 }
 0x1bf   :  { %v2943_v5 = vmul.f32 %v2940_v55, %v11814_v30  ;;  %v2945_v19 = vmul.f32 %v2941_v32, %v11815_v17  ;;  %v2948_v52 = vmul.f32 %v2940_v55, %v11816_v14  ;;  %v2950_v31 = vmul.f32 %v2941_v32, %v11820_v12 }
 0x1c0   :  { %v2953_v57 = vmul.f32 %v2940_v55, %v11821_v56  ;;  %v2955_v29 = vmul.f32 %v2941_v32, %v11822_v15  ;;  %v3319_v58 = vsel %vm3311_vm10, %v3302_v43, %v3318_v53  ;;  %v3082_v55 = vshll.u32 %v3081_v39, 23  ;;  %v7447_v53 = vld [vmem:[#allocation5 + $0x8] sm:$0xff] }
 0x1c1   :  { %v2944_v63 = vadd.f32 %v2943_v5, %v2942_v47  ;;  %v2949_v4 = vadd.f32 %v2948_v52, %v2947_v61  ;;  %v3315_v32 = vsel %vm3311_vm10, %v3299_v13, %v3314_v45  ;;  %v3086_v47 = vcvt.s32.f32 %v3079_v36 }
 0x1c2   :  { %v2954_v14 = vadd.f32 %v2953_v57, %v2952_v25  ;;  %v3322_v61 = vsel %vm3312_vm12, %v3308_v20, 1326507024  ;;  %v3083_v42 = vor.u32 4788187, %v3082_v55  ;;  %v3320_v25 = vsel %vm3310_vm9, %v3317_v37, %v3319_v58 }
 0x1c3   :  { %v9461_v17 = vadd.f32 %v2945_v19, %v2944_v63  ;;  %v9463_v18 = vadd.f32 %v2950_v31, %v2949_v4  ;;  %v3323_v45 = vsel %vm3311_vm10, %v3305_v28, %v3322_v61  ;;  %v7446_v28 = vld [vmem:[#allocation5] sm:$0xff]  ;;  %v7448_v31 = vld [vmem:[#allocation5 + $0x10] sm:$0xff]  ;;  %v3599_v36 = vsel %vm3598_vm14, %v9401_v26, 0 }
 0x1c4   :  { %v9467_v1 = vadd.f32 %v2955_v29, %v2954_v14  ;;  %v3324_v4 = vsel %vm3310_vm9, %v3321_v60, %v3323_v45  ;;  %v3084_v20 = vand.u32 2147483647, %v3083_v42  ;;  %v3316_v29 = vsel %vm3310_vm9, %v3313_v6, %v3315_v32 }
 0x1c5   :  { %v2961_v13 = vmul.f32 %v9342_v2, %v9461_v17  ;;  %v2963_v43 = vmul.f32 %v9342_v2, %v9463_v18  ;;  %v9483_v58 = vmul.u32.u64.low %v9398_v23, %v3324_v4  ;;  %v9484_v37 = vmul.u32.u64.high %v9398_v23, %v3324_v4, %v9483_v58 }
 0x1c6   :  { %v2965_v14 = vmul.f32 %v9342_v2, %v9467_v1  ;;  %v9491_v19 = vmul.u32.u64.low %v9398_v23, %v3320_v25  ;;  %v9492_v52 = vmul.u32.u64.high %v9398_v23, %v3320_v25, %v9491_v19  ;;  %v3087_v2 = vmul.f32 %v3086_v47, %v3084_v20 }
 0x1c7   :  { %v9486_v62 = vadd.f32 %v7446_v28, %v2961_v13  ;;  %v9488_v5 = vadd.f32 %v7447_v53, %v2963_v43  ;;  %v3093_v55 = vsel %vm9449_vm13, 0, %v9405_v9  ;;  %v11826_v60 = vand.u32 2147483647, %v9324_v48 }
 0x1c8   :  { %v9495_v57 = vadd.f32 %v7448_v31, %v2965_v14  ;;  %v9516_v6 = vadd.f32 %v9369_v3, %v9365_v0  ;;  %v2934_v32 = vmul.f32 %v9345_v33, %v11820_v12  ;;  %v2936_v47 = vmul.f32 %v9353_v21, %v11821_v56 }
 0x1c9   :  { %2969 = vst [vmem:[#allocation5 + $0xc0] sm:$0xff] %v9486_v62  ;;  %2972 = vst [vmem:[#allocation5 + $0xc8] sm:$0xff] %v9488_v5  ;;  %v2985_v39 = vmul.f32 %v9179_v7, %v9486_v62  ;;  %v2986_v63 = vmul.f32 %v9182_v22, %v9488_v5  ;;  %v3594_v16 = vand.u32 8388607, %v11826_v60  ;;  %v3088_v9 = vxor.u32 2147483648, %v3087_v2 }
 0x1ca   :  { %2974 = vst [vmem:[#allocation5 + $0xd0] sm:$0xff] %v9495_v57  ;;  %v2988_v26 = vmul.f32 %v9188_v8, %v9495_v57  ;;  %v3332_v42 = vmul.u32 %v9398_v23, %v3316_v29  ;;  %v3601_v25 = vand.u32 31, %v3599_v36  ;;  %v3097_v45 = vadd.s32 3, %v3093_v55 }
 0x1cb   :  { %v2987_v61 = vadd.f32 %v2986_v63, %v2985_v39  ;;  %v2937_v13 = vmul.f32 %v9345_v33, %v11822_v15  ;;  %vm3334_vm0 = vc.u32 %v9484_v37, %v9491_v19  ;;  %v3335_v0 = vadd.s32 1, %v9492_v52 }
 0x1cc   :  { %v3089_v43 = vsel %vm3006_vm3, %v3088_v9, %v3087_v2  ;;  %v9530_v4 = vand.u32 3, %v3093_v55  ;;  %v3595_v21 = vor.u32 8388608, %v3594_v16  ;;  %v2975_v23 = vmul.f32 %v9173_v44, %v9486_v62 }
 0x1cd   :  { %v2989_v3 = vadd.f32 %v2988_v26, %v2987_v61  ;;  %v2976_v14 = vmul.f32 %v9176_v50, %v9488_v5  ;;  %v3092_v33 = vsel %vm9449_vm13, %v9040_v11, %v3089_v43  ;;  %v3336_v20 = vsel %vm3334_vm0, %v3335_v0, %v9492_v52 }
 0x1ce   :  { %v9541_v58 = vadd.f32 %v2934_v32, %v9375_v40  ;;  %v3337_v28 = vadd.s32 %v3336_v20, %v3332_v42  ;;  %v3602_v53 = vsub.s32 32, %v3601_v25  ;;  %v2980_v31 = vmul.f32 %v9191_v59, %v9486_v62 }
 0x1cf   :  { %7334 = vrcp.f32 %v2989_v3  ;;  %v2981_v2 = vmul.f32 %v9194_v10, %v9488_v5  ;;  %v9547_v29 = vand.u32 3, %v3097_v45  ;;  %v9549_v51 = vadd.f32 %v2937_v13, %v2936_v47 }
 0x1d0   :  { %7336 = vcosq.f32 %v3092_v33  ;;  %v3338_v39 = vadd.s32 536870912, %v3337_v28  ;;  %v9551_v52 = vshll.u32 %v3595_v21, 8  ;;  %v2977_v63 = vadd.f32 %v2976_v14, %v2975_v23 }
 0x1d1   :  { %7338 = vsinq.f32 %v3092_v33  ;;  %v2978_v40 = vmul.f32 %v9185_v24, %v9495_v57  ;;  %vm3206_vm2 = vcmp.eq.s32.totalorder %v9530_v4, 2  ;;  %v9556_v55 = vshrl.u32 %v3599_v36, 5 }
 0x1d2   :  { %v2983_v60 = vmul.f32 %v9197_v49, %v9495_v57  ;;  %vm3203_vm4 = vcmp.eq.s32.totalorder %v9530_v4, 0  ;;  %v9561_v16 = vshrl.u32 %v3338_v39, 30  ;;  %v3613_v26 = vshll.u32 %v11776_v41, %v3601_v25 }
 0x1d3   :  { %v3614_v32 = vshrl.u32 %v11777_v35, %v3602_v53  ;;  %v2982_v47 = vadd.f32 %v2981_v2, %v2980_v31  ;;  %vm3099_vm3 = vcmp.lt.s32.totalorder %v9547_v29, 2  ;;  %vm3202_vm5 = vcmp.lt.s32.totalorder %v9530_v4, 2 }
 0x1d4   :  { %v3604_v61 = vshll.u32 %v11781_v38, %v3601_v25  ;;  %v3605_v36 = vshrl.u32 %v11774_v46, %v3602_v53  ;;  %v3607_v9 = vshll.u32 %v11774_v46, %v3601_v25  ;;  %vm3096_vm6 = vweird.f32 %v9040_v11 }
 0x1d5   :  { %v3340_v42 = vshll.u32 %v9561_v16, 30  ;;  %v3608_v45 = vshrl.u32 %v11775_v34, %v3602_v53  ;;  %v3610_v13 = vshll.u32 %v11775_v34, %v3601_v25  ;;  %v3611_v0 = vshrl.u32 %v11776_v41, %v3602_v53 }
 0x1d6   :  { %v2979_v43 = vadd.f32 %v2978_v40, %v2977_v63  ;;  %vm3100_vm1 = vcmp.eq.s32.totalorder %v9547_v29, 0  ;;  %vm3103_vm15 = vcmp.eq.s32.totalorder %v9547_v29, 2  ;;  %v9579_v21 = vadd.s32 %v9491_v19, %v9484_v37 }
 0x1d7   :  { %v9581_v23 = vsub.s32 %v3337_v28, %v3340_v42  ;;  %v3615_v14 = vor.u32 %v3614_v32, %v3613_v26  ;;  %v3616_v33 = vshll.u32 %v11777_v35, %v3601_v25  ;;  %v3617_v20 = vshrl.u32 %v11778_v27, %v3602_v53 }
 0x1d8   :  { %v2984_v31 = vadd.f32 %v2983_v60, %v2982_v47  ;;  %v3603_v2 = vshrl.u32 %v11781_v38, %v3602_v53  ;;  %v3606_v39 = vor.u32 %v3605_v36, %v3604_v61  ;;  %vm3622_vm7 = vcmp.lt.s32.totalorder %v9556_v55, 4 }
 0x1d9   :  { %v7335_v63 = vpop.eup %7334  ;;  %v3343_v40 = vsub.s32 0, %v9581_v23  ;;  %v3609_v15 = vor.u32 %v3608_v45, %v3607_v9  ;;  %v3612_v56 = vor.u32 %v3611_v0, %v3610_v13  ;;  %vm3619_vm8 = vcmp.lt.s32.totalorder %v9556_v55, 1 }
 0x1da   :  { %v7337_v37 = vpop.eup %7336  ;;  %v2991_v19 = vmul.f32 %v7335_v63, %v2989_v3  ;;  %v3363_v28 = vsub.s32 4, %v9561_v16  ;;  %vm3620_vm9 = vcmp.lt.s32.totalorder %v9556_v55, 2  ;;  %vm3621_vm10 = vcmp.lt.s32.totalorder %v9556_v55, 3 }
 0x1db   :  { %v7339_v25 = vpop.eup %7338  ;;  %v3104_v53 = vxor.u32 2147483648, %v7337_v37  ;;  %vm3279_vm12 = vcmp.lt.s32.totalorder %v9304_v54, 0  ;;  %v7059_v60 = vmin.u32 %v3343_v40, %v9581_v23  ;;  %v3618_v26 = vor.u32 %v3617_v20, %v3616_v33 }
 0x1dc   :  { %v3628_v32 = vsel %vm3622_vm7, %v3615_v14, 920167782  ;;  %v2992_v47 = vsub.f32 2.0, %v2991_v19  ;;  %v3101_v61 = vxor.u32 2147483648, %v7339_v25  ;;  %v3623_v3 = vsel %vm3619_vm8, %v3603_v2, %v3606_v39 }
 0x1dd   :  { %v3624_v36 = vsel %vm3622_vm7, %v3612_v56, 2102212464  ;;  %v3105_v9 = vsel %vm3103_vm15, %v3104_v53, %v7339_v25  ;;  %v3208_v42 = vsel %vm3206_vm2, %v3104_v53, %v7339_v25  ;;  %v3345_v45 = vclz %v7059_v60 }
 0x1de   :  { %v3627_v13 = vsel %vm3619_vm8, %v3606_v39, %v3609_v15  ;;  %v2993_v0 = vmul.f32 %v7335_v63, %v2992_v47  ;;  %v3102_v33 = vsel %vm3100_vm1, %v7337_v37, %v3101_v61  ;;  %v3205_v20 = vsel %vm3203_vm4, %v7337_v37, %v3101_v61 }
 0x1df   :  { %v3629_v2 = vsel %vm3621_vm10, %v3612_v56, %v3628_v32  ;;  %v3106_v40 = vsel %vm3099_vm3, %v3102_v33, %v3105_v9  ;;  %v3209_v19 = vsel %vm3202_vm5, %v3205_v20, %v3208_v42  ;;  %v7060_v25 = vadd.s32 4294967294, %v3345_v45 }
 0x1e0   :  { %v3632_v39 = vsel %vm3622_vm7, %v3618_v26, 1326507024  ;;  %v2994_v63 = vmul.f32 %v2993_v0, %v2979_v43  ;;  %v2998_v53 = vmul.f32 %v2993_v0, %v2984_v31  ;;  %v9620_v60 = vsel %vm3096_vm6, nan, %v3106_v40 }
 0x1e1   :  { %v9624_v37 = vsel %vm3096_vm6, nan, %v3209_v19  ;;  %v3221_v4 = vmul.f32 %v9620_v60, %v9516_v6  ;;  %v3224_v43 = vmul.f32 %v9620_v60, %v9541_v58  ;;  %v3227_v11 = vmul.f32 %v9620_v60, %v9549_v51 }
 0x1e2   :  { %v3220_v29 = vmul.f32 %v9624_v37, %v9461_v17  ;;  %v3223_v32 = vmul.f32 %v9624_v37, %v9463_v18  ;;  %2997 = vst [vmem:[#allocation5 + $0x278] sm:$0xff] %v2994_v63  ;;  %3001 = vst [vmem:[#allocation5 + $0x280] sm:$0xff] %v2998_v53  ;;  %v3226_v31 = vmul.f32 %v9624_v37, %v9467_v1  ;;  %vm7061_vm11 = vcmp.lt.s32.totalorder %v7060_v25, 0 }
 0x1e3   :  { %v3631_v26 = vsel %vm3619_vm8, %v3609_v15, %v3612_v56  ;;  %v3633_v47 = vsel %vm3621_vm10, %v3615_v14, %v3632_v39  ;;  %v3630_v42 = vsel %vm3620_vm9, %v3627_v13, %v3629_v2  ;;  %v3348_v0 = vsel %vm7061_vm11, 0, %v7060_v25  ;;  %v11827_v14 = vld [vmem:[#allocation18_spill] sm:$0xff] }
 0x1e4   :  { %v9642_v61 = vsub.f32 %v3220_v29, %v3221_v4  ;;  %v9644_v9 = vsub.f32 %v3223_v32, %v3224_v43  ;;  %v9648_v45 = vsub.f32 %v3226_v31, %v3227_v11  ;;  %v3364_v33 = vsel %vm3279_vm12, %v3363_v28, %v9561_v16 }
 0x1e5   :  { %v3625_v56 = vsel %vm3621_vm10, %v3609_v15, %v3624_v36  ;;  %v3349_v19 = vsub.s32 32, %v3348_v0  ;;  %v3634_v13 = vsel %vm3620_vm9, %v3631_v26, %v3633_v47  ;;  %v3353_v25 = vsub.s32 4294967266, %v3348_v0  ;;  %v9702_v26 = vld [vmem:[#allocation2 + $0x78] sm:$0xff] }
 0x1e6   :  { %v3233_v20 = vmul.f32 %v11827_v14, %v9642_v61  ;;  %v3235_v40 = vmul.f32 %v11827_v14, %v9644_v9  ;;  %v3237_v2 = vmul.f32 %v11827_v14, %v9648_v45  ;;  %v3350_v36 = vshll.u32 %v9581_v23, %v3348_v0  ;;  %v3495_v0 = vld [vmem:[#allocation2 + $0x100] sm:$0xff]  ;;  %v3541_v14 = vld [vmem:[#allocation2 + $0x108] sm:$0xff] }
 0x1e7   :  { %v9664_v39 = vmul.u32.u64.low %v9551_v52, %v3630_v42  ;;  %v9665_v16 = vmul.u32.u64.high %v9551_v52, %v3630_v42, %v9664_v39  ;;  %v3351_v63 = vshrl.u32 %v9579_v21, %v3349_v19  ;;  %v3354_v29 = vadd.s32 127, %v3353_v25 }
 0x1e8   :  { %v9669_v15 = vadd.f32 %v3233_v20, %v9486_v62  ;;  %v9672_v28 = vadd.f32 %v3235_v40, %v9488_v5  ;;  %v9677_v53 = vadd.f32 %v3237_v2, %v9495_v57  ;;  %v11828_v21 = vand.u32 2147483647, %v9304_v54  ;;  %v9718_v2 = vld [vmem:[#allocation2 + $0x80] sm:$0xff] }
 0x1e9   :  { %v9680_v4 = vmul.u32.u64.low %v9551_v52, %v3634_v13  ;;  %v9681_v32 = vmul.u32.u64.high %v9551_v52, %v3634_v13, %v9680_v4  ;;  %v3352_v11 = vor.u32 %v3351_v63, %v3350_v36  ;;  %v3799_v55 = vand.u32 2139095040, %v9702_v26 }
 0x1ea   :  { %3241 = vst [vmem:[#allocation5 + $0xa8] sm:$0xff] %v9669_v15  ;;  %3244 = vst [vmem:[#allocation5 + $0xb0] sm:$0xff] %v9672_v28  ;;  %v3258_v62 = vmul.f32 %v9179_v7, %v9669_v15  ;;  %v3259_v5 = vmul.f32 %v9182_v22, %v9672_v28  ;;  %vm9691_vm13 = vcmp.le.f32.partialorder %v11828_v21, 0.7853982  ;;  %v3261_v23 = vmul.f32 %v9188_v8, %v9677_v53 }
 0x1eb   :  { %3247 = vst [vmem:[#allocation5 + $0xb8] sm:$0xff] %v9677_v53  ;;  %v3366_v43 = vsel %vm9691_vm13, 0, %v3364_v33  ;;  %v3626_v7 = vsel %vm3620_vm9, %v3623_v3, %v3625_v56  ;;  %v3355_v22 = vshll.u32 %v3354_v29, 23  ;;  %v3359_v19 = vcvt.s32.f32 %v3352_v11  ;;  %v9709_v33 = vld [vmem:[#allocation2 + $0x170] sm:$0xff] }
 0x1ec   :  { %v3260_v31 = vadd.f32 %v3259_v5, %v3258_v62  ;;  %v3370_v42 = vadd.s32 3, %v3366_v43  ;;  %v3642_v20 = vmul.u32 %v9551_v52, %v3626_v7  ;;  %vm3644_vm14 = vc.u32 %v9681_v32, %v9664_v39 }
 0x1ed   :  { %v3356_v40 = vor.u32 4788187, %v3355_v22  ;;  %v3645_v8 = vadd.s32 1, %v9665_v16  ;;  %v9712_v56 = vmul.f32 %v9709_v33, %v3495_v0  ;;  %v9715_v13 = vmul.f32 %v9709_v33, %v3541_v14 }
 0x1ee   :  { %v3262_v47 = vadd.f32 %v3261_v23, %v3260_v31  ;;  %v9720_v25 = vand.u32 3, %v3366_v43  ;;  %v3796_v63 = vand.u32 2147483647, %v9702_v26  ;;  %v3800_v29 = vshrl.u32 %v3799_v55, 23 }
 0x1ef   :  { %v3357_v3 = vand.u32 2147483647, %v3356_v40  ;;  %v3646_v52 = vsel %vm3644_vm14, %v3645_v8, %v9665_v16  ;;  %v3248_v4 = vmul.f32 %v9173_v44, %v9669_v15  ;;  %v3249_v62 = vmul.f32 %v9176_v50, %v9672_v28 }
 0x1f0   :  { %7340 = vrcp.f32 %v3262_v47  ;;  %v3647_v36 = vadd.s32 %v3646_v52, %v3642_v20  ;;  %v9727_v21 = vand.u32 3, %v3370_v42  ;;  %v3211_v16 = vmul.f32 %v9624_v37, %v9516_v6 }
 0x1f1   :  { %v3360_v5 = vmul.f32 %v3359_v19, %v3357_v3  ;;  %v7074_v7 = vadd.s32 4294967169, %v3800_v29  ;;  %v4081_v43 = vand.u32 2139095040, %v9718_v2  ;;  %v3253_v31 = vmul.f32 %v9191_v59, %v9669_v15 }
 0x1f2   :  { %v3648_v23 = vadd.s32 536870912, %v3647_v36  ;;  %v3254_v11 = vmul.f32 %v9194_v10, %v9672_v28  ;;  %v3212_v44 = vmul.f32 %v9620_v60, %v9461_v17  ;;  %v3214_v22 = vmul.f32 %v9624_v37, %v9541_v58 }
 0x1f3   :  { %v3361_v50 = vxor.u32 2147483648, %v3360_v5  ;;  %v3215_v6 = vmul.f32 %v9620_v60, %v9463_v18  ;;  %v3806_v0 = vadd.s32 1, %v7074_v7  ;;  %v3250_v14 = vadd.f32 %v3249_v62, %v3248_v4 }
 0x1f4   :  { %v9742_v42 = vshrl.u32 %v3648_v23, 30  ;;  %v3251_v59 = vmul.f32 %v9185_v24, %v9677_v53  ;;  %v3803_v17 = vand.u32 8388607, %v3796_v63  ;;  %v4082_v18 = vshrl.u32 %v4081_v43, 23 }
 0x1f5   :  { %v3362_v10 = vsel %vm3279_vm12, %v3361_v50, %v3360_v5  ;;  %vm3807_vm0 = vcmp.gt.s32.totalorder %v3806_v0, 0  ;;  %v3255_v40 = vadd.f32 %v3254_v11, %v3253_v31  ;;  %v3256_v19 = vmul.f32 %v9197_v49, %v9677_v53 }
 0x1f6   :  { %v3365_v58 = vsel %vm9691_vm13, %v9304_v54, %v3362_v10  ;;  %v3650_v20 = vshll.u32 %v9742_v42, 30  ;;  %v3808_v24 = vsel %vm3807_vm0, %v3806_v0, 0  ;;  %v3217_v55 = vmul.f32 %v9624_v37, %v9549_v51 }
 0x1f7   :  { %7342 = vcosq.f32 %v3365_v58  ;;  %v3218_v3 = vmul.f32 %v9620_v60, %v9467_v1  ;;  %vm3376_vm2 = vcmp.eq.s32.totalorder %v9727_v21, 2  ;;  %vm3479_vm4 = vcmp.eq.s32.totalorder %v9720_v25, 2 }
 0x1f8   :  { %7344 = vsinq.f32 %v3365_v58  ;;  %v9760_v57 = vsub.s32 %v3647_v36, %v3650_v20  ;;  %v3810_v29 = vand.u32 31, %v3808_v24  ;;  %v9764_v4 = vadd.f32 %v3212_v44, %v3211_v16 }
 0x1f9   :  { %vm3373_vm3 = vcmp.eq.s32.totalorder %v9727_v21, 0  ;;  %vm3476_vm5 = vcmp.eq.s32.totalorder %v9720_v25, 0  ;;  %v3804_v51 = vor.u32 8388608, %v3803_v17  ;;  %v7082_v37 = vadd.s32 4294967169, %v4082_v18 }
 0x1fa   :  { %v7341_v8 = vpop.eup %7340  ;;  %v3653_v49 = vsub.s32 0, %v9760_v57  ;;  %v3252_v62 = vadd.f32 %v3251_v59, %v3250_v14  ;;  %v3257_v60 = vadd.f32 %v3256_v19, %v3255_v40  ;;  %vm3372_vm6 = vcmp.lt.s32.totalorder %v9727_v21, 2 }
 0x1fb   :  { %v3264_v52 = vmul.f32 %v7341_v8, %v3262_v47  ;;  %vm3475_vm1 = vcmp.lt.s32.totalorder %v9720_v25, 2  ;;  %v3811_v47 = vsub.s32 32, %v3810_v29  ;;  %vm3369_vm15 = vweird.f32 %v9304_v54 }
 0x1fc   :  { %v3216_v36 = vadd.f32 %v3215_v6, %v3214_v22  ;;  %v3219_v5 = vadd.f32 %v3218_v3, %v3217_v55  ;;  %v3643_v16 = vadd.s32 %v9664_v39, %v9681_v32  ;;  %v7067_v23 = vmin.u32 %v3653_v49, %v9760_v57 }
 0x1fd   :  { %v3265_v1 = vsub.f32 2.0, %v3264_v52  ;;  %v9775_v43 = vshrl.u32 %v3808_v24, 5  ;;  %v3813_v31 = vshll.u32 %v11781_v38, %v3810_v29  ;;  %v3814_v11 = vshrl.u32 %v11774_v46, %v3811_v47 }
 0x1fe   :  { %v3655_v44 = vclz %v7067_v23  ;;  %v9779_v50 = vshll.u32 %v3804_v51, 8  ;;  %v4078_v0 = vand.u32 2147483647, %v9718_v2  ;;  %v9782_v14 = vadd.s32 1, %v7082_v37 }
 0x1ff   :  { %v3266_v7 = vmul.f32 %v7341_v8, %v3265_v1  ;;  %v3816_v39 = vshll.u32 %v11774_v46, %v3810_v29  ;;  %v3817_v32 = vshrl.u32 %v11775_v34, %v3811_v47  ;;  %v3819_v10 = vshll.u32 %v11775_v34, %v3810_v29 }
 0x200   :  { %v7068_v59 = vadd.s32 4294967294, %v3655_v44  ;;  %v3820_v17 = vshrl.u32 %v11776_v41, %v3811_v47  ;;  %v3822_v58 = vshll.u32 %v11776_v41, %v3810_v29  ;;  %v3812_v18 = vshrl.u32 %v11781_v38, %v3811_v47 }
 0x201   :  { %v3267_v22 = vmul.f32 %v3266_v7, %v3252_v62  ;;  %v3271_v6 = vmul.f32 %v3266_v7, %v3257_v60  ;;  %v7343_v20 = vpop.eup %7342  ;;  %v3815_v40 = vor.u32 %v3814_v11, %v3813_v31  ;;  %v3823_v19 = vshrl.u32 %v11777_v35, %v3811_v47 }
 0x202   :  { %vm3828_vm7 = vcmp.lt.s32.totalorder %v9775_v43, 1  ;;  %v7345_v24 = vpop.eup %7344  ;;  %v3377_v8 = vxor.u32 2147483648, %v7343_v20  ;;  %vm7069_vm8 = vcmp.lt.s32.totalorder %v7068_v59, 0  ;;  %v9793_v55 = vshll.u32 %v11777_v35, %v3810_v29 }
 0x203   :  { %3270 = vst [vmem:[#allocation5 + $0x268] sm:$0xff] %v3267_v22  ;;  %3274 = vst [vmem:[#allocation5 + $0x270] sm:$0xff] %v3271_v6  ;;  %v9796_v3 = vshrl.u32 %v11778_v27, %v3811_v47  ;;  %v3374_v52 = vxor.u32 2147483648, %v7345_v24  ;;  %v3658_v49 = vsel %vm7069_vm8, 0, %v7068_v59  ;;  %v3818_v51 = vor.u32 %v3817_v32, %v3816_v39 }
 0x204   :  { %v3821_v37 = vor.u32 %v3820_v17, %v3819_v10  ;;  %v3378_v62 = vsel %vm3376_vm2, %v3377_v8, %v7345_v24  ;;  %v3481_v1 = vsel %vm3479_vm4, %v3377_v8, %v7345_v24  ;;  %v3659_v60 = vsub.s32 32, %v3658_v49 }
 0x205   :  { %v9802_v23 = vor.u32 %v3823_v19, %v3822_v58  ;;  %v3375_v29 = vsel %vm3373_vm3, %v7343_v20, %v3374_v52  ;;  %v3478_v47 = vsel %vm3476_vm5, %v7343_v20, %v3374_v52  ;;  %v3660_v7 = vshll.u32 %v9760_v57, %v3658_v49 }
 0x206   :  { %v3663_v31 = vsub.s32 4294967266, %v3658_v49  ;;  %v3379_v11 = vsel %vm3372_vm6, %v3375_v29, %v3378_v62  ;;  %v3482_v44 = vsel %vm3475_vm1, %v3478_v47, %v3481_v1  ;;  %v3661_v22 = vshrl.u32 %v3643_v16, %v3659_v60 }
 0x207   :  { %v3827_v6 = vor.u32 %v9796_v3, %v9793_v55  ;;  %v3380_v39 = vsel %vm3369_vm15, nan, %v3379_v11  ;;  %v3483_v32 = vsel %vm3369_vm15, nan, %v3482_v44  ;;  %vm3831_vm9 = vcmp.lt.s32.totalorder %v9775_v43, 4 }
 0x208   :  { %v3664_v59 = vadd.s32 127, %v3663_v31  ;;  %v3484_v57 = vmul.f32 %v3483_v32, %v9642_v61  ;;  %v3485_v21 = vmul.f32 %v3380_v39, %v9764_v4  ;;  %v3487_v25 = vmul.f32 %v3483_v32, %v9644_v9 }
 0x209   :  { %v3488_v10 = vmul.f32 %v3380_v39, %v3216_v36  ;;  %v3490_v16 = vmul.f32 %v3483_v32, %v9648_v45  ;;  %v3491_v17 = vmul.f32 %v3380_v39, %v3219_v5  ;;  %v3662_v58 = vor.u32 %v3661_v22, %v3660_v7  ;;  %v9864_v22 = vld [vmem:[#allocation2 + $0x1c0] sm:$0xff]  ;;  %v9867_v39 = vld [vmem:[#allocation2 + $0x1c8] sm:$0xff] }
 0x20a   :  { %v3665_v20 = vshll.u32 %v3664_v59, 23  ;;  %v3486_v19 = vsub.f32 %v3484_v57, %v3485_v21  ;;  %vm3830_vm10 = vcmp.lt.s32.totalorder %v9775_v43, 3  ;;  %v3833_v54 = vsel %vm3831_vm9, %v3821_v37, 2102212464  ;;  %v9874_v59 = vld [vmem:[#allocation2 + $0x1d0] sm:$0xff]  ;;  %v9877_v21 = vld [vmem:[#allocation2 + $0x1a8] sm:$0xff] }
 0x20b   :  { %v3489_v24 = vsub.f32 %v3487_v25, %v3488_v10  ;;  %v3492_v8 = vsub.f32 %v3490_v16, %v3491_v17  ;;  %v3669_v61 = vcvt.s32.f32 %v3662_v58  ;;  %v9829_v4 = vsel %vm3828_vm7, %v3812_v18, %v3815_v40  ;;  %v9880_v10 = vld [vmem:[#allocation2 + $0x1b0] sm:$0xff] }
 0x20c   :  { %v3666_v52 = vor.u32 4788187, %v3665_v20  ;;  %v3497_v9 = vmul.f32 %v9712_v56, %v3486_v19  ;;  %v9835_v36 = vsel %vm3830_vm10, %v3818_v51, %v3833_v54  ;;  %v9839_v5 = vsel %vm3828_vm7, %v3815_v40, %v3818_v51  ;;  %v9883_v20 = vld [vmem:[#allocation2 + $0x1b8] sm:$0xff] }
 0x20d   :  { %v3499_v45 = vmul.f32 %v9712_v56, %v3489_v24  ;;  %v3501_v49 = vmul.f32 %v9712_v56, %v3492_v8  ;;  %v3543_v62 = vmul.f32 %v9715_v13, %v3486_v19  ;;  %v3545_v1 = vmul.f32 %v9715_v13, %v3489_v24 }
 0x20e   :  { %v3667_v18 = vand.u32 2147483647, %v3666_v52  ;;  %vm3829_vm12 = vcmp.lt.s32.totalorder %v9775_v43, 2  ;;  %v3498_v60 = vadd.f32 %v3497_v9, %v9669_v15  ;;  %v3547_v47 = vmul.f32 %v9715_v13, %v3492_v8  ;;  %v9858_v15 = vld [vmem:[#allocation2 + $0x190] sm:$0xff]  ;;  %v9861_v13 = vld [vmem:[#allocation2 + $0x198] sm:$0xff] }
 0x20f   :  { %v3500_v29 = vadd.f32 %v3499_v45, %v9672_v28  ;;  %v3837_v40 = vsel %vm3831_vm9, %v9802_v23, 920167782  ;;  %v3502_v7 = vadd.f32 %v3501_v49, %v9677_v53  ;;  %v3840_v11 = vsel %vm3828_vm7, %v3818_v51, %v3821_v37  ;;  %v9871_v51 = vld [vmem:[#allocation2 + $0x1a0] sm:$0xff] }
 0x210   :  { %v9852_v56 = vmul.f32 %v3669_v61, %v3667_v18  ;;  %v3838_v31 = vsel %vm3830_vm10, %v3821_v37, %v3837_v40  ;;  %3505 = vst [vmem:[#allocation5 + $0x90] sm:$0xff] %v3498_v60  ;;  %v3512_v28 = vmul.f32 %v9858_v15, %v3498_v60  ;;  %v3522_v53 = vmul.f32 %v9864_v22, %v3498_v60 }
 0x211   :  { %3508 = vst [vmem:[#allocation5 + $0x98] sm:$0xff] %v3500_v29  ;;  %v3513_v44 = vmul.f32 %v9861_v13, %v3500_v29  ;;  %v3523_v32 = vmul.f32 %v9867_v39, %v3500_v29  ;;  %vm3589_vm11 = vcmp.lt.s32.totalorder %v9324_v48, 0  ;;  %3511 = vst [vmem:[#allocation5 + $0xa0] sm:$0xff] %v3502_v7  ;;  %v3515_v37 = vmul.f32 %v9871_v51, %v3502_v7 }
 0x212   :  { %v3525_v57 = vmul.f32 %v9874_v59, %v3502_v7  ;;  %v3517_v25 = vmul.f32 %v9877_v21, %v3498_v60  ;;  %v3518_v16 = vmul.f32 %v9880_v10, %v3500_v29  ;;  %v3520_v19 = vmul.f32 %v9883_v20, %v3502_v7 }
 0x213   :  { %v3514_v17 = vadd.f32 %v3513_v44, %v3512_v28  ;;  %v3524_v58 = vadd.f32 %v3523_v32, %v3522_v53  ;;  %v3544_v24 = vadd.f32 %v3543_v62, %v3498_v60  ;;  %v3546_v8 = vadd.f32 %v3545_v1, %v3500_v29 }
 0x214   :  { %v3519_v54 = vadd.f32 %v3518_v16, %v3517_v25  ;;  %v3548_v52 = vadd.f32 %v3547_v47, %v3502_v7  ;;  %v11831_v61 = vand.u32 2147483647, %v9324_v48  ;;  %v3841_v45 = vsel %vm3831_vm9, %v3827_v6, 1326507024 }
 0x215   :  { %v9897_v49 = vadd.f32 %v3515_v37, %v3514_v17  ;;  %v3526_v18 = vadd.f32 %v3525_v57, %v3524_v58  ;;  %3551 = vst [vmem:[#allocation5 + $0x78] sm:$0xff] %v3544_v24  ;;  %v3558_v62 = vmul.f32 %v9858_v15, %v3544_v24  ;;  %v3568_v1 = vmul.f32 %v9864_v22, %v3544_v24 }
 0x216   :  { %vm9888_vm13 = vcmp.le.f32.partialorder %v11831_v61, 0.7853982  ;;  %v9901_v60 = vadd.f32 %v3520_v19, %v3519_v54  ;;  %3554 = vst [vmem:[#allocation5 + $0x80] sm:$0xff] %v3546_v8  ;;  %3557 = vst [vmem:[#allocation5 + $0x88] sm:$0xff] %v3548_v52  ;;  %v3559_v29 = vmul.f32 %v9861_v13, %v3546_v8  ;;  %v3561_v47 = vmul.f32 %v9871_v51, %v3548_v52 }
 0x217   :  { %v3569_v55 = vmul.f32 %v9867_v39, %v3546_v8  ;;  %7346 = vrcp.f32 %v3526_v18  ;;  %v3571_v3 = vmul.f32 %v9874_v59, %v3548_v52  ;;  %v3563_v6 = vmul.f32 %v9877_v21, %v3544_v24 }
 0x218   :  { %v3564_v40 = vmul.f32 %v9880_v10, %v3546_v8  ;;  %v3560_v7 = vadd.f32 %v3559_v29, %v3558_v62  ;;  %v3566_v44 = vmul.f32 %v9883_v20, %v3548_v52  ;;  %v3671_v53 = vxor.u32 2147483648, %v9852_v56 }
 0x219   :  { %v3570_v28 = vadd.f32 %v3569_v55, %v3568_v1  ;;  %v3673_v37 = vsub.s32 4, %v9742_v42  ;;  %v3839_v57 = vsel %vm3829_vm12, %v9839_v5, %v3838_v31  ;;  %v3842_v25 = vsel %vm3830_vm10, %v9802_v23, %v3841_v45 }
 0x21a   :  { %v3565_v32 = vadd.f32 %v3564_v40, %v3563_v6  ;;  %v9918_v16 = vadd.f32 %v3561_v47, %v3560_v7  ;;  %v3843_v58 = vsel %vm3829_vm12, %v3840_v11, %v3842_v25  ;;  %vm4089_vm14 = vcmp.gt.s32.totalorder %v9782_v14, 0 }
 0x21b   :  { %v3572_v17 = vadd.f32 %v3571_v3, %v3570_v28  ;;  %v3835_v24 = vsel %vm3829_vm12, %v9829_v4, %v9835_v36  ;;  %v9930_v5 = vmul.u32.u64.low %v9779_v50, %v3843_v58  ;;  %v9931_v31 = vmul.u32.u64.high %v9779_v50, %v3843_v58, %v9930_v5  ;;  %v9945_v36 = vld [vmem:[#allocation2 + $0x70] sm:$0xff] }
 0x21c   :  { %v9923_v19 = vadd.f32 %v3566_v44, %v3565_v32  ;;  %v3672_v23 = vsel %vm3589_vm11, %v3671_v53, %v9852_v56  ;;  %v9937_v11 = vmul.u32.u64.low %v9779_v50, %v3839_v57  ;;  %v9938_v54 = vmul.u32.u64.high %v9779_v50, %v3839_v57, %v9937_v11 }
 0x21d   :  { %7348 = vrcp.f32 %v3572_v17  ;;  %v4090_v8 = vsel %vm4089_vm14, %v9782_v14, 0  ;;  %v3674_v43 = vsel %vm3589_vm11, %v3673_v37, %v9742_v42  ;;  %v3675_v52 = vsel %vm9888_vm13, %v9945_v36, %v3672_v23  ;;  %v9958_v42 = vld [vmem:[#allocation2 + $0x88] sm:$0xff] }
 0x21e   :  { %v4092_v4 = vand.u32 31, %v4090_v8  ;;  %v3851_v56 = vmul.u32 %v9779_v50, %v3835_v24  ;;  %vm3853_vm0 = vc.u32 %v9931_v31, %v9937_v11  ;;  %v3854_v61 = vadd.s32 1, %v9938_v54 }
 0x21f   :  { %v4085_v14 = vand.u32 8388607, %v4078_v0  ;;  %v3676_v48 = vsel %vm9888_vm13, 0, %v3674_v43  ;;  %7350 = vcosq.f32 %v3675_v52  ;;  %v11728_v3 = vand.u32 2147483647, %v9958_v42 }
 0x220   :  { %v3855_v1 = vsel %vm3853_vm0, %v3854_v61, %v9938_v54  ;;  %v4093_v29 = vsub.s32 32, %v4092_v4  ;;  %7352 = vsinq.f32 %v3675_v52  ;;  %v4351_v6 = vand.u32 2139095040, %v9958_v42 }
 0x221   :  { %v7347_v45 = vpop.eup %7346  ;;  %v3856_v50 = vadd.s32 %v3855_v1, %v3851_v56  ;;  %v4086_v55 = vor.u32 8388608, %v4085_v14  ;;  %v3680_v40 = vadd.s32 3, %v3676_v48  ;;  %v9963_v7 = vand.u32 3, %v3676_v48 }
 0x222   :  { %v3528_v62 = vmul.f32 %v7347_v45, %v3526_v18  ;;  %v4095_v28 = vshll.u32 %v11781_v38, %v4092_v4  ;;  %v4096_v53 = vshrl.u32 %v11774_v46, %v4093_v29  ;;  %v4098_v32 = vshll.u32 %v11774_v46, %v4092_v4 }
 0x223   :  { %v3857_v9 = vadd.s32 536870912, %v3856_v50  ;;  %v4104_v37 = vshll.u32 %v11776_v41, %v4092_v4  ;;  %v4099_v58 = vshrl.u32 %v11775_v34, %v4093_v29  ;;  %v4105_v24 = vshrl.u32 %v11777_v35, %v4093_v29 }
 0x224   :  { %v3529_v47 = vsub.f32 2.0, %v3528_v62  ;;  %v9975_v54 = vshrl.u32 %v4090_v8, 5  ;;  %v9977_v43 = vshll.u32 %v4086_v55, 8  ;;  %v4101_v61 = vshll.u32 %v11775_v34, %v4092_v4 }
 0x225   :  { %v9969_v25 = vshrl.u32 %v3857_v9, 30  ;;  %v9982_v14 = vand.u32 3, %v3680_v40  ;;  %vm3786_vm2 = vcmp.eq.s32.totalorder %v9963_v7, 0  ;;  %v4100_v62 = vor.u32 %v4099_v58, %v4098_v32 }
 0x226   :  { %v3530_v18 = vmul.f32 %v7347_v45, %v3529_v47  ;;  %v4097_v45 = vor.u32 %v4096_v53, %v4095_v28  ;;  %v4106_v1 = vor.u32 %v4105_v24, %v4104_v37  ;;  %vm3789_vm4 = vcmp.eq.s32.totalorder %v9963_v7, 2 }
 0x227   :  { %v7349_v44 = vpop.eup %7348  ;;  %v3859_v56 = vshll.u32 %v9969_v25, 30  ;;  %vm4110_vm3 = vcmp.lt.s32.totalorder %v9975_v54, 1  ;;  %vm4113_vm5 = vcmp.lt.s32.totalorder %v9975_v54, 4  ;;  %v4352_v55 = vshrl.u32 %v4351_v6, 23 }
 0x228   :  { %v3574_v57 = vmul.f32 %v7349_v44, %v3572_v17  ;;  %v3531_v5 = vmul.f32 %v3530_v18, %v9897_v49  ;;  %v3535_v23 = vmul.f32 %v3530_v18, %v9901_v60  ;;  %v4102_v17 = vshrl.u32 %v11776_v41, %v4093_v29 }
 0x229   :  { %v4107_v49 = vshll.u32 %v11777_v35, %v4092_v4  ;;  %v4108_v60 = vshrl.u32 %v11778_v27, %v4093_v29  ;;  %v9987_v48 = vsub.s32 %v3856_v50, %v3859_v56  ;;  %v7351_v47 = vpop.eup %7350  ;;  %vm3682_vm6 = vcmp.lt.s32.totalorder %v9982_v14, 2 }
 0x22a   :  { %v3575_v52 = vsub.f32 2.0, %v3574_v57  ;;  %3534 = vst [vmem:[#allocation5 + $0x258] sm:$0xff] %v3531_v5  ;;  %3538 = vst [vmem:[#allocation5 + $0x260] sm:$0xff] %v3535_v23  ;;  %v7353_v40 = vpop.eup %7352  ;;  %v4094_v50 = vshrl.u32 %v11781_v38, %v4093_v29  ;;  %vm4111_vm1 = vcmp.lt.s32.totalorder %v9975_v54, 2  ;;  %vm4112_vm15 = vcmp.lt.s32.totalorder %v9975_v54, 3 }
 0x22b   :  { %v3862_v28 = vsub.s32 0, %v9987_v48  ;;  %v4109_v18 = vor.u32 %v4108_v60, %v4107_v49  ;;  %vm3785_vm7 = vcmp.lt.s32.totalorder %v9963_v7, 2  ;;  %v4118_v6 = vsel %vm4110_vm3, %v4097_v45, %v4100_v62 }
 0x22c   :  { %v3576_v8 = vmul.f32 %v7349_v44, %v3575_v52  ;;  %v4103_v44 = vor.u32 %v4102_v17, %v4101_v61  ;;  %v4119_v29 = vsel %vm4113_vm5, %v4106_v1, 920167782  ;;  %vm3683_vm8 = vcmp.eq.s32.totalorder %v9982_v14, 0 }
 0x22d   :  { %v3684_v53 = vxor.u32 2147483648, %v7353_v40  ;;  %vm3686_vm9 = vcmp.eq.s32.totalorder %v9982_v14, 2  ;;  %v3687_v32 = vxor.u32 2147483648, %v7351_v47  ;;  %vm3679_vm10 = vweird.f32 %v9945_v36 }
 0x22e   :  { %v3577_v4 = vmul.f32 %v3576_v8, %v9918_v16  ;;  %v3581_v9 = vmul.f32 %v3576_v8, %v9923_v19  ;;  %v7075_v16 = vmin.u32 %v3862_v28, %v9987_v48  ;;  %v4115_v19 = vsel %vm4113_vm5, %v4103_v44, 2102212464 }
 0x22f   :  { %v3852_v37 = vadd.s32 %v9937_v11, %v9931_v31  ;;  %v4120_v58 = vsel %vm4112_vm15, %v4103_v44, %v4119_v29  ;;  %v7090_v24 = vadd.s32 4294967169, %v4352_v55  ;;  %v4114_v5 = vsel %vm4110_vm3, %v4094_v50, %v4097_v45 }
 0x230   :  { %3580 = vst [vmem:[#allocation5 + $0x248] sm:$0xff] %v3577_v4  ;;  %3584 = vst [vmem:[#allocation5 + $0x250] sm:$0xff] %v3581_v9  ;;  %v3864_v57 = vclz %v7075_v16  ;;  %v4116_v23 = vsel %vm4112_vm15, %v4100_v62, %v4115_v19  ;;  %v4121_v52 = vsel %vm4111_vm1, %v4118_v6, %v4120_v58  ;;  %v4122_v56 = vsel %vm4110_vm3, %v4100_v62, %v4103_v44 }
 0x231   :  { %v4123_v31 = vsel %vm4113_vm5, %v4109_v18, 1326507024  ;;  %v10025_v11 = vmul.u32.u64.low %v9977_v43, %v4121_v52  ;;  %v10026_v17 = vmul.u32.u64.high %v9977_v43, %v4121_v52, %v10025_v11  ;;  %v3685_v45 = vsel %vm3683_vm8, %v7351_v47, %v3684_v53 }
 0x232   :  { %v7076_v61 = vadd.s32 4294967294, %v3864_v57  ;;  %v3688_v49 = vsel %vm3686_vm9, %v3687_v32, %v7353_v40  ;;  %v3791_v60 = vsel %vm3789_vm4, %v3687_v32, %v7353_v40  ;;  %v4124_v8 = vsel %vm4112_vm15, %v4106_v1, %v4123_v31  ;;  %v4032_v32 = vld [vmem:[#allocation2 + $0x110] sm:$0xff]  ;;  %v4305_v57 = vld [vmem:[#allocation2 + $0x118] sm:$0xff] }
 0x233   :  { %v3882_v62 = vsub.s32 4, %v9969_v25  ;;  %v4117_v55 = vsel %vm4111_vm1, %v4114_v5, %v4116_v23  ;;  %v4125_v4 = vsel %vm4111_vm1, %v4122_v56, %v4124_v8  ;;  %v3788_v9 = vsel %vm3786_vm2, %v7351_v47, %v3684_v53  ;;  %v4565_v5 = vld [vmem:[#allocation2 + $0x120] sm:$0xff] }
 0x234   :  { %vm7077_vm12 = vcmp.lt.s32.totalorder %v7076_v61, 0  ;;  %v10043_v44 = vmul.u32.u64.low %v9977_v43, %v4125_v4  ;;  %v10044_v50 = vmul.u32.u64.high %v9977_v43, %v4125_v4, %v10043_v44  ;;  %v4136_v16 = vadd.s32 1, %v10026_v17 }
 0x235   :  { %v3867_v28 = vsel %vm7077_vm12, 0, %v7076_v61  ;;  %vm10050_vm11 = vcmp.le.f32.partialorder %v3796_v63, 0.7853982  ;;  %vm3798_vm13 = vcmp.lt.s32.totalorder %v9702_v26, 0  ;;  %v4133_v54 = vmul.u32 %v9977_v43, %v4117_v55 }
 0x236   :  { %v3868_v40 = vsub.s32 32, %v3867_v28  ;;  %v3869_v1 = vshll.u32 %v9987_v48, %v3867_v28  ;;  %v3872_v18 = vsub.s32 4294967266, %v3867_v28  ;;  %v4358_v47 = vadd.s32 1, %v7090_v24 }
 0x237   :  { %v3689_v6 = vsel %vm3682_vm6, %v3685_v45, %v3688_v49  ;;  %v3883_v48 = vsel %vm3798_vm13, %v3882_v62, %v9969_v25  ;;  %v3792_v63 = vsel %vm3785_vm7, %v3788_v9, %v3791_v60  ;;  %vm4135_vm14 = vc.u32 %v10044_v50, %v10025_v11 }
 0x238   :  { %v3870_v29 = vshrl.u32 %v3852_v37, %v3868_v40  ;;  %v3873_v53 = vadd.s32 127, %v3872_v18  ;;  %v10067_v43 = vand.u32 8388607, %v11728_v3  ;;  %vm4359_vm0 = vcmp.gt.s32.totalorder %v4358_v47, 0 }
 0x239   :  { %v4137_v58 = vsel %vm4135_vm14, %v4136_v16, %v10026_v17  ;;  %v4360_v24 = vsel %vm4359_vm0, %v4358_v47, 0  ;;  %v10072_v7 = vsel %vm3679_vm10, nan, %v3689_v6  ;;  %v3885_v25 = vsel %vm10050_vm11, 0, %v3883_v48 }
 0x23a   :  { %v3871_v14 = vor.u32 %v3870_v29, %v3869_v1  ;;  %v3874_v37 = vshll.u32 %v3873_v53, 23  ;;  %v4138_v23 = vadd.s32 %v4137_v58, %v4133_v54  ;;  %v4362_v52 = vand.u32 31, %v4360_v24 }
 0x23b   :  { %v10077_v31 = vmul.f32 %v9709_v33, %v4032_v32  ;;  %v10080_v45 = vmul.f32 %v9709_v33, %v4305_v57  ;;  %v4356_v49 = vor.u32 8388608, %v10067_v43  ;;  %v10084_v8 = vmul.f32 %v9709_v33, %v4565_v5 }
 0x23c   :  { %v3875_v56 = vor.u32 4788187, %v3874_v37  ;;  %v3878_v61 = vcvt.s32.f32 %v3871_v14  ;;  %v4139_v17 = vadd.s32 536870912, %v4138_v23  ;;  %v4363_v60 = vsub.s32 32, %v4362_v52  ;;  %v11836_v14 = vld [vmem:[#allocation8_spill] sm:$0xff] }
 0x23d   :  { %v10088_v62 = vsel %vm3679_vm10, nan, %v3792_v63  ;;  %v3889_v4 = vadd.s32 3, %v3885_v25  ;;  %v4012_v9 = vsub.f32 0.0, %v10072_v7  ;;  %v4365_v44 = vshll.u32 %v11781_v38, %v4362_v52 }
 0x23e   :  { %v3876_v55 = vand.u32 2147483647, %v3875_v56  ;;  %v10091_v28 = vshrl.u32 %v4139_v17, 30  ;;  %v4368_v40 = vshll.u32 %v11774_v46, %v4362_v52  ;;  %v4374_v1 = vshll.u32 %v11776_v41, %v4362_v52 }
 0x23f   :  { %v4366_v33 = vshrl.u32 %v11774_v46, %v4363_v60  ;;  %v4369_v16 = vshrl.u32 %v11775_v34, %v4363_v60  ;;  %v4375_v36 = vshrl.u32 %v11777_v35, %v4363_v60  ;;  %v10101_v54 = vmul.f32 %v10088_v62, %v11814_v30 }
 0x240   :  { %v3879_v18 = vmul.f32 %v3878_v61, %v3876_v55  ;;  %v4141_v47 = vshll.u32 %v10091_v28, 30  ;;  %v10104_v6 = vshrl.u32 %v4360_v24, 5  ;;  %v4371_v29 = vshll.u32 %v11775_v34, %v4362_v52  ;;  %v10120_v24 = vld [vmem:[#allocation2 + $0x90] sm:$0xff] }
 0x241   :  { %v4372_v48 = vshrl.u32 %v11776_v41, %v4363_v60  ;;  %v4377_v63 = vshll.u32 %v11777_v35, %v4362_v52  ;;  %v4378_v32 = vshrl.u32 %v11778_v27, %v4363_v60  ;;  %v10110_v57 = vand.u32 3, %v3889_v4  ;;  %11837 = vst [vmem:[#allocation19_spill] sm:$0xff] %v10120_v24 }
 0x242   :  { %v3880_v53 = vxor.u32 2147483648, %v3879_v18  ;;  %v10112_v43 = vand.u32 3, %v3885_v25  ;;  %v10116_v37 = vmul.f32 %v10072_v7, %v11836_v14  ;;  %v10118_v58 = vsub.s32 %v4138_v23, %v4141_v47 }
 0x243   :  { %v4367_v56 = vor.u32 %v4366_v33, %v4365_v44  ;;  %v4370_v61 = vor.u32 %v4369_v16, %v4368_v40  ;;  %v4376_v52 = vor.u32 %v4375_v36, %v4374_v1  ;;  %vm4380_vm2 = vcmp.lt.s32.totalorder %v10104_v6, 1 }
 0x244   :  { %v3881_v5 = vsel %vm3798_vm13, %v3880_v53, %v3879_v18  ;;  %v4144_v25 = vsub.s32 0, %v10118_v58  ;;  %vm4383_vm4 = vcmp.lt.s32.totalorder %v10104_v6, 4  ;;  %v4373_v23 = vor.u32 %v4372_v48, %v4371_v29 }
 0x245   :  { %v3884_v17 = vsel %vm10050_vm11, %v9702_v26, %v3881_v5  ;;  %v4379_v55 = vor.u32 %v4378_v32, %v4377_v63  ;;  %v4653_v4 = vand.u32 2139095040, %v10120_v24  ;;  %v4364_v40 = vshrl.u32 %v11781_v38, %v4363_v60 }
 0x246   :  { %7354 = vcosq.f32 %v3884_v17  ;;  %v7083_v44 = vmin.u32 %v4144_v25, %v10118_v58  ;;  %vm4382_vm3 = vcmp.lt.s32.totalorder %v10104_v6, 3  ;;  %vm4381_vm5 = vcmp.lt.s32.totalorder %v10104_v6, 2 }
 0x247   :  { %7356 = vsinq.f32 %v3884_v17  ;;  %v4388_v19 = vsel %vm4380_vm2, %v4367_v56, %v4370_v61  ;;  %v4389_v1 = vsel %vm4383_vm4, %v4376_v52, 920167782  ;;  %v10139_v18 = vshll.u32 %v4356_v49, 8 }
 0x248   :  { %vm3995_vm6 = vcmp.eq.s32.totalorder %v10112_v43, 0  ;;  %vm3998_vm1 = vcmp.eq.s32.totalorder %v10112_v43, 2  ;;  %vm4080_vm15 = vcmp.lt.s32.totalorder %v9718_v2, 0  ;;  %v4146_v33 = vclz %v7083_v44 }
 0x249   :  { %v4385_v60 = vsel %vm4383_vm4, %v4373_v23, 2102212464  ;;  %vm3994_vm7 = vcmp.lt.s32.totalorder %v10112_v43, 2  ;;  %v4390_v16 = vsel %vm4382_vm3, %v4373_v23, %v4389_v1  ;;  %v4392_v36 = vsel %vm4380_vm2, %v4370_v61, %v4373_v23 }
 0x24a   :  { %v4393_v49 = vsel %vm4383_vm4, %v4379_v55, 1326507024  ;;  %v4654_v47 = vshrl.u32 %v4653_v4, 23  ;;  %vm3888_vm8 = vweird.f32 %v9702_v26  ;;  %v7084_v29 = vadd.s32 4294967294, %v4146_v33 }
 0x24b   :  { %v4384_v53 = vsel %vm4380_vm2, %v4364_v40, %v4367_v56  ;;  %v4391_v48 = vsel %vm4381_vm5, %v4388_v19, %v4390_v16  ;;  %v4394_v63 = vsel %vm4382_vm3, %v4376_v52, %v4393_v49  ;;  %vm10162_vm9 = vcmp.le.f32.partialorder %v4078_v0, 0.7853982 }
 0x24c   :  { %v4386_v5 = vsel %vm4382_vm3, %v4370_v61, %v4385_v60  ;;  %v4395_v17 = vsel %vm4381_vm5, %v4392_v36, %v4394_v63  ;;  %v10171_v56 = vmul.u32.u64.low %v10139_v18, %v4391_v48  ;;  %v10172_v25 = vmul.u32.u64.high %v10139_v18, %v4391_v48, %v10171_v56 }
 0x24d   :  { %v4134_v52 = vadd.s32 %v10025_v11, %v10044_v50  ;;  %vm7085_vm10 = vcmp.lt.s32.totalorder %v7084_v29, 0  ;;  %v10178_v0 = vmul.u32.u64.low %v10139_v18, %v4395_v17  ;;  %v10179_v23 = vmul.u32.u64.high %v10139_v18, %v4395_v17, %v10178_v0  ;;  %v11840_v50 = vld [vmem:[#allocation13_spill] sm:$0xff] }
 0x24e   :  { %vm3891_vm12 = vcmp.lt.s32.totalorder %v10110_v57, 2  ;;  %vm3892_vm11 = vcmp.eq.s32.totalorder %v10110_v57, 0  ;;  %v4149_v61 = vsel %vm7085_vm10, 0, %v7084_v29  ;;  %v4164_v55 = vsub.s32 4, %v10091_v28 }
 0x24f   :  { %v4150_v4 = vsub.s32 32, %v4149_v61  ;;  %v4151_v44 = vshll.u32 %v10118_v58, %v4149_v61  ;;  %v4154_v40 = vsub.s32 4294967266, %v4149_v61  ;;  %v4387_v19 = vsel %vm4381_vm5, %v4384_v53, %v4386_v5 }
 0x250   :  { %v7355_v11 = vpop.eup %7354  ;;  %vm3895_vm13 = vcmp.eq.s32.totalorder %v10110_v57, 2  ;;  %v10190_v1 = vmul.f32 %v10088_v62, %v11840_v50  ;;  %v4406_v33 = vadd.s32 1, %v10172_v25  ;;  %v7098_v60 = vadd.s32 4294967169, %v4654_v47 }
 0x251   :  { %v7357_v16 = vpop.eup %7356  ;;  %v3896_v36 = vxor.u32 2147483648, %v7355_v11  ;;  %v4152_v49 = vshrl.u32 %v4134_v52, %v4150_v4  ;;  %v4155_v29 = vadd.s32 127, %v4154_v40  ;;  %v4165_v6 = vsel %vm4080_vm15, %v4164_v55, %v10091_v28 }
 0x252   :  { %v3893_v48 = vxor.u32 2147483648, %v7357_v16  ;;  %v4403_v53 = vmul.u32 %v10139_v18, %v4387_v19  ;;  %vm4405_vm14 = vc.u32 %v10179_v23, %v10171_v56  ;;  %v4660_v28 = vadd.s32 1, %v7098_v60  ;;  %v11842_v60 = vld [vmem:[#allocation15_spill] sm:$0xff] }
 0x253   :  { %v3897_v63 = vsel %vm3895_vm13, %v3896_v36, %v7357_v16  ;;  %v4000_v47 = vsel %vm3998_vm1, %v3896_v36, %v7357_v16  ;;  %v4153_v5 = vor.u32 %v4152_v49, %v4151_v44  ;;  %v4156_v17 = vshll.u32 %v4155_v29, 23  ;;  %v11843_v49 = vld [vmem:[#allocation16_spill] sm:$0xff] }
 0x254   :  { %v3894_v52 = vsel %vm3892_vm11, %v7355_v11, %v3893_v48  ;;  %v3997_v0 = vsel %vm3995_vm6, %v7355_v11, %v3893_v48  ;;  %v4407_v61 = vsel %vm4405_vm14, %v4406_v33, %v10172_v25  ;;  %v4167_v44 = vsel %vm10162_vm9, 0, %v4165_v6  ;;  %v11841_v33 = vld [vmem:[#allocation11_spill] sm:$0xff] }
 0x255   :  { %v3898_v18 = vsel %vm3891_vm12, %v3894_v52, %v3897_v63  ;;  %v4001_v55 = vsel %vm3994_vm7, %v3997_v0, %v4000_v47  ;;  %v4157_v4 = vor.u32 4788187, %v4156_v17  ;;  %v4160_v11 = vcvt.s32.f32 %v4153_v5  ;;  %v11845_v17 = vld [vmem:[#allocation10_spill] sm:$0xff] }
 0x256   :  { %v3899_v40 = vsel %vm3888_vm8, nan, %v3898_v18  ;;  %v4002_v19 = vsel %vm3888_vm8, nan, %v4001_v55  ;;  %v4408_v16 = vadd.s32 %v4407_v61, %v4403_v53  ;;  %vm4661_vm0 = vcmp.gt.s32.totalorder %v4660_v28, 0 }
 0x257   :  { %v4013_v25 = vmul.f32 %v4012_v9, %v4002_v19  ;;  %v4014_v57 = vmul.f32 %v4002_v19, %v10088_v62  ;;  %v4015_v43 = vmul.f32 %v3899_v40, %v11841_v33  ;;  %v4020_v36 = vmul.f32 %v3899_v40, %v11842_v60  ;;  %v11844_v9 = vld [vmem:[#allocation14_spill] sm:$0xff] }
 0x258   :  { %v4025_v29 = vmul.f32 %v3899_v40, %v11843_v49  ;;  %v4158_v48 = vand.u32 2147483647, %v4157_v4  ;;  %v4409_v6 = vadd.s32 536870912, %v4408_v16  ;;  %v4007_v4 = vmul.f32 %v10072_v7, %v11820_v12 }
 0x259   :  { %v4016_v63 = vmul.f32 %v4013_v25, %v11814_v30  ;;  %v4018_v26 = vmul.f32 %v4014_v57, %v11836_v14  ;;  %v4021_v53 = vmul.f32 %v4013_v25, %v11840_v50  ;;  %v4023_v47 = vmul.f32 %v4014_v57, %v11820_v12 }
 0x25a   :  { %v4026_v5 = vmul.f32 %v4013_v25, %v11844_v9  ;;  %v4028_v52 = vmul.f32 %v4014_v57, %v11845_v17  ;;  %v4161_v0 = vmul.f32 %v4160_v11, %v4158_v48  ;;  %v10229_v61 = vshrl.u32 %v4409_v6, 30 }
 0x25b   :  { %v4017_v18 = vadd.f32 %v4016_v63, %v4015_v43  ;;  %v4022_v55 = vadd.f32 %v4021_v53, %v4020_v36  ;;  %v4009_v40 = vmul.f32 %v10088_v62, %v11844_v9  ;;  %v4010_v58 = vmul.f32 %v10072_v7, %v11845_v17 }
 0x25c   :  { %v4027_v19 = vadd.f32 %v4026_v5, %v4025_v29  ;;  %v4162_v3 = vxor.u32 2147483648, %v4161_v0  ;;  %v4411_v25 = vshll.u32 %v10229_v61, 30  ;;  %v4171_v57 = vadd.s32 3, %v4167_v44 }
 0x25d   :  { %v10238_v50 = vadd.f32 %v4018_v26, %v4017_v18  ;;  %v10240_v11 = vadd.f32 %v4023_v47, %v4022_v55  ;;  %v4662_v43 = vsel %vm4661_vm0, %v4660_v28, 0  ;;  %v11846_v29 = vand.u32 2147483647, %v10120_v24  ;;  %v7460_v47 = vld [vmem:[#allocation5] sm:$0xff] }
 0x25e   :  { %v10243_v36 = vadd.f32 %v4028_v52, %v4027_v19  ;;  %v4163_v48 = vsel %vm4080_vm15, %v4162_v3, %v4161_v0  ;;  %v10247_v62 = vsub.s32 %v4408_v16, %v4411_v25  ;;  %v10258_v26 = vand.u32 3, %v4167_v44  ;;  %v7461_v52 = vld [vmem:[#allocation5 + $0x8] sm:$0xff]  ;;  %v7462_v44 = vld [vmem:[#allocation5 + $0x10] sm:$0xff] }
 0x25f   :  { %v4657_v6 = vand.u32 8388607, %v11846_v29  ;;  %v4034_v7 = vmul.f32 %v10077_v31, %v10238_v50  ;;  %v4036_v63 = vmul.f32 %v10077_v31, %v10240_v11  ;;  %v4166_v28 = vsel %vm10162_vm9, %v9718_v2, %v4163_v48 }
 0x260   :  { %v4038_v3 = vmul.f32 %v10077_v31, %v10243_v36  ;;  %7358 = vcosq.f32 %v4166_v28  ;;  %vm4350_vm2 = vcmp.lt.s32.totalorder %v9958_v42, 0  ;;  %v4414_v16 = vsub.s32 0, %v10247_v62 }
 0x261   :  { %v10264_v53 = vand.u32 31, %v4662_v43  ;;  %v10266_v5 = vadd.f32 %v7460_v47, %v4034_v7  ;;  %v10268_v0 = vadd.f32 %v7461_v52, %v4036_v63  ;;  %7360 = vsinq.f32 %v4166_v28 }
 0x262   :  { %v10270_v32 = vand.u32 3, %v4171_v57  ;;  %v10272_v18 = vadd.f32 %v7462_v44, %v4038_v3  ;;  %v10276_v31 = vadd.f32 %v10116_v37, %v10101_v54  ;;  %v7091_v55 = vmin.u32 %v4414_v16, %v10247_v62 }
 0x263   :  { %v4658_v19 = vor.u32 8388608, %v4657_v6  ;;  %4042 = vst [vmem:[#allocation5 + $0x120] sm:$0xff] %v10266_v5  ;;  %4045 = vst [vmem:[#allocation5 + $0x128] sm:$0xff] %v10268_v0  ;;  %v4059_v25 = vmul.f32 %v9864_v22, %v10266_v5  ;;  %v4060_v57 = vmul.f32 %v9867_v39, %v10268_v0  ;;  %v10286_v48 = vadd.f32 %v4007_v4, %v10190_v1 }
 0x264   :  { %v10288_v29 = vadd.f32 %v4010_v58, %v4009_v40  ;;  %v11847_v54 = vand.u32 2147483647, %v9958_v42  ;;  %4048 = vst [vmem:[#allocation5 + $0x130] sm:$0xff] %v10272_v18  ;;  %v4062_v6 = vmul.f32 %v9874_v59, %v10272_v18  ;;  %vm4276_vm3 = vcmp.lt.s32.totalorder %v10258_v26, 2  ;;  %v10305_v58 = vld [vmem:[#allocation2 + $0x98] sm:$0xff] }
 0x265   :  { %vm4277_vm5 = vcmp.eq.s32.totalorder %v10258_v26, 0  ;;  %vm4280_vm6 = vcmp.eq.s32.totalorder %v10258_v26, 2  ;;  %v10303_v1 = vsub.s32 32, %v10264_v53  ;;  %v4061_v4 = vadd.f32 %v4060_v57, %v4059_v25 }
 0x266   :  { %vm10292_vm4 = vcmp.le.f32.partialorder %v11847_v54, 0.7853982  ;;  %vm4170_vm1 = vweird.f32 %v9718_v2  ;;  %vm4173_vm15 = vcmp.lt.s32.totalorder %v10270_v32, 2  ;;  %v4416_v40 = vclz %v7091_v55 }
 0x267   :  { %v4434_v7 = vsub.s32 4, %v10229_v61  ;;  %vm4174_vm7 = vcmp.eq.s32.totalorder %v10270_v32, 0  ;;  %vm4177_vm8 = vcmp.eq.s32.totalorder %v10270_v32, 2  ;;  %v10312_v63 = vshll.u32 %v4658_v19, 8 }
 0x268   :  { %v4063_v3 = vadd.f32 %v4062_v6, %v4061_v4  ;;  %v4404_v16 = vadd.s32 %v10171_v56, %v10179_v23  ;;  %v7092_v47 = vadd.s32 4294967294, %v4416_v40  ;;  %v10318_v44 = vshrl.u32 %v4662_v43, 5 }
 0x269   :  { %v10322_v55 = vshrl.u32 %v11781_v38, %v10303_v1  ;;  %v10326_v25 = vshll.u32 %v11781_v38, %v10264_v53  ;;  %v10330_v19 = vshrl.u32 %v11774_v46, %v10303_v1  ;;  %v4435_v56 = vsel %vm4350_vm2, %v4434_v7, %v10229_v61 }
 0x26a   :  { %7362 = vrcp.f32 %v4063_v3  ;;  %vm7093_vm9 = vcmp.lt.s32.totalorder %v7092_v47, 0  ;;  %v10337_v23 = vshll.u32 %v11774_v46, %v10264_v53  ;;  %v7359_v43 = vpop.eup %7358  ;;  %v4049_v57 = vmul.f32 %v9858_v15, %v10266_v5 }
 0x26b   :  { %v4050_v54 = vmul.f32 %v9861_v13, %v10268_v0  ;;  %v4054_v6 = vmul.f32 %v9877_v21, %v10266_v5  ;;  %v4419_v4 = vsel %vm7093_vm9, 0, %v7092_v47  ;;  %v7361_v40 = vpop.eup %7360  ;;  %v4055_v28 = vmul.f32 %v9880_v10, %v10268_v0 }
 0x26c   :  { %v4178_v61 = vxor.u32 2147483648, %v7359_v43  ;;  %v4420_v7 = vsub.s32 32, %v4419_v4  ;;  %v4424_v52 = vsub.s32 4294967266, %v4419_v4  ;;  %v4052_v17 = vmul.f32 %v9871_v51, %v10272_v18 }
 0x26d   :  { %v4175_v9 = vxor.u32 2147483648, %v7361_v40  ;;  %v4421_v12 = vshll.u32 %v10247_v62, %v4419_v4  ;;  %v4437_v14 = vsel %vm10292_vm4, 0, %v4435_v56  ;;  %v4051_v30 = vadd.f32 %v4050_v54, %v4049_v57 }
 0x26e   :  { %v4179_v49 = vsel %vm4177_vm8, %v4178_v61, %v7361_v40  ;;  %v4282_v47 = vsel %vm4280_vm6, %v4178_v61, %v7361_v40  ;;  %v4422_v60 = vshrl.u32 %v4404_v16, %v4420_v7  ;;  %v4425_v33 = vadd.s32 127, %v4424_v52 }
 0x26f   :  { %v4057_v24 = vmul.f32 %v9883_v20, %v10272_v18  ;;  %v4176_v46 = vsel %vm4174_vm7, %v7359_v43, %v4175_v9  ;;  %v4279_v62 = vsel %vm4277_vm5, %v7359_v43, %v4175_v9  ;;  %v4056_v4 = vadd.f32 %v4055_v28, %v4054_v6 }
 0x270   :  { %v4180_v56 = vsel %vm4173_vm15, %v4176_v46, %v4179_v49  ;;  %v4283_v38 = vsel %vm4276_vm3, %v4279_v62, %v4282_v47  ;;  %v4426_v40 = vshll.u32 %v4425_v33, 23  ;;  %v4423_v57 = vor.u32 %v4422_v60, %v4421_v12 }
 0x271   :  { %v10368_v16 = vsel %vm4170_vm1, nan, %v4180_v56  ;;  %v10372_v52 = vsel %vm4170_vm1, nan, %v4283_v38  ;;  %v4441_v54 = vadd.s32 3, %v4437_v14  ;;  %v4053_v26 = vadd.f32 %v4052_v17, %v4051_v30 }
 0x272   :  { %v4294_v9 = vmul.f32 %v10372_v52, %v10238_v50  ;;  %v4295_v46 = vmul.f32 %v10368_v16, %v10276_v31  ;;  %v4297_v49 = vmul.f32 %v10372_v52, %v10240_v11  ;;  %v4298_v33 = vmul.f32 %v10368_v16, %v10286_v48 }
 0x273   :  { %v4300_v2 = vmul.f32 %v10372_v52, %v10243_v36  ;;  %v4301_v38 = vmul.f32 %v10368_v16, %v10288_v29  ;;  %v10386_v12 = vand.u32 3, %v4437_v14  ;;  %v4058_v32 = vadd.f32 %v4057_v24, %v4056_v4 }
 0x274   :  { %v7363_v60 = vpop.eup %7362  ;;  %v10388_v28 = vsub.f32 %v4294_v9, %v4295_v46  ;;  %v10390_v43 = vsub.f32 %v4297_v49, %v4298_v33  ;;  %v4427_v6 = vor.u32 4788187, %v4426_v40  ;;  %v4430_v47 = vcvt.s32.f32 %v4423_v57 }
 0x275   :  { %v4065_v61 = vmul.f32 %v7363_v60, %v4063_v3  ;;  %v10392_v7 = vsub.f32 %v4300_v2, %v4301_v38  ;;  %v4671_v30 = vshrl.u32 %v11775_v34, %v10303_v1  ;;  %v4673_v24 = vshll.u32 %v11775_v34, %v10264_v53 }
 0x276   :  { %v4307_v17 = vmul.f32 %v10080_v45, %v10388_v28  ;;  %v4309_v14 = vmul.f32 %v10080_v45, %v10390_v43  ;;  %v4428_v62 = vand.u32 2147483647, %v4427_v6  ;;  %v4676_v56 = vshll.u32 %v11776_v41, %v10264_v53 }
 0x277   :  { %v4066_v4 = vsub.f32 2.0, %v4065_v61  ;;  %v4311_v3 = vmul.f32 %v10080_v45, %v10392_v7  ;;  %v4677_v40 = vshrl.u32 %v11777_v35, %v10303_v1  ;;  %v4674_v46 = vshrl.u32 %v11776_v41, %v10303_v1 }
 0x278   :  { %v10409_v57 = vadd.f32 %v4307_v17, %v10266_v5  ;;  %v10412_v9 = vadd.f32 %v4309_v14, %v10268_v0  ;;  %v4679_v49 = vshll.u32 %v11777_v35, %v10264_v53  ;;  %v4431_v2 = vmul.f32 %v4430_v47, %v4428_v62 }
 0x279   :  { %v4067_v33 = vmul.f32 %v7363_v60, %v4066_v4  ;;  %v10419_v45 = vadd.f32 %v4311_v3, %v10272_v18  ;;  %v4680_v38 = vshrl.u32 %v11778_v27, %v10303_v1  ;;  %v4669_v53 = vor.u32 %v10330_v19, %v10326_v25 }
 0x27a   :  { %4314 = vst [vmem:[#allocation5 + $0x108] sm:$0xff] %v10409_v57  ;;  %4316 = vst [vmem:[#allocation5 + $0x110] sm:$0xff] %v10412_v9  ;;  %v4329_v5 = vmul.f32 %v9864_v22, %v10409_v57  ;;  %v4330_v0 = vmul.f32 %v9867_v39, %v10412_v9  ;;  %v4672_v18 = vor.u32 %v4671_v30, %v10337_v23  ;;  %v10435_v17 = vand.u32 3, %v4441_v54 }
 0x27b   :  { %v4068_v60 = vmul.f32 %v4067_v33, %v4053_v26  ;;  %v4072_v6 = vmul.f32 %v4067_v33, %v4058_v32  ;;  %4318 = vst [vmem:[#allocation5 + $0x118] sm:$0xff] %v10419_v45  ;;  %v4332_v1 = vmul.f32 %v9874_v59, %v10419_v45  ;;  %v4678_v61 = vor.u32 %v4677_v40, %v4676_v56 }
 0x27c   :  { %v4331_v47 = vadd.f32 %v4330_v0, %v4329_v5  ;;  %v4675_v22 = vor.u32 %v4674_v46, %v4673_v24  ;;  %vm4682_vm10 = vcmp.lt.s32.totalorder %v10318_v44, 1  ;;  %v4432_v39 = vxor.u32 2147483648, %v4431_v2 }
 0x27d   :  { %4071 = vst [vmem:[#allocation5 + $0x2b8] sm:$0xff] %v4068_v60  ;;  %4075 = vst [vmem:[#allocation5 + $0x2c0] sm:$0xff] %v4072_v6  ;;  %v4681_v25 = vor.u32 %v4680_v38, %v4679_v49  ;;  %vm4683_vm12 = vcmp.lt.s32.totalorder %v10318_v44, 2  ;;  %vm4685_vm11 = vcmp.lt.s32.totalorder %v10318_v44, 4  ;;  %vm4684_vm13 = vcmp.lt.s32.totalorder %v10318_v44, 3 }
 0x27e   :  { %v4333_v19 = vadd.f32 %v4332_v1, %v4331_v47  ;;  %v4686_v59 = vsel %vm4682_vm10, %v10322_v55, %v4669_v53  ;;  %v4687_v23 = vsel %vm4685_vm11, %v4675_v22, 2102212464  ;;  %v4433_v54 = vsel %vm4350_vm2, %v4432_v39, %v4431_v2 }
 0x27f   :  { %v4688_v26 = vsel %vm4684_vm13, %v4672_v18, %v4687_v23  ;;  %v4690_v32 = vsel %vm4682_vm10, %v4669_v53, %v4672_v18  ;;  %v4691_v30 = vsel %vm4685_vm11, %v4678_v61, 920167782  ;;  %v4319_v14 = vmul.f32 %v9858_v15, %v10409_v57 }
 0x280   :  { %v4320_v55 = vmul.f32 %v9861_v13, %v10412_v9  ;;  %7364 = vrcp.f32 %v4333_v19  ;;  %v4436_v62 = vsel %vm10292_vm4, %v9958_v42, %v4433_v54  ;;  %v4692_v24 = vsel %vm4684_vm13, %v4675_v22, %v4691_v30 }
 0x281   :  { %7366 = vcosq.f32 %v4436_v62  ;;  %v4694_v4 = vsel %vm4682_vm10, %v4672_v18, %v4675_v22  ;;  %v4695_v3 = vsel %vm4685_vm11, %v4681_v25, 1326507024  ;;  %v4689_v15 = vsel %vm4683_vm12, %v4686_v59, %v4688_v26 }
 0x282   :  { %7368 = vsinq.f32 %v4436_v62  ;;  %v4693_v13 = vsel %vm4683_vm12, %v4690_v32, %v4692_v24  ;;  %v4696_v37 = vsel %vm4684_vm13, %v4678_v61, %v4695_v3  ;;  %v11850_v49 = vand.u32 2139095040, %v10305_v58 }
 0x283   :  { %v4697_v56 = vsel %vm4683_vm12, %v4694_v4, %v4696_v37  ;;  %v10476_v40 = vmul.u32.u64.low %v10312_v63, %v4693_v13  ;;  %v10477_v46 = vmul.u32.u64.high %v10312_v63, %v4693_v13, %v10476_v40  ;;  %v4324_v2 = vmul.f32 %v9877_v21, %v10409_v57 }
 0x284   :  { %v4863_v33 = vshrl.u32 %v11850_v49, 23  ;;  %v4325_v38 = vmul.f32 %v9880_v10, %v10412_v9  ;;  %v10487_v5 = vmul.u32.u64.low %v10312_v63, %v4697_v56  ;;  %v10488_v0 = vmul.u32.u64.high %v10312_v63, %v4697_v56, %v10487_v5 }
 0x285   :  { %v4285_v44 = vmul.f32 %v10372_v52, %v10276_v31  ;;  %vm4443_vm14 = vcmp.lt.s32.totalorder %v10435_v17, 2  ;;  %vm4444_vm0 = vcmp.eq.s32.totalorder %v10435_v17, 0  ;;  %vm4447_vm2 = vcmp.eq.s32.totalorder %v10435_v17, 2 }
 0x286   :  { %v7106_v53 = vadd.s32 4294967169, %v4863_v33  ;;  %v4286_v21 = vmul.f32 %v10368_v16, %v10238_v50  ;;  %vm4440_vm4 = vweird.f32 %v9958_v42  ;;  %v4288_v10 = vmul.f32 %v10372_v52, %v10286_v48 }
 0x287   :  { %v4289_v18 = vmul.f32 %v10368_v16, %v10240_v11  ;;  %v4705_v31 = vmul.u32 %v10312_v63, %v4689_v15  ;;  %v4322_v60 = vmul.f32 %v9871_v51, %v10419_v45  ;;  %v4291_v6 = vmul.f32 %v10372_v52, %v10288_v29  ;;  %v10514_v11 = vld [vmem:[#allocation2 + $0xa0] sm:$0xff] }
 0x288   :  { %v4292_v1 = vmul.f32 %v10368_v16, %v10243_v36  ;;  %v4708_v50 = vadd.s32 1, %v10477_v46  ;;  %v4321_v61 = vadd.f32 %v4320_v55, %v4319_v14  ;;  %v4326_v47 = vadd.f32 %v4325_v38, %v4324_v2 }
 0x289   :  { %v4327_v48 = vmul.f32 %v9883_v20, %v10419_v45  ;;  %vm4707_vm3 = vc.u32 %v10488_v0, %v10476_v40  ;;  %vm4546_vm5 = vcmp.lt.s32.totalorder %v10386_v12, 2  ;;  %vm4547_vm6 = vcmp.eq.s32.totalorder %v10386_v12, 0 }
 0x28a   :  { %v4709_v51 = vsel %vm4707_vm3, %v4708_v50, %v10477_v46  ;;  %v4869_v29 = vadd.s32 1, %v7106_v53  ;;  %v7365_v36 = vpop.eup %7364  ;;  %v4287_v63 = vadd.f32 %v4286_v21, %v4285_v44  ;;  %vm4550_vm1 = vcmp.eq.s32.totalorder %v10386_v12, 2 }
 0x28b   :  { %v4710_v16 = vadd.s32 %v4709_v51, %v4705_v31  ;;  %v11851_v52 = vand.u32 2147483647, %v10305_v58  ;;  %v7367_v22 = vpop.eup %7366  ;;  %v4335_v39 = vmul.f32 %v7365_v36, %v4333_v19  ;;  %v4290_v25 = vadd.f32 %v4289_v18, %v4288_v10  ;;  %v4607_v10 = vld [vmem:[#allocation2 + $0x128] sm:$0xff] }
 0x28c   :  { %v4293_v59 = vadd.f32 %v4292_v1, %v4291_v6  ;;  %v5140_v23 = vand.u32 2139095040, %v10514_v11  ;;  %v7369_v54 = vpop.eup %7368  ;;  %v4323_v26 = vadd.f32 %v4322_v60, %v4321_v61  ;;  %v4328_v32 = vadd.f32 %v4327_v48, %v4326_v47  ;;  %v10548_v48 = vld [vmem:[#allocation2 + $0x170] sm:$0xff] }
 0x28d   :  { %v4866_v20 = vand.u32 8388607, %v11851_v52  ;;  %v4448_v30 = vxor.u32 2147483648, %v7367_v22  ;;  %v4711_v14 = vadd.s32 536870912, %v4710_v16  ;;  %v4336_v55 = vsub.f32 2.0, %v4335_v39 }
 0x28e   :  { %v4445_v62 = vxor.u32 2147483648, %v7369_v54  ;;  %vm4870_vm15 = vcmp.gt.s32.totalorder %v4869_v29, 0  ;;  %v5137_v24 = vand.u32 2147483647, %v10514_v11  ;;  %v5141_v46 = vshrl.u32 %v5140_v23, 23 }
 0x28f   :  { %v4449_v4 = vsel %vm4447_vm2, %v4448_v30, %v7369_v54  ;;  %v4552_v19 = vsel %vm4550_vm1, %v4448_v30, %v7369_v54  ;;  %v10528_v3 = vshrl.u32 %v4711_v14, 30  ;;  %v4867_v15 = vor.u32 8388608, %v4866_v20  ;;  %v10581_v14 = vld [vmem:[#allocation2 + $0x198] sm:$0xff] }
 0x290   :  { %v4337_v13 = vmul.f32 %v7365_v36, %v4336_v55  ;;  %v4446_v37 = vsel %vm4444_vm0, %v7367_v22, %v4445_v62  ;;  %v4549_v56 = vsel %vm4547_vm6, %v7367_v22, %v4445_v62  ;;  %v4871_v38 = vsel %vm4870_vm15, %v4869_v29, 0  ;;  %v10587_v62 = vld [vmem:[#allocation2 + $0x1c8] sm:$0xff] }
 0x291   :  { %v4450_v49 = vsel %vm4443_vm14, %v4446_v37, %v4449_v4  ;;  %v4553_v33 = vsel %vm4546_vm5, %v4549_v56, %v4552_v19  ;;  %v4713_v2 = vshll.u32 %v10528_v3, 30  ;;  %v7114_v50 = vadd.s32 4294967169, %v5141_v46  ;;  %v10590_v4 = vld [vmem:[#allocation2 + $0x1a0] sm:$0xff]  ;;  %v10596_v37 = vld [vmem:[#allocation2 + $0x1a8] sm:$0xff]  ;;  %v10599_v46 = vld [vmem:[#allocation2 + $0x1b0] sm:$0xff] }
 0x292   :  { %v4338_v5 = vmul.f32 %v4337_v13, %v4323_v26  ;;  %v4342_v44 = vmul.f32 %v4337_v13, %v4328_v32  ;;  %v4451_v53 = vsel %vm4440_vm4, nan, %v4450_v49  ;;  %v4554_v21 = vsel %vm4440_vm4, nan, %v4553_v33 }
 0x293   :  { %v4555_v18 = vmul.f32 %v4554_v21, %v10388_v28  ;;  %v4556_v31 = vmul.f32 %v4451_v53, %v4287_v63  ;;  %v4558_v17 = vmul.f32 %v4554_v21, %v10390_v43  ;;  %v4559_v60 = vmul.f32 %v4451_v53, %v4290_v25 }
 0x294   :  { %4341 = vst [vmem:[#allocation5 + $0x2a8] sm:$0xff] %v4338_v5  ;;  %4345 = vst [vmem:[#allocation5 + $0x2b0] sm:$0xff] %v4342_v44  ;;  %v4561_v12 = vmul.f32 %v4554_v21, %v10392_v7  ;;  %v4562_v6 = vmul.f32 %v4451_v53, %v4293_v59  ;;  %v10546_v1 = vsub.s32 %v4710_v16, %v4713_v2  ;;  %v10551_v51 = vand.u32 31, %v4871_v38 }
 0x295   :  { %v4557_v61 = vsub.f32 %v4555_v18, %v4556_v31  ;;  %v4560_v47 = vsub.f32 %v4558_v17, %v4559_v60  ;;  %v4608_v42 = vmul.f32 %v10548_v48, %v4607_v10  ;;  %v10556_v29 = vand.u32 8388607, %v5137_v24 }
 0x296   :  { %v4563_v28 = vsub.f32 %v4561_v12, %v4562_v6  ;;  %v4716_v43 = vsub.s32 0, %v10546_v1  ;;  %v10562_v63 = vadd.s32 %v10476_v40, %v10488_v0  ;;  %v10564_v16 = vshll.u32 %v4867_v15, 8  ;;  %v10593_v15 = vld [vmem:[#allocation2 + $0x1d0] sm:$0xff] }
 0x297   :  { %v4567_v7 = vmul.f32 %v10084_v8, %v4557_v61  ;;  %v4569_v36 = vmul.f32 %v10084_v8, %v4560_v47  ;;  %v10568_v22 = vshrl.u32 %v4871_v38, 5  ;;  %v10570_v39 = vadd.s32 1, %v7114_v50  ;;  %v10602_v38 = vld [vmem:[#allocation2 + $0x1b8] sm:$0xff] }
 0x298   :  { %v4571_v52 = vmul.f32 %v10084_v8, %v4563_v28  ;;  %v7099_v20 = vmin.u32 %v4716_v43, %v10546_v1  ;;  %v4609_v23 = vmul.f32 %v4608_v42, %v4557_v61  ;;  %v10575_v54 = vsub.s32 32, %v10551_v51  ;;  %v10578_v8 = vld [vmem:[#allocation2 + $0x190] sm:$0xff] }
 0x299   :  { %v4568_v25 = vadd.f32 %v4567_v7, %v10409_v57  ;;  %v4570_v59 = vadd.f32 %v4569_v36, %v10412_v9  ;;  %v4611_v0 = vmul.f32 %v4608_v42, %v4560_v47  ;;  %v4613_v26 = vmul.f32 %v4608_v42, %v4563_v28  ;;  %v10584_v9 = vld [vmem:[#allocation2 + $0x1c0] sm:$0xff] }
 0x29a   :  { %v4572_v40 = vadd.f32 %v4571_v52, %v10419_v45  ;;  %v4718_v32 = vclz %v7099_v20  ;;  %v11852_v60 = vmov 683565275   ;;  %v11853_v6 = vmov 2475754826  }
 0x29b   :  { %4574 = vst [vmem:[#allocation5 + $0xf0] sm:$0xff] %v4568_v25  ;;  %4576 = vst [vmem:[#allocation5 + $0xf8] sm:$0xff] %v4570_v59  ;;  %v4579_v30 = vmul.f32 %v10578_v8, %v4568_v25  ;;  %v4580_v57 = vmul.f32 %v10581_v14, %v4570_v59  ;;  %v4589_v55 = vmul.f32 %v10584_v9, %v4568_v25  ;;  %v4736_v7 = vsub.s32 4, %v10528_v3 }
 0x29c   :  { %v4590_v45 = vmul.f32 %v10587_v62, %v4570_v59  ;;  %4578 = vst [vmem:[#allocation5 + $0x100] sm:$0xff] %v4572_v40  ;;  %v4582_v19 = vmul.f32 %v10590_v4, %v4572_v40  ;;  %v4592_v13 = vmul.f32 %v10593_v15, %v4572_v40  ;;  %v4584_v56 = vmul.f32 %v10596_v37, %v4568_v25 }
 0x29d   :  { %v4585_v49 = vmul.f32 %v10599_v46, %v4570_v59  ;;  %v4581_v33 = vadd.f32 %v4580_v57, %v4579_v30  ;;  %v4587_v5 = vmul.f32 %v10602_v38, %v4572_v40  ;;  %v4610_v44 = vadd.f32 %v4609_v23, %v4568_v25 }
 0x29e   :  { %v4591_v2 = vadd.f32 %v4590_v45, %v4589_v55  ;;  %v4612_v21 = vadd.f32 %v4611_v0, %v4570_v59  ;;  %v4614_v10 = vadd.f32 %v4613_v26, %v4572_v40  ;;  %v7100_v18 = vadd.s32 4294967294, %v4718_v32 }
 0x29f   :  { %v4586_v53 = vadd.f32 %v4585_v49, %v4584_v56  ;;  %4616 = vst [vmem:[#allocation5 + $0xd8] sm:$0xff] %v4610_v44  ;;  %v4631_v17 = vmul.f32 %v10584_v9, %v4610_v44  ;;  %v4876_v12 = vshll.u32 %v11852_v60, %v10551_v51  ;;  %v4879_v50 = vshll.u32 %v11853_v6, %v10551_v51 }
 0x2a0   :  { %v4593_v31 = vadd.f32 %v4592_v13, %v4591_v2  ;;  %4618 = vst [vmem:[#allocation5 + $0xe0] sm:$0xff] %v4612_v21  ;;  %4620 = vst [vmem:[#allocation5 + $0xe8] sm:$0xff] %v4614_v10  ;;  %v4621_v61 = vmul.f32 %v10578_v8, %v4610_v44  ;;  %v4622_v47 = vmul.f32 %v10581_v14, %v4612_v21  ;;  %vm7101_vm7 = vcmp.lt.s32.totalorder %v7100_v18, 0 }
 0x2a1   :  { %v4632_v42 = vmul.f32 %v10587_v62, %v4612_v21  ;;  %v4875_v28 = vshrl.u32 %v11852_v60, %v10575_v54  ;;  %v4634_v43 = vmul.f32 %v10593_v15, %v4614_v10  ;;  %v4877_v36 = vshrl.u32 %v11853_v6, %v10575_v54 }
 0x2a2   :  { %7370 = vrcp.f32 %v4593_v31  ;;  %v10619_v52 = vadd.f32 %v4582_v19, %v4581_v33  ;;  %v10621_v20 = vadd.f32 %v4587_v5, %v4586_v53  ;;  %v4624_v59 = vmul.f32 %v10590_v4, %v4614_v10  ;;  %v11854_v53 = vld [vmem:[#allocation19_spill] sm:$0xff] }
 0x2a3   :  { %v4633_v25 = vadd.f32 %v4632_v42, %v4631_v17  ;;  %v4626_v23 = vmul.f32 %v10596_v37, %v4610_v44  ;;  %v4627_v40 = vmul.f32 %v10599_v46, %v4612_v21  ;;  %v4721_v0 = vsel %vm7101_vm7, 0, %v7100_v18 }
 0x2a4   :  { %v4623_v26 = vadd.f32 %v4622_v47, %v4621_v61  ;;  %v4722_v30 = vsub.s32 32, %v4721_v0  ;;  %v4723_v57 = vshll.u32 %v10546_v1, %v4721_v0  ;;  %v4629_v55 = vmul.f32 %v10602_v38, %v4614_v10 }
 0x2a5   :  { %v4635_v32 = vadd.f32 %v4634_v43, %v4633_v25  ;;  %v4726_v45 = vsub.s32 4294967266, %v4721_v0  ;;  %v4878_v19 = vor.u32 %v4877_v36, %v4876_v12  ;;  %v4880_v13 = vshrl.u32 %v11775_v34, %v10575_v54 }
 0x2a6   :  { %v4724_v56 = vshrl.u32 %v10562_v63, %v4722_v30  ;;  %v4882_v49 = vshll.u32 %v11775_v34, %v10551_v51  ;;  %v4883_v33 = vshrl.u32 %v11776_v41, %v10575_v54  ;;  %v4885_v1 = vshll.u32 %v11776_v41, %v10551_v51 }
 0x2a7   :  { %7372 = vrcp.f32 %v4635_v32  ;;  %v4727_v2 = vadd.s32 127, %v4726_v45  ;;  %v4881_v5 = vor.u32 %v4880_v13, %v4879_v50  ;;  %v4886_v44 = vshrl.u32 %v11777_v35, %v10575_v54 }
 0x2a8   :  { %vm4652_vm8 = vcmp.lt.s32.totalorder %v11854_v53, 0  ;;  %v4725_v21 = vor.u32 %v4724_v56, %v4723_v57  ;;  %v4884_v10 = vor.u32 %v4883_v33, %v4882_v49  ;;  %v4888_v63 = vshll.u32 %v11777_v35, %v10551_v51 }
 0x2a9   :  { %v4889_v18 = vshrl.u32 %v11778_v27, %v10575_v54  ;;  %v4728_v17 = vshll.u32 %v4727_v2, 23  ;;  %v4887_v12 = vor.u32 %v4886_v44, %v4885_v1  ;;  %vm4891_vm9 = vcmp.lt.s32.totalorder %v10568_v22, 1 }
 0x2aa   :  { %vm4892_vm10 = vcmp.lt.s32.totalorder %v10568_v22, 2  ;;  %v4732_v50 = vcvt.s32.f32 %v4725_v21  ;;  %vm4893_vm12 = vcmp.lt.s32.totalorder %v10568_v22, 3  ;;  %vm4894_vm11 = vcmp.lt.s32.totalorder %v10568_v22, 4 }
 0x2ab   :  { %v4890_v61 = vor.u32 %v4889_v18, %v4888_v63  ;;  %v11855_v42 = vand.u32 2147483647, %v11854_v53  ;;  %v4729_v54 = vor.u32 4788187, %v4728_v17  ;;  %v4895_v43 = vsel %vm4891_vm9, %v4875_v28, %v4878_v19 }
 0x2ac   :  { %v7371_v47 = vpop.eup %7370  ;;  %v4896_v36 = vsel %vm4894_vm11, %v4884_v10, 2102212464  ;;  %v4899_v25 = vsel %vm4891_vm9, %v4878_v19, %v4881_v5  ;;  %v4900_v57 = vsel %vm4894_vm11, %v4887_v12, 920167782  ;;  %v4903_v45 = vsel %vm4891_vm9, %v4881_v5, %v4884_v10 }
 0x2ad   :  { %vm10650_vm13 = vcmp.le.f32.partialorder %v11855_v42, 0.7853982  ;;  %v4595_v0 = vmul.f32 %v7371_v47, %v4593_v31  ;;  %v4897_v30 = vsel %vm4893_vm12, %v4881_v5, %v4896_v36  ;;  %v4628_v13 = vadd.f32 %v4627_v40, %v4626_v23 }
 0x2ae   :  { %v4730_v56 = vand.u32 2147483647, %v4729_v54  ;;  %v4901_v49 = vsel %vm4893_vm12, %v4884_v10, %v4900_v57  ;;  %v4904_v33 = vsel %vm4894_vm11, %v4890_v61, 1326507024  ;;  %v4898_v1 = vsel %vm4892_vm10, %v4895_v43, %v4897_v30 }
 0x2af   :  { %v4596_v2 = vsub.f32 2.0, %v4595_v0  ;;  %v4902_v28 = vsel %vm4892_vm10, %v4899_v25, %v4901_v49  ;;  %v4905_v31 = vsel %vm4893_vm12, %v4887_v12, %v4904_v33  ;;  %vm5148_vm14 = vcmp.gt.s32.totalorder %v10570_v39, 0 }
 0x2b0   :  { %v4733_v19 = vmul.f32 %v4732_v50, %v4730_v56  ;;  %v4906_v5 = vsel %vm4892_vm10, %v4903_v45, %v4905_v31  ;;  %v10667_v23 = vmul.u32.u64.low %v10564_v16, %v4902_v28  ;;  %v10668_v40 = vmul.u32.u64.high %v10564_v16, %v4902_v28, %v10667_v23 }
 0x2b1   :  { %v7373_v44 = vpop.eup %7372  ;;  %v4597_v21 = vmul.f32 %v7371_v47, %v4596_v2  ;;  %v10672_v10 = vmul.u32.u64.low %v10564_v16, %v4906_v5  ;;  %v10673_v63 = vmul.u32.u64.high %v10564_v16, %v4906_v5, %v10672_v10  ;;  %v4625_v18 = vadd.f32 %v4624_v59, %v4623_v26 }
 0x2b2   :  { %v4637_v17 = vmul.f32 %v7373_v44, %v4635_v32  ;;  %v4734_v12 = vxor.u32 2147483648, %v4733_v19  ;;  %v5149_v50 = vsel %vm5148_vm14, %v10570_v39, 0  ;;  %v4914_v42 = vmul.u32 %v10564_v16, %v4898_v1 }
 0x2b3   :  { %v4598_v22 = vmul.f32 %v4597_v21, %v10619_v52  ;;  %v4602_v61 = vmul.f32 %v4597_v21, %v10621_v20  ;;  %v5151_v54 = vand.u32 31, %v5149_v50  ;;  %v4630_v47 = vadd.f32 %v4629_v55, %v4628_v13 }
 0x2b4   :  { %v4638_v43 = vsub.f32 2.0, %v4637_v17  ;;  %v4735_v36 = vsel %vm4652_vm8, %v4734_v12, %v4733_v19  ;;  %v4917_v25 = vadd.s32 1, %v10668_v40  ;;  %vm4916_vm0 = vc.u32 %v10673_v63, %v10667_v23 }
 0x2b5   :  { %4601 = vst [vmem:[#allocation5 + $0x298] sm:$0xff] %v4598_v22  ;;  %4605 = vst [vmem:[#allocation5 + $0x2a0] sm:$0xff] %v4602_v61  ;;  %v5145_v39 = vor.u32 8388608, %v10556_v29  ;;  %v5152_v52 = vsub.s32 32, %v5151_v54  ;;  %v4737_v16 = vsel %vm4652_vm8, %v4736_v7, %v10528_v3  ;;  %v5154_v26 = vshll.u32 %v11852_v60, %v5151_v54 }
 0x2b6   :  { %v4639_v59 = vmul.f32 %v7373_v44, %v4638_v43  ;;  %v4918_v20 = vsel %vm4916_vm0, %v4917_v25, %v10668_v40  ;;  %v4738_v32 = vsel %vm10650_vm13, %v11854_v53, %v4735_v36  ;;  %v5150_v0 = vshrl.u32 %v5149_v50, 5 }
 0x2b7   :  { %v4919_v55 = vadd.s32 %v4918_v20, %v4914_v42  ;;  %v5155_v29 = vshrl.u32 %v11853_v6, %v5152_v52  ;;  %v5157_v45 = vshll.u32 %v11853_v6, %v5151_v54  ;;  %v5158_v13 = vshrl.u32 %v11775_v34, %v5152_v52 }
 0x2b8   :  { %v4640_v30 = vmul.f32 %v4639_v59, %v4625_v18  ;;  %v4644_v57 = vmul.f32 %v4639_v59, %v4630_v47  ;;  %v5160_v7 = vshll.u32 %v11775_v34, %v5151_v54  ;;  %v5161_v49 = vshrl.u32 %v11776_v41, %v5152_v52 }
 0x2b9   :  { %v4920_v56 = vadd.s32 536870912, %v4919_v55  ;;  %v5156_v3 = vor.u32 %v5155_v29, %v5154_v26  ;;  %v5159_v33 = vor.u32 %v5158_v13, %v5157_v45  ;;  %v5163_v53 = vshll.u32 %v11776_v41, %v5151_v54 }
 0x2ba   :  { %4643 = vst [vmem:[#allocation5 + $0x288] sm:$0xff] %v4640_v30  ;;  %4647 = vst [vmem:[#allocation5 + $0x290] sm:$0xff] %v4644_v57  ;;  %v5164_v2 = vshrl.u32 %v11777_v35, %v5152_v52  ;;  %v5166_v1 = vshll.u32 %v11777_v35, %v5151_v54  ;;  %v5162_v31 = vor.u32 %v5161_v49, %v5160_v7  ;;  %vm5169_vm2 = vcmp.lt.s32.totalorder %v5150_v0, 1  ;;  %v10714_v54 = vld [vmem:[#allocation2 + $0xa8] sm:$0xff] }
 0x2bb   :  { %v4921_v28 = vshrl.u32 %v4920_v56, 30  ;;  %v5167_v19 = vshrl.u32 %v11778_v27, %v5152_v52  ;;  %vm5171_vm4 = vcmp.lt.s32.totalorder %v5150_v0, 3  ;;  %vm5172_vm3 = vcmp.lt.s32.totalorder %v5150_v0, 4 }
 0x2bc   :  { %v5165_v5 = vor.u32 %v5164_v2, %v5163_v53  ;;  %v4739_v40 = vsel %vm10650_vm13, 0, %v4737_v16  ;;  %vm5170_vm5 = vcmp.lt.s32.totalorder %v5150_v0, 2  ;;  %v10707_v21 = vshll.u32 %v5145_v39, 8 }
 0x2bd   :  { %v4922_v44 = vshll.u32 %v4921_v28, 30  ;;  %7374 = vcosq.f32 %v4738_v32  ;;  %v5168_v10 = vor.u32 %v5167_v19, %v5166_v1  ;;  %v5177_v18 = vsel %vm5169_vm2, %v5156_v3, %v5159_v33 }
 0x2be   :  { %v5178_v17 = vsel %vm5172_vm3, %v5165_v5, 920167782  ;;  %7376 = vsinq.f32 %v4738_v32  ;;  %v5153_v22 = vshrl.u32 %v11852_v60, %v5152_v52  ;;  %v4743_v51 = vadd.s32 3, %v4739_v40 }
 0x2bf   :  { %v4923_v12 = vsub.s32 %v4919_v55, %v4922_v44  ;;  %v5179_v50 = vsel %vm5171_vm4, %v5162_v31, %v5178_v17  ;;  %v5174_v43 = vsel %vm5172_vm3, %v5162_v31, 2102212464  ;;  %v5182_v47 = vsel %vm5172_vm3, %v5168_v10, 1326507024 }
 0x2c0   :  { %v5180_v61 = vsel %vm5170_vm5, %v5177_v18, %v5179_v50  ;;  %v5173_v59 = vsel %vm5169_vm2, %v5153_v22, %v5156_v3  ;;  %v5411_v52 = vand.u32 2139095040, %v10714_v54  ;;  %v5175_v20 = vsel %vm5171_vm4, %v5159_v33, %v5174_v43 }
 0x2c1   :  { %v4925_v42 = vsub.s32 0, %v4923_v12  ;;  %v10719_v36 = vmul.u32.u64.low %v10707_v21, %v5180_v61  ;;  %v10720_v25 = vmul.u32.u64.high %v10707_v21, %v5180_v61, %v10719_v36  ;;  %v5181_v26 = vsel %vm5169_vm2, %v5159_v33, %v5162_v31 }
 0x2c2   :  { %v5183_v32 = vsel %vm5171_vm4, %v5165_v5, %v5182_v47  ;;  %v4744_v55 = vand.u32 3, %v4743_v51  ;;  %v4945_v29 = vsub.s32 4, %v4921_v28  ;;  %v11858_v30 = vand.u32 2147483647, %v10305_v58 }
 0x2c3   :  { %v7107_v39 = vmin.u32 %v4925_v42, %v4923_v12  ;;  %vm4861_vm1 = vcmp.lt.s32.totalorder %v10305_v58, 0  ;;  %v5408_v13 = vand.u32 2147483647, %v10714_v54  ;;  %v4847_v3 = vand.u32 3, %v4739_v40 }
 0x2c4   :  { %vm10730_vm6 = vcmp.le.f32.partialorder %v11858_v30, 0.7853982  ;;  %v5176_v7 = vsel %vm5170_vm5, %v5173_v59, %v5175_v20  ;;  %v5184_v49 = vsel %vm5170_vm5, %v5181_v26, %v5183_v32  ;;  %v5412_v33 = vshrl.u32 %v5411_v52, 23  ;;  %v7473_v32 = vld [vmem:[#allocation2 + $0x90] sm:$0xff] }
 0x2c5   :  { %v4927_v16 = vclz %v7107_v39  ;;  %v4915_v2 = vadd.s32 %v10667_v23, %v10673_v63  ;;  %v10741_v1 = vmul.u32.u64.low %v10707_v21, %v5184_v49  ;;  %v10742_v31 = vmul.u32.u64.high %v10707_v21, %v5184_v49, %v10741_v1 }
 0x2c6   :  { %vm4746_vm7 = vcmp.eq.s32.totalorder %v4744_v55, 0  ;;  %v4946_v5 = vsel %vm4861_vm1, %v4945_v29, %v4921_v28  ;;  %v5195_v40 = vadd.s32 1, %v10720_v25  ;;  %v5192_v18 = vmul.u32 %v10707_v21, %v5176_v7 }
 0x2c7   :  { %v7108_v45 = vadd.s32 4294967294, %v4927_v16  ;;  %v7375_v56 = vpop.eup %7374  ;;  %vm4749_vm8 = vcmp.eq.s32.totalorder %v4744_v55, 2  ;;  %v7122_v63 = vadd.s32 4294967169, %v5412_v33  ;;  %v4948_v61 = vsel %vm10730_vm6, 0, %v4946_v5  ;;  %v5094_v16 = vld [vmem:[#allocation2 + $0x130] sm:$0xff] }
 0x2c8   :  { %v7377_v53 = vpop.eup %7376  ;;  %v4750_v23 = vxor.u32 2147483648, %v7375_v56  ;;  %vm5194_vm9 = vc.u32 %v10742_v31, %v10719_v36  ;;  %vm4745_vm10 = vcmp.lt.s32.totalorder %v4744_v55, 2  ;;  %vm4849_vm12 = vcmp.eq.s32.totalorder %v4847_v3, 0 }
 0x2c9   :  { %vm7109_vm15 = vcmp.lt.s32.totalorder %v7108_v45, 0  ;;  %v4747_v17 = vxor.u32 2147483648, %v7377_v53  ;;  %v5196_v28 = vsel %vm5194_vm9, %v5195_v40, %v10720_v25  ;;  %vm4852_vm11 = vcmp.eq.s32.totalorder %v4847_v3, 2 }
 0x2ca   :  { %v4930_v19 = vsel %vm7109_vm15, 0, %v7108_v45  ;;  %v5197_v42 = vadd.s32 %v5196_v28, %v5192_v18  ;;  %v4751_v47 = vsel %vm4749_vm8, %v4750_v23, %v7377_v53  ;;  %v4952_v39 = vadd.s32 3, %v4948_v61 }
 0x2cb   :  { %v4931_v44 = vsub.s32 32, %v4930_v19  ;;  %v4932_v0 = vshll.u32 %v4923_v12, %v4930_v19  ;;  %v4935_v10 = vsub.s32 4294967266, %v4930_v19  ;;  %v5418_v12 = vadd.s32 1, %v7122_v63 }
 0x2cc   :  { %v4748_v43 = vsel %vm4746_vm7, %v7375_v56, %v4747_v17  ;;  %v5198_v20 = vadd.s32 536870912, %v5197_v42  ;;  %vm4742_vm14 = vweird.f32 %v7473_v32  ;;  %vm4848_vm0 = vcmp.lt.s32.totalorder %v4847_v3, 2 }
 0x2cd   :  { %v4933_v50 = vshrl.u32 %v4915_v2, %v4931_v44  ;;  %v4936_v22 = vadd.s32 127, %v4935_v10  ;;  %vm5419_vm13 = vcmp.gt.s32.totalorder %v5418_v12, 0  ;;  %v4854_v25 = vsel %vm4852_vm11, %v4750_v23, %v7377_v53 }
 0x2ce   :  { %v5420_v26 = vsel %vm5419_vm13, %v5418_v12, 0  ;;  %v4752_v30 = vsel %vm4745_vm10, %v4748_v43, %v4751_v47  ;;  %v4851_v45 = vsel %vm4849_vm12, %v7375_v56, %v4747_v17  ;;  %v10758_v49 = vshrl.u32 %v5198_v20, 30 }
 0x2cf   :  { %v4934_v51 = vor.u32 %v4933_v50, %v4932_v0  ;;  %v4937_v21 = vshll.u32 %v4936_v22, 23  ;;  %v5422_v29 = vand.u32 31, %v5420_v26  ;;  %v10760_v33 = vand.u32 3, %v4948_v61 }
 0x2d0   :  { %v10763_v2 = vmul.f32 %v10548_v48, %v5094_v16  ;;  %v10765_v5 = vand.u32 3, %v4952_v39  ;;  %v5200_v40 = vshll.u32 %v10758_v49, 30  ;;  %v5415_v55 = vand.u32 8388607, %v5408_v13 }
 0x2d1   :  { %v4938_v59 = vor.u32 4788187, %v4937_v21  ;;  %v4941_v52 = vcvt.s32.f32 %v4934_v51  ;;  %v5423_v1 = vsub.s32 32, %v5422_v29  ;;  %v10771_v3 = vsel %vm4742_vm14, nan, %v4752_v30 }
 0x2d2   :  { %v4855_v56 = vsel %vm4848_vm0, %v4851_v45, %v4854_v25  ;;  %v5425_v53 = vshll.u32 %v11852_v60, %v5422_v29  ;;  %v5428_v44 = vshll.u32 %v11853_v6, %v5422_v29  ;;  %v10775_v10 = vsub.s32 %v5197_v42, %v5200_v40  ;;  %v10797_v25 = vld [vmem:[#allocation2 + $0xb0] sm:$0xff] }
 0x2d3   :  { %v4939_v7 = vand.u32 2147483647, %v4938_v59  ;;  %v5426_v18 = vshrl.u32 %v11853_v6, %v5423_v1  ;;  %v5429_v17 = vshrl.u32 %v11775_v34, %v5423_v1  ;;  %v5431_v23 = vshll.u32 %v11775_v34, %v5422_v29 }
 0x2d4   :  { %v5432_v63 = vshrl.u32 %v11776_v41, %v5423_v1  ;;  %v5434_v50 = vshll.u32 %v11776_v41, %v5422_v29  ;;  %v5435_v22 = vshrl.u32 %v11777_v35, %v5423_v1  ;;  %v10784_v61 = vsel %vm4742_vm14, nan, %v4855_v56 }
 0x2d5   :  { %v4942_v19 = vmul.f32 %v4941_v52, %v4939_v7  ;;  %v5203_v12 = vsub.s32 0, %v10775_v10  ;;  %v5416_v51 = vor.u32 8388608, %v5415_v55  ;;  %v10792_v42 = vshrl.u32 %v5420_v26, 5 }
 0x2d6   :  { %v5437_v43 = vshll.u32 %v11777_v35, %v5422_v29  ;;  %v5438_v47 = vshrl.u32 %v11778_v27, %v5423_v1  ;;  %v5427_v59 = vor.u32 %v5426_v18, %v5425_v53  ;;  %v5430_v52 = vor.u32 %v5429_v17, %v5428_v44 }
 0x2d7   :  { %v4943_v0 = vxor.u32 2147483648, %v4942_v19  ;;  %v7115_v39 = vmin.u32 %v5203_v12, %v10775_v10  ;;  %v5433_v16 = vor.u32 %v5432_v63, %v5431_v23  ;;  %v5436_v20 = vor.u32 %v5435_v22, %v5434_v50 }
 0x2d8   :  { %v5439_v32 = vor.u32 %v5438_v47, %v5437_v43  ;;  %vm4958_vm2 = vcmp.eq.s32.totalorder %v10765_v5, 2  ;;  %vm5061_vm4 = vcmp.eq.s32.totalorder %v10760_v33, 2  ;;  %v5193_v57 = vadd.s32 %v10719_v36, %v10742_v31 }
 0x2d9   :  { %v4944_v28 = vsel %vm4861_vm1, %v4943_v0, %v4942_v19  ;;  %v5205_v26 = vclz %v7115_v39  ;;  %vm5058_vm3 = vcmp.eq.s32.totalorder %v10760_v33, 0  ;;  %vm5139_vm5 = vcmp.lt.s32.totalorder %v10514_v11, 0 }
 0x2da   :  { %v4947_v21 = vsel %vm10730_vm6, %v10305_v58, %v4944_v28  ;;  %vm5440_vm6 = vcmp.lt.s32.totalorder %v10792_v42, 1  ;;  %vm5442_vm1 = vcmp.lt.s32.totalorder %v10792_v42, 3  ;;  %vm5443_vm15 = vcmp.lt.s32.totalorder %v10792_v42, 4 }
 0x2db   :  { %7378 = vcosq.f32 %v4947_v21  ;;  %v10808_v29 = vshll.u32 %v5416_v51, 8  ;;  %vm4954_vm7 = vcmp.lt.s32.totalorder %v10765_v5, 2  ;;  %vm5057_vm8 = vcmp.lt.s32.totalorder %v10760_v33, 2 }
 0x2dc   :  { %7380 = vsinq.f32 %v4947_v21  ;;  %v7116_v30 = vadd.s32 4294967294, %v5205_v26  ;;  %vm5441_vm9 = vcmp.lt.s32.totalorder %v10792_v42, 2  ;;  %v5448_v36 = vsel %vm5440_vm6, %v5427_v59, %v5430_v52  ;;  %v11861_v26 = vld [vmem:[#allocation12_spill] sm:$0xff] }
 0x2dd   :  { %v5718_v31 = vand.u32 2139095040, %v10797_v25  ;;  %vm4951_vm10 = vweird.f32 %v10305_v58  ;;  %v5223_v45 = vsub.s32 4, %v10758_v49  ;;  %v5449_v7 = vsel %vm5443_vm15, %v5436_v20, 920167782  ;;  %v11867_v58 = vld [vmem:[#allocation8_spill] sm:$0xff] }
 0x2de   :  { %v5452_v19 = vsel %vm5440_vm6, %v5430_v52, %v5433_v16  ;;  %v5453_v40 = vsel %vm5443_vm15, %v5439_v32, 1326507024  ;;  %vm7117_vm12 = vcmp.lt.s32.totalorder %v7116_v30, 0  ;;  %v5424_v55 = vshrl.u32 %v11852_v60, %v5423_v1 }
 0x2df   :  { %v5450_v56 = vsel %vm5442_vm1, %v5433_v16, %v5449_v7  ;;  %v5454_v53 = vsel %vm5442_vm1, %v5436_v20, %v5453_v40  ;;  %v5208_v44 = vsel %vm7117_vm12, 0, %v7116_v30  ;;  %v5445_v0 = vsel %vm5443_vm15, %v5433_v16, 2102212464 }
 0x2e0   :  { %v5451_v18 = vsel %vm5441_vm9, %v5448_v36, %v5450_v56  ;;  %v5455_v17 = vsel %vm5441_vm9, %v5452_v19, %v5454_v53  ;;  %v5209_v23 = vsub.s32 32, %v5208_v44  ;;  %v5210_v63 = vshll.u32 %v10775_v10, %v5208_v44 }
 0x2e1   :  { %v5213_v1 = vsub.s32 4294967266, %v5208_v44  ;;  %v5719_v50 = vshrl.u32 %v5718_v31, 23  ;;  %v10837_v22 = vmul.u32.u64.low %v10808_v29, %v5455_v17  ;;  %v10838_v28 = vmul.u32.u64.high %v10808_v29, %v5455_v17, %v10837_v22 }
 0x2e2   :  { %v10841_v12 = vmul.u32.u64.low %v10808_v29, %v5451_v18  ;;  %v10842_v51 = vmul.u32.u64.high %v10808_v29, %v5451_v18, %v10841_v12  ;;  %v5211_v43 = vshrl.u32 %v5193_v57, %v5209_v23  ;;  %v5444_v39 = vsel %vm5440_vm6, %v5424_v55, %v5427_v59 }
 0x2e3   :  { %v5214_v47 = vadd.s32 127, %v5213_v1  ;;  %v5446_v10 = vsel %vm5442_vm1, %v5430_v52, %v5445_v0  ;;  %vm4955_vm11 = vcmp.eq.s32.totalorder %v10765_v5, 0  ;;  %v5075_v32 = vsub.f32 0.0, %v10771_v3  ;;  %v11864_v1 = vld [vmem:[#allocation11_spill] sm:$0xff] }
 0x2e4   :  { %v10853_v30 = vmul.f32 %v10784_v61, %v11861_v26  ;;  %vm10857_vm13 = vcmp.le.f32.partialorder %v5137_v24, 0.7853982  ;;  %v5212_v59 = vor.u32 %v5211_v43, %v5210_v63  ;;  %v5224_v52 = vsel %vm5139_vm5, %v5223_v45, %v10758_v49 }
 0x2e5   :  { %v7379_v21 = vpop.eup %7378  ;;  %v5215_v31 = vshll.u32 %v5214_v47, 23  ;;  %v5447_v40 = vsel %vm5441_vm9, %v5444_v39, %v5446_v10  ;;  %v7130_v55 = vadd.s32 4294967169, %v5719_v50  ;;  %vm5465_vm14 = vc.u32 %v10838_v28, %v10841_v12  ;;  %v11865_v50 = vld [vmem:[#allocation15_spill] sm:$0xff] }
 0x2e6   :  { %v7381_v16 = vpop.eup %7380  ;;  %v4959_v20 = vxor.u32 2147483648, %v7379_v21  ;;  %v5219_v44 = vcvt.s32.f32 %v5212_v59  ;;  %v5466_v45 = vadd.s32 1, %v10842_v51  ;;  %v5463_v23 = vmul.u32 %v10808_v29, %v5447_v40  ;;  %v11869_v29 = vld [vmem:[#allocation9_spill] sm:$0xff] }
 0x2e7   :  { %v4956_v36 = vxor.u32 2147483648, %v7381_v16  ;;  %v5216_v53 = vor.u32 4788187, %v5215_v31  ;;  %v5725_v10 = vadd.s32 1, %v7130_v55  ;;  %v11870_v31 = vld [vmem:[#allocation14_spill] sm:$0xff]  ;;  %v5226_v55 = vsel %vm10857_vm13, 0, %v5224_v52 }
 0x2e8   :  { %v4960_v7 = vsel %vm4958_vm2, %v4959_v20, %v7381_v16  ;;  %v5063_v19 = vsel %vm5061_vm4, %v4959_v20, %v7381_v16  ;;  %v5467_v39 = vsel %vm5465_vm14, %v5466_v45, %v10842_v51  ;;  %v5067_v51 = vmul.f32 %v10771_v3, %v11867_v58 }
 0x2e9   :  { %v4957_v24 = vsel %vm4955_vm11, %v7379_v21, %v4956_v36  ;;  %v5060_v56 = vsel %vm5058_vm3, %v7379_v21, %v4956_v36  ;;  %v5217_v17 = vand.u32 2147483647, %v5216_v53  ;;  %v11866_v21 = vld [vmem:[#allocation16_spill] sm:$0xff]  ;;  %v11868_v36 = vld [vmem:[#allocation13_spill] sm:$0xff]  ;;  %vm5726_vm0 = vcmp.gt.s32.totalorder %v5725_v10, 0 }
 0x2ea   :  { %v4961_v0 = vsel %vm4954_vm7, %v4957_v24, %v4960_v7  ;;  %v5064_v49 = vsel %vm5057_vm8, %v5060_v56, %v5063_v19  ;;  %v11871_v19 = vld [vmem:[#allocation10_spill] sm:$0xff]  ;;  %v5468_v56 = vadd.s32 %v5467_v39, %v5463_v23  ;;  %v5069_v23 = vmul.f32 %v10784_v61, %v11868_v36 }
 0x2eb   :  { %v4962_v42 = vsel %vm4951_vm10, nan, %v4961_v0  ;;  %v5065_v18 = vsel %vm4951_vm10, nan, %v5064_v49  ;;  %v5220_v47 = vmul.f32 %v5219_v44, %v5217_v17  ;;  %v5230_v52 = vadd.s32 3, %v5226_v55 }
 0x2ec   :  { %v5076_v63 = vmul.f32 %v5075_v32, %v5065_v18  ;;  %v5077_v5 = vmul.f32 %v5065_v18, %v10784_v61  ;;  %v5078_v33 = vmul.f32 %v4962_v42, %v11864_v1  ;;  %v5083_v22 = vmul.f32 %v4962_v42, %v11865_v50 }
 0x2ed   :  { %v5088_v43 = vmul.f32 %v4962_v42, %v11866_v21  ;;  %v5221_v24 = vxor.u32 2147483648, %v5220_v47  ;;  %v5469_v45 = vadd.s32 536870912, %v5468_v56  ;;  %v5070_v39 = vmul.f32 %v10771_v3, %v11869_v29 }
 0x2ee   :  { %v5079_v16 = vmul.f32 %v5076_v63, %v11861_v26  ;;  %v5081_v20 = vmul.f32 %v5077_v5, %v11867_v58  ;;  %v5084_v59 = vmul.f32 %v5076_v63, %v11868_v36  ;;  %v5086_v32 = vmul.f32 %v5077_v5, %v11869_v29 }
 0x2ef   :  { %v5089_v7 = vmul.f32 %v5076_v63, %v11870_v31  ;;  %v5091_v40 = vmul.f32 %v5077_v5, %v11871_v19  ;;  %v5222_v49 = vsel %vm5139_vm5, %v5221_v24, %v5220_v47  ;;  %v5470_v5 = vshrl.u32 %v5469_v45, 30  ;;  %v5364_v47 = vld [vmem:[#allocation2 + $0x138] sm:$0xff] }
 0x2f0   :  { %v5080_v53 = vadd.f32 %v5079_v16, %v5078_v33  ;;  %v5085_v0 = vadd.f32 %v5084_v59, %v5083_v22  ;;  %v5225_v17 = vsel %vm10857_vm13, %v10514_v11, %v5222_v49  ;;  %v7474_v59 = vld [vmem:[#allocation5] sm:$0xff]  ;;  %v5072_v24 = vmul.f32 %v10784_v61, %v11870_v31 }
 0x2f1   :  { %v5090_v44 = vadd.f32 %v5089_v7, %v5088_v43  ;;  %7382 = vcosq.f32 %v5225_v17  ;;  %v5727_v43 = vsel %vm5726_vm0, %v5725_v10, 0  ;;  %v5471_v16 = vshll.u32 %v5470_v5, 30  ;;  %v7475_v7 = vld [vmem:[#allocation5 + $0x8] sm:$0xff] }
 0x2f2   :  { %v10901_v42 = vadd.f32 %v5081_v20, %v5080_v53  ;;  %v10903_v18 = vadd.f32 %v5086_v32, %v5085_v0  ;;  %7384 = vsinq.f32 %v5225_v17  ;;  %v11739_v20 = vand.u32 2147483647, %v10797_v25 }
 0x2f3   :  { %v10910_v63 = vadd.f32 %v5091_v40, %v5090_v44  ;;  %v5073_v10 = vmul.f32 %v10771_v3, %v11871_v19  ;;  %v5334_v0 = vand.u32 3, %v5226_v55  ;;  %v10931_v44 = vsub.s32 %v5468_v56, %v5471_v16 }
 0x2f4   :  { %v5096_v33 = vmul.f32 %v10763_v2, %v10901_v42  ;;  %v5098_v22 = vmul.f32 %v10763_v2, %v10903_v18  ;;  %v10933_v49 = vand.u32 31, %v5727_v43  ;;  %vm5229_vm2 = vweird.f32 %v10514_v11 }
 0x2f5   :  { %v5100_v57 = vmul.f32 %v10763_v2, %v10910_v63  ;;  %v7476_v2 = vld [vmem:[#allocation5 + $0x10] sm:$0xff]  ;;  %v5231_v3 = vand.u32 3, %v5230_v52  ;;  %v10943_v17 = vmul.f32 %v10548_v48, %v5364_v47  ;;  %v10949_v55 = vadd.f32 %v5067_v51, %v10853_v30 }
 0x2f6   :  { %v10921_v32 = vadd.f32 %v7474_v59, %v5096_v33  ;;  %v10923_v40 = vadd.f32 %v7475_v7, %v5098_v22  ;;  %vm5410_vm4 = vcmp.lt.s32.totalorder %v10714_v54, 0  ;;  %v10954_v33 = vand.u32 8388607, %v11739_v20 }
 0x2f7   :  { %v10929_v53 = vadd.f32 %v7476_v2, %v5100_v57  ;;  %v10956_v57 = vadd.f32 %v5070_v39, %v5069_v23  ;;  %v10958_v52 = vadd.f32 %v5073_v10, %v5072_v24  ;;  %v5474_v48 = vsub.s32 0, %v10931_v44 }
 0x2f8   :  { %5103 = vst [vmem:[#allocation5 + $0x180] sm:$0xff] %v10921_v32  ;;  %5105 = vst [vmem:[#allocation5 + $0x188] sm:$0xff] %v10923_v40  ;;  %v5118_v45 = vmul.f32 %v10584_v9, %v10921_v32  ;;  %v5119_v61 = vmul.f32 %v10587_v62, %v10923_v40  ;;  %vm5335_vm3 = vcmp.lt.s32.totalorder %v5334_v0, 2  ;;  %vm5336_vm5 = vcmp.eq.s32.totalorder %v5334_v0, 0 }
 0x2f9   :  { %5107 = vst [vmem:[#allocation5 + $0x190] sm:$0xff] %v10929_v53  ;;  %v5121_v56 = vmul.f32 %v10593_v15, %v10929_v53  ;;  %v5494_v47 = vsub.s32 4, %v5470_v5  ;;  %v10962_v16 = vsub.s32 32, %v10933_v49  ;;  %vm5232_vm6 = vcmp.lt.s32.totalorder %v5231_v3, 2 }
 0x2fa   :  { %v5120_v22 = vadd.f32 %v5119_v61, %v5118_v45  ;;  %vm5339_vm1 = vcmp.eq.s32.totalorder %v5334_v0, 2  ;;  %v7123_v51 = vmin.u32 %v5474_v48, %v10931_v44  ;;  %vm5233_vm15 = vcmp.eq.s32.totalorder %v5231_v3, 0 }
 0x2fb   :  { %v7383_v59 = vpop.eup %7382  ;;  %vm5236_vm7 = vcmp.eq.s32.totalorder %v5231_v3, 2  ;;  %v5464_v23 = vadd.s32 %v10841_v12, %v10838_v28  ;;  %v10968_v2 = vshrl.u32 %v5727_v43, 5  ;;  %v5495_v61 = vsel %vm5410_vm4, %v5494_v47, %v5470_v5 }
 0x2fc   :  { %v5122_v30 = vadd.f32 %v5121_v56, %v5120_v22  ;;  %v7385_v7 = vpop.eup %7384  ;;  %v5237_v24 = vxor.u32 2147483648, %v7383_v59  ;;  %v5476_v10 = vclz %v7123_v51  ;;  %v10974_v56 = vshll.u32 %v11852_v60, %v10933_v49 }
 0x2fd   :  { %v5234_v45 = vxor.u32 2147483648, %v7385_v7  ;;  %v10978_v22 = vshrl.u32 %v11853_v6, %v10962_v16  ;;  %v5108_v28 = vmul.f32 %v10578_v8, %v10921_v32  ;;  %vm10985_vm8 = vcmp.le.f32.partialorder %v5408_v13, 0.7853982 }
 0x2fe   :  { %7386 = vrcp.f32 %v5122_v30  ;;  %v5238_v12 = vsel %vm5236_vm7, %v5237_v24, %v7385_v7  ;;  %v5341_v48 = vsel %vm5339_vm1, %v5237_v24, %v7385_v7  ;;  %v7124_v5 = vadd.s32 4294967294, %v5476_v10 }
 0x2ff   :  { %v5109_v47 = vmul.f32 %v10581_v14, %v10923_v40  ;;  %v5113_v51 = vmul.f32 %v10596_v37, %v10921_v32  ;;  %v5235_v20 = vsel %vm5233_vm15, %v7383_v59, %v5234_v45  ;;  %v5338_v39 = vsel %vm5336_vm5, %v7383_v59, %v5234_v45 }
 0x300   :  { %v5114_v7 = vmul.f32 %v10599_v46, %v10923_v40  ;;  %v5239_v24 = vsel %vm5232_vm6, %v5235_v20, %v5238_v12  ;;  %v5342_v13 = vsel %vm5335_vm3, %v5338_v39, %v5341_v48  ;;  %vm7125_vm9 = vcmp.lt.s32.totalorder %v7124_v5, 0 }
 0x301   :  { %v5111_v10 = vmul.f32 %v10590_v4, %v10929_v53  ;;  %v11003_v19 = vsel %vm5229_vm2, nan, %v5239_v24  ;;  %v11007_v31 = vsel %vm5229_vm2, nan, %v5342_v13  ;;  %v5479_v59 = vsel %vm7125_vm9, 0, %v7124_v5 }
 0x302   :  { %v5353_v45 = vmul.f32 %v11007_v31, %v10901_v42  ;;  %v5354_v20 = vmul.f32 %v11003_v19, %v10949_v55  ;;  %v5356_v0 = vmul.f32 %v11007_v31, %v10903_v18  ;;  %v5357_v4 = vmul.f32 %v11003_v19, %v10956_v57 }
 0x303   :  { %v5110_v3 = vadd.f32 %v5109_v47, %v5108_v28  ;;  %v5116_v39 = vmul.f32 %v10602_v38, %v10929_v53  ;;  %v5359_v11 = vmul.f32 %v11007_v31, %v10910_v63  ;;  %v5360_v12 = vmul.f32 %v11003_v19, %v10958_v52 }
 0x304   :  { %v5115_v48 = vadd.f32 %v5114_v7, %v5113_v51  ;;  %v11023_v5 = vsub.f32 %v5353_v45, %v5354_v20  ;;  %v11025_v24 = vsub.f32 %v5356_v0, %v5357_v4  ;;  %v5480_v13 = vsub.s32 32, %v5479_v59 }
 0x305   :  { %v11027_v29 = vsub.f32 %v5359_v11, %v5360_v12  ;;  %v5481_v36 = vshll.u32 %v10931_v44, %v5479_v59  ;;  %v5484_v28 = vsub.s32 4294967266, %v5479_v59  ;;  %v5735_v38 = vshll.u32 %v11853_v6, %v10933_v49 }
 0x306   :  { %v5366_v58 = vmul.f32 %v10943_v17, %v11023_v5  ;;  %v5368_v51 = vmul.f32 %v10943_v17, %v11025_v24  ;;  %v5482_v7 = vshrl.u32 %v5464_v23, %v5480_v13  ;;  %v5736_v45 = vshrl.u32 %v11775_v34, %v10962_v16 }
 0x307   :  { %v5370_v0 = vmul.f32 %v10943_v17, %v11027_v29  ;;  %v5485_v44 = vadd.s32 127, %v5484_v28  ;;  %v11042_v59 = vsel %vm10985_vm8, 0, %v5495_v61  ;;  %vm5747_vm10 = vcmp.lt.s32.totalorder %v10968_v2, 1 }
 0x308   :  { %v7387_v47 = vpop.eup %7386  ;;  %v5112_v4 = vadd.f32 %v5111_v10, %v5110_v3  ;;  %v5117_v11 = vadd.f32 %v5116_v39, %v5115_v48  ;;  %v11046_v12 = vadd.f32 %v5366_v58, %v10921_v32  ;;  %v11049_v23 = vadd.f32 %v5368_v51, %v10923_v40 }
 0x309   :  { %v5124_v20 = vmul.f32 %v7387_v47, %v5122_v30  ;;  %v11052_v30 = vadd.f32 %v5370_v0, %v10929_v53  ;;  %v5483_v17 = vor.u32 %v5482_v7, %v5481_v36  ;;  %v5486_v28 = vshll.u32 %v5485_v44, 23 }
 0x30a   :  { %5374 = vst [vmem:[#allocation5 + $0x168] sm:$0xff] %v11046_v12  ;;  %5376 = vst [vmem:[#allocation5 + $0x170] sm:$0xff] %v11049_v23  ;;  %v5389_v61 = vmul.f32 %v10584_v9, %v11046_v12  ;;  %v5390_v58 = vmul.f32 %v10587_v62, %v11049_v23  ;;  %v5738_v32 = vshll.u32 %v11775_v34, %v10933_v49  ;;  %vm5748_vm12 = vcmp.lt.s32.totalorder %v10968_v2, 2 }
 0x30b   :  { %v5125_v13 = vsub.f32 2.0, %v5124_v20  ;;  %v5739_v40 = vshrl.u32 %v11776_v41, %v10962_v16  ;;  %5378 = vst [vmem:[#allocation5 + $0x178] sm:$0xff] %v11052_v30  ;;  %v5392_v36 = vmul.f32 %v10593_v15, %v11052_v30  ;;  %v5741_v10 = vshll.u32 %v11776_v41, %v10933_v49 }
 0x30c   :  { %v5742_v9 = vshrl.u32 %v11777_v35, %v10962_v16  ;;  %v5391_v3 = vadd.f32 %v5390_v58, %v5389_v61  ;;  %v5731_v62 = vshrl.u32 %v11852_v60, %v10962_v16  ;;  %v5734_v39 = vor.u32 %v10978_v22, %v10974_v56 }
 0x30d   :  { %v5126_v53 = vmul.f32 %v7387_v47, %v5125_v13  ;;  %v5487_v51 = vor.u32 4788187, %v5486_v28  ;;  %v5490_v7 = vcvt.s32.f32 %v5483_v17  ;;  %v5501_v20 = vadd.s32 3, %v11042_v59  ;;  %v11093_v28 = vld [vmem:[#allocation2 + $0xb8] sm:$0xff] }
 0x30e   :  { %v5393_v15 = vadd.f32 %v5392_v36, %v5391_v3  ;;  %v5737_v0 = vor.u32 %v5736_v45, %v5735_v38  ;;  %v5740_v44 = vor.u32 %v5739_v40, %v5738_v32  ;;  %v5743_v61 = vor.u32 %v5742_v9, %v5741_v10 }
 0x30f   :  { %v5127_v48 = vmul.f32 %v5126_v53, %v5112_v4  ;;  %v5131_v47 = vmul.f32 %v5126_v53, %v5117_v11  ;;  %v5488_v13 = vand.u32 2147483647, %v5487_v51  ;;  %v5744_v58 = vshll.u32 %v11777_v35, %v10933_v49 }
 0x310   :  { %v5745_v56 = vshrl.u32 %v11778_v27, %v10962_v16  ;;  %v5379_v22 = vmul.f32 %v10578_v8, %v11046_v12  ;;  %7388 = vrcp.f32 %v5393_v15  ;;  %vm5749_vm11 = vcmp.lt.s32.totalorder %v10968_v2, 3 }
 0x311   :  { %5130 = vst [vmem:[#allocation5 + $0x2f8] sm:$0xff] %v5127_v48  ;;  %5134 = vst [vmem:[#allocation5 + $0x300] sm:$0xff] %v5131_v47  ;;  %vm5750_vm13 = vcmp.lt.s32.totalorder %v10968_v2, 4  ;;  %v5380_v38 = vmul.f32 %v10581_v14, %v11049_v23  ;;  %v5491_v45 = vmul.f32 %v5490_v7, %v5488_v13  ;;  %v5751_v49 = vsel %vm5747_vm10, %v5731_v62, %v5734_v39 }
 0x312   :  { %v5746_v4 = vor.u32 %v5745_v56, %v5744_v58  ;;  %v5752_v11 = vsel %vm5750_vm13, %v5740_v44, 2102212464  ;;  %v5755_v16 = vsel %vm5747_vm10, %v5734_v39, %v5737_v0  ;;  %v5756_v17 = vsel %vm5750_vm13, %v5743_v61, 920167782  ;;  %v11126_v58 = vld [vmem:[#allocation2 + $0x1a0] sm:$0xff] }
 0x313   :  { %v5759_v8 = vsel %vm5747_vm10, %v5737_v0, %v5740_v44  ;;  %v5492_v32 = vxor.u32 2147483648, %v5491_v45  ;;  %v5753_v40 = vsel %vm5749_vm11, %v5737_v0, %v5752_v11  ;;  %v5757_v14 = vsel %vm5749_vm11, %v5740_v44, %v5756_v17 }
 0x314   :  { %v5760_v53 = vsel %vm5750_vm13, %v5746_v4, 1326507024  ;;  %v5384_v36 = vmul.f32 %v10596_v37, %v11046_v12  ;;  %v5758_v10 = vsel %vm5748_vm12, %v5755_v16, %v5757_v14  ;;  %v11874_v3 = vor.u32 8388608, %v10954_v33 }
 0x315   :  { %v5761_v9 = vsel %vm5749_vm11, %v5743_v61, %v5760_v53  ;;  %v5385_v39 = vmul.f32 %v10599_v46, %v11049_v23  ;;  %v5493_v48 = vsel %vm5410_vm4, %v5492_v32, %v5491_v45  ;;  %v5927_v37 = vand.u32 2139095040, %v11093_v28  ;;  %v11133_v45 = vld [vmem:[#allocation2 + $0x1b8] sm:$0xff]  ;;  %v11144_v32 = vld [vmem:[#allocation2 + $0xc0] sm:$0xff] }
 0x316   :  { %v5763_v62 = vshll.u32 %v11874_v3, 8  ;;  %v5762_v47 = vsel %vm5748_vm12, %v5759_v8, %v5761_v9  ;;  %v5496_v51 = vsel %vm10985_vm8, %v10714_v54, %v5493_v48  ;;  %v5754_v7 = vsel %vm5748_vm12, %v5751_v49, %v5753_v40 }
 0x317   :  { %7390 = vcosq.f32 %v5496_v51  ;;  %v5928_v13 = vshrl.u32 %v5927_v37, 23  ;;  %v5381_v61 = vadd.f32 %v5380_v38, %v5379_v22  ;;  %v5382_v56 = vmul.f32 %v11126_v58, %v11052_v30 }
 0x318   :  { %v11119_v33 = vmul.u32.u64.low %v5763_v62, %v5762_v47  ;;  %v11120_v0 = vmul.u32.u64.high %v5763_v62, %v5762_v47, %v11119_v33  ;;  %v11122_v46 = vmul.u32.u64.low %v5763_v62, %v5758_v10  ;;  %v11123_v44 = vmul.u32.u64.high %v5763_v62, %v5758_v10, %v11122_v46 }
 0x319   :  { %7392 = vsinq.f32 %v5496_v51  ;;  %v11131_v43 = vand.u32 3, %v11042_v59  ;;  %v5386_v2 = vadd.f32 %v5385_v39, %v5384_v36  ;;  %v5387_v4 = vmul.f32 %v11133_v45, %v11052_v30  ;;  %v5626_v33 = vld [vmem:[#allocation2 + $0x140] sm:$0xff] }
 0x31a   :  { %v7138_v11 = vadd.s32 4294967169, %v5928_v13  ;;  %v7389_v49 = vpop.eup %7388  ;;  %v5770_v16 = vmul.u32 %v5763_v62, %v5754_v7  ;;  %vm5772_vm14 = vc.u32 %v11120_v0, %v11122_v46  ;;  %v5773_v38 = vadd.s32 1, %v11123_v44 }
 0x31b   :  { %v5395_v22 = vmul.f32 %v7389_v49, %v5393_v15  ;;  %v5924_v17 = vand.u32 2147483647, %v11093_v28  ;;  %v5383_v8 = vadd.f32 %v5382_v56, %v5381_v61  ;;  %vm5500_vm0 = vweird.f32 %v10714_v54 }
 0x31c   :  { %v5502_v59 = vand.u32 3, %v5501_v20  ;;  %vm5606_vm2 = vcmp.lt.s32.totalorder %v11131_v43, 2  ;;  %vm5607_vm4 = vcmp.eq.s32.totalorder %v11131_v43, 0  ;;  %v5388_v14 = vadd.f32 %v5387_v4, %v5386_v2 }
 0x31d   :  { %v5396_v40 = vsub.f32 2.0, %v5395_v22  ;;  %v5774_v53 = vsel %vm5772_vm14, %v5773_v38, %v11123_v44  ;;  %v5934_v36 = vadd.s32 1, %v7138_v11  ;;  %v5344_v15 = vmul.f32 %v11007_v31, %v10949_v55 }
 0x31e   :  { %v5345_v10 = vmul.f32 %v11003_v19, %v10901_v42  ;;  %vm5610_vm3 = vcmp.eq.s32.totalorder %v11131_v43, 2  ;;  %v5775_v20 = vadd.s32 %v5774_v53, %v5770_v16  ;;  %v5347_v3 = vmul.f32 %v11007_v31, %v10956_v57 }
 0x31f   :  { %v5397_v9 = vmul.f32 %v7389_v49, %v5396_v40  ;;  %v5348_v62 = vmul.f32 %v11003_v19, %v10903_v18  ;;  %v6208_v39 = vand.u32 2139095040, %v11144_v32  ;;  %vm5503_vm5 = vcmp.lt.s32.totalorder %v5502_v59, 2  ;;  %v11172_v49 = vld [vmem:[#allocation2 + $0x170] sm:$0xff] }
 0x320   :  { %vm5507_vm6 = vcmp.eq.s32.totalorder %v5502_v59, 2  ;;  %v5350_v55 = vmul.f32 %v11007_v31, %v10958_v52  ;;  %v5776_v48 = vadd.s32 536870912, %v5775_v20  ;;  %v5351_v51 = vmul.f32 %v11003_v19, %v10910_v63 }
 0x321   :  { %v7391_v47 = vpop.eup %7390  ;;  %v5398_v42 = vmul.f32 %v5397_v9, %v5383_v8  ;;  %v5402_v37 = vmul.f32 %v5397_v9, %v5388_v14  ;;  %vm5935_vm1 = vcmp.gt.s32.totalorder %v5934_v36, 0  ;;  %vm5504_vm15 = vcmp.eq.s32.totalorder %v5502_v59, 0 }
 0x322   :  { %v5508_v57 = vxor.u32 2147483648, %v7391_v47  ;;  %v11161_v18 = vshrl.u32 %v5776_v48, 30  ;;  %v5931_v44 = vand.u32 8388607, %v5924_v17  ;;  %v5346_v31 = vadd.f32 %v5345_v10, %v5344_v15  ;;  %v5672_v15 = vld [vmem:[#allocation2 + $0x148] sm:$0xff] }
 0x323   :  { %v7393_v7 = vpop.eup %7392  ;;  %5401 = vst [vmem:[#allocation5 + $0x2e8] sm:$0xff] %v5398_v42  ;;  %5405 = vst [vmem:[#allocation5 + $0x2f0] sm:$0xff] %v5402_v37  ;;  %v5349_v13 = vadd.f32 %v5348_v62, %v5347_v3  ;;  %v6209_v61 = vshrl.u32 %v6208_v39, 23  ;;  %v5936_v2 = vsel %vm5935_vm1, %v5934_v36, 0  ;;  %v5627_v16 = vmul.f32 %v11172_v49, %v5626_v33 }
 0x324   :  { %v5505_v52 = vxor.u32 2147483648, %v7393_v7  ;;  %v5509_v56 = vsel %vm5507_vm6, %v5508_v57, %v7393_v7  ;;  %v5612_v19 = vsel %vm5610_vm3, %v5508_v57, %v7393_v7  ;;  %v5778_v63 = vshll.u32 %v11161_v18, 30 }
 0x325   :  { %v5352_v22 = vadd.f32 %v5351_v51, %v5350_v55  ;;  %v5932_v14 = vor.u32 8388608, %v5931_v44  ;;  %v11184_v10 = vand.u32 31, %v5936_v2  ;;  %v7146_v9 = vadd.s32 4294967169, %v6209_v61 }
 0x326   :  { %v5506_v4 = vsel %vm5504_vm15, %v7391_v47, %v5505_v52  ;;  %v5609_v11 = vsel %vm5607_vm4, %v7391_v47, %v5505_v52  ;;  %v11178_v40 = vsub.s32 %v5775_v20, %v5778_v63  ;;  %v5673_v54 = vmul.f32 %v11172_v49, %v5672_v15 }
 0x327   :  { %v5510_v38 = vsel %vm5503_vm5, %v5506_v4, %v5509_v56  ;;  %v5613_v8 = vsel %vm5606_vm2, %v5609_v11, %v5612_v19  ;;  %v11193_v42 = vadd.s32 %v11122_v46, %v11120_v0  ;;  %v11196_v51 = vshrl.u32 %v5936_v2, 5  ;;  %v11214_v11 = vld [vmem:[#allocation2 + $0x190] sm:$0xff] }
 0x328   :  { %v5511_v53 = vsel %vm5500_vm0, nan, %v5510_v38  ;;  %v5614_v36 = vsel %vm5500_vm0, nan, %v5613_v8  ;;  %v5781_v55 = vsub.s32 0, %v11178_v40  ;;  %v11201_v57 = vsub.s32 32, %v11184_v10  ;;  %v11223_v8 = vld [vmem:[#allocation2 + $0x1c8] sm:$0xff] }
 0x329   :  { %v5615_v3 = vmul.f32 %v5614_v36, %v11023_v5  ;;  %v5616_v59 = vmul.f32 %v5511_v53, %v5346_v31  ;;  %v5618_v62 = vmul.f32 %v5614_v36, %v11025_v24  ;;  %v5619_v43 = vmul.f32 %v5511_v53, %v5349_v13 }
 0x32a   :  { %v5621_v20 = vmul.f32 %v5614_v36, %v11027_v29  ;;  %v5622_v39 = vmul.f32 %v5511_v53, %v5352_v22  ;;  %v7131_v5 = vmin.u32 %v5781_v55, %v11178_v40  ;;  %v11198_v24 = vshll.u32 %v5932_v14, 8  ;;  %v11217_v22 = vld [vmem:[#allocation2 + $0x198] sm:$0xff]  ;;  %v11226_v14 = vld [vmem:[#allocation2 + $0x1d0] sm:$0xff] }
 0x32b   :  { %v5617_v48 = vsub.f32 %v5615_v3, %v5616_v59  ;;  %v5620_v47 = vsub.f32 %v5618_v62, %v5619_v43  ;;  %v11203_v33 = vadd.s32 1, %v7146_v9  ;;  %v5941_v0 = vshll.u32 %v11852_v60, %v11184_v10  ;;  %v11236_v62 = vld [vmem:[#allocation2 + $0x1a8] sm:$0xff]  ;;  %v11239_v55 = vld [vmem:[#allocation2 + $0x1b0] sm:$0xff] }
 0x32c   :  { %v5623_v37 = vsub.f32 %v5621_v20, %v5622_v39  ;;  %v5783_v31 = vclz %v7131_v5  ;;  %v5944_v46 = vshll.u32 %v11853_v6, %v11184_v10  ;;  %v5947_v56 = vshll.u32 %v11775_v34, %v11184_v10 }
 0x32d   :  { %v5628_v7 = vmul.f32 %v5627_v16, %v5617_v48  ;;  %v5630_v29 = vmul.f32 %v5627_v16, %v5620_v47  ;;  %v5674_v61 = vmul.f32 %v5673_v54, %v5617_v48  ;;  %v5676_v63 = vmul.f32 %v5673_v54, %v5620_v47 }
 0x32e   :  { %v5632_v44 = vmul.f32 %v5627_v16, %v5623_v37  ;;  %v5678_v2 = vmul.f32 %v5673_v54, %v5623_v37  ;;  %v7132_v4 = vadd.s32 4294967294, %v5783_v31  ;;  %v5942_v36 = vshrl.u32 %v11853_v6, %v11201_v57 }
 0x32f   :  { %v5629_v52 = vadd.f32 %v5628_v7, %v11046_v12  ;;  %v5631_v13 = vadd.f32 %v5630_v29, %v11049_v23  ;;  %v11220_v23 = vld [vmem:[#allocation2 + $0x1c0] sm:$0xff]  ;;  %v5945_v15 = vshrl.u32 %v11775_v34, %v11201_v57  ;;  %v5948_v9 = vshrl.u32 %v11776_v41, %v11201_v57 }
 0x330   :  { %v5633_v19 = vadd.f32 %v5632_v44, %v11052_v30  ;;  %vm7133_vm7 = vcmp.lt.s32.totalorder %v7132_v4, 0  ;;  %v5940_v7 = vshrl.u32 %v11852_v60, %v11201_v57  ;;  %v5943_v44 = vor.u32 %v5942_v36, %v5941_v0 }
 0x331   :  { %5636 = vst [vmem:[#allocation5 + $0x150] sm:$0xff] %v5629_v52  ;;  %5639 = vst [vmem:[#allocation5 + $0x158] sm:$0xff] %v5631_v13  ;;  %v5643_v16 = vmul.f32 %v11214_v11, %v5629_v52  ;;  %v5644_v12 = vmul.f32 %v11217_v22, %v5631_v13  ;;  %v5653_v38 = vmul.f32 %v11220_v23, %v5629_v52  ;;  %vm5956_vm8 = vcmp.lt.s32.totalorder %v11196_v51, 1 }
 0x332   :  { %v5654_v30 = vmul.f32 %v11223_v8, %v5631_v13  ;;  %5642 = vst [vmem:[#allocation5 + $0x160] sm:$0xff] %v5633_v19  ;;  %v5656_v53 = vmul.f32 %v11226_v14, %v5633_v19  ;;  %v5646_v3 = vmul.f32 %v11126_v58, %v5633_v19  ;;  %v5648_v43 = vmul.f32 %v11236_v62, %v5629_v52 }
 0x333   :  { %v5675_v20 = vadd.f32 %v5674_v61, %v5629_v52  ;;  %v5645_v39 = vadd.f32 %v5644_v12, %v5643_v16  ;;  %v5649_v48 = vmul.f32 %v11239_v55, %v5631_v13  ;;  %v5677_v47 = vadd.f32 %v5676_v63, %v5631_v13 }
 0x334   :  { %v5655_v59 = vadd.f32 %v5654_v30, %v5653_v38  ;;  %v11242_v54 = vadd.f32 %v5678_v2, %v5633_v19  ;;  %v5946_v31 = vor.u32 %v5945_v15, %v5944_v46  ;;  %v5949_v52 = vor.u32 %v5948_v9, %v5947_v56 }
 0x335   :  { %5681 = vst [vmem:[#allocation5 + $0x138] sm:$0xff] %v5675_v20  ;;  %v5696_v5 = vmul.f32 %v11220_v23, %v5675_v20  ;;  %5683 = vst [vmem:[#allocation5 + $0x140] sm:$0xff] %v5677_v47  ;;  %v5697_v29 = vmul.f32 %v11223_v8, %v5677_v47  ;;  %v5651_v13 = vmul.f32 %v11133_v45, %v5633_v19  ;;  %v5786_v38 = vsel %vm7133_vm7, 0, %v7132_v4 }
 0x336   :  { %v5657_v37 = vadd.f32 %v5656_v53, %v5655_v59  ;;  %5685 = vst [vmem:[#allocation5 + $0x148] sm:$0xff] %v11242_v54  ;;  %v5699_v61 = vmul.f32 %v11226_v14, %v11242_v54  ;;  %v5950_v63 = vshll.u32 %v11776_v41, %v11184_v10  ;;  %v11254_v2 = vadd.f32 %v5646_v3, %v5645_v39 }
 0x337   :  { %v5650_v16 = vadd.f32 %v5649_v48, %v5648_v43  ;;  %v5698_v12 = vadd.f32 %v5697_v29, %v5696_v5  ;;  %v5686_v30 = vmul.f32 %v11214_v11, %v5675_v20  ;;  %v5787_v53 = vsub.s32 32, %v5786_v38 }
 0x338   :  { %7394 = vrcp.f32 %v5657_v37  ;;  %v5788_v0 = vshll.u32 %v11178_v40, %v5786_v38  ;;  %v5791_v46 = vsub.s32 4294967266, %v5786_v38  ;;  %v5687_v56 = vmul.f32 %v11217_v22, %v5677_v47 }
 0x339   :  { %v5700_v19 = vadd.f32 %v5699_v61, %v5698_v12  ;;  %v5691_v36 = vmul.f32 %v11236_v62, %v5675_v20  ;;  %v5951_v15 = vshrl.u32 %v11777_v35, %v11201_v57  ;;  %v5692_v9 = vmul.f32 %v11239_v55, %v5677_v47 }
 0x33a   :  { %v5789_v3 = vshrl.u32 %v11193_v42, %v5787_v53  ;;  %v5792_v59 = vadd.s32 127, %v5791_v46  ;;  %v5953_v4 = vshll.u32 %v11777_v35, %v11184_v10  ;;  %v5954_v40 = vshrl.u32 %v11778_v27, %v11201_v57 }
 0x33b   :  { %7396 = vrcp.f32 %v5700_v19  ;;  %v5952_v43 = vor.u32 %v5951_v15, %v5950_v63  ;;  %vm5957_vm9 = vcmp.lt.s32.totalorder %v11196_v51, 2  ;;  %vm5958_vm10 = vcmp.lt.s32.totalorder %v11196_v51, 3 }
 0x33c   :  { %v5790_v39 = vor.u32 %v5789_v3, %v5788_v0  ;;  %v5793_v20 = vshll.u32 %v5792_v59, 23  ;;  %v5955_v48 = vor.u32 %v5954_v40, %v5953_v4  ;;  %vm5959_vm12 = vcmp.lt.s32.totalorder %v11196_v51, 4 }
 0x33d   :  { %v5960_v42 = vsel %vm5956_vm8, %v5940_v7, %v5943_v44  ;;  %v5964_v47 = vsel %vm5956_vm8, %v5943_v44, %v5946_v31  ;;  %v5961_v29 = vsel %vm5959_vm12, %v5949_v52, 2102212464  ;;  %v5965_v61 = vsel %vm5959_vm12, %v5952_v43, 920167782 }
 0x33e   :  { %v5794_v5 = vor.u32 4788187, %v5793_v20  ;;  %v5797_v10 = vcvt.s32.f32 %v5790_v39  ;;  %v5962_v57 = vsel %vm5958_vm10, %v5946_v31, %v5961_v29  ;;  %v5966_v63 = vsel %vm5958_vm10, %v5949_v52, %v5965_v61 }
 0x33f   :  { %v5968_v12 = vsel %vm5956_vm8, %v5946_v31, %v5949_v52  ;;  %v5969_v38 = vsel %vm5959_vm12, %v5955_v48, 1326507024  ;;  %v5963_v46 = vsel %vm5957_vm9, %v5960_v42, %v5962_v57  ;;  %v5967_v7 = vsel %vm5957_vm9, %v5964_v47, %v5966_v63 }
 0x340   :  { %v5795_v0 = vand.u32 2147483647, %v5794_v5  ;;  %v5970_v44 = vsel %vm5958_vm10, %v5952_v43, %v5969_v38  ;;  %v11285_v59 = vmul.u32.u64.low %v11198_v24, %v5967_v7  ;;  %v11286_v4 = vmul.u32.u64.high %v11198_v24, %v5967_v7, %v11285_v59 }
 0x341   :  { %v5971_v3 = vsel %vm5957_vm9, %v5968_v12, %v5970_v44  ;;  %v5688_v31 = vadd.f32 %v5687_v56, %v5686_v30  ;;  %v5689_v52 = vmul.f32 %v11126_v58, %v11242_v54  ;;  %v5652_v48 = vadd.f32 %v5651_v13, %v5650_v16 }
 0x342   :  { %v7395_v53 = vpop.eup %7394  ;;  %v11292_v40 = vmul.u32.u64.low %v11198_v24, %v5971_v3  ;;  %v11293_v39 = vmul.u32.u64.high %v11198_v24, %v5971_v3, %v11292_v40  ;;  %v5798_v43 = vmul.f32 %v5797_v10, %v5795_v0  ;;  %vm6216_vm11 = vcmp.gt.s32.totalorder %v11203_v33, 0 }
 0x343   :  { %v5659_v15 = vmul.f32 %v7395_v53, %v5657_v37  ;;  %v5693_v51 = vadd.f32 %v5692_v9, %v5691_v36  ;;  %v5694_v37 = vmul.f32 %v11133_v45, %v11242_v54  ;;  %v5979_v42 = vmul.u32 %v11198_v24, %v5963_v46 }
 0x344   :  { %v6217_v30 = vsel %vm6216_vm11, %v11203_v33, 0  ;;  %vm5717_vm13 = vcmp.lt.s32.totalorder %v10797_v25, 0  ;;  %v5982_v5 = vadd.s32 1, %v11286_v4  ;;  %v5690_v61 = vadd.f32 %v5689_v52, %v5688_v31 }
 0x345   :  { %v5660_v20 = vsub.f32 2.0, %v5659_v15  ;;  %v7397_v56 = vpop.eup %7396  ;;  %v6219_v29 = vand.u32 31, %v6217_v30  ;;  %vm5981_vm14 = vc.u32 %v11293_v39, %v11285_v59  ;;  %v6205_v16 = vand.u32 2147483647, %v11144_v32 }
 0x346   :  { %v5702_v13 = vmul.f32 %v7397_v56, %v5700_v19  ;;  %v5799_v24 = vxor.u32 2147483648, %v5798_v43  ;;  %v5983_v33 = vsel %vm5981_vm14, %v5982_v5, %v11286_v4  ;;  %v5695_v10 = vadd.f32 %v5694_v37, %v5693_v51 }
 0x347   :  { %v5661_v47 = vmul.f32 %v7395_v53, %v5660_v20  ;;  %v5984_v57 = vadd.s32 %v5983_v33, %v5979_v42  ;;  %v6220_v63 = vsub.s32 32, %v6219_v29  ;;  %v11875_v12 = vand.u32 2147483647, %v10797_v25  ;;  %v11332_v33 = vld [vmem:[#allocation2 + $0xc8] sm:$0xff] }
 0x348   :  { %v5703_v9 = vsub.f32 2.0, %v5702_v13  ;;  %v6218_v0 = vshrl.u32 %v6217_v30, 5  ;;  %v5800_v46 = vsel %vm5717_vm13, %v5799_v24, %v5798_v43  ;;  %v6222_v7 = vshll.u32 %v11852_v60, %v6219_v29 }
 0x349   :  { %v5662_v54 = vmul.f32 %v5661_v47, %v11254_v2  ;;  %v5666_v36 = vmul.f32 %v5661_v47, %v5652_v48  ;;  %vm11309_vm0 = vcmp.le.f32.partialorder %v11875_v12, 0.7853982  ;;  %v5985_v53 = vadd.s32 536870912, %v5984_v57 }
 0x34a   :  { %v5704_v38 = vmul.f32 %v7397_v56, %v5703_v9  ;;  %v6212_v2 = vand.u32 8388607, %v6205_v16  ;;  %v6231_v44 = vshll.u32 %v11776_v41, %v6219_v29  ;;  %v6232_v15 = vshrl.u32 %v11777_v35, %v6220_v63 }
 0x34b   :  { %5665 = vst [vmem:[#allocation5 + $0x2d8] sm:$0xff] %v5662_v54  ;;  %5669 = vst [vmem:[#allocation5 + $0x2e0] sm:$0xff] %v5666_v36  ;;  %v5986_v31 = vshrl.u32 %v5985_v53, 30  ;;  %v6225_v52 = vshll.u32 %v11853_v6, %v6219_v29  ;;  %v6223_v40 = vshrl.u32 %v11853_v6, %v6220_v63  ;;  %v6226_v20 = vshrl.u32 %v11775_v34, %v6220_v63 }
 0x34c   :  { %v5705_v3 = vmul.f32 %v5704_v38, %v5690_v61  ;;  %v5709_v4 = vmul.f32 %v5704_v38, %v5695_v10  ;;  %v6228_v48 = vshll.u32 %v11775_v34, %v6219_v29  ;;  %v6229_v51 = vshrl.u32 %v11776_v41, %v6220_v63 }
 0x34d   :  { %v5987_v43 = vshll.u32 %v5986_v31, 30  ;;  %v6233_v37 = vor.u32 %v6232_v15, %v6231_v44  ;;  %v6234_v42 = vshll.u32 %v11777_v35, %v6219_v29  ;;  %v6235_v30 = vshrl.u32 %v11778_v27, %v6220_v63 }
 0x34e   :  { %5708 = vst [vmem:[#allocation5 + $0x2c8] sm:$0xff] %v5705_v3  ;;  %5712 = vst [vmem:[#allocation5 + $0x2d0] sm:$0xff] %v5709_v4  ;;  %v6213_v56 = vor.u32 8388608, %v6212_v2  ;;  %vm6240_vm2 = vcmp.lt.s32.totalorder %v6218_v0, 4  ;;  %v5801_v47 = vsub.s32 4, %v11161_v18  ;;  %v5803_v5 = vsel %vm11309_vm0, %v10797_v25, %v5800_v46 }
 0x34f   :  { %v5988_v61 = vsub.s32 %v5984_v57, %v5987_v43  ;;  %v6221_v13 = vshrl.u32 %v11852_v60, %v6220_v63  ;;  %v6224_v54 = vor.u32 %v6223_v40, %v6222_v7  ;;  %v6227_v36 = vor.u32 %v6226_v20, %v6225_v52 }
 0x350   :  { %v6230_v24 = vor.u32 %v6229_v51, %v6228_v48  ;;  %vm6237_vm4 = vcmp.lt.s32.totalorder %v6218_v0, 1  ;;  %v6236_v9 = vor.u32 %v6235_v30, %v6234_v42  ;;  %vm6239_vm3 = vcmp.lt.s32.totalorder %v6218_v0, 3 }
 0x351   :  { %v5990_v29 = vsub.s32 0, %v5988_v61  ;;  %v6246_v10 = vsel %vm6240_vm2, %v6233_v37, 920167782  ;;  %v6253_v38 = vshll.u32 %v6213_v56, 8  ;;  %v5802_v57 = vsel %vm5717_vm13, %v5801_v47, %v11161_v18 }
 0x352   :  { %v6242_v12 = vsel %vm6240_vm2, %v6230_v24, 2102212464  ;;  %7398 = vcosq.f32 %v5803_v5  ;;  %v6478_v53 = vand.u32 2139095040, %v11332_v33  ;;  %vm6238_vm5 = vcmp.lt.s32.totalorder %v6218_v0, 2 }
 0x353   :  { %v7139_v63 = vmin.u32 %v5990_v29, %v5988_v61  ;;  %7400 = vsinq.f32 %v5803_v5  ;;  %v6245_v2 = vsel %vm6237_vm4, %v6224_v54, %v6227_v36  ;;  %v6247_v46 = vsel %vm6239_vm3, %v6230_v24, %v6246_v10 }
 0x354   :  { %v6241_v44 = vsel %vm6237_vm4, %v6221_v13, %v6224_v54  ;;  %v6243_v15 = vsel %vm6239_vm3, %v6227_v36, %v6242_v12  ;;  %v6250_v3 = vsel %vm6240_vm2, %v6236_v9, 1326507024  ;;  %v6249_v25 = vsel %vm6237_vm4, %v6227_v36, %v6230_v24 }
 0x355   :  { %v5992_v7 = vclz %v7139_v63  ;;  %v5804_v18 = vsel %vm11309_vm0, 0, %v5802_v57  ;;  %v6248_v52 = vsel %vm6238_vm5, %v6245_v2, %v6247_v46  ;;  %v6479_v40 = vshrl.u32 %v6478_v53, 23 }
 0x356   :  { %v5980_v20 = vadd.s32 %v11285_v59, %v11293_v39  ;;  %v6010_v48 = vsub.s32 4, %v5986_v31  ;;  %v6244_v51 = vsel %vm6238_vm5, %v6241_v44, %v6243_v15  ;;  %v6251_v43 = vsel %vm6239_vm3, %v6233_v37, %v6250_v3 }
 0x357   :  { %v7140_v4 = vadd.s32 4294967294, %v5992_v7  ;;  %v6252_v42 = vsel %vm6238_vm5, %v6249_v25, %v6251_v43  ;;  %v11354_v30 = vmul.u32.u64.low %v6253_v38, %v6248_v52  ;;  %v11355_v56 = vmul.u32.u64.high %v6253_v38, %v6248_v52, %v11354_v30  ;;  %v6159_v7 = vld [vmem:[#allocation2 + $0x150] sm:$0xff] }
 0x358   :  { %v5808_v19 = vadd.s32 3, %v5804_v18  ;;  %v11358_v5 = vmul.u32.u64.low %v6253_v38, %v6252_v42  ;;  %v11359_v13 = vmul.u32.u64.high %v6253_v38, %v6252_v42, %v11358_v5  ;;  %vm5926_vm1 = vcmp.lt.s32.totalorder %v11093_v28, 0 }
 0x359   :  { %vm7141_vm6 = vcmp.lt.s32.totalorder %v7140_v4, 0  ;;  %v6011_v37 = vsel %vm5926_vm1, %v6010_v48, %v5986_v31  ;;  %v6260_v36 = vmul.u32 %v6253_v38, %v6244_v51  ;;  %v6263_v9 = vadd.s32 1, %v11355_v56 }
 0x35a   :  { %v5995_v47 = vsel %vm7141_vm6, 0, %v7140_v4  ;;  %v7154_v10 = vadd.s32 4294967169, %v6479_v40  ;;  %v5809_v57 = vand.u32 3, %v5808_v19  ;;  %vm11367_vm15 = vcmp.le.f32.partialorder %v5924_v17, 0.7853982  ;;  %v11377_v17 = vld [vmem:[#allocation2 + $0xb0] sm:$0xff] }
 0x35b   :  { %v5996_v59 = vsub.s32 32, %v5995_v47  ;;  %v5997_v39 = vshll.u32 %v5988_v61, %v5995_v47  ;;  %v6000_v54 = vsub.s32 4294967266, %v5995_v47  ;;  %vm6262_vm7 = vc.u32 %v11359_v13, %v11354_v30 }
 0x35c   :  { %v7399_v0 = vpop.eup %7398  ;;  %v6264_v38 = vsel %vm6262_vm7, %v6263_v9, %v11355_v56  ;;  %v6475_v53 = vand.u32 2147483647, %v11332_v33  ;;  %v5912_v2 = vand.u32 3, %v5804_v18  ;;  %v6013_v46 = vsel %vm11367_vm15, 0, %v6011_v37 }
 0x35d   :  { %v5998_v24 = vshrl.u32 %v5980_v20, %v5996_v59  ;;  %v6001_v29 = vadd.s32 127, %v6000_v54  ;;  %v7401_v12 = vpop.eup %7400  ;;  %v6265_v44 = vadd.s32 %v6264_v38, %v6260_v36  ;;  %v6485_v15 = vadd.s32 1, %v7154_v10 }
 0x35e   :  { %vm5807_vm8 = vweird.f32 %v11377_v17  ;;  %v5812_v3 = vxor.u32 2147483648, %v7401_v12  ;;  %v5815_v25 = vxor.u32 2147483648, %v7399_v0  ;;  %vm5811_vm9 = vcmp.eq.s32.totalorder %v5809_v57, 0 }
 0x35f   :  { %v5999_v61 = vor.u32 %v5998_v24, %v5997_v39  ;;  %v6002_v31 = vshll.u32 %v6001_v29, 23  ;;  %vm5814_vm10 = vcmp.eq.s32.totalorder %v5809_v57, 2  ;;  %v6266_v40 = vadd.s32 536870912, %v6265_v44 }
 0x360   :  { %vm6486_vm12 = vcmp.gt.s32.totalorder %v6485_v15, 0  ;;  %v6017_v18 = vadd.s32 3, %v6013_v46  ;;  %v11381_v48 = vmul.f32 %v11172_v49, %v6159_v7  ;;  %vm5810_vm11 = vcmp.lt.s32.totalorder %v5809_v57, 2 }
 0x361   :  { %v6003_v4 = vor.u32 4788187, %v6002_v31  ;;  %v6006_v52 = vcvt.s32.f32 %v5999_v61  ;;  %v6487_v51 = vsel %vm6486_vm12, %v6485_v15, 0  ;;  %vm5917_vm13 = vcmp.eq.s32.totalorder %v5912_v2, 2 }
 0x362   :  { %v11383_v43 = vshrl.u32 %v6266_v40, 30  ;;  %v6489_v42 = vand.u32 31, %v6487_v51  ;;  %v5813_v56 = vsel %vm5811_vm9, %v7399_v0, %v5812_v3  ;;  %v5816_v19 = vsel %vm5814_vm10, %v5815_v25, %v7401_v12 }
 0x363   :  { %v6004_v20 = vand.u32 2147483647, %v6003_v4  ;;  %vm5914_vm14 = vcmp.eq.s32.totalorder %v5912_v2, 0  ;;  %vm5913_vm0 = vcmp.lt.s32.totalorder %v5912_v2, 2  ;;  %v6482_v59 = vand.u32 8388607, %v6475_v53 }
 0x364   :  { %v6268_v5 = vshll.u32 %v11383_v43, 30  ;;  %v6490_v39 = vsub.s32 32, %v6489_v42  ;;  %v5919_v54 = vsel %vm5917_vm13, %v5815_v25, %v7401_v12  ;;  %v11388_v36 = vand.u32 3, %v6017_v18 }
 0x365   :  { %v6007_v47 = vmul.f32 %v6006_v52, %v6004_v20  ;;  %v11390_v24 = vand.u32 3, %v6013_v46  ;;  %v5817_v29 = vsel %vm5810_vm11, %v5813_v56, %v5816_v19  ;;  %v5916_v9 = vsel %vm5914_vm14, %v7399_v0, %v5812_v3 }
 0x366   :  { %v11393_v10 = vsub.s32 %v6265_v44, %v6268_v5  ;;  %v6492_v61 = vshll.u32 %v11852_v60, %v6489_v42  ;;  %v6493_v38 = vshrl.u32 %v11853_v6, %v6490_v39  ;;  %v6495_v7 = vshll.u32 %v11853_v6, %v6489_v42 }
 0x367   :  { %v6008_v37 = vxor.u32 2147483648, %v6007_v47  ;;  %v6496_v12 = vshrl.u32 %v11775_v34, %v6490_v39  ;;  %v6498_v0 = vshll.u32 %v11775_v34, %v6489_v42  ;;  %v6499_v44 = vshrl.u32 %v11776_v41, %v6490_v39 }
 0x368   :  { %v6271_v57 = vsub.s32 0, %v11393_v10  ;;  %v6483_v15 = vor.u32 8388608, %v6482_v59  ;;  %v6488_v3 = vshrl.u32 %v6487_v51, 5  ;;  %v6501_v25 = vshll.u32 %v11776_v41, %v6489_v42 }
 0x369   :  { %v6009_v31 = vsel %vm5926_vm1, %v6008_v37, %v6007_v47  ;;  %v11410_v6 = vsel %vm5807_vm8, nan, %v5817_v29  ;;  %v5920_v4 = vsel %vm5913_vm0, %v5916_v9, %v5919_v54  ;;  %vm6126_vm2 = vcmp.eq.s32.totalorder %v11390_v24, 2 }
 0x36a   :  { %v6012_v46 = vsel %vm11367_vm15, %v11093_v28, %v6009_v31  ;;  %v7147_v63 = vmin.u32 %v6271_v57, %v11393_v10  ;;  %v6494_v52 = vor.u32 %v6493_v38, %v6492_v61  ;;  %v6497_v34 = vor.u32 %v6496_v12, %v6495_v7 }
 0x36b   :  { %7402 = vcosq.f32 %v6012_v46  ;;  %v6502_v40 = vshrl.u32 %v11777_v35, %v6490_v39  ;;  %v6504_v20 = vshll.u32 %v11777_v35, %v6489_v42  ;;  %vm6020_vm4 = vcmp.eq.s32.totalorder %v11388_v36, 0 }
 0x36c   :  { %7404 = vsinq.f32 %v6012_v46  ;;  %vm6123_vm3 = vcmp.eq.s32.totalorder %v11390_v24, 0  ;;  %v6261_v41 = vadd.s32 %v11354_v30, %v11359_v13  ;;  %v6273_v2 = vclz %v7147_v63 }
 0x36d   :  { %v6491_v18 = vshrl.u32 %v11852_v60, %v6490_v39  ;;  %v6500_v51 = vor.u32 %v6499_v44, %v6498_v0  ;;  %vm6019_vm5 = vcmp.lt.s32.totalorder %v11388_v36, 2  ;;  %vm6122_vm6 = vcmp.lt.s32.totalorder %v11390_v24, 2 }
 0x36e   :  { %v6503_v56 = vor.u32 %v6502_v40, %v6501_v25  ;;  %v6505_v19 = vshrl.u32 %v11778_v27, %v6490_v39  ;;  %vm6507_vm1 = vcmp.lt.s32.totalorder %v6488_v3, 1  ;;  %v11425_v35 = vshll.u32 %v6483_v15, 8 }
 0x36f   :  { %vm6016_vm15 = vweird.f32 %v11093_v28  ;;  %v7148_v42 = vadd.s32 4294967294, %v6273_v2  ;;  %vm6508_vm7 = vcmp.lt.s32.totalorder %v6488_v3, 2  ;;  %vm6509_vm9 = vcmp.lt.s32.totalorder %v6488_v3, 3 }
 0x370   :  { %vm6510_vm10 = vcmp.lt.s32.totalorder %v6488_v3, 4  ;;  %v6506_v30 = vor.u32 %v6505_v19, %v6504_v20  ;;  %v6515_v60 = vsel %vm6507_vm1, %v6494_v52, %v6497_v34  ;;  %v6511_v5 = vsel %vm6507_vm1, %v6491_v18, %v6494_v52 }
 0x371   :  { %v6512_v13 = vsel %vm6510_vm10, %v6500_v51, 2102212464  ;;  %v6516_v47 = vsel %vm6510_vm10, %v6503_v56, 920167782  ;;  %vm7149_vm12 = vcmp.lt.s32.totalorder %v7148_v42, 0  ;;  %v6519_v54 = vsel %vm6507_vm1, %v6497_v34, %v6500_v51 }
 0x372   :  { %v6517_v59 = vsel %vm6509_vm9, %v6500_v51, %v6516_v47  ;;  %v6276_v37 = vsel %vm7149_vm12, 0, %v7148_v42  ;;  %v6513_v27 = vsel %vm6509_vm9, %v6497_v34, %v6512_v13  ;;  %v6520_v29 = vsel %vm6510_vm10, %v6506_v30, 1326507024 }
 0x373   :  { %v6518_v39 = vsel %vm6508_vm7, %v6515_v60, %v6517_v59  ;;  %v6277_v9 = vsub.s32 32, %v6276_v37  ;;  %v6278_v61 = vshll.u32 %v11393_v10, %v6276_v37  ;;  %v6281_v31 = vsub.s32 4294967266, %v6276_v37 }
 0x374   :  { %v6521_v38 = vsel %vm6509_vm9, %v6503_v56, %v6520_v29  ;;  %vm6023_vm11 = vcmp.eq.s32.totalorder %v11388_v36, 2  ;;  %v11436_v46 = vmul.u32.u64.low %v11425_v35, %v6518_v39  ;;  %v11437_v57 = vmul.u32.u64.high %v11425_v35, %v6518_v39, %v11436_v46  ;;  %v11880_v39 = vld [vmem:[#allocation8_spill] sm:$0xff] }
 0x375   :  { %v7403_v7 = vpop.eup %7402  ;;  %v6522_v12 = vsel %vm6508_vm7, %v6519_v54, %v6521_v38  ;;  %v6140_v15 = vsub.f32 0.0, %v11410_v6  ;;  %v6279_v25 = vshrl.u32 %v6261_v41, %v6277_v9  ;;  %v6282_v63 = vadd.s32 127, %v6281_v31  ;;  %v11881_v9 = vld [vmem:[#allocation13_spill] sm:$0xff] }
 0x376   :  { %v7405_v0 = vpop.eup %7404  ;;  %v6024_v44 = vxor.u32 2147483648, %v7403_v7  ;;  %v6514_v52 = vsel %vm6508_vm7, %v6511_v5, %v6513_v27  ;;  %v11443_v34 = vmul.u32.u64.low %v11425_v35, %v6522_v12  ;;  %v11444_v40 = vmul.u32.u64.high %v11425_v35, %v6522_v12, %v11443_v34  ;;  %v11882_v31 = vld [vmem:[#allocation9_spill] sm:$0xff] }
 0x377   :  { %v6021_v10 = vxor.u32 2147483648, %v7405_v0  ;;  %v6280_v18 = vor.u32 %v6279_v25, %v6278_v61  ;;  %v6283_v51 = vshll.u32 %v6282_v63, 23  ;;  %v11450_v56 = vsel %vm5807_vm8, nan, %v5920_v4 }
 0x378   :  { %v6025_v20 = vsel %vm6023_vm11, %v6024_v44, %v7405_v0  ;;  %v6128_v2 = vsel %vm6126_vm2, %v6024_v44, %v7405_v0  ;;  %v6533_v19 = vadd.s32 1, %v11437_v57  ;;  %v6530_v60 = vmul.u32 %v11425_v35, %v6514_v52 }
 0x379   :  { %v6022_v41 = vsel %vm6020_vm4, %v7403_v7, %v6021_v10  ;;  %v6125_v3 = vsel %vm6123_vm3, %v7403_v7, %v6021_v10  ;;  %v6284_v13 = vor.u32 4788187, %v6283_v51  ;;  %v6287_v47 = vcvt.s32.f32 %v6280_v18  ;;  %v11883_v7 = vld [vmem:[#allocation14_spill] sm:$0xff] }
 0x37a   :  { %v6026_v42 = vsel %vm6019_vm5, %v6022_v41, %v6025_v20  ;;  %v6129_v30 = vsel %vm6122_vm6, %v6125_v3, %v6128_v2  ;;  %vm6532_vm8 = vc.u32 %v11444_v40, %v11436_v46  ;;  %v6291_v37 = vsub.s32 4, %v11383_v43 }
 0x37b   :  { %v6027_v17 = vsel %vm6016_vm15, nan, %v6026_v42  ;;  %v6130_v4 = vsel %vm6016_vm15, nan, %v6129_v30  ;;  %v6285_v35 = vand.u32 2147483647, %v6284_v13  ;;  %v6534_v27 = vsel %vm6532_vm8, %v6533_v19, %v11437_v57  ;;  %v7488_v42 = vld [vmem:[#allocation5] sm:$0xff]  ;;  %v7489_v13 = vld [vmem:[#allocation5 + $0x8] sm:$0xff] }
 0x37c   :  { %v6141_v5 = vmul.f32 %v6140_v15, %v6130_v4  ;;  %v6142_v36 = vmul.f32 %v6130_v4, %v11450_v56  ;;  %v6143_v59 = vmul.f32 %v6027_v17, %v11864_v1  ;;  %v6148_v24 = vmul.f32 %v6027_v17, %v11865_v50  ;;  %v11884_v1 = vld [vmem:[#allocation10_spill] sm:$0xff] }
 0x37d   :  { %v6153_v54 = vmul.f32 %v6027_v17, %v11866_v21  ;;  %v6288_v50 = vmul.f32 %v6287_v47, %v6285_v35  ;;  %v6535_v44 = vadd.s32 %v6534_v27, %v6530_v60  ;;  %vm6206_vm13 = vcmp.le.f32.partialorder %v6205_v16, 0.7853982  ;;  %v7490_v17 = vld [vmem:[#allocation5 + $0x10] sm:$0xff] }
 0x37e   :  { %v6144_v28 = vmul.f32 %v6141_v5, %v11861_v26  ;;  %v6146_v29 = vmul.f32 %v6142_v36, %v11880_v39  ;;  %v6149_v61 = vmul.f32 %v6141_v5, %v11881_v9  ;;  %v6151_v38 = vmul.f32 %v6142_v36, %v11882_v31 }
 0x37f   :  { %v6154_v12 = vmul.f32 %v6141_v5, %v11883_v7  ;;  %v6156_v0 = vmul.f32 %v6142_v36, %v11884_v1  ;;  %vm6207_vm14 = vcmp.lt.s32.totalorder %v11144_v32, 0  ;;  %v6289_v25 = vxor.u32 2147483648, %v6288_v50 }
 0x380   :  { %v6145_v21 = vadd.f32 %v6144_v28, %v6143_v59  ;;  %v6150_v15 = vadd.f32 %v6149_v61, %v6148_v24  ;;  %v6292_v63 = vsel %vm6207_vm14, %v6291_v37, %v11383_v43  ;;  %v6536_v10 = vadd.s32 536870912, %v6535_v44 }
 0x381   :  { %v6155_v57 = vadd.f32 %v6154_v12, %v6153_v54  ;;  %v6290_v2 = vsel %vm6207_vm14, %v6289_v25, %v6288_v50  ;;  %v6294_v3 = vsel %vm6206_vm13, 0, %v6292_v63  ;;  %v6131_v59 = vmul.f32 %v11450_v56, %v11861_v26  ;;  %v6431_v26 = vld [vmem:[#allocation2 + $0x158] sm:$0xff] }
 0x382   :  { %v11484_v52 = vadd.f32 %v6146_v29, %v6145_v21  ;;  %v11486_v34 = vadd.f32 %v6151_v38, %v6150_v15  ;;  %v11490_v18 = vshrl.u32 %v6536_v10, 30  ;;  %v6293_v41 = vsel %vm6206_vm13, %v11144_v32, %v6290_v2 }
 0x383   :  { %v11488_v20 = vadd.f32 %v6156_v0, %v6155_v57  ;;  %7406 = vcosq.f32 %v6293_v41  ;;  %v6298_v47 = vadd.s32 3, %v6294_v3  ;;  %v6132_v24 = vmul.f32 %v11410_v6, %v11880_v39 }
 0x384   :  { %v6161_v51 = vmul.f32 %v11381_v48, %v11484_v52  ;;  %v6163_v16 = vmul.f32 %v11381_v48, %v11486_v34  ;;  %v6538_v19 = vshll.u32 %v11490_v18, 30  ;;  %7408 = vsinq.f32 %v6293_v41 }
 0x385   :  { %v6165_v43 = vmul.f32 %v11381_v48, %v11488_v20  ;;  %v6134_v35 = vmul.f32 %v11450_v56, %v11881_v9  ;;  %v6135_v37 = vmul.f32 %v11410_v6, %v11882_v31  ;;  %v6137_v27 = vmul.f32 %v11450_v56, %v11883_v7 }
 0x386   :  { %v11500_v30 = vadd.f32 %v7488_v42, %v6161_v51  ;;  %v11502_v60 = vadd.f32 %v7489_v13, %v6163_v16  ;;  %v11506_v5 = vsub.s32 %v6535_v44, %v6538_v19  ;;  %v6402_v29 = vand.u32 3, %v6294_v3 }
 0x387   :  { %v11504_v4 = vadd.f32 %v7490_v17, %v6165_v43  ;;  %v6138_v39 = vmul.f32 %v11410_v6, %v11884_v1  ;;  %v6299_v38 = vand.u32 3, %v6298_v47  ;;  %v11531_v50 = vadd.f32 %v6132_v24, %v6131_v59 }
 0x388   :  { %6169 = vst [vmem:[#allocation5 + $0x1e0] sm:$0xff] %v11500_v30  ;;  %6172 = vst [vmem:[#allocation5 + $0x1e8] sm:$0xff] %v11502_v60  ;;  %v6186_v48 = vmul.f32 %v11220_v23, %v11500_v30  ;;  %v6187_v36 = vmul.f32 %v11223_v8, %v11502_v60  ;;  %v6541_v61 = vsub.s32 0, %v11506_v5  ;;  %vm6297_vm0 = vweird.f32 %v11144_v32 }
 0x389   :  { %6175 = vst [vmem:[#allocation5 + $0x1f0] sm:$0xff] %v11504_v4  ;;  %v6189_v54 = vmul.f32 %v11226_v14, %v11504_v4  ;;  %v6432_v9 = vmul.f32 %v11172_v49, %v6431_v26  ;;  %v11535_v31 = vadd.f32 %v6135_v37, %v6134_v35  ;;  %vm6403_vm2 = vcmp.lt.s32.totalorder %v6402_v29, 2 }
 0x38a   :  { %v6188_v28 = vadd.f32 %v6187_v36, %v6186_v48  ;;  %v7155_v0 = vmin.u32 %v6541_v61, %v11506_v5  ;;  %v11537_v56 = vadd.f32 %v6138_v39, %v6137_v27  ;;  %vm6301_vm4 = vcmp.eq.s32.totalorder %v6299_v38, 0 }
 0x38b   :  { %vm6304_vm3 = vcmp.eq.s32.totalorder %v6299_v38, 2  ;;  %vm6404_vm5 = vcmp.eq.s32.totalorder %v6402_v29, 0  ;;  %vm6407_vm6 = vcmp.eq.s32.totalorder %v6402_v29, 2  ;;  %v6176_v44 = vmul.f32 %v11214_v11, %v11500_v30 }
 0x38c   :  { %v6190_v12 = vadd.f32 %v6189_v54, %v6188_v28  ;;  %v6543_v7 = vclz %v7155_v0  ;;  %v6177_v21 = vmul.f32 %v11217_v22, %v11502_v60  ;;  %v6179_v57 = vmul.f32 %v11126_v58, %v11504_v4 }
 0x38d   :  { %v7407_v6 = vpop.eup %7406  ;;  %vm6300_vm1 = vcmp.lt.s32.totalorder %v6299_v38, 2  ;;  %v6531_v63 = vadd.s32 %v11436_v46, %v11444_v40  ;;  %v6181_v10 = vmul.f32 %v11236_v62, %v11500_v30  ;;  %v6182_v16 = vmul.f32 %v11239_v55, %v11502_v60 }
 0x38e   :  { %7410 = vrcp.f32 %v6190_v12  ;;  %v7409_v1 = vpop.eup %7408  ;;  %v6305_v49 = vxor.u32 2147483648, %v7407_v6  ;;  %v7156_v15 = vadd.s32 4294967294, %v6543_v7  ;;  %v6178_v58 = vadd.f32 %v6177_v21, %v6176_v44 }
 0x38f   :  { %v6302_v25 = vxor.u32 2147483648, %v7409_v1  ;;  %v6184_v46 = vmul.f32 %v11133_v45, %v11504_v4  ;;  %v6183_v24 = vadd.f32 %v6182_v16, %v6181_v10  ;;  %v6561_v16 = vsub.s32 4, %v11490_v18 }
 0x390   :  { %v6306_v2 = vsel %vm6304_vm3, %v6305_v49, %v7409_v1  ;;  %v6409_v51 = vsel %vm6407_vm6, %v6305_v49, %v7409_v1  ;;  %vm7157_vm15 = vcmp.lt.s32.totalorder %v7156_v15, 0  ;;  %v6180_v38 = vadd.f32 %v6179_v57, %v6178_v58 }
 0x391   :  { %v6303_v41 = vsel %vm6301_vm4, %v7407_v6, %v6302_v25  ;;  %v6406_v3 = vsel %vm6404_vm5, %v7407_v6, %v6302_v25  ;;  %v6546_v43 = vsel %vm7157_vm15, 0, %v7156_v15  ;;  %v6185_v44 = vadd.f32 %v6184_v46, %v6183_v24 }
 0x392   :  { %v6307_v19 = vsel %vm6300_vm1, %v6303_v41, %v6306_v2  ;;  %v6410_v42 = vsel %vm6403_vm2, %v6406_v3, %v6409_v51  ;;  %v6547_v13 = vsub.s32 32, %v6546_v43  ;;  %v6551_v47 = vsub.s32 4294967266, %v6546_v43 }
 0x393   :  { %v11558_v40 = vsel %vm6297_vm0, nan, %v6307_v19  ;;  %v11562_v17 = vsel %vm6297_vm0, nan, %v6410_v42  ;;  %v6548_v35 = vshll.u32 %v11506_v5, %v6546_v43  ;;  %vm6477_vm7 = vcmp.lt.s32.totalorder %v11332_v33, 0 }
 0x394   :  { %v6421_v48 = vmul.f32 %v11562_v17, %v11484_v52  ;;  %v6422_v36 = vmul.f32 %v11558_v40, %v11531_v50  ;;  %v6424_v59 = vmul.f32 %v11562_v17, %v11486_v34  ;;  %v6425_v45 = vmul.f32 %v11558_v40, %v11535_v31 }
 0x395   :  { %v6427_v54 = vmul.f32 %v11562_v17, %v11488_v20  ;;  %v6428_v32 = vmul.f32 %v11558_v40, %v11537_v56  ;;  %v6549_v29 = vshrl.u32 %v6531_v63, %v6547_v13  ;;  %v6552_v26 = vadd.s32 127, %v6551_v47 }
 0x396   :  { %v11577_v27 = vsub.f32 %v6421_v48, %v6422_v36  ;;  %v11579_v28 = vsub.f32 %v6424_v59, %v6425_v45  ;;  %vm6476_vm9 = vcmp.le.f32.partialorder %v6475_v53, 0.7853982  ;;  %v11618_v48 = vld [vmem:[#allocation2 + $0x1a0] sm:$0xff]  ;;  %v11622_v59 = vld [vmem:[#allocation2 + $0x1b8] sm:$0xff]  ;;  %vm6567_vm10 = vweird.f32 %v11332_v33 }
 0x397   :  { %v11581_v61 = vsub.f32 %v6427_v54, %v6428_v32  ;;  %v6553_v6 = vshll.u32 %v6552_v26, 23  ;;  %v6550_v21 = vor.u32 %v6549_v29, %v6548_v35  ;;  %v6412_v35 = vmul.f32 %v11562_v17, %v11531_v50 }
 0x398   :  { %v7411_v37 = vpop.eup %7410  ;;  %v6433_v0 = vmul.f32 %v6432_v9, %v11577_v27  ;;  %v6435_v7 = vmul.f32 %v6432_v9, %v11579_v28  ;;  %v6415_v29 = vmul.f32 %v11562_v17, %v11535_v31  ;;  %v6416_v26 = vmul.f32 %v11558_v40, %v11486_v34 }
 0x399   :  { %v6192_v39 = vmul.f32 %v7411_v37, %v6190_v12  ;;  %v6437_v5 = vmul.f32 %v6432_v9, %v11581_v61  ;;  %v6554_v57 = vor.u32 4788187, %v6553_v6 }
 0x39a   :  { %v11587_v49 = vadd.f32 %v6433_v0, %v11500_v30  ;;  %v11590_v15 = vadd.f32 %v6435_v7, %v11502_v60  ;;  %v6418_v0 = vmul.f32 %v11562_v17, %v11537_v56  ;;  %v6419_v7 = vmul.f32 %v11558_v40, %v11488_v20 }
 0x39b   :  { %v6193_v1 = vsub.f32 2.0, %v6192_v39  ;;  %v11593_v25 = vadd.f32 %v6437_v5, %v11504_v4  ;;  %v6557_v4 = vcvt.s32.f32 %v6550_v21  ;;  %v6555_v51 = vand.u32 2147483647, %v6554_v57  ;;  %v6692_v21 = vld [vmem:[#allocation2 + $0x160] sm:$0xff] }
 0x39c   :  { %6440 = vst [vmem:[#allocation5 + $0x1c8] sm:$0xff] %v11587_v49  ;;  %6442 = vst [vmem:[#allocation5 + $0x1d0] sm:$0xff] %v11590_v15  ;;  %v6456_v63 = vmul.f32 %v11220_v23, %v11587_v49  ;;  %v6457_v9 = vmul.f32 %v11223_v8, %v11590_v15  ;;  %v6562_v8 = vsel %vm6477_vm7, %v6561_v16, %v11490_v18 }
 0x39d   :  { %v6194_v12 = vmul.f32 %v7411_v37, %v6193_v1  ;;  %6445 = vst [vmem:[#allocation5 + $0x1d8] sm:$0xff] %v11593_v25  ;;  %v6459_v60 = vmul.f32 %v11226_v14, %v11593_v25  ;;  %v6558_v3 = vmul.f32 %v6557_v4, %v6555_v51  ;;  %v6446_v14 = vmul.f32 %v11214_v11, %v11587_v49 }
 0x39e   :  { %v6458_v2 = vadd.f32 %v6457_v9, %v6456_v63  ;;  %v6564_v19 = vsel %vm6476_vm9, 0, %v6562_v8  ;;  %v6447_v42 = vmul.f32 %v11217_v22, %v11590_v15  ;;  %v6451_v13 = vmul.f32 %v11236_v62, %v11587_v49 }
 0x39f   :  { %v6195_v30 = vmul.f32 %v6194_v12, %v6180_v38  ;;  %v6199_v10 = vmul.f32 %v6194_v12, %v6185_v44  ;;  %v6559_v23 = vxor.u32 2147483648, %v6558_v3  ;;  %v6452_v46 = vmul.f32 %v11239_v55, %v11590_v15 }
 0x3a0   :  { %v6460_v41 = vadd.f32 %v6459_v60, %v6458_v2  ;;  %v6568_v53 = vadd.s32 3, %v6564_v19  ;;  %v6672_v18 = vand.u32 3, %v6564_v19  ;;  %v6448_v47 = vadd.f32 %v6447_v42, %v6446_v14  ;;  %v6734_v60 = vld [vmem:[#allocation2 + $0x168] sm:$0xff] }
 0x3a1   :  { %6198 = vst [vmem:[#allocation5 + $0x338] sm:$0xff] %v6195_v30  ;;  %6202 = vst [vmem:[#allocation5 + $0x340] sm:$0xff] %v6199_v10  ;;  %v6560_v43 = vsel %vm6477_vm7, %v6559_v23, %v6558_v3  ;;  %v6449_v11 = vmul.f32 %v11618_v48, %v11593_v25  ;;  %v6453_v36 = vadd.f32 %v6452_v46, %v6451_v13  ;;  %v7493_v30 = vld [vmem:[#allocation2 + $0x170] sm:$0xff] }
 0x3a2   :  { %7412 = vrcp.f32 %v6460_v41  ;;  %v6563_v58 = vsel %vm6476_vm9, %v11332_v33, %v6560_v43  ;;  %v6454_v22 = vmul.f32 %v11622_v59, %v11593_v25  ;;  %v6569_v24 = vand.u32 3, %v6568_v53 }
 0x3a3   :  { %7414 = vcosq.f32 %v6563_v58  ;;  %v6450_v55 = vadd.f32 %v6449_v11, %v6448_v47  ;;  %vm6677_vm12 = vcmp.eq.s32.totalorder %v6672_v18, 2  ;;  %v6413_v37 = vmul.f32 %v11558_v40, %v11484_v52  ;;  %v7495_v47 = vld [vmem:[#allocation2 + $0x1c8] sm:$0xff] }
 0x3a4   :  { %7416 = vsinq.f32 %v6563_v58  ;;  %v6455_v32 = vadd.f32 %v6454_v22, %v6453_v36  ;;  %vm6574_vm11 = vcmp.eq.s32.totalorder %v6569_v24, 2  ;;  %vm6571_vm8 = vcmp.eq.s32.totalorder %v6569_v24, 0  ;;  %v7496_v36 = vld [vmem:[#allocation2 + $0x1d0] sm:$0xff] }
 0x3a5   :  { %vm6673_vm13 = vcmp.lt.s32.totalorder %v6672_v18, 2  ;;  %vm6674_vm14 = vcmp.eq.s32.totalorder %v6672_v18, 0  ;;  %vm6570_vm0 = vcmp.lt.s32.totalorder %v6569_v24, 2  ;;  %v6414_v44 = vadd.f32 %v6413_v37, %v6412_v35  ;;  %v7497_v37 = vld [vmem:[#allocation2 + $0x190] sm:$0xff] }
 0x3a6   :  { %v6417_v12 = vadd.f32 %v6416_v26, %v6415_v29  ;;  %v6420_v20 = vadd.f32 %v6419_v7, %v6418_v0  ;;  %v6693_v10 = vmul.f32 %v7493_v30, %v6692_v21  ;;  %v6735_v43 = vmul.f32 %v7493_v30, %v6734_v60  ;;  %v7498_v26 = vld [vmem:[#allocation2 + $0x198] sm:$0xff]  ;;  %v7500_v7 = vld [vmem:[#allocation2 + $0x1b0] sm:$0xff] }
 0x3ac   :  { %v7413_v62 = vpop.eup %7412 }
 0x3ad   :  { %v6462_v45 = vmul.f32 %v7413_v62, %v6460_v41  ;;  %v7415_v39 = vpop.eup %7414 }
 0x3ae   :  { %v7417_v6 = vpop.eup %7416  ;;  %v6575_v50 = vxor.u32 2147483648, %v7415_v39 }
 0x3af   :  { %v6463_v54 = vsub.f32 2.0, %v6462_v45  ;;  %v6572_v31 = vxor.u32 2147483648, %v7417_v6 }
 0x3b0   :  { %v6576_v34 = vsel %vm6574_vm11, %v6575_v50, %v7417_v6  ;;  %v6679_v5 = vsel %vm6677_vm12, %v6575_v50, %v7417_v6 }
 0x3b1   :  { %v6464_v38 = vmul.f32 %v7413_v62, %v6463_v54  ;;  %v6573_v56 = vsel %vm6571_vm8, %v7415_v39, %v6572_v31  ;;  %v6676_v17 = vsel %vm6674_vm14, %v7415_v39, %v6572_v31 }
 0x3b2   :  { %v6577_v40 = vsel %vm6570_vm0, %v6573_v56, %v6576_v34  ;;  %v6680_v57 = vsel %vm6673_vm13, %v6676_v17, %v6679_v5 }
 0x3b3   :  { %v6465_v52 = vmul.f32 %v6464_v38, %v6450_v55  ;;  %v6469_v1 = vmul.f32 %v6464_v38, %v6455_v32  ;;  %v6578_v63 = vsel %vm6567_vm10, nan, %v6577_v40  ;;  %v6681_v9 = vsel %vm6567_vm10, nan, %v6680_v57  ;;  %v7499_v38 = vld [vmem:[#allocation2 + $0x1a8] sm:$0xff] }
 0x3b4   :  { %v6682_v4 = vmul.f32 %v6681_v9, %v11577_v27  ;;  %v6683_v2 = vmul.f32 %v6578_v63, %v6414_v44  ;;  %v6685_v51 = vmul.f32 %v6681_v9, %v11579_v28  ;;  %v6686_v16 = vmul.f32 %v6578_v63, %v6417_v12 }
 0x3b5   :  { %6468 = vst [vmem:[#allocation5 + $0x328] sm:$0xff] %v6465_v52  ;;  %6472 = vst [vmem:[#allocation5 + $0x330] sm:$0xff] %v6469_v1  ;;  %v6688_v41 = vmul.f32 %v6681_v9, %v11581_v61  ;;  %v6689_v3 = vmul.f32 %v6578_v63, %v6420_v20  ;;  %v7494_v61 = vld [vmem:[#allocation2 + $0x1c0] sm:$0xff] }
 0x3b6   :  { %v6684_v23 = vsub.f32 %v6682_v4, %v6683_v2  ;;  %v6687_v8 = vsub.f32 %v6685_v51, %v6686_v16 }
 0x3b7   :  { %v6690_v14 = vsub.f32 %v6688_v41, %v6689_v3 }
 0x3b8   :  { %v6694_v58 = vmul.f32 %v6693_v10, %v6684_v23  ;;  %v6696_v19 = vmul.f32 %v6693_v10, %v6687_v8  ;;  %v6736_v46 = vmul.f32 %v6735_v43, %v6684_v23  ;;  %v6738_v53 = vmul.f32 %v6735_v43, %v6687_v8 }
 0x3b9   :  { %v6698_v33 = vmul.f32 %v6693_v10, %v6690_v14  ;;  %v6740_v28 = vmul.f32 %v6735_v43, %v6690_v14 }
 0x3ba   :  { %v6695_v42 = vadd.f32 %v6694_v58, %v11587_v49  ;;  %v6697_v13 = vadd.f32 %v6696_v19, %v11590_v15 }
 0x3bb   :  { %v6699_v27 = vadd.f32 %v6698_v33, %v11593_v25 }
 0x3bc   :  { %6701 = vst [vmem:[#allocation5 + $0x1b0] sm:$0xff] %v6695_v42  ;;  %6703 = vst [vmem:[#allocation5 + $0x1b8] sm:$0xff] %v6697_v13  ;;  %v6716_v18 = vmul.f32 %v7494_v61, %v6695_v42  ;;  %v6717_v11 = vmul.f32 %v7495_v47, %v6697_v13  ;;  %v6737_v45 = vadd.f32 %v6736_v46, %v6695_v42 }
 0x3bd   :  { %6705 = vst [vmem:[#allocation5 + $0x1c0] sm:$0xff] %v6699_v27  ;;  %v6719_v22 = vmul.f32 %v7496_v36, %v6699_v27  ;;  %v6739_v24 = vadd.f32 %v6738_v53, %v6697_v13  ;;  %v6741_v49 = vadd.f32 %v6740_v28, %v6699_v27  ;;  %v6706_v29 = vmul.f32 %v7497_v37, %v6695_v42 }
 0x3be   :  { %v6718_v62 = vadd.f32 %v6717_v11, %v6716_v18  ;;  %6743 = vst [vmem:[#allocation5 + $0x198] sm:$0xff] %v6737_v45  ;;  %v6758_v15 = vmul.f32 %v7494_v61, %v6737_v45  ;;  %v6707_v39 = vmul.f32 %v7498_v26, %v6697_v13  ;;  %v6711_v0 = vmul.f32 %v7499_v38, %v6695_v42 }
 0x3bf   :  { %6745 = vst [vmem:[#allocation5 + $0x1a0] sm:$0xff] %v6739_v24  ;;  %6747 = vst [vmem:[#allocation5 + $0x1a8] sm:$0xff] %v6741_v49  ;;  %v6759_v25 = vmul.f32 %v7495_v47, %v6739_v24  ;;  %v6761_v54 = vmul.f32 %v7496_v36, %v6741_v49  ;;  %v6712_v6 = vmul.f32 %v7500_v7, %v6697_v13 }
 0x3c0   :  { %v6720_v55 = vadd.f32 %v6719_v22, %v6718_v62  ;;  %v6708_v50 = vadd.f32 %v6707_v39, %v6706_v29  ;;  %v6709_v52 = vmul.f32 %v11618_v48, %v6699_v27  ;;  %v6714_v31 = vmul.f32 %v11622_v59, %v6699_v27 }
 0x3c1   :  { %v6760_v32 = vadd.f32 %v6759_v25, %v6758_v15  ;;  %v6713_v1 = vadd.f32 %v6712_v6, %v6711_v0  ;;  %v6748_v34 = vmul.f32 %v7497_v37, %v6737_v45  ;;  %v6749_v5 = vmul.f32 %v7498_v26, %v6739_v24 }
 0x3c2   :  { %7418 = vrcp.f32 %v6720_v55  ;;  %v6753_v21 = vmul.f32 %v7499_v38, %v6737_v45  ;;  %v6754_v12 = vmul.f32 %v7500_v7, %v6739_v24  ;;  %v6710_v17 = vadd.f32 %v6709_v52, %v6708_v50 }
 0x3c3   :  { %v6762_v35 = vadd.f32 %v6761_v54, %v6760_v32  ;;  %v6715_v40 = vadd.f32 %v6714_v31, %v6713_v1  ;;  %v6750_v57 = vadd.f32 %v6749_v5, %v6748_v34  ;;  %v6751_v63 = vmul.f32 %v11618_v48, %v6741_v49 }
 0x3c4   :  { %v6755_v9 = vadd.f32 %v6754_v12, %v6753_v21  ;;  %v6756_v30 = vmul.f32 %v11622_v59, %v6741_v49 }
 0x3c5   :  { %7420 = vrcp.f32 %v6762_v35  ;;  %v6752_v16 = vadd.f32 %v6751_v63, %v6750_v57 }
 0x3c6   :  { %v6757_v3 = vadd.f32 %v6756_v30, %v6755_v9 }
 0x3cc   :  { %v7419_v44 = vpop.eup %7418 }
 0x3cd   :  { %v6722_v56 = vmul.f32 %v7419_v44, %v6720_v55 }
 0x3cf   :  { %v6723_v20 = vsub.f32 2.0, %v6722_v56  ;;  %v7421_v10 = vpop.eup %7420 }
 0x3d0   :  { %v6764_v4 = vmul.f32 %v7421_v10, %v6762_v35 }
 0x3d1   :  { %v6724_v60 = vmul.f32 %v7419_v44, %v6723_v20 }
 0x3d2   :  { %v6765_v41 = vsub.f32 2.0, %v6764_v4 }
 0x3d3   :  { %v6725_v2 = vmul.f32 %v6724_v60, %v6710_v17  ;;  %v6729_v51 = vmul.f32 %v6724_v60, %v6715_v40 }
 0x3d4   :  { %v6766_v23 = vmul.f32 %v7421_v10, %v6765_v41 }
 0x3d5   :  { %6728 = vst [vmem:[#allocation5 + $0x318] sm:$0xff] %v6725_v2  ;;  %6732 = vst [vmem:[#allocation5 + $0x320] sm:$0xff] %v6729_v51 }
 0x3d6   :  { %v6767_v8 = vmul.f32 %v6766_v23, %v6752_v16  ;;  %v6771_v43 = vmul.f32 %v6766_v23, %v6757_v3 }
 0x3d8   :  { %6770 = vst [vmem:[#allocation5 + $0x308] sm:$0xff] %v6767_v8  ;;  %6774 = vst [vmem:[#allocation5 + $0x310] sm:$0xff] %v6771_v43 }
 0x3d9   :  { %7534 = shalt.err (!%p7531_p12)
}
 0x3da   :  { %s7535_s24 = scalar_lea.hbm %s11671_s1, 13440 }
 0x3db   :  { %p7536_p13 = scmp.ne.s32.totalorder %s11671_s1, %s7535_s24  ;;  %p7539_p0 = scmp.lt.u32.totalorder %s7535_s24, %s11671_s1 }
 0x3dd   :  { %p7541_p1 = pnand %p7539_p0, %p7536_p13 }
 0x3df   :  { %7544 = shalt.err (!%p7541_p1)
}
 0x3e0   :  { %6786 = dma.vmem_to_hbm [thread:$0]  %s6781_s20, 13440, %s11671_s1, [#allocation4], %s7550_s16, %s7550_s16, %s7551_s17  }
 0x3e1   :  { %7547 = dma.done.wait [#allocation4], 13440  }
 0x3e2   :  { %7548 = vsyncadd [#allocation4], 4294953856 }
 0x3e3   :  { %6790 = vsyncpa [#allocation3], 1 }
 0x3e4   :  { %6791 = vsyncpa [#allocation4], 1 }

</bundles_post_ra>
